<compile_context>
chip_gen: v7x
topology: tpu7x:2x2x1
jax: 0.10.0
libtpu: 0.0.40
codegen_flags: <defaults>
</compile_context>

<pallas_src>
import functools

import jax
import jax.numpy as jnp
from jax.experimental import pallas as pl
from jax.experimental.pallas import tpu as pltpu


# ---------------------------------------------------------------------------
# helpers
# ---------------------------------------------------------------------------
def _round_up(x, m):
    return (x + m - 1) // m * m


def _pick_time_block(t, cap):
    """Largest divisor of t that is <= cap."""
    for d in range(min(t, cap), 0, -1):
        if t % d == 0:
            return d
    return t


def _gru_cell(gi, h_prev, w_hh, b_hn, compute_dtype):
    """One GRU step.

    gi already contains the input projection plus the input bias and the
    (folded) recurrent r/z biases.  b_hn is the recurrent bias of the n gate.
    """
    hd = h_prev.shape[-1]
    gh = jnp.dot(h_prev.astype(compute_dtype), w_hh,
                 preferred_element_type=jnp.float32)
    r = jax.nn.sigmoid(gi[:, :hd] + gh[:, :hd])
    z = jax.nn.sigmoid(gi[:, hd:2 * hd] + gh[:, hd:2 * hd])
    n = jnp.tanh(gi[:, 2 * hd:] + r * (gh[:, 2 * hd:] + b_hn))
    # (1 - z) * n + z * h  ==  n + z * (h - n)
    return n + z * (h_prev - n)


# ---------------------------------------------------------------------------
# Fused kernel: 3 GRU layers + mean over time + FC head.
# Grid: (batch_chunk [parallel], time_block [arbitrary, sequential]).
# ---------------------------------------------------------------------------
def _fused_gru_head_kernel(
    x_ref,
    wih1_ref, bi1_ref, whh1_ref, bhn1_ref,
    wih2_ref, bi2_ref, whh2_ref, bhn2_ref,
    wih3_ref, bi3_ref, whh3_ref, bhn3_ref,
    fw1_ref, fb1_ref, fw2_ref, fb2_ref, fw3_ref, fb3_ref,
    out_ref,
    gi1_s, h1_s, h2_s, h3_s, acc_s,
    *, t_total, compute_dtype, unroll):
    t_blk = pl.program_id(1)
    tt, bc, in_dim = x_ref.shape
    hid = h1_s.shape[-1]

    @pl.when(t_blk == 0)
    def _():
        h1_s[...] = jnp.zeros_like(h1_s)
        h2_s[...] = jnp.zeros_like(h2_s)
        h3_s[...] = jnp.zeros_like(h3_s)
        acc_s[...] = jnp.zeros_like(acc_s)

    # Layer-1 input projection hoisted out of the recurrence: one MXU-dense
    # (tt*bc, I) x (I, 3H) matmul per time block instead of one per timestep.
    x_blk = x_ref[...].reshape(tt * bc, in_dim).astype(compute_dtype)
    gi1 = jnp.dot(x_blk, wih1_ref[...], preferred_element_type=jnp.float32)
    gi1_s[...] = (gi1 + bi1_ref[...]).reshape(tt, bc, 3 * hid)

    # Hoist weight / bias loads out of the per-timestep loop.
    whh1 = whh1_ref[...]; bhn1 = bhn1_ref[...]
    wih2 = wih2_ref[...]; bi2 = bi2_ref[...]
    whh2 = whh2_ref[...]; bhn2 = bhn2_ref[...]
    wih3 = wih3_ref[...]; bi3 = bi3_ref[...]
    whh3 = whh3_ref[...]; bhn3 = bhn3_ref[...]

    def step(i, carry):
        h1, h2, h3, acc = carry
        g1 = gi1_s[i]                                        # (bc, 3H) f32
        h1 = _gru_cell(g1, h1, whh1, bhn1, compute_dtype)
        g2 = jnp.dot(h1.astype(compute_dtype), wih2,
                     preferred_element_type=jnp.float32) + bi2
        h2 = _gru_cell(g2, h2, whh2, bhn2, compute_dtype)
        g3 = jnp.dot(h2.astype(compute_dtype), wih3,
                     preferred_element_type=jnp.float32) + bi3
        h3 = _gru_cell(g3, h3, whh3, bhn3, compute_dtype)
        return h1, h2, h3, acc + h3

    carry0 = (h1_s[...], h2_s[...], h3_s[...], acc_s[...])
    h1, h2, h3, acc = jax.lax.fori_loop(0, tt, step, carry0, unroll=unroll)
    h1_s[...] = h1
    h2_s[...] = h2
    h3_s[...] = h3
    acc_s[...] = acc

    # Finalize: mean over time + FC head, only at the last time block.
    @pl.when(t_blk == pl.num_programs(1) - 1)
    def _():
        mean = acc * (1.0 / t_total)                         # (bc, H) f32
        a1 = jnp.dot(mean, fw1_ref[...],
                     preferred_element_type=jnp.float32) + fb1_ref[...]
        a1 = jnp.maximum(a1, 0.0)
        a2 = jnp.dot(a1, fw2_ref[...],
                     preferred_element_type=jnp.float32) + fb2_ref[...]
        a2 = jnp.maximum(a2, 0.0)
        y = jnp.dot(a2, fw3_ref[...],
                    preferred_element_type=jnp.float32) + fb3_ref[...]
        out_ref[...] = y.astype(out_ref.dtype)


# ---------------------------------------------------------------------------
# Wrapper
# ---------------------------------------------------------------------------
@functools.partial(jax.jit, static_argnames=("compute_dtype", "time_block_cap"))
def gru_model(x_bti, params, *, compute_dtype=jnp.bfloat16, time_block_cap=64):
    """x_bti: (B, T, input_size), batch_first like the PyTorch module."""
    assert len(params["gru"]) == 3, "fused kernel is specialized to 3 layers"
    b, t, in_dim = x_bti.shape
    hid = params["gru"][0][1].shape[0]

    # Batch: pad to a sublane-aligned chunk; chunk axis is the parallel grid
    # axis (megacore on v7x).
    bc = min(128, _round_up(b, 8))
    bp = _round_up(b, bc)
    nb = bp // bc

    # Time: block many timesteps per grid step.
    tt = _pick_time_block(t, time_block_cap)
    nt = t // tt

    x = jnp.transpose(x_bti.astype(jnp.float32), (1, 0, 2))   # (T, B, I)
    x = jnp.pad(x, ((0, 0), (0, bp - b), (0, 0)))              # (T, Bp, I)

    # Per-layer GRU args: bf16 weights, folded input-side bias (bih + bhh for
    # the r/z gates), separate recurrent n-gate bias.
    gru_args = []
    for (wih, whh, bih, bhh) in params["gru"]:
        bi_fold = bih + jnp.concatenate(
            [bhh[:, :hid], bhh[:, hid:2 * hid],
             jnp.zeros((1, hid), jnp.float32)], axis=1)
        gru_args += [wih.astype(compute_dtype), bi_fold,
                     whh.astype(compute_dtype), bhh[:, 2 * hid:]]

    fw1, fb1, fw2, fb2, fw3, fb3 = params["fc"]

    # Whole-array VMEM operands: loaded once, not pipelined/double-buffered.
    vmem = pl.BlockSpec(memory_space=pltpu.MemorySpace.VMEM)

    kernel = functools.partial(
        _fused_gru_head_kernel,
        t_total=t, compute_dtype=compute_dtype, unroll=(tt <= 16))

    out = pl.pallas_call(
        kernel,
        out_shape=jax.ShapeDtypeStruct((bp, 1), jnp.float32),
        grid_spec=pltpu.PrefetchScalarGridSpec(
            num_scalar_prefetch=0,
            grid=(nb, nt),
            in_specs=[pl.BlockSpec((tt, bc, in_dim), lambda bi, ti: (ti, bi, 0))]
                     + [vmem] * 18,
            out_specs=pl.BlockSpec((bc, 1), lambda bi, ti: (bi, 0)),
            scratch_shapes=[
                pltpu.VMEM((tt, bc, 3 * hid), jnp.float32),   # hoisted layer-1 gi
                pltpu.VMEM((bc, hid), jnp.float32),           # h1 carry
                pltpu.VMEM((bc, hid), jnp.float32),           # h2 carry
                pltpu.VMEM((bc, hid), jnp.float32),           # h3 carry
                pltpu.VMEM((bc, hid), jnp.float32),           # running sum of h3
            ]),
        compiler_params=pltpu.CompilerParams(
            dimension_semantics=("parallel", "arbitrary")),
    )(x, *gru_args, fw1, fb1, fw2, fb2, fw3, fb3)
    return out[:b]


# ---------------------------------------------------------------------------
# Pure-JAX reference (same math, same bf16 matmul casts) for correctness.
# ---------------------------------------------------------------------------
def _gru_layer_ref(x_tbi, wih, whh, bih, bhh, compute_dtype):
    hid = whh.shape[0]
    b = x_tbi.shape[1]
    wih_c = wih.astype(compute_dtype)
    whh_c = whh.astype(compute_dtype)

    def step(h, x_t):
        gi = jnp.dot(x_t.astype(compute_dtype), wih_c,
                     preferred_element_type=jnp.float32) + bih
        gh = jnp.dot(h.astype(compute_dtype), whh_c,
                     preferred_element_type=jnp.float32) + bhh
        r = jax.nn.sigmoid(gi[:, :hid] + gh[:, :hid])
        z = jax.nn.sigmoid(gi[:, hid:2 * hid] + gh[:, hid:2 * hid])
        n = jnp.tanh(gi[:, 2 * hid:] + r * gh[:, 2 * hid:])
        h_new = (1.0 - z) * n + z * h
        return h_new, h_new

    h0 = jnp.zeros((b, hid), jnp.float32)
    _, ys = jax.lax.scan(step, h0, x_tbi)
    return ys


def gru_model_ref(x_bti, params, compute_dtype=jnp.bfloat16):
    h = jnp.transpose(x_bti.astype(jnp.float32), (1, 0, 2))
    for (wih, whh, bih, bhh) in params["gru"]:
        h = _gru_layer_ref(h, wih, whh, bih, bhh, compute_dtype)
    m = jnp.mean(h, axis=0)
    fw1, fb1, fw2, fb2, fw3, fb3 = params["fc"]
    a1 = jnp.maximum(m @ fw1 + fb1, 0.0)
    a2 = jnp.maximum(a1 @ fw2 + fb2, 0.0)
    return a2 @ fw3 + fb3


# ---------------------------------------------------------------------------
# Deterministic parameter init (PyTorch-style uniform(-1/sqrt(H), 1/sqrt(H))).
# ---------------------------------------------------------------------------
def init_params(key, input_size, hidden_size, num_layers, fc_dims=(512, 256, 1)):
    params = {"gru": [], "fc": []}
    k = 1.0 / jnp.sqrt(hidden_size)
    in_dim = input_size
    for _ in range(num_layers):
        key, k1, k2, k3, k4 = jax.random.split(key, 5)
        wih_t = jax.random.uniform(k1, (in_dim, 3 * hidden_size), jnp.float32, -k, k)
        whh_t = jax.random.uniform(k2, (hidden_size, 3 * hidden_size), jnp.float32, -k, k)
        bih = jax.random.uniform(k3, (1, 3 * hidden_size), jnp.float32, -k, k)
        bhh = jax.random.uniform(k4, (1, 3 * hidden_size), jnp.float32, -k, k)
        params["gru"].append((wih_t, whh_t, bih, bhh))
        in_dim = hidden_size

    d_in = hidden_size
    fc = []
    for d_out in fc_dims:
        key, k1, k2 = jax.random.split(key, 3)
        bound = 1.0 / jnp.sqrt(d_in)
        w = jax.random.uniform(k1, (d_in, d_out), jnp.float32, -bound, bound)
        b = jax.random.uniform(k2, (1, d_out), jnp.float32, -bound, bound)
        fc.extend([w, b])
        d_in = d_out
    params["fc"] = tuple(fc)
    return params


if __name__ == "__main__":
    INPUT_SIZE = 8
    HIDDEN = 128     # small stand-in for the module's default 1024
    NUM_LAYERS = 3
    B, T = 4, 16

    key = jax.random.PRNGKey(0)
    key, pkey, xkey = jax.random.split(key, 3)
    params = init_params(pkey, INPUT_SIZE, HIDDEN, NUM_LAYERS)
    x = jax.random.normal(xkey, (B, T, INPUT_SIZE), jnp.float32)

    # time_block_cap=8 -> 2 time blocks, exercising the cross-grid-step
    # hidden-state carry in VMEM scratch.
    out = jax.block_until_ready(gru_model(x, params, time_block_cap=8))
    assert out.shape == (B, 1), out.shape

    ref = jax.block_until_ready(gru_model_ref(x, params))
    assert jnp.allclose(out, ref, rtol=2e-2, atol=2e-2), (out, ref)

    print("KERNEL_OK")
</pallas_src>

<mosaic_0001>
module attributes {stable_mosaic.version = 11 : i64} {
  func.func @_fused_gru_head_kernel(%arg0: i32, %arg1: i32, %arg2: memref<8x8x8xf32, #tpu.memory_space<vmem>>, %arg3: memref<8x384xbf16, #tpu.memory_space<vmem>>, %arg4: memref<1x384xf32, #tpu.memory_space<vmem>>, %arg5: memref<128x384xbf16, #tpu.memory_space<vmem>>, %arg6: memref<1x128xf32, #tpu.memory_space<vmem>>, %arg7: memref<128x384xbf16, #tpu.memory_space<vmem>>, %arg8: memref<1x384xf32, #tpu.memory_space<vmem>>, %arg9: memref<128x384xbf16, #tpu.memory_space<vmem>>, %arg10: memref<1x128xf32, #tpu.memory_space<vmem>>, %arg11: memref<128x384xbf16, #tpu.memory_space<vmem>>, %arg12: memref<1x384xf32, #tpu.memory_space<vmem>>, %arg13: memref<128x384xbf16, #tpu.memory_space<vmem>>, %arg14: memref<1x128xf32, #tpu.memory_space<vmem>>, %arg15: memref<128x512xf32, #tpu.memory_space<vmem>>, %arg16: memref<1x512xf32, #tpu.memory_space<vmem>>, %arg17: memref<512x256xf32, #tpu.memory_space<vmem>>, %arg18: memref<1x256xf32, #tpu.memory_space<vmem>>, %arg19: memref<256x1xf32, #tpu.memory_space<vmem>>, %arg20: memref<1x1xf32, #tpu.memory_space<vmem>>, %arg21: memref<8x1xf32, #tpu.memory_space<vmem>>, %arg22: memref<8x8x384xf32, #tpu.memory_space<vmem>>, %arg23: memref<8x128xf32, #tpu.memory_space<vmem>>, %arg24: memref<8x128xf32, #tpu.memory_space<vmem>>, %arg25: memref<8x128xf32, #tpu.memory_space<vmem>>, %arg26: memref<8x128xf32, #tpu.memory_space<vmem>>) attributes {dimension_semantics = [#tpu.dimension_semantics<parallel>, #tpu.dimension_semantics<arbitrary>], iteration_bounds = array<i64: 1, 2>, scalar_prefetch = 0 : i64, scratch_operands = 5 : i64, tpu.core_type = #tpu.core_type<tc>, window_params = [{transform_indices = @transform_0, window_bounds = array<i64: 8, 8, 8>}, {pipeline_mode = #tpu.pipeline_mode<synchronous>, transform_indices = @transform_1, window_bounds = array<i64: 8, 384>}, {pipeline_mode = #tpu.pipeline_mode<synchronous>, transform_indices = @transform_2, window_bounds = array<i64: 1, 384>}, {pipeline_mode = #tpu.pipeline_mode<synchronous>, transform_indices = @transform_3, window_bounds = array<i64: 128, 384>}, {pipeline_mode = #tpu.pipeline_mode<synchronous>, transform_indices = @transform_4, window_bounds = array<i64: 1, 128>}, {pipeline_mode = #tpu.pipeline_mode<synchronous>, transform_indices = @transform_5, window_bounds = array<i64: 128, 384>}, {pipeline_mode = #tpu.pipeline_mode<synchronous>, transform_indices = @transform_6, window_bounds = array<i64: 1, 384>}, {pipeline_mode = #tpu.pipeline_mode<synchronous>, transform_indices = @transform_7, window_bounds = array<i64: 128, 384>}, {pipeline_mode = #tpu.pipeline_mode<synchronous>, transform_indices = @transform_8, window_bounds = array<i64: 1, 128>}, {pipeline_mode = #tpu.pipeline_mode<synchronous>, transform_indices = @transform_9, window_bounds = array<i64: 128, 384>}, {pipeline_mode = #tpu.pipeline_mode<synchronous>, transform_indices = @transform_10, window_bounds = array<i64: 1, 384>}, {pipeline_mode = #tpu.pipeline_mode<synchronous>, transform_indices = @transform_11, window_bounds = array<i64: 128, 384>}, {pipeline_mode = #tpu.pipeline_mode<synchronous>, transform_indices = @transform_12, window_bounds = array<i64: 1, 128>}, {pipeline_mode = #tpu.pipeline_mode<synchronous>, transform_indices = @transform_13, window_bounds = array<i64: 128, 512>}, {pipeline_mode = #tpu.pipeline_mode<synchronous>, transform_indices = @transform_14, window_bounds = array<i64: 1, 512>}, {pipeline_mode = #tpu.pipeline_mode<synchronous>, transform_indices = @transform_15, window_bounds = array<i64: 512, 256>}, {pipeline_mode = #tpu.pipeline_mode<synchronous>, transform_indices = @transform_16, window_bounds = array<i64: 1, 256>}, {pipeline_mode = #tpu.pipeline_mode<synchronous>, transform_indices = @transform_17, window_bounds = array<i64: 256, 1>}, {pipeline_mode = #tpu.pipeline_mode<synchronous>, transform_indices = @transform_18, window_bounds = array<i64: 1, 1>}, {transform_indices = @transform_19, window_bounds = array<i64: 8, 1>}]} {
    %c0_i32 = arith.constant 0 : i32
    %0 = arith.cmpi eq, %arg1, %c0_i32 : i32
    %1 = arith.extui %0 : i1 to i32
    %c0_i32_0 = arith.constant 0 : i32
    %2 = arith.cmpi ne, %1, %c0_i32_0 : i32
    scf.if %2 {
      %cst_153 = arith.constant 0.000000e+00 : f32
      %802 = vector.broadcast %cst_153 : f32 to vector<8x128xf32>
      %c0_154 = arith.constant 0 : index
      %c0_155 = arith.constant 0 : index
      %803 = vector.load %arg23[%c0_154, %c0_155] : memref<8x128xf32, #tpu.memory_space<vmem>>, vector<8x128xf32>
      tpu.vector_store %arg23[%c0_154, %c0_155], %802 {strides = array<i32>} : memref<8x128xf32, #tpu.memory_space<vmem>>, vector<8x128xf32>,
      %cst_156 = arith.constant 0.000000e+00 : f32
      %804 = vector.broadcast %cst_156 : f32 to vector<8x128xf32>
      %c0_157 = arith.constant 0 : index
      %c0_158 = arith.constant 0 : index
      %805 = vector.load %arg24[%c0_157, %c0_158] : memref<8x128xf32, #tpu.memory_space<vmem>>, vector<8x128xf32>
      tpu.vector_store %arg24[%c0_157, %c0_158], %804 {strides = array<i32>} : memref<8x128xf32, #tpu.memory_space<vmem>>, vector<8x128xf32>,
      %cst_159 = arith.constant 0.000000e+00 : f32
      %806 = vector.broadcast %cst_159 : f32 to vector<8x128xf32>
      %c0_160 = arith.constant 0 : index
      %c0_161 = arith.constant 0 : index
      %807 = vector.load %arg25[%c0_160, %c0_161] : memref<8x128xf32, #tpu.memory_space<vmem>>, vector<8x128xf32>
      tpu.vector_store %arg25[%c0_160, %c0_161], %806 {strides = array<i32>} : memref<8x128xf32, #tpu.memory_space<vmem>>, vector<8x128xf32>,
      %cst_162 = arith.constant 0.000000e+00 : f32
      %808 = vector.broadcast %cst_162 : f32 to vector<8x128xf32>
      %c0_163 = arith.constant 0 : index
      %c0_164 = arith.constant 0 : index
      %809 = vector.load %arg26[%c0_163, %c0_164] : memref<8x128xf32, #tpu.memory_space<vmem>>, vector<8x128xf32>
      tpu.vector_store %arg26[%c0_163, %c0_164], %808 {strides = array<i32>} : memref<8x128xf32, #tpu.memory_space<vmem>>, vector<8x128xf32>,
    } else {
    }
    %c0 = arith.constant 0 : index
    %c0_1 = arith.constant 0 : index
    %c0_2 = arith.constant 0 : index
    %3 = vector.load %arg2[%c0, %c0_1, %c0_2] : memref<8x8x8xf32, #tpu.memory_space<vmem>>, vector<8x8x8xf32>
    %4 = vector.shape_cast %3 : vector<8x8x8xf32> to vector<64x8xf32>
    %5 = arith.truncf %4 : vector<64x8xf32> to vector<64x8xbf16>
    %c0_3 = arith.constant 0 : index
    %c0_4 = arith.constant 0 : index
    %6 = vector.load %arg3[%c0_3, %c0_4] : memref<8x384xbf16, #tpu.memory_space<vmem>>, vector<8x384xbf16>
    %cst = arith.constant dense<0.000000e+00> : vector<64x384xf32>
    %7 = tpu.matmul %5, %6, %cst {dimension_numbers = #tpu.dot_dimension_numbers<[1], [0], [0], [1], [0, 0, 1, 1], [], []>} : vector<64x8xbf16>, vector<8x384xbf16>, vector<64x384xf32> -> vector<64x384xf32>
    %c0_5 = arith.constant 0 : index
    %c0_6 = arith.constant 0 : index
    %8 = vector.load %arg4[%c0_5, %c0_6] : memref<1x384xf32, #tpu.memory_space<vmem>>, vector<1x384xf32>
    %9 = vector.broadcast %8 : vector<1x384xf32> to vector<64x384xf32>
    %10 = arith.addf %7, %9 : vector<64x384xf32>
    %11 = vector.shape_cast %10 : vector<64x384xf32> to vector<8x8x384xf32>
    %c0_7 = arith.constant 0 : index
    %c0_8 = arith.constant 0 : index
    %c0_9 = arith.constant 0 : index
    %12 = vector.load %arg22[%c0_7, %c0_8, %c0_9] : memref<8x8x384xf32, #tpu.memory_space<vmem>>, vector<8x8x384xf32>
    tpu.vector_store %arg22[%c0_7, %c0_8, %c0_9], %11 {strides = array<i32>} : memref<8x8x384xf32, #tpu.memory_space<vmem>>, vector<8x8x384xf32>,
    %c0_10 = arith.constant 0 : index
    %c0_11 = arith.constant 0 : index
    %13 = vector.load %arg5[%c0_10, %c0_11] : memref<128x384xbf16, #tpu.memory_space<vmem>>, vector<128x384xbf16>
    %c0_12 = arith.constant 0 : index
    %c0_13 = arith.constant 0 : index
    %14 = vector.load %arg6[%c0_12, %c0_13] : memref<1x128xf32, #tpu.memory_space<vmem>>, vector<1x128xf32>
    %c0_14 = arith.constant 0 : index
    %c0_15 = arith.constant 0 : index
    %15 = vector.load %arg7[%c0_14, %c0_15] : memref<128x384xbf16, #tpu.memory_space<vmem>>, vector<128x384xbf16>
    %c0_16 = arith.constant 0 : index
    %c0_17 = arith.constant 0 : index
    %16 = vector.load %arg8[%c0_16, %c0_17] : memref<1x384xf32, #tpu.memory_space<vmem>>, vector<1x384xf32>
    %c0_18 = arith.constant 0 : index
    %c0_19 = arith.constant 0 : index
    %17 = vector.load %arg9[%c0_18, %c0_19] : memref<128x384xbf16, #tpu.memory_space<vmem>>, vector<128x384xbf16>
    %c0_20 = arith.constant 0 : index
    %c0_21 = arith.constant 0 : index
    %18 = vector.load %arg10[%c0_20, %c0_21] : memref<1x128xf32, #tpu.memory_space<vmem>>, vector<1x128xf32>
    %c0_22 = arith.constant 0 : index
    %c0_23 = arith.constant 0 : index
    %19 = vector.load %arg11[%c0_22, %c0_23] : memref<128x384xbf16, #tpu.memory_space<vmem>>, vector<128x384xbf16>
    %c0_24 = arith.constant 0 : index
    %c0_25 = arith.constant 0 : index
    %20 = vector.load %arg12[%c0_24, %c0_25] : memref<1x384xf32, #tpu.memory_space<vmem>>, vector<1x384xf32>
    %c0_26 = arith.constant 0 : index
    %c0_27 = arith.constant 0 : index
    %21 = vector.load %arg13[%c0_26, %c0_27] : memref<128x384xbf16, #tpu.memory_space<vmem>>, vector<128x384xbf16>
    %c0_28 = arith.constant 0 : index
    %c0_29 = arith.constant 0 : index
    %22 = vector.load %arg14[%c0_28, %c0_29] : memref<1x128xf32, #tpu.memory_space<vmem>>, vector<1x128xf32>
    %c0_30 = arith.constant 0 : index
    %c0_31 = arith.constant 0 : index
    %23 = vector.load %arg23[%c0_30, %c0_31] : memref<8x128xf32, #tpu.memory_space<vmem>>, vector<8x128xf32>
    %c0_32 = arith.constant 0 : index
    %c0_33 = arith.constant 0 : index
    %24 = vector.load %arg24[%c0_32, %c0_33] : memref<8x128xf32, #tpu.memory_space<vmem>>, vector<8x128xf32>
    %c0_34 = arith.constant 0 : index
    %c0_35 = arith.constant 0 : index
    %25 = vector.load %arg25[%c0_34, %c0_35] : memref<8x128xf32, #tpu.memory_space<vmem>>, vector<8x128xf32>
    %c0_36 = arith.constant 0 : index
    %c0_37 = arith.constant 0 : index
    %26 = vector.load %arg26[%c0_36, %c0_37] : memref<8x128xf32, #tpu.memory_space<vmem>>, vector<8x128xf32>
    %c0_i32_38 = arith.constant 0 : i32
    %27 = arith.index_cast %c0_i32_38 : i32 to index
    %c0_39 = arith.constant 0 : index
    %c0_40 = arith.constant 0 : index
    %28 = vector.load %arg22[%27, %c0_39, %c0_40] : memref<8x8x384xf32, #tpu.memory_space<vmem>>, vector<1x8x384xf32>
    %29 = vector.shape_cast %28 : vector<1x8x384xf32> to vector<8x384xf32>
    %30 = arith.truncf %23 : vector<8x128xf32> to vector<8x128xbf16>
    %cst_41 = arith.constant dense<0.000000e+00> : vector<8x384xf32>
    %31 = tpu.matmul %30, %13, %cst_41 {dimension_numbers = #tpu.dot_dimension_numbers<[1], [0], [0], [1], [0, 0, 1, 1], [], []>} : vector<8x128xbf16>, vector<128x384xbf16>, vector<8x384xf32> -> vector<8x384xf32>
    %32 = vector.extract_strided_slice %29 {offsets = [0, 0], sizes = [8, 128], strides = [1, 1]} : vector<8x384xf32> to vector<8x128xf32>
    %33 = vector.extract_strided_slice %31 {offsets = [0, 0], sizes = [8, 128], strides = [1, 1]} : vector<8x384xf32> to vector<8x128xf32>
    %34 = arith.addf %32, %33 : vector<8x128xf32>
    %35 = arith.negf %34 : vector<8x128xf32>
    %36 = math.exp %35 : vector<8x128xf32>
    %cst_42 = arith.constant 1.000000e+00 : f32
    %37 = vector.broadcast %cst_42 : f32 to vector<8x128xf32>
    %38 = arith.addf %37, %36 : vector<8x128xf32>
    %39 = arith.divf %37, %38 : vector<8x128xf32>
    %40 = vector.extract_strided_slice %29 {offsets = [0, 128], sizes = [8, 128], strides = [1, 1]} : vector<8x384xf32> to vector<8x128xf32>
    %41 = vector.extract_strided_slice %31 {offsets = [0, 128], sizes = [8, 128], strides = [1, 1]} : vector<8x384xf32> to vector<8x128xf32>
    %42 = arith.addf %40, %41 : vector<8x128xf32>
    %43 = arith.negf %42 : vector<8x128xf32>
    %44 = math.exp %43 : vector<8x128xf32>
    %cst_43 = arith.constant 1.000000e+00 : f32
    %45 = vector.broadcast %cst_43 : f32 to vector<8x128xf32>
    %46 = arith.addf %45, %44 : vector<8x128xf32>
    %47 = arith.divf %45, %46 : vector<8x128xf32>
    %48 = vector.extract_strided_slice %29 {offsets = [0, 256], sizes = [8, 128], strides = [1, 1]} : vector<8x384xf32> to vector<8x128xf32>
    %49 = vector.extract_strided_slice %31 {offsets = [0, 256], sizes = [8, 128], strides = [1, 1]} : vector<8x384xf32> to vector<8x128xf32>
    %50 = vector.broadcast %14 : vector<1x128xf32> to vector<8x128xf32>
    %51 = arith.addf %49, %50 : vector<8x128xf32>
    %52 = arith.mulf %39, %51 : vector<8x128xf32>
    %53 = arith.addf %48, %52 : vector<8x128xf32>
    %54 = math.tanh %53 : vector<8x128xf32>
    %55 = arith.subf %23, %54 : vector<8x128xf32>
    %56 = arith.mulf %47, %55 : vector<8x128xf32>
    %57 = arith.addf %54, %56 : vector<8x128xf32>
    %58 = arith.truncf %57 : vector<8x128xf32> to vector<8x128xbf16>
    %cst_44 = arith.constant dense<0.000000e+00> : vector<8x384xf32>
    %59 = tpu.matmul %58, %15, %cst_44 {dimension_numbers = #tpu.dot_dimension_numbers<[1], [0], [0], [1], [0, 0, 1, 1], [], []>} : vector<8x128xbf16>, vector<128x384xbf16>, vector<8x384xf32> -> vector<8x384xf32>
    %60 = vector.broadcast %16 : vector<1x384xf32> to vector<8x384xf32>
    %61 = arith.addf %59, %60 : vector<8x384xf32>
    %62 = arith.truncf %24 : vector<8x128xf32> to vector<8x128xbf16>
    %cst_45 = arith.constant dense<0.000000e+00> : vector<8x384xf32>
    %63 = tpu.matmul %62, %17, %cst_45 {dimension_numbers = #tpu.dot_dimension_numbers<[1], [0], [0], [1], [0, 0, 1, 1], [], []>} : vector<8x128xbf16>, vector<128x384xbf16>, vector<8x384xf32> -> vector<8x384xf32>
    %64 = vector.extract_strided_slice %61 {offsets = [0, 0], sizes = [8, 128], strides = [1, 1]} : vector<8x384xf32> to vector<8x128xf32>
    %65 = vector.extract_strided_slice %63 {offsets = [0, 0], sizes = [8, 128], strides = [1, 1]} : vector<8x384xf32> to vector<8x128xf32>
    %66 = arith.addf %64, %65 : vector<8x128xf32>
    %67 = arith.negf %66 : vector<8x128xf32>
    %68 = math.exp %67 : vector<8x128xf32>
    %cst_46 = arith.constant 1.000000e+00 : f32
    %69 = vector.broadcast %cst_46 : f32 to vector<8x128xf32>
    %70 = arith.addf %69, %68 : vector<8x128xf32>
    %71 = arith.divf %69, %70 : vector<8x128xf32>
    %72 = vector.extract_strided_slice %61 {offsets = [0, 128], sizes = [8, 128], strides = [1, 1]} : vector<8x384xf32> to vector<8x128xf32>
    %73 = vector.extract_strided_slice %63 {offsets = [0, 128], sizes = [8, 128], strides = [1, 1]} : vector<8x384xf32> to vector<8x128xf32>
    %74 = arith.addf %72, %73 : vector<8x128xf32>
    %75 = arith.negf %74 : vector<8x128xf32>
    %76 = math.exp %75 : vector<8x128xf32>
    %cst_47 = arith.constant 1.000000e+00 : f32
    %77 = vector.broadcast %cst_47 : f32 to vector<8x128xf32>
    %78 = arith.addf %77, %76 : vector<8x128xf32>
    %79 = arith.divf %77, %78 : vector<8x128xf32>
    %80 = vector.extract_strided_slice %61 {offsets = [0, 256], sizes = [8, 128], strides = [1, 1]} : vector<8x384xf32> to vector<8x128xf32>
    %81 = vector.extract_strided_slice %63 {offsets = [0, 256], sizes = [8, 128], strides = [1, 1]} : vector<8x384xf32> to vector<8x128xf32>
    %82 = vector.broadcast %18 : vector<1x128xf32> to vector<8x128xf32>
    %83 = arith.addf %81, %82 : vector<8x128xf32>
    %84 = arith.mulf %71, %83 : vector<8x128xf32>
    %85 = arith.addf %80, %84 : vector<8x128xf32>
    %86 = math.tanh %85 : vector<8x128xf32>
    %87 = arith.subf %24, %86 : vector<8x128xf32>
    %88 = arith.mulf %79, %87 : vector<8x128xf32>
    %89 = arith.addf %86, %88 : vector<8x128xf32>
    %90 = arith.truncf %89 : vector<8x128xf32> to vector<8x128xbf16>
    %cst_48 = arith.constant dense<0.000000e+00> : vector<8x384xf32>
    %91 = tpu.matmul %90, %19, %cst_48 {dimension_numbers = #tpu.dot_dimension_numbers<[1], [0], [0], [1], [0, 0, 1, 1], [], []>} : vector<8x128xbf16>, vector<128x384xbf16>, vector<8x384xf32> -> vector<8x384xf32>
    %92 = vector.broadcast %20 : vector<1x384xf32> to vector<8x384xf32>
    %93 = arith.addf %91, %92 : vector<8x384xf32>
    %94 = arith.truncf %25 : vector<8x128xf32> to vector<8x128xbf16>
    %cst_49 = arith.constant dense<0.000000e+00> : vector<8x384xf32>
    %95 = tpu.matmul %94, %21, %cst_49 {dimension_numbers = #tpu.dot_dimension_numbers<[1], [0], [0], [1], [0, 0, 1, 1], [], []>} : vector<8x128xbf16>, vector<128x384xbf16>, vector<8x384xf32> -> vector<8x384xf32>
    %96 = vector.extract_strided_slice %93 {offsets = [0, 0], sizes = [8, 128], strides = [1, 1]} : vector<8x384xf32> to vector<8x128xf32>
    %97 = vector.extract_strided_slice %95 {offsets = [0, 0], sizes = [8, 128], strides = [1, 1]} : vector<8x384xf32> to vector<8x128xf32>
    %98 = arith.addf %96, %97 : vector<8x128xf32>
    %99 = arith.negf %98 : vector<8x128xf32>
    %100 = math.exp %99 : vector<8x128xf32>
    %cst_50 = arith.constant 1.000000e+00 : f32
    %101 = vector.broadcast %cst_50 : f32 to vector<8x128xf32>
    %102 = arith.addf %101, %100 : vector<8x128xf32>
    %103 = arith.divf %101, %102 : vector<8x128xf32>
    %104 = vector.extract_strided_slice %93 {offsets = [0, 128], sizes = [8, 128], strides = [1, 1]} : vector<8x384xf32> to vector<8x128xf32>
    %105 = vector.extract_strided_slice %95 {offsets = [0, 128], sizes = [8, 128], strides = [1, 1]} : vector<8x384xf32> to vector<8x128xf32>
    %106 = arith.addf %104, %105 : vector<8x128xf32>
    %107 = arith.negf %106 : vector<8x128xf32>
    %108 = math.exp %107 : vector<8x128xf32>
    %cst_51 = arith.constant 1.000000e+00 : f32
    %109 = vector.broadcast %cst_51 : f32 to vector<8x128xf32>
    %110 = arith.addf %109, %108 : vector<8x128xf32>
    %111 = arith.divf %109, %110 : vector<8x128xf32>
    %112 = vector.extract_strided_slice %93 {offsets = [0, 256], sizes = [8, 128], strides = [1, 1]} : vector<8x384xf32> to vector<8x128xf32>
    %113 = vector.extract_strided_slice %95 {offsets = [0, 256], sizes = [8, 128], strides = [1, 1]} : vector<8x384xf32> to vector<8x128xf32>
    %114 = vector.broadcast %22 : vector<1x128xf32> to vector<8x128xf32>
    %115 = arith.addf %113, %114 : vector<8x128xf32>
    %116 = arith.mulf %103, %115 : vector<8x128xf32>
    %117 = arith.addf %112, %116 : vector<8x128xf32>
    %118 = math.tanh %117 : vector<8x128xf32>
    %119 = arith.subf %25, %118 : vector<8x128xf32>
    %120 = arith.mulf %111, %119 : vector<8x128xf32>
    %121 = arith.addf %118, %120 : vector<8x128xf32>
    %122 = arith.addf %26, %121 : vector<8x128xf32>
    %c1_i32 = arith.constant 1 : i32
    %123 = arith.index_cast %c1_i32 : i32 to index
    %c0_52 = arith.constant 0 : index
    %c0_53 = arith.constant 0 : index
    %124 = vector.load %arg22[%123, %c0_52, %c0_53] : memref<8x8x384xf32, #tpu.memory_space<vmem>>, vector<1x8x384xf32>
    %125 = vector.shape_cast %124 : vector<1x8x384xf32> to vector<8x384xf32>
    %126 = arith.truncf %57 : vector<8x128xf32> to vector<8x128xbf16>
    %cst_54 = arith.constant dense<0.000000e+00> : vector<8x384xf32>
    %127 = tpu.matmul %126, %13, %cst_54 {dimension_numbers = #tpu.dot_dimension_numbers<[1], [0], [0], [1], [0, 0, 1, 1], [], []>} : vector<8x128xbf16>, vector<128x384xbf16>, vector<8x384xf32> -> vector<8x384xf32>
    %128 = vector.extract_strided_slice %125 {offsets = [0, 0], sizes = [8, 128], strides = [1, 1]} : vector<8x384xf32> to vector<8x128xf32>
    %129 = vector.extract_strided_slice %127 {offsets = [0, 0], sizes = [8, 128], strides = [1, 1]} : vector<8x384xf32> to vector<8x128xf32>
    %130 = arith.addf %128, %129 : vector<8x128xf32>
    %131 = arith.negf %130 : vector<8x128xf32>
    %132 = math.exp %131 : vector<8x128xf32>
    %cst_55 = arith.constant 1.000000e+00 : f32
    %133 = vector.broadcast %cst_55 : f32 to vector<8x128xf32>
    %134 = arith.addf %133, %132 : vector<8x128xf32>
    %135 = arith.divf %133, %134 : vector<8x128xf32>
    %136 = vector.extract_strided_slice %125 {offsets = [0, 128], sizes = [8, 128], strides = [1, 1]} : vector<8x384xf32> to vector<8x128xf32>
    %137 = vector.extract_strided_slice %127 {offsets = [0, 128], sizes = [8, 128], strides = [1, 1]} : vector<8x384xf32> to vector<8x128xf32>
    %138 = arith.addf %136, %137 : vector<8x128xf32>
    %139 = arith.negf %138 : vector<8x128xf32>
    %140 = math.exp %139 : vector<8x128xf32>
    %cst_56 = arith.constant 1.000000e+00 : f32
    %141 = vector.broadcast %cst_56 : f32 to vector<8x128xf32>
    %142 = arith.addf %141, %140 : vector<8x128xf32>
    %143 = arith.divf %141, %142 : vector<8x128xf32>
    %144 = vector.extract_strided_slice %125 {offsets = [0, 256], sizes = [8, 128], strides = [1, 1]} : vector<8x384xf32> to vector<8x128xf32>
    %145 = vector.extract_strided_slice %127 {offsets = [0, 256], sizes = [8, 128], strides = [1, 1]} : vector<8x384xf32> to vector<8x128xf32>
    %146 = vector.broadcast %14 : vector<1x128xf32> to vector<8x128xf32>
    %147 = arith.addf %145, %146 : vector<8x128xf32>
    %148 = arith.mulf %135, %147 : vector<8x128xf32>
    %149 = arith.addf %144, %148 : vector<8x128xf32>
    %150 = math.tanh %149 : vector<8x128xf32>
    %151 = arith.subf %57, %150 : vector<8x128xf32>
    %152 = arith.mulf %143, %151 : vector<8x128xf32>
    %153 = arith.addf %150, %152 : vector<8x128xf32>
    %154 = arith.truncf %153 : vector<8x128xf32> to vector<8x128xbf16>
    %cst_57 = arith.constant dense<0.000000e+00> : vector<8x384xf32>
    %155 = tpu.matmul %154, %15, %cst_57 {dimension_numbers = #tpu.dot_dimension_numbers<[1], [0], [0], [1], [0, 0, 1, 1], [], []>} : vector<8x128xbf16>, vector<128x384xbf16>, vector<8x384xf32> -> vector<8x384xf32>
    %156 = vector.broadcast %16 : vector<1x384xf32> to vector<8x384xf32>
    %157 = arith.addf %155, %156 : vector<8x384xf32>
    %158 = arith.truncf %89 : vector<8x128xf32> to vector<8x128xbf16>
    %cst_58 = arith.constant dense<0.000000e+00> : vector<8x384xf32>
    %159 = tpu.matmul %158, %17, %cst_58 {dimension_numbers = #tpu.dot_dimension_numbers<[1], [0], [0], [1], [0, 0, 1, 1], [], []>} : vector<8x128xbf16>, vector<128x384xbf16>, vector<8x384xf32> -> vector<8x384xf32>
    %160 = vector.extract_strided_slice %157 {offsets = [0, 0], sizes = [8, 128], strides = [1, 1]} : vector<8x384xf32> to vector<8x128xf32>
    %161 = vector.extract_strided_slice %159 {offsets = [0, 0], sizes = [8, 128], strides = [1, 1]} : vector<8x384xf32> to vector<8x128xf32>
    %162 = arith.addf %160, %161 : vector<8x128xf32>
    %163 = arith.negf %162 : vector<8x128xf32>
    %164 = math.exp %163 : vector<8x128xf32>
    %cst_59 = arith.constant 1.000000e+00 : f32
    %165 = vector.broadcast %cst_59 : f32 to vector<8x128xf32>
    %166 = arith.addf %165, %164 : vector<8x128xf32>
    %167 = arith.divf %165, %166 : vector<8x128xf32>
    %168 = vector.extract_strided_slice %157 {offsets = [0, 128], sizes = [8, 128], strides = [1, 1]} : vector<8x384xf32> to vector<8x128xf32>
    %169 = vector.extract_strided_slice %159 {offsets = [0, 128], sizes = [8, 128], strides = [1, 1]} : vector<8x384xf32> to vector<8x128xf32>
    %170 = arith.addf %168, %169 : vector<8x128xf32>
    %171 = arith.negf %170 : vector<8x128xf32>
    %172 = math.exp %171 : vector<8x128xf32>
    %cst_60 = arith.constant 1.000000e+00 : f32
    %173 = vector.broadcast %cst_60 : f32 to vector<8x128xf32>
    %174 = arith.addf %173, %172 : vector<8x128xf32>
    %175 = arith.divf %173, %174 : vector<8x128xf32>
    %176 = vector.extract_strided_slice %157 {offsets = [0, 256], sizes = [8, 128], strides = [1, 1]} : vector<8x384xf32> to vector<8x128xf32>
    %177 = vector.extract_strided_slice %159 {offsets = [0, 256], sizes = [8, 128], strides = [1, 1]} : vector<8x384xf32> to vector<8x128xf32>
    %178 = vector.broadcast %18 : vector<1x128xf32> to vector<8x128xf32>
    %179 = arith.addf %177, %178 : vector<8x128xf32>
    %180 = arith.mulf %167, %179 : vector<8x128xf32>
    %181 = arith.addf %176, %180 : vector<8x128xf32>
    %182 = math.tanh %181 : vector<8x128xf32>
    %183 = arith.subf %89, %182 : vector<8x128xf32>
    %184 = arith.mulf %175, %183 : vector<8x128xf32>
    %185 = arith.addf %182, %184 : vector<8x128xf32>
    %186 = arith.truncf %185 : vector<8x128xf32> to vector<8x128xbf16>
    %cst_61 = arith.constant dense<0.000000e+00> : vector<8x384xf32>
    %187 = tpu.matmul %186, %19, %cst_61 {dimension_numbers = #tpu.dot_dimension_numbers<[1], [0], [0], [1], [0, 0, 1, 1], [], []>} : vector<8x128xbf16>, vector<128x384xbf16>, vector<8x384xf32> -> vector<8x384xf32>
    %188 = vector.broadcast %20 : vector<1x384xf32> to vector<8x384xf32>
    %189 = arith.addf %187, %188 : vector<8x384xf32>
    %190 = arith.truncf %121 : vector<8x128xf32> to vector<8x128xbf16>
    %cst_62 = arith.constant dense<0.000000e+00> : vector<8x384xf32>
    %191 = tpu.matmul %190, %21, %cst_62 {dimension_numbers = #tpu.dot_dimension_numbers<[1], [0], [0], [1], [0, 0, 1, 1], [], []>} : vector<8x128xbf16>, vector<128x384xbf16>, vector<8x384xf32> -> vector<8x384xf32>
    %192 = vector.extract_strided_slice %189 {offsets = [0, 0], sizes = [8, 128], strides = [1, 1]} : vector<8x384xf32> to vector<8x128xf32>
    %193 = vector.extract_strided_slice %191 {offsets = [0, 0], sizes = [8, 128], strides = [1, 1]} : vector<8x384xf32> to vector<8x128xf32>
    %194 = arith.addf %192, %193 : vector<8x128xf32>
    %195 = arith.negf %194 : vector<8x128xf32>
    %196 = math.exp %195 : vector<8x128xf32>
    %cst_63 = arith.constant 1.000000e+00 : f32
    %197 = vector.broadcast %cst_63 : f32 to vector<8x128xf32>
    %198 = arith.addf %197, %196 : vector<8x128xf32>
    %199 = arith.divf %197, %198 : vector<8x128xf32>
    %200 = vector.extract_strided_slice %189 {offsets = [0, 128], sizes = [8, 128], strides = [1, 1]} : vector<8x384xf32> to vector<8x128xf32>
    %201 = vector.extract_strided_slice %191 {offsets = [0, 128], sizes = [8, 128], strides = [1, 1]} : vector<8x384xf32> to vector<8x128xf32>
    %202 = arith.addf %200, %201 : vector<8x128xf32>
    %203 = arith.negf %202 : vector<8x128xf32>
    %204 = math.exp %203 : vector<8x128xf32>
    %cst_64 = arith.constant 1.000000e+00 : f32
    %205 = vector.broadcast %cst_64 : f32 to vector<8x128xf32>
    %206 = arith.addf %205, %204 : vector<8x128xf32>
    %207 = arith.divf %205, %206 : vector<8x128xf32>
    %208 = vector.extract_strided_slice %189 {offsets = [0, 256], sizes = [8, 128], strides = [1, 1]} : vector<8x384xf32> to vector<8x128xf32>
    %209 = vector.extract_strided_slice %191 {offsets = [0, 256], sizes = [8, 128], strides = [1, 1]} : vector<8x384xf32> to vector<8x128xf32>
    %210 = vector.broadcast %22 : vector<1x128xf32> to vector<8x128xf32>
    %211 = arith.addf %209, %210 : vector<8x128xf32>
    %212 = arith.mulf %199, %211 : vector<8x128xf32>
    %213 = arith.addf %208, %212 : vector<8x128xf32>
    %214 = math.tanh %213 : vector<8x128xf32>
    %215 = arith.subf %121, %214 : vector<8x128xf32>
    %216 = arith.mulf %207, %215 : vector<8x128xf32>
    %217 = arith.addf %214, %216 : vector<8x128xf32>
    %218 = arith.addf %122, %217 : vector<8x128xf32>
    %c2_i32 = arith.constant 2 : i32
    %219 = arith.index_cast %c2_i32 : i32 to index
    %c0_65 = arith.constant 0 : index
    %c0_66 = arith.constant 0 : index
    %220 = vector.load %arg22[%219, %c0_65, %c0_66] : memref<8x8x384xf32, #tpu.memory_space<vmem>>, vector<1x8x384xf32>
    %221 = vector.shape_cast %220 : vector<1x8x384xf32> to vector<8x384xf32>
    %222 = arith.truncf %153 : vector<8x128xf32> to vector<8x128xbf16>
    %cst_67 = arith.constant dense<0.000000e+00> : vector<8x384xf32>
    %223 = tpu.matmul %222, %13, %cst_67 {dimension_numbers = #tpu.dot_dimension_numbers<[1], [0], [0], [1], [0, 0, 1, 1], [], []>} : vector<8x128xbf16>, vector<128x384xbf16>, vector<8x384xf32> -> vector<8x384xf32>
    %224 = vector.extract_strided_slice %221 {offsets = [0, 0], sizes = [8, 128], strides = [1, 1]} : vector<8x384xf32> to vector<8x128xf32>
    %225 = vector.extract_strided_slice %223 {offsets = [0, 0], sizes = [8, 128], strides = [1, 1]} : vector<8x384xf32> to vector<8x128xf32>
    %226 = arith.addf %224, %225 : vector<8x128xf32>
    %227 = arith.negf %226 : vector<8x128xf32>
    %228 = math.exp %227 : vector<8x128xf32>
    %cst_68 = arith.constant 1.000000e+00 : f32
    %229 = vector.broadcast %cst_68 : f32 to vector<8x128xf32>
    %230 = arith.addf %229, %228 : vector<8x128xf32>
    %231 = arith.divf %229, %230 : vector<8x128xf32>
    %232 = vector.extract_strided_slice %221 {offsets = [0, 128], sizes = [8, 128], strides = [1, 1]} : vector<8x384xf32> to vector<8x128xf32>
    %233 = vector.extract_strided_slice %223 {offsets = [0, 128], sizes = [8, 128], strides = [1, 1]} : vector<8x384xf32> to vector<8x128xf32>
    %234 = arith.addf %232, %233 : vector<8x128xf32>
    %235 = arith.negf %234 : vector<8x128xf32>
    %236 = math.exp %235 : vector<8x128xf32>
    %cst_69 = arith.constant 1.000000e+00 : f32
    %237 = vector.broadcast %cst_69 : f32 to vector<8x128xf32>
    %238 = arith.addf %237, %236 : vector<8x128xf32>
    %239 = arith.divf %237, %238 : vector<8x128xf32>
    %240 = vector.extract_strided_slice %221 {offsets = [0, 256], sizes = [8, 128], strides = [1, 1]} : vector<8x384xf32> to vector<8x128xf32>
    %241 = vector.extract_strided_slice %223 {offsets = [0, 256], sizes = [8, 128], strides = [1, 1]} : vector<8x384xf32> to vector<8x128xf32>
    %242 = vector.broadcast %14 : vector<1x128xf32> to vector<8x128xf32>
    %243 = arith.addf %241, %242 : vector<8x128xf32>
    %244 = arith.mulf %231, %243 : vector<8x128xf32>
    %245 = arith.addf %240, %244 : vector<8x128xf32>
    %246 = math.tanh %245 : vector<8x128xf32>
    %247 = arith.subf %153, %246 : vector<8x128xf32>
    %248 = arith.mulf %239, %247 : vector<8x128xf32>
    %249 = arith.addf %246, %248 : vector<8x128xf32>
    %250 = arith.truncf %249 : vector<8x128xf32> to vector<8x128xbf16>
    %cst_70 = arith.constant dense<0.000000e+00> : vector<8x384xf32>
    %251 = tpu.matmul %250, %15, %cst_70 {dimension_numbers = #tpu.dot_dimension_numbers<[1], [0], [0], [1], [0, 0, 1, 1], [], []>} : vector<8x128xbf16>, vector<128x384xbf16>, vector<8x384xf32> -> vector<8x384xf32>
    %252 = vector.broadcast %16 : vector<1x384xf32> to vector<8x384xf32>
    %253 = arith.addf %251, %252 : vector<8x384xf32>
    %254 = arith.truncf %185 : vector<8x128xf32> to vector<8x128xbf16>
    %cst_71 = arith.constant dense<0.000000e+00> : vector<8x384xf32>
    %255 = tpu.matmul %254, %17, %cst_71 {dimension_numbers = #tpu.dot_dimension_numbers<[1], [0], [0], [1], [0, 0, 1, 1], [], []>} : vector<8x128xbf16>, vector<128x384xbf16>, vector<8x384xf32> -> vector<8x384xf32>
    %256 = vector.extract_strided_slice %253 {offsets = [0, 0], sizes = [8, 128], strides = [1, 1]} : vector<8x384xf32> to vector<8x128xf32>
    %257 = vector.extract_strided_slice %255 {offsets = [0, 0], sizes = [8, 128], strides = [1, 1]} : vector<8x384xf32> to vector<8x128xf32>
    %258 = arith.addf %256, %257 : vector<8x128xf32>
    %259 = arith.negf %258 : vector<8x128xf32>
    %260 = math.exp %259 : vector<8x128xf32>
    %cst_72 = arith.constant 1.000000e+00 : f32
    %261 = vector.broadcast %cst_72 : f32 to vector<8x128xf32>
    %262 = arith.addf %261, %260 : vector<8x128xf32>
    %263 = arith.divf %261, %262 : vector<8x128xf32>
    %264 = vector.extract_strided_slice %253 {offsets = [0, 128], sizes = [8, 128], strides = [1, 1]} : vector<8x384xf32> to vector<8x128xf32>
    %265 = vector.extract_strided_slice %255 {offsets = [0, 128], sizes = [8, 128], strides = [1, 1]} : vector<8x384xf32> to vector<8x128xf32>
    %266 = arith.addf %264, %265 : vector<8x128xf32>
    %267 = arith.negf %266 : vector<8x128xf32>
    %268 = math.exp %267 : vector<8x128xf32>
    %cst_73 = arith.constant 1.000000e+00 : f32
    %269 = vector.broadcast %cst_73 : f32 to vector<8x128xf32>
    %270 = arith.addf %269, %268 : vector<8x128xf32>
    %271 = arith.divf %269, %270 : vector<8x128xf32>
    %272 = vector.extract_strided_slice %253 {offsets = [0, 256], sizes = [8, 128], strides = [1, 1]} : vector<8x384xf32> to vector<8x128xf32>
    %273 = vector.extract_strided_slice %255 {offsets = [0, 256], sizes = [8, 128], strides = [1, 1]} : vector<8x384xf32> to vector<8x128xf32>
    %274 = vector.broadcast %18 : vector<1x128xf32> to vector<8x128xf32>
    %275 = arith.addf %273, %274 : vector<8x128xf32>
    %276 = arith.mulf %263, %275 : vector<8x128xf32>
    %277 = arith.addf %272, %276 : vector<8x128xf32>
    %278 = math.tanh %277 : vector<8x128xf32>
    %279 = arith.subf %185, %278 : vector<8x128xf32>
    %280 = arith.mulf %271, %279 : vector<8x128xf32>
    %281 = arith.addf %278, %280 : vector<8x128xf32>
    %282 = arith.truncf %281 : vector<8x128xf32> to vector<8x128xbf16>
    %cst_74 = arith.constant dense<0.000000e+00> : vector<8x384xf32>
    %283 = tpu.matmul %282, %19, %cst_74 {dimension_numbers = #tpu.dot_dimension_numbers<[1], [0], [0], [1], [0, 0, 1, 1], [], []>} : vector<8x128xbf16>, vector<128x384xbf16>, vector<8x384xf32> -> vector<8x384xf32>
    %284 = vector.broadcast %20 : vector<1x384xf32> to vector<8x384xf32>
    %285 = arith.addf %283, %284 : vector<8x384xf32>
    %286 = arith.truncf %217 : vector<8x128xf32> to vector<8x128xbf16>
    %cst_75 = arith.constant dense<0.000000e+00> : vector<8x384xf32>
    %287 = tpu.matmul %286, %21, %cst_75 {dimension_numbers = #tpu.dot_dimension_numbers<[1], [0], [0], [1], [0, 0, 1, 1], [], []>} : vector<8x128xbf16>, vector<128x384xbf16>, vector<8x384xf32> -> vector<8x384xf32>
    %288 = vector.extract_strided_slice %285 {offsets = [0, 0], sizes = [8, 128], strides = [1, 1]} : vector<8x384xf32> to vector<8x128xf32>
    %289 = vector.extract_strided_slice %287 {offsets = [0, 0], sizes = [8, 128], strides = [1, 1]} : vector<8x384xf32> to vector<8x128xf32>
    %290 = arith.addf %288, %289 : vector<8x128xf32>
    %291 = arith.negf %290 : vector<8x128xf32>
    %292 = math.exp %291 : vector<8x128xf32>
    %cst_76 = arith.constant 1.000000e+00 : f32
    %293 = vector.broadcast %cst_76 : f32 to vector<8x128xf32>
    %294 = arith.addf %293, %292 : vector<8x128xf32>
    %295 = arith.divf %293, %294 : vector<8x128xf32>
    %296 = vector.extract_strided_slice %285 {offsets = [0, 128], sizes = [8, 128], strides = [1, 1]} : vector<8x384xf32> to vector<8x128xf32>
    %297 = vector.extract_strided_slice %287 {offsets = [0, 128], sizes = [8, 128], strides = [1, 1]} : vector<8x384xf32> to vector<8x128xf32>
    %298 = arith.addf %296, %297 : vector<8x128xf32>
    %299 = arith.negf %298 : vector<8x128xf32>
    %300 = math.exp %299 : vector<8x128xf32>
    %cst_77 = arith.constant 1.000000e+00 : f32
    %301 = vector.broadcast %cst_77 : f32 to vector<8x128xf32>
    %302 = arith.addf %301, %300 : vector<8x128xf32>
    %303 = arith.divf %301, %302 : vector<8x128xf32>
    %304 = vector.extract_strided_slice %285 {offsets = [0, 256], sizes = [8, 128], strides = [1, 1]} : vector<8x384xf32> to vector<8x128xf32>
    %305 = vector.extract_strided_slice %287 {offsets = [0, 256], sizes = [8, 128], strides = [1, 1]} : vector<8x384xf32> to vector<8x128xf32>
    %306 = vector.broadcast %22 : vector<1x128xf32> to vector<8x128xf32>
    %307 = arith.addf %305, %306 : vector<8x128xf32>
    %308 = arith.mulf %295, %307 : vector<8x128xf32>
    %309 = arith.addf %304, %308 : vector<8x128xf32>
    %310 = math.tanh %309 : vector<8x128xf32>
    %311 = arith.subf %217, %310 : vector<8x128xf32>
    %312 = arith.mulf %303, %311 : vector<8x128xf32>
    %313 = arith.addf %310, %312 : vector<8x128xf32>
    %314 = arith.addf %218, %313 : vector<8x128xf32>
    %c3_i32 = arith.constant 3 : i32
    %315 = arith.index_cast %c3_i32 : i32 to index
    %c0_78 = arith.constant 0 : index
    %c0_79 = arith.constant 0 : index
    %316 = vector.load %arg22[%315, %c0_78, %c0_79] : memref<8x8x384xf32, #tpu.memory_space<vmem>>, vector<1x8x384xf32>
    %317 = vector.shape_cast %316 : vector<1x8x384xf32> to vector<8x384xf32>
    %318 = arith.truncf %249 : vector<8x128xf32> to vector<8x128xbf16>
    %cst_80 = arith.constant dense<0.000000e+00> : vector<8x384xf32>
    %319 = tpu.matmul %318, %13, %cst_80 {dimension_numbers = #tpu.dot_dimension_numbers<[1], [0], [0], [1], [0, 0, 1, 1], [], []>} : vector<8x128xbf16>, vector<128x384xbf16>, vector<8x384xf32> -> vector<8x384xf32>
    %320 = vector.extract_strided_slice %317 {offsets = [0, 0], sizes = [8, 128], strides = [1, 1]} : vector<8x384xf32> to vector<8x128xf32>
    %321 = vector.extract_strided_slice %319 {offsets = [0, 0], sizes = [8, 128], strides = [1, 1]} : vector<8x384xf32> to vector<8x128xf32>
    %322 = arith.addf %320, %321 : vector<8x128xf32>
    %323 = arith.negf %322 : vector<8x128xf32>
    %324 = math.exp %323 : vector<8x128xf32>
    %cst_81 = arith.constant 1.000000e+00 : f32
    %325 = vector.broadcast %cst_81 : f32 to vector<8x128xf32>
    %326 = arith.addf %325, %324 : vector<8x128xf32>
    %327 = arith.divf %325, %326 : vector<8x128xf32>
    %328 = vector.extract_strided_slice %317 {offsets = [0, 128], sizes = [8, 128], strides = [1, 1]} : vector<8x384xf32> to vector<8x128xf32>
    %329 = vector.extract_strided_slice %319 {offsets = [0, 128], sizes = [8, 128], strides = [1, 1]} : vector<8x384xf32> to vector<8x128xf32>
    %330 = arith.addf %328, %329 : vector<8x128xf32>
    %331 = arith.negf %330 : vector<8x128xf32>
    %332 = math.exp %331 : vector<8x128xf32>
    %cst_82 = arith.constant 1.000000e+00 : f32
    %333 = vector.broadcast %cst_82 : f32 to vector<8x128xf32>
    %334 = arith.addf %333, %332 : vector<8x128xf32>
    %335 = arith.divf %333, %334 : vector<8x128xf32>
    %336 = vector.extract_strided_slice %317 {offsets = [0, 256], sizes = [8, 128], strides = [1, 1]} : vector<8x384xf32> to vector<8x128xf32>
    %337 = vector.extract_strided_slice %319 {offsets = [0, 256], sizes = [8, 128], strides = [1, 1]} : vector<8x384xf32> to vector<8x128xf32>
    %338 = vector.broadcast %14 : vector<1x128xf32> to vector<8x128xf32>
    %339 = arith.addf %337, %338 : vector<8x128xf32>
    %340 = arith.mulf %327, %339 : vector<8x128xf32>
    %341 = arith.addf %336, %340 : vector<8x128xf32>
    %342 = math.tanh %341 : vector<8x128xf32>
    %343 = arith.subf %249, %342 : vector<8x128xf32>
    %344 = arith.mulf %335, %343 : vector<8x128xf32>
    %345 = arith.addf %342, %344 : vector<8x128xf32>
    %346 = arith.truncf %345 : vector<8x128xf32> to vector<8x128xbf16>
    %cst_83 = arith.constant dense<0.000000e+00> : vector<8x384xf32>
    %347 = tpu.matmul %346, %15, %cst_83 {dimension_numbers = #tpu.dot_dimension_numbers<[1], [0], [0], [1], [0, 0, 1, 1], [], []>} : vector<8x128xbf16>, vector<128x384xbf16>, vector<8x384xf32> -> vector<8x384xf32>
    %348 = vector.broadcast %16 : vector<1x384xf32> to vector<8x384xf32>
    %349 = arith.addf %347, %348 : vector<8x384xf32>
    %350 = arith.truncf %281 : vector<8x128xf32> to vector<8x128xbf16>
    %cst_84 = arith.constant dense<0.000000e+00> : vector<8x384xf32>
    %351 = tpu.matmul %350, %17, %cst_84 {dimension_numbers = #tpu.dot_dimension_numbers<[1], [0], [0], [1], [0, 0, 1, 1], [], []>} : vector<8x128xbf16>, vector<128x384xbf16>, vector<8x384xf32> -> vector<8x384xf32>
    %352 = vector.extract_strided_slice %349 {offsets = [0, 0], sizes = [8, 128], strides = [1, 1]} : vector<8x384xf32> to vector<8x128xf32>
    %353 = vector.extract_strided_slice %351 {offsets = [0, 0], sizes = [8, 128], strides = [1, 1]} : vector<8x384xf32> to vector<8x128xf32>
    %354 = arith.addf %352, %353 : vector<8x128xf32>
    %355 = arith.negf %354 : vector<8x128xf32>
    %356 = math.exp %355 : vector<8x128xf32>
    %cst_85 = arith.constant 1.000000e+00 : f32
    %357 = vector.broadcast %cst_85 : f32 to vector<8x128xf32>
    %358 = arith.addf %357, %356 : vector<8x128xf32>
    %359 = arith.divf %357, %358 : vector<8x128xf32>
    %360 = vector.extract_strided_slice %349 {offsets = [0, 128], sizes = [8, 128], strides = [1, 1]} : vector<8x384xf32> to vector<8x128xf32>
    %361 = vector.extract_strided_slice %351 {offsets = [0, 128], sizes = [8, 128], strides = [1, 1]} : vector<8x384xf32> to vector<8x128xf32>
    %362 = arith.addf %360, %361 : vector<8x128xf32>
    %363 = arith.negf %362 : vector<8x128xf32>
    %364 = math.exp %363 : vector<8x128xf32>
    %cst_86 = arith.constant 1.000000e+00 : f32
    %365 = vector.broadcast %cst_86 : f32 to vector<8x128xf32>
    %366 = arith.addf %365, %364 : vector<8x128xf32>
    %367 = arith.divf %365, %366 : vector<8x128xf32>
    %368 = vector.extract_strided_slice %349 {offsets = [0, 256], sizes = [8, 128], strides = [1, 1]} : vector<8x384xf32> to vector<8x128xf32>
    %369 = vector.extract_strided_slice %351 {offsets = [0, 256], sizes = [8, 128], strides = [1, 1]} : vector<8x384xf32> to vector<8x128xf32>
    %370 = vector.broadcast %18 : vector<1x128xf32> to vector<8x128xf32>
    %371 = arith.addf %369, %370 : vector<8x128xf32>
    %372 = arith.mulf %359, %371 : vector<8x128xf32>
    %373 = arith.addf %368, %372 : vector<8x128xf32>
    %374 = math.tanh %373 : vector<8x128xf32>
    %375 = arith.subf %281, %374 : vector<8x128xf32>
    %376 = arith.mulf %367, %375 : vector<8x128xf32>
    %377 = arith.addf %374, %376 : vector<8x128xf32>
    %378 = arith.truncf %377 : vector<8x128xf32> to vector<8x128xbf16>
    %cst_87 = arith.constant dense<0.000000e+00> : vector<8x384xf32>
    %379 = tpu.matmul %378, %19, %cst_87 {dimension_numbers = #tpu.dot_dimension_numbers<[1], [0], [0], [1], [0, 0, 1, 1], [], []>} : vector<8x128xbf16>, vector<128x384xbf16>, vector<8x384xf32> -> vector<8x384xf32>
    %380 = vector.broadcast %20 : vector<1x384xf32> to vector<8x384xf32>
    %381 = arith.addf %379, %380 : vector<8x384xf32>
    %382 = arith.truncf %313 : vector<8x128xf32> to vector<8x128xbf16>
    %cst_88 = arith.constant dense<0.000000e+00> : vector<8x384xf32>
    %383 = tpu.matmul %382, %21, %cst_88 {dimension_numbers = #tpu.dot_dimension_numbers<[1], [0], [0], [1], [0, 0, 1, 1], [], []>} : vector<8x128xbf16>, vector<128x384xbf16>, vector<8x384xf32> -> vector<8x384xf32>
    %384 = vector.extract_strided_slice %381 {offsets = [0, 0], sizes = [8, 128], strides = [1, 1]} : vector<8x384xf32> to vector<8x128xf32>
    %385 = vector.extract_strided_slice %383 {offsets = [0, 0], sizes = [8, 128], strides = [1, 1]} : vector<8x384xf32> to vector<8x128xf32>
    %386 = arith.addf %384, %385 : vector<8x128xf32>
    %387 = arith.negf %386 : vector<8x128xf32>
    %388 = math.exp %387 : vector<8x128xf32>
    %cst_89 = arith.constant 1.000000e+00 : f32
    %389 = vector.broadcast %cst_89 : f32 to vector<8x128xf32>
    %390 = arith.addf %389, %388 : vector<8x128xf32>
    %391 = arith.divf %389, %390 : vector<8x128xf32>
    %392 = vector.extract_strided_slice %381 {offsets = [0, 128], sizes = [8, 128], strides = [1, 1]} : vector<8x384xf32> to vector<8x128xf32>
    %393 = vector.extract_strided_slice %383 {offsets = [0, 128], sizes = [8, 128], strides = [1, 1]} : vector<8x384xf32> to vector<8x128xf32>
    %394 = arith.addf %392, %393 : vector<8x128xf32>
    %395 = arith.negf %394 : vector<8x128xf32>
    %396 = math.exp %395 : vector<8x128xf32>
    %cst_90 = arith.constant 1.000000e+00 : f32
    %397 = vector.broadcast %cst_90 : f32 to vector<8x128xf32>
    %398 = arith.addf %397, %396 : vector<8x128xf32>
    %399 = arith.divf %397, %398 : vector<8x128xf32>
    %400 = vector.extract_strided_slice %381 {offsets = [0, 256], sizes = [8, 128], strides = [1, 1]} : vector<8x384xf32> to vector<8x128xf32>
    %401 = vector.extract_strided_slice %383 {offsets = [0, 256], sizes = [8, 128], strides = [1, 1]} : vector<8x384xf32> to vector<8x128xf32>
    %402 = vector.broadcast %22 : vector<1x128xf32> to vector<8x128xf32>
    %403 = arith.addf %401, %402 : vector<8x128xf32>
    %404 = arith.mulf %391, %403 : vector<8x128xf32>
    %405 = arith.addf %400, %404 : vector<8x128xf32>
    %406 = math.tanh %405 : vector<8x128xf32>
    %407 = arith.subf %313, %406 : vector<8x128xf32>
    %408 = arith.mulf %399, %407 : vector<8x128xf32>
    %409 = arith.addf %406, %408 : vector<8x128xf32>
    %410 = arith.addf %314, %409 : vector<8x128xf32>
    %c4_i32 = arith.constant 4 : i32
    %411 = arith.index_cast %c4_i32 : i32 to index
    %c0_91 = arith.constant 0 : index
    %c0_92 = arith.constant 0 : index
    %412 = vector.load %arg22[%411, %c0_91, %c0_92] : memref<8x8x384xf32, #tpu.memory_space<vmem>>, vector<1x8x384xf32>
    %413 = vector.shape_cast %412 : vector<1x8x384xf32> to vector<8x384xf32>
    %414 = arith.truncf %345 : vector<8x128xf32> to vector<8x128xbf16>
    %cst_93 = arith.constant dense<0.000000e+00> : vector<8x384xf32>
    %415 = tpu.matmul %414, %13, %cst_93 {dimension_numbers = #tpu.dot_dimension_numbers<[1], [0], [0], [1], [0, 0, 1, 1], [], []>} : vector<8x128xbf16>, vector<128x384xbf16>, vector<8x384xf32> -> vector<8x384xf32>
    %416 = vector.extract_strided_slice %413 {offsets = [0, 0], sizes = [8, 128], strides = [1, 1]} : vector<8x384xf32> to vector<8x128xf32>
    %417 = vector.extract_strided_slice %415 {offsets = [0, 0], sizes = [8, 128], strides = [1, 1]} : vector<8x384xf32> to vector<8x128xf32>
    %418 = arith.addf %416, %417 : vector<8x128xf32>
    %419 = arith.negf %418 : vector<8x128xf32>
    %420 = math.exp %419 : vector<8x128xf32>
    %cst_94 = arith.constant 1.000000e+00 : f32
    %421 = vector.broadcast %cst_94 : f32 to vector<8x128xf32>
    %422 = arith.addf %421, %420 : vector<8x128xf32>
    %423 = arith.divf %421, %422 : vector<8x128xf32>
    %424 = vector.extract_strided_slice %413 {offsets = [0, 128], sizes = [8, 128], strides = [1, 1]} : vector<8x384xf32> to vector<8x128xf32>
    %425 = vector.extract_strided_slice %415 {offsets = [0, 128], sizes = [8, 128], strides = [1, 1]} : vector<8x384xf32> to vector<8x128xf32>
    %426 = arith.addf %424, %425 : vector<8x128xf32>
    %427 = arith.negf %426 : vector<8x128xf32>
    %428 = math.exp %427 : vector<8x128xf32>
    %cst_95 = arith.constant 1.000000e+00 : f32
    %429 = vector.broadcast %cst_95 : f32 to vector<8x128xf32>
    %430 = arith.addf %429, %428 : vector<8x128xf32>
    %431 = arith.divf %429, %430 : vector<8x128xf32>
    %432 = vector.extract_strided_slice %413 {offsets = [0, 256], sizes = [8, 128], strides = [1, 1]} : vector<8x384xf32> to vector<8x128xf32>
    %433 = vector.extract_strided_slice %415 {offsets = [0, 256], sizes = [8, 128], strides = [1, 1]} : vector<8x384xf32> to vector<8x128xf32>
    %434 = vector.broadcast %14 : vector<1x128xf32> to vector<8x128xf32>
    %435 = arith.addf %433, %434 : vector<8x128xf32>
    %436 = arith.mulf %423, %435 : vector<8x128xf32>
    %437 = arith.addf %432, %436 : vector<8x128xf32>
    %438 = math.tanh %437 : vector<8x128xf32>
    %439 = arith.subf %345, %438 : vector<8x128xf32>
    %440 = arith.mulf %431, %439 : vector<8x128xf32>
    %441 = arith.addf %438, %440 : vector<8x128xf32>
    %442 = arith.truncf %441 : vector<8x128xf32> to vector<8x128xbf16>
    %cst_96 = arith.constant dense<0.000000e+00> : vector<8x384xf32>
    %443 = tpu.matmul %442, %15, %cst_96 {dimension_numbers = #tpu.dot_dimension_numbers<[1], [0], [0], [1], [0, 0, 1, 1], [], []>} : vector<8x128xbf16>, vector<128x384xbf16>, vector<8x384xf32> -> vector<8x384xf32>
    %444 = vector.broadcast %16 : vector<1x384xf32> to vector<8x384xf32>
    %445 = arith.addf %443, %444 : vector<8x384xf32>
    %446 = arith.truncf %377 : vector<8x128xf32> to vector<8x128xbf16>
    %cst_97 = arith.constant dense<0.000000e+00> : vector<8x384xf32>
    %447 = tpu.matmul %446, %17, %cst_97 {dimension_numbers = #tpu.dot_dimension_numbers<[1], [0], [0], [1], [0, 0, 1, 1], [], []>} : vector<8x128xbf16>, vector<128x384xbf16>, vector<8x384xf32> -> vector<8x384xf32>
    %448 = vector.extract_strided_slice %445 {offsets = [0, 0], sizes = [8, 128], strides = [1, 1]} : vector<8x384xf32> to vector<8x128xf32>
    %449 = vector.extract_strided_slice %447 {offsets = [0, 0], sizes = [8, 128], strides = [1, 1]} : vector<8x384xf32> to vector<8x128xf32>
    %450 = arith.addf %448, %449 : vector<8x128xf32>
    %451 = arith.negf %450 : vector<8x128xf32>
    %452 = math.exp %451 : vector<8x128xf32>
    %cst_98 = arith.constant 1.000000e+00 : f32
    %453 = vector.broadcast %cst_98 : f32 to vector<8x128xf32>
    %454 = arith.addf %453, %452 : vector<8x128xf32>
    %455 = arith.divf %453, %454 : vector<8x128xf32>
    %456 = vector.extract_strided_slice %445 {offsets = [0, 128], sizes = [8, 128], strides = [1, 1]} : vector<8x384xf32> to vector<8x128xf32>
    %457 = vector.extract_strided_slice %447 {offsets = [0, 128], sizes = [8, 128], strides = [1, 1]} : vector<8x384xf32> to vector<8x128xf32>
    %458 = arith.addf %456, %457 : vector<8x128xf32>
    %459 = arith.negf %458 : vector<8x128xf32>
    %460 = math.exp %459 : vector<8x128xf32>
    %cst_99 = arith.constant 1.000000e+00 : f32
    %461 = vector.broadcast %cst_99 : f32 to vector<8x128xf32>
    %462 = arith.addf %461, %460 : vector<8x128xf32>
    %463 = arith.divf %461, %462 : vector<8x128xf32>
    %464 = vector.extract_strided_slice %445 {offsets = [0, 256], sizes = [8, 128], strides = [1, 1]} : vector<8x384xf32> to vector<8x128xf32>
    %465 = vector.extract_strided_slice %447 {offsets = [0, 256], sizes = [8, 128], strides = [1, 1]} : vector<8x384xf32> to vector<8x128xf32>
    %466 = vector.broadcast %18 : vector<1x128xf32> to vector<8x128xf32>
    %467 = arith.addf %465, %466 : vector<8x128xf32>
    %468 = arith.mulf %455, %467 : vector<8x128xf32>
    %469 = arith.addf %464, %468 : vector<8x128xf32>
    %470 = math.tanh %469 : vector<8x128xf32>
    %471 = arith.subf %377, %470 : vector<8x128xf32>
    %472 = arith.mulf %463, %471 : vector<8x128xf32>
    %473 = arith.addf %470, %472 : vector<8x128xf32>
    %474 = arith.truncf %473 : vector<8x128xf32> to vector<8x128xbf16>
    %cst_100 = arith.constant dense<0.000000e+00> : vector<8x384xf32>
    %475 = tpu.matmul %474, %19, %cst_100 {dimension_numbers = #tpu.dot_dimension_numbers<[1], [0], [0], [1], [0, 0, 1, 1], [], []>} : vector<8x128xbf16>, vector<128x384xbf16>, vector<8x384xf32> -> vector<8x384xf32>
    %476 = vector.broadcast %20 : vector<1x384xf32> to vector<8x384xf32>
    %477 = arith.addf %475, %476 : vector<8x384xf32>
    %478 = arith.truncf %409 : vector<8x128xf32> to vector<8x128xbf16>
    %cst_101 = arith.constant dense<0.000000e+00> : vector<8x384xf32>
    %479 = tpu.matmul %478, %21, %cst_101 {dimension_numbers = #tpu.dot_dimension_numbers<[1], [0], [0], [1], [0, 0, 1, 1], [], []>} : vector<8x128xbf16>, vector<128x384xbf16>, vector<8x384xf32> -> vector<8x384xf32>
    %480 = vector.extract_strided_slice %477 {offsets = [0, 0], sizes = [8, 128], strides = [1, 1]} : vector<8x384xf32> to vector<8x128xf32>
    %481 = vector.extract_strided_slice %479 {offsets = [0, 0], sizes = [8, 128], strides = [1, 1]} : vector<8x384xf32> to vector<8x128xf32>
    %482 = arith.addf %480, %481 : vector<8x128xf32>
    %483 = arith.negf %482 : vector<8x128xf32>
    %484 = math.exp %483 : vector<8x128xf32>
    %cst_102 = arith.constant 1.000000e+00 : f32
    %485 = vector.broadcast %cst_102 : f32 to vector<8x128xf32>
    %486 = arith.addf %485, %484 : vector<8x128xf32>
    %487 = arith.divf %485, %486 : vector<8x128xf32>
    %488 = vector.extract_strided_slice %477 {offsets = [0, 128], sizes = [8, 128], strides = [1, 1]} : vector<8x384xf32> to vector<8x128xf32>
    %489 = vector.extract_strided_slice %479 {offsets = [0, 128], sizes = [8, 128], strides = [1, 1]} : vector<8x384xf32> to vector<8x128xf32>
    %490 = arith.addf %488, %489 : vector<8x128xf32>
    %491 = arith.negf %490 : vector<8x128xf32>
    %492 = math.exp %491 : vector<8x128xf32>
    %cst_103 = arith.constant 1.000000e+00 : f32
    %493 = vector.broadcast %cst_103 : f32 to vector<8x128xf32>
    %494 = arith.addf %493, %492 : vector<8x128xf32>
    %495 = arith.divf %493, %494 : vector<8x128xf32>
    %496 = vector.extract_strided_slice %477 {offsets = [0, 256], sizes = [8, 128], strides = [1, 1]} : vector<8x384xf32> to vector<8x128xf32>
    %497 = vector.extract_strided_slice %479 {offsets = [0, 256], sizes = [8, 128], strides = [1, 1]} : vector<8x384xf32> to vector<8x128xf32>
    %498 = vector.broadcast %22 : vector<1x128xf32> to vector<8x128xf32>
    %499 = arith.addf %497, %498 : vector<8x128xf32>
    %500 = arith.mulf %487, %499 : vector<8x128xf32>
    %501 = arith.addf %496, %500 : vector<8x128xf32>
    %502 = math.tanh %501 : vector<8x128xf32>
    %503 = arith.subf %409, %502 : vector<8x128xf32>
    %504 = arith.mulf %495, %503 : vector<8x128xf32>
    %505 = arith.addf %502, %504 : vector<8x128xf32>
    %506 = arith.addf %410, %505 : vector<8x128xf32>
    %c5_i32 = arith.constant 5 : i32
    %507 = arith.index_cast %c5_i32 : i32 to index
    %c0_104 = arith.constant 0 : index
    %c0_105 = arith.constant 0 : index
    %508 = vector.load %arg22[%507, %c0_104, %c0_105] : memref<8x8x384xf32, #tpu.memory_space<vmem>>, vector<1x8x384xf32>
    %509 = vector.shape_cast %508 : vector<1x8x384xf32> to vector<8x384xf32>
    %510 = arith.truncf %441 : vector<8x128xf32> to vector<8x128xbf16>
    %cst_106 = arith.constant dense<0.000000e+00> : vector<8x384xf32>
    %511 = tpu.matmul %510, %13, %cst_106 {dimension_numbers = #tpu.dot_dimension_numbers<[1], [0], [0], [1], [0, 0, 1, 1], [], []>} : vector<8x128xbf16>, vector<128x384xbf16>, vector<8x384xf32> -> vector<8x384xf32>
    %512 = vector.extract_strided_slice %509 {offsets = [0, 0], sizes = [8, 128], strides = [1, 1]} : vector<8x384xf32> to vector<8x128xf32>
    %513 = vector.extract_strided_slice %511 {offsets = [0, 0], sizes = [8, 128], strides = [1, 1]} : vector<8x384xf32> to vector<8x128xf32>
    %514 = arith.addf %512, %513 : vector<8x128xf32>
    %515 = arith.negf %514 : vector<8x128xf32>
    %516 = math.exp %515 : vector<8x128xf32>
    %cst_107 = arith.constant 1.000000e+00 : f32
    %517 = vector.broadcast %cst_107 : f32 to vector<8x128xf32>
    %518 = arith.addf %517, %516 : vector<8x128xf32>
    %519 = arith.divf %517, %518 : vector<8x128xf32>
    %520 = vector.extract_strided_slice %509 {offsets = [0, 128], sizes = [8, 128], strides = [1, 1]} : vector<8x384xf32> to vector<8x128xf32>
    %521 = vector.extract_strided_slice %511 {offsets = [0, 128], sizes = [8, 128], strides = [1, 1]} : vector<8x384xf32> to vector<8x128xf32>
    %522 = arith.addf %520, %521 : vector<8x128xf32>
    %523 = arith.negf %522 : vector<8x128xf32>
    %524 = math.exp %523 : vector<8x128xf32>
    %cst_108 = arith.constant 1.000000e+00 : f32
    %525 = vector.broadcast %cst_108 : f32 to vector<8x128xf32>
    %526 = arith.addf %525, %524 : vector<8x128xf32>
    %527 = arith.divf %525, %526 : vector<8x128xf32>
    %528 = vector.extract_strided_slice %509 {offsets = [0, 256], sizes = [8, 128], strides = [1, 1]} : vector<8x384xf32> to vector<8x128xf32>
    %529 = vector.extract_strided_slice %511 {offsets = [0, 256], sizes = [8, 128], strides = [1, 1]} : vector<8x384xf32> to vector<8x128xf32>
    %530 = vector.broadcast %14 : vector<1x128xf32> to vector<8x128xf32>
    %531 = arith.addf %529, %530 : vector<8x128xf32>
    %532 = arith.mulf %519, %531 : vector<8x128xf32>
    %533 = arith.addf %528, %532 : vector<8x128xf32>
    %534 = math.tanh %533 : vector<8x128xf32>
    %535 = arith.subf %441, %534 : vector<8x128xf32>
    %536 = arith.mulf %527, %535 : vector<8x128xf32>
    %537 = arith.addf %534, %536 : vector<8x128xf32>
    %538 = arith.truncf %537 : vector<8x128xf32> to vector<8x128xbf16>
    %cst_109 = arith.constant dense<0.000000e+00> : vector<8x384xf32>
    %539 = tpu.matmul %538, %15, %cst_109 {dimension_numbers = #tpu.dot_dimension_numbers<[1], [0], [0], [1], [0, 0, 1, 1], [], []>} : vector<8x128xbf16>, vector<128x384xbf16>, vector<8x384xf32> -> vector<8x384xf32>
    %540 = vector.broadcast %16 : vector<1x384xf32> to vector<8x384xf32>
    %541 = arith.addf %539, %540 : vector<8x384xf32>
    %542 = arith.truncf %473 : vector<8x128xf32> to vector<8x128xbf16>
    %cst_110 = arith.constant dense<0.000000e+00> : vector<8x384xf32>
    %543 = tpu.matmul %542, %17, %cst_110 {dimension_numbers = #tpu.dot_dimension_numbers<[1], [0], [0], [1], [0, 0, 1, 1], [], []>} : vector<8x128xbf16>, vector<128x384xbf16>, vector<8x384xf32> -> vector<8x384xf32>
    %544 = vector.extract_strided_slice %541 {offsets = [0, 0], sizes = [8, 128], strides = [1, 1]} : vector<8x384xf32> to vector<8x128xf32>
    %545 = vector.extract_strided_slice %543 {offsets = [0, 0], sizes = [8, 128], strides = [1, 1]} : vector<8x384xf32> to vector<8x128xf32>
    %546 = arith.addf %544, %545 : vector<8x128xf32>
    %547 = arith.negf %546 : vector<8x128xf32>
    %548 = math.exp %547 : vector<8x128xf32>
    %cst_111 = arith.constant 1.000000e+00 : f32
    %549 = vector.broadcast %cst_111 : f32 to vector<8x128xf32>
    %550 = arith.addf %549, %548 : vector<8x128xf32>
    %551 = arith.divf %549, %550 : vector<8x128xf32>
    %552 = vector.extract_strided_slice %541 {offsets = [0, 128], sizes = [8, 128], strides = [1, 1]} : vector<8x384xf32> to vector<8x128xf32>
    %553 = vector.extract_strided_slice %543 {offsets = [0, 128], sizes = [8, 128], strides = [1, 1]} : vector<8x384xf32> to vector<8x128xf32>
    %554 = arith.addf %552, %553 : vector<8x128xf32>
    %555 = arith.negf %554 : vector<8x128xf32>
    %556 = math.exp %555 : vector<8x128xf32>
    %cst_112 = arith.constant 1.000000e+00 : f32
    %557 = vector.broadcast %cst_112 : f32 to vector<8x128xf32>
    %558 = arith.addf %557, %556 : vector<8x128xf32>
    %559 = arith.divf %557, %558 : vector<8x128xf32>
    %560 = vector.extract_strided_slice %541 {offsets = [0, 256], sizes = [8, 128], strides = [1, 1]} : vector<8x384xf32> to vector<8x128xf32>
    %561 = vector.extract_strided_slice %543 {offsets = [0, 256], sizes = [8, 128], strides = [1, 1]} : vector<8x384xf32> to vector<8x128xf32>
    %562 = vector.broadcast %18 : vector<1x128xf32> to vector<8x128xf32>
    %563 = arith.addf %561, %562 : vector<8x128xf32>
    %564 = arith.mulf %551, %563 : vector<8x128xf32>
    %565 = arith.addf %560, %564 : vector<8x128xf32>
    %566 = math.tanh %565 : vector<8x128xf32>
    %567 = arith.subf %473, %566 : vector<8x128xf32>
    %568 = arith.mulf %559, %567 : vector<8x128xf32>
    %569 = arith.addf %566, %568 : vector<8x128xf32>
    %570 = arith.truncf %569 : vector<8x128xf32> to vector<8x128xbf16>
    %cst_113 = arith.constant dense<0.000000e+00> : vector<8x384xf32>
    %571 = tpu.matmul %570, %19, %cst_113 {dimension_numbers = #tpu.dot_dimension_numbers<[1], [0], [0], [1], [0, 0, 1, 1], [], []>} : vector<8x128xbf16>, vector<128x384xbf16>, vector<8x384xf32> -> vector<8x384xf32>
    %572 = vector.broadcast %20 : vector<1x384xf32> to vector<8x384xf32>
    %573 = arith.addf %571, %572 : vector<8x384xf32>
    %574 = arith.truncf %505 : vector<8x128xf32> to vector<8x128xbf16>
    %cst_114 = arith.constant dense<0.000000e+00> : vector<8x384xf32>
    %575 = tpu.matmul %574, %21, %cst_114 {dimension_numbers = #tpu.dot_dimension_numbers<[1], [0], [0], [1], [0, 0, 1, 1], [], []>} : vector<8x128xbf16>, vector<128x384xbf16>, vector<8x384xf32> -> vector<8x384xf32>
    %576 = vector.extract_strided_slice %573 {offsets = [0, 0], sizes = [8, 128], strides = [1, 1]} : vector<8x384xf32> to vector<8x128xf32>
    %577 = vector.extract_strided_slice %575 {offsets = [0, 0], sizes = [8, 128], strides = [1, 1]} : vector<8x384xf32> to vector<8x128xf32>
    %578 = arith.addf %576, %577 : vector<8x128xf32>
    %579 = arith.negf %578 : vector<8x128xf32>
    %580 = math.exp %579 : vector<8x128xf32>
    %cst_115 = arith.constant 1.000000e+00 : f32
    %581 = vector.broadcast %cst_115 : f32 to vector<8x128xf32>
    %582 = arith.addf %581, %580 : vector<8x128xf32>
    %583 = arith.divf %581, %582 : vector<8x128xf32>
    %584 = vector.extract_strided_slice %573 {offsets = [0, 128], sizes = [8, 128], strides = [1, 1]} : vector<8x384xf32> to vector<8x128xf32>
    %585 = vector.extract_strided_slice %575 {offsets = [0, 128], sizes = [8, 128], strides = [1, 1]} : vector<8x384xf32> to vector<8x128xf32>
    %586 = arith.addf %584, %585 : vector<8x128xf32>
    %587 = arith.negf %586 : vector<8x128xf32>
    %588 = math.exp %587 : vector<8x128xf32>
    %cst_116 = arith.constant 1.000000e+00 : f32
    %589 = vector.broadcast %cst_116 : f32 to vector<8x128xf32>
    %590 = arith.addf %589, %588 : vector<8x128xf32>
    %591 = arith.divf %589, %590 : vector<8x128xf32>
    %592 = vector.extract_strided_slice %573 {offsets = [0, 256], sizes = [8, 128], strides = [1, 1]} : vector<8x384xf32> to vector<8x128xf32>
    %593 = vector.extract_strided_slice %575 {offsets = [0, 256], sizes = [8, 128], strides = [1, 1]} : vector<8x384xf32> to vector<8x128xf32>
    %594 = vector.broadcast %22 : vector<1x128xf32> to vector<8x128xf32>
    %595 = arith.addf %593, %594 : vector<8x128xf32>
    %596 = arith.mulf %583, %595 : vector<8x128xf32>
    %597 = arith.addf %592, %596 : vector<8x128xf32>
    %598 = math.tanh %597 : vector<8x128xf32>
    %599 = arith.subf %505, %598 : vector<8x128xf32>
    %600 = arith.mulf %591, %599 : vector<8x128xf32>
    %601 = arith.addf %598, %600 : vector<8x128xf32>
    %602 = arith.addf %506, %601 : vector<8x128xf32>
    %c6_i32 = arith.constant 6 : i32
    %603 = arith.index_cast %c6_i32 : i32 to index
    %c0_117 = arith.constant 0 : index
    %c0_118 = arith.constant 0 : index
    %604 = vector.load %arg22[%603, %c0_117, %c0_118] : memref<8x8x384xf32, #tpu.memory_space<vmem>>, vector<1x8x384xf32>
    %605 = vector.shape_cast %604 : vector<1x8x384xf32> to vector<8x384xf32>
    %606 = arith.truncf %537 : vector<8x128xf32> to vector<8x128xbf16>
    %cst_119 = arith.constant dense<0.000000e+00> : vector<8x384xf32>
    %607 = tpu.matmul %606, %13, %cst_119 {dimension_numbers = #tpu.dot_dimension_numbers<[1], [0], [0], [1], [0, 0, 1, 1], [], []>} : vector<8x128xbf16>, vector<128x384xbf16>, vector<8x384xf32> -> vector<8x384xf32>
    %608 = vector.extract_strided_slice %605 {offsets = [0, 0], sizes = [8, 128], strides = [1, 1]} : vector<8x384xf32> to vector<8x128xf32>
    %609 = vector.extract_strided_slice %607 {offsets = [0, 0], sizes = [8, 128], strides = [1, 1]} : vector<8x384xf32> to vector<8x128xf32>
    %610 = arith.addf %608, %609 : vector<8x128xf32>
    %611 = arith.negf %610 : vector<8x128xf32>
    %612 = math.exp %611 : vector<8x128xf32>
    %cst_120 = arith.constant 1.000000e+00 : f32
    %613 = vector.broadcast %cst_120 : f32 to vector<8x128xf32>
    %614 = arith.addf %613, %612 : vector<8x128xf32>
    %615 = arith.divf %613, %614 : vector<8x128xf32>
    %616 = vector.extract_strided_slice %605 {offsets = [0, 128], sizes = [8, 128], strides = [1, 1]} : vector<8x384xf32> to vector<8x128xf32>
    %617 = vector.extract_strided_slice %607 {offsets = [0, 128], sizes = [8, 128], strides = [1, 1]} : vector<8x384xf32> to vector<8x128xf32>
    %618 = arith.addf %616, %617 : vector<8x128xf32>
    %619 = arith.negf %618 : vector<8x128xf32>
    %620 = math.exp %619 : vector<8x128xf32>
    %cst_121 = arith.constant 1.000000e+00 : f32
    %621 = vector.broadcast %cst_121 : f32 to vector<8x128xf32>
    %622 = arith.addf %621, %620 : vector<8x128xf32>
    %623 = arith.divf %621, %622 : vector<8x128xf32>
    %624 = vector.extract_strided_slice %605 {offsets = [0, 256], sizes = [8, 128], strides = [1, 1]} : vector<8x384xf32> to vector<8x128xf32>
    %625 = vector.extract_strided_slice %607 {offsets = [0, 256], sizes = [8, 128], strides = [1, 1]} : vector<8x384xf32> to vector<8x128xf32>
    %626 = vector.broadcast %14 : vector<1x128xf32> to vector<8x128xf32>
    %627 = arith.addf %625, %626 : vector<8x128xf32>
    %628 = arith.mulf %615, %627 : vector<8x128xf32>
    %629 = arith.addf %624, %628 : vector<8x128xf32>
    %630 = math.tanh %629 : vector<8x128xf32>
    %631 = arith.subf %537, %630 : vector<8x128xf32>
    %632 = arith.mulf %623, %631 : vector<8x128xf32>
    %633 = arith.addf %630, %632 : vector<8x128xf32>
    %634 = arith.truncf %633 : vector<8x128xf32> to vector<8x128xbf16>
    %cst_122 = arith.constant dense<0.000000e+00> : vector<8x384xf32>
    %635 = tpu.matmul %634, %15, %cst_122 {dimension_numbers = #tpu.dot_dimension_numbers<[1], [0], [0], [1], [0, 0, 1, 1], [], []>} : vector<8x128xbf16>, vector<128x384xbf16>, vector<8x384xf32> -> vector<8x384xf32>
    %636 = vector.broadcast %16 : vector<1x384xf32> to vector<8x384xf32>
    %637 = arith.addf %635, %636 : vector<8x384xf32>
    %638 = arith.truncf %569 : vector<8x128xf32> to vector<8x128xbf16>
    %cst_123 = arith.constant dense<0.000000e+00> : vector<8x384xf32>
    %639 = tpu.matmul %638, %17, %cst_123 {dimension_numbers = #tpu.dot_dimension_numbers<[1], [0], [0], [1], [0, 0, 1, 1], [], []>} : vector<8x128xbf16>, vector<128x384xbf16>, vector<8x384xf32> -> vector<8x384xf32>
    %640 = vector.extract_strided_slice %637 {offsets = [0, 0], sizes = [8, 128], strides = [1, 1]} : vector<8x384xf32> to vector<8x128xf32>
    %641 = vector.extract_strided_slice %639 {offsets = [0, 0], sizes = [8, 128], strides = [1, 1]} : vector<8x384xf32> to vector<8x128xf32>
    %642 = arith.addf %640, %641 : vector<8x128xf32>
    %643 = arith.negf %642 : vector<8x128xf32>
    %644 = math.exp %643 : vector<8x128xf32>
    %cst_124 = arith.constant 1.000000e+00 : f32
    %645 = vector.broadcast %cst_124 : f32 to vector<8x128xf32>
    %646 = arith.addf %645, %644 : vector<8x128xf32>
    %647 = arith.divf %645, %646 : vector<8x128xf32>
    %648 = vector.extract_strided_slice %637 {offsets = [0, 128], sizes = [8, 128], strides = [1, 1]} : vector<8x384xf32> to vector<8x128xf32>
    %649 = vector.extract_strided_slice %639 {offsets = [0, 128], sizes = [8, 128], strides = [1, 1]} : vector<8x384xf32> to vector<8x128xf32>
    %650 = arith.addf %648, %649 : vector<8x128xf32>
    %651 = arith.negf %650 : vector<8x128xf32>
    %652 = math.exp %651 : vector<8x128xf32>
    %cst_125 = arith.constant 1.000000e+00 : f32
    %653 = vector.broadcast %cst_125 : f32 to vector<8x128xf32>
    %654 = arith.addf %653, %652 : vector<8x128xf32>
    %655 = arith.divf %653, %654 : vector<8x128xf32>
    %656 = vector.extract_strided_slice %637 {offsets = [0, 256], sizes = [8, 128], strides = [1, 1]} : vector<8x384xf32> to vector<8x128xf32>
    %657 = vector.extract_strided_slice %639 {offsets = [0, 256], sizes = [8, 128], strides = [1, 1]} : vector<8x384xf32> to vector<8x128xf32>
    %658 = vector.broadcast %18 : vector<1x128xf32> to vector<8x128xf32>
    %659 = arith.addf %657, %658 : vector<8x128xf32>
    %660 = arith.mulf %647, %659 : vector<8x128xf32>
    %661 = arith.addf %656, %660 : vector<8x128xf32>
    %662 = math.tanh %661 : vector<8x128xf32>
    %663 = arith.subf %569, %662 : vector<8x128xf32>
    %664 = arith.mulf %655, %663 : vector<8x128xf32>
    %665 = arith.addf %662, %664 : vector<8x128xf32>
    %666 = arith.truncf %665 : vector<8x128xf32> to vector<8x128xbf16>
    %cst_126 = arith.constant dense<0.000000e+00> : vector<8x384xf32>
    %667 = tpu.matmul %666, %19, %cst_126 {dimension_numbers = #tpu.dot_dimension_numbers<[1], [0], [0], [1], [0, 0, 1, 1], [], []>} : vector<8x128xbf16>, vector<128x384xbf16>, vector<8x384xf32> -> vector<8x384xf32>
    %668 = vector.broadcast %20 : vector<1x384xf32> to vector<8x384xf32>
    %669 = arith.addf %667, %668 : vector<8x384xf32>
    %670 = arith.truncf %601 : vector<8x128xf32> to vector<8x128xbf16>
    %cst_127 = arith.constant dense<0.000000e+00> : vector<8x384xf32>
    %671 = tpu.matmul %670, %21, %cst_127 {dimension_numbers = #tpu.dot_dimension_numbers<[1], [0], [0], [1], [0, 0, 1, 1], [], []>} : vector<8x128xbf16>, vector<128x384xbf16>, vector<8x384xf32> -> vector<8x384xf32>
    %672 = vector.extract_strided_slice %669 {offsets = [0, 0], sizes = [8, 128], strides = [1, 1]} : vector<8x384xf32> to vector<8x128xf32>
    %673 = vector.extract_strided_slice %671 {offsets = [0, 0], sizes = [8, 128], strides = [1, 1]} : vector<8x384xf32> to vector<8x128xf32>
    %674 = arith.addf %672, %673 : vector<8x128xf32>
    %675 = arith.negf %674 : vector<8x128xf32>
    %676 = math.exp %675 : vector<8x128xf32>
    %cst_128 = arith.constant 1.000000e+00 : f32
    %677 = vector.broadcast %cst_128 : f32 to vector<8x128xf32>
    %678 = arith.addf %677, %676 : vector<8x128xf32>
    %679 = arith.divf %677, %678 : vector<8x128xf32>
    %680 = vector.extract_strided_slice %669 {offsets = [0, 128], sizes = [8, 128], strides = [1, 1]} : vector<8x384xf32> to vector<8x128xf32>
    %681 = vector.extract_strided_slice %671 {offsets = [0, 128], sizes = [8, 128], strides = [1, 1]} : vector<8x384xf32> to vector<8x128xf32>
    %682 = arith.addf %680, %681 : vector<8x128xf32>
    %683 = arith.negf %682 : vector<8x128xf32>
    %684 = math.exp %683 : vector<8x128xf32>
    %cst_129 = arith.constant 1.000000e+00 : f32
    %685 = vector.broadcast %cst_129 : f32 to vector<8x128xf32>
    %686 = arith.addf %685, %684 : vector<8x128xf32>
    %687 = arith.divf %685, %686 : vector<8x128xf32>
    %688 = vector.extract_strided_slice %669 {offsets = [0, 256], sizes = [8, 128], strides = [1, 1]} : vector<8x384xf32> to vector<8x128xf32>
    %689 = vector.extract_strided_slice %671 {offsets = [0, 256], sizes = [8, 128], strides = [1, 1]} : vector<8x384xf32> to vector<8x128xf32>
    %690 = vector.broadcast %22 : vector<1x128xf32> to vector<8x128xf32>
    %691 = arith.addf %689, %690 : vector<8x128xf32>
    %692 = arith.mulf %679, %691 : vector<8x128xf32>
    %693 = arith.addf %688, %692 : vector<8x128xf32>
    %694 = math.tanh %693 : vector<8x128xf32>
    %695 = arith.subf %601, %694 : vector<8x128xf32>
    %696 = arith.mulf %687, %695 : vector<8x128xf32>
    %697 = arith.addf %694, %696 : vector<8x128xf32>
    %698 = arith.addf %602, %697 : vector<8x128xf32>
    %c7_i32 = arith.constant 7 : i32
    %699 = arith.index_cast %c7_i32 : i32 to index
    %c0_130 = arith.constant 0 : index
    %c0_131 = arith.constant 0 : index
    %700 = vector.load %arg22[%699, %c0_130, %c0_131] : memref<8x8x384xf32, #tpu.memory_space<vmem>>, vector<1x8x384xf32>
    %701 = vector.shape_cast %700 : vector<1x8x384xf32> to vector<8x384xf32>
    %702 = arith.truncf %633 : vector<8x128xf32> to vector<8x128xbf16>
    %cst_132 = arith.constant dense<0.000000e+00> : vector<8x384xf32>
    %703 = tpu.matmul %702, %13, %cst_132 {dimension_numbers = #tpu.dot_dimension_numbers<[1], [0], [0], [1], [0, 0, 1, 1], [], []>} : vector<8x128xbf16>, vector<128x384xbf16>, vector<8x384xf32> -> vector<8x384xf32>
    %704 = vector.extract_strided_slice %701 {offsets = [0, 0], sizes = [8, 128], strides = [1, 1]} : vector<8x384xf32> to vector<8x128xf32>
    %705 = vector.extract_strided_slice %703 {offsets = [0, 0], sizes = [8, 128], strides = [1, 1]} : vector<8x384xf32> to vector<8x128xf32>
    %706 = arith.addf %704, %705 : vector<8x128xf32>
    %707 = arith.negf %706 : vector<8x128xf32>
    %708 = math.exp %707 : vector<8x128xf32>
    %cst_133 = arith.constant 1.000000e+00 : f32
    %709 = vector.broadcast %cst_133 : f32 to vector<8x128xf32>
    %710 = arith.addf %709, %708 : vector<8x128xf32>
    %711 = arith.divf %709, %710 : vector<8x128xf32>
    %712 = vector.extract_strided_slice %701 {offsets = [0, 128], sizes = [8, 128], strides = [1, 1]} : vector<8x384xf32> to vector<8x128xf32>
    %713 = vector.extract_strided_slice %703 {offsets = [0, 128], sizes = [8, 128], strides = [1, 1]} : vector<8x384xf32> to vector<8x128xf32>
    %714 = arith.addf %712, %713 : vector<8x128xf32>
    %715 = arith.negf %714 : vector<8x128xf32>
    %716 = math.exp %715 : vector<8x128xf32>
    %cst_134 = arith.constant 1.000000e+00 : f32
    %717 = vector.broadcast %cst_134 : f32 to vector<8x128xf32>
    %718 = arith.addf %717, %716 : vector<8x128xf32>
    %719 = arith.divf %717, %718 : vector<8x128xf32>
    %720 = vector.extract_strided_slice %701 {offsets = [0, 256], sizes = [8, 128], strides = [1, 1]} : vector<8x384xf32> to vector<8x128xf32>
    %721 = vector.extract_strided_slice %703 {offsets = [0, 256], sizes = [8, 128], strides = [1, 1]} : vector<8x384xf32> to vector<8x128xf32>
    %722 = vector.broadcast %14 : vector<1x128xf32> to vector<8x128xf32>
    %723 = arith.addf %721, %722 : vector<8x128xf32>
    %724 = arith.mulf %711, %723 : vector<8x128xf32>
    %725 = arith.addf %720, %724 : vector<8x128xf32>
    %726 = math.tanh %725 : vector<8x128xf32>
    %727 = arith.subf %633, %726 : vector<8x128xf32>
    %728 = arith.mulf %719, %727 : vector<8x128xf32>
    %729 = arith.addf %726, %728 : vector<8x128xf32>
    %730 = arith.truncf %729 : vector<8x128xf32> to vector<8x128xbf16>
    %cst_135 = arith.constant dense<0.000000e+00> : vector<8x384xf32>
    %731 = tpu.matmul %730, %15, %cst_135 {dimension_numbers = #tpu.dot_dimension_numbers<[1], [0], [0], [1], [0, 0, 1, 1], [], []>} : vector<8x128xbf16>, vector<128x384xbf16>, vector<8x384xf32> -> vector<8x384xf32>
    %732 = vector.broadcast %16 : vector<1x384xf32> to vector<8x384xf32>
    %733 = arith.addf %731, %732 : vector<8x384xf32>
    %734 = arith.truncf %665 : vector<8x128xf32> to vector<8x128xbf16>
    %cst_136 = arith.constant dense<0.000000e+00> : vector<8x384xf32>
    %735 = tpu.matmul %734, %17, %cst_136 {dimension_numbers = #tpu.dot_dimension_numbers<[1], [0], [0], [1], [0, 0, 1, 1], [], []>} : vector<8x128xbf16>, vector<128x384xbf16>, vector<8x384xf32> -> vector<8x384xf32>
    %736 = vector.extract_strided_slice %733 {offsets = [0, 0], sizes = [8, 128], strides = [1, 1]} : vector<8x384xf32> to vector<8x128xf32>
    %737 = vector.extract_strided_slice %735 {offsets = [0, 0], sizes = [8, 128], strides = [1, 1]} : vector<8x384xf32> to vector<8x128xf32>
    %738 = arith.addf %736, %737 : vector<8x128xf32>
    %739 = arith.negf %738 : vector<8x128xf32>
    %740 = math.exp %739 : vector<8x128xf32>
    %cst_137 = arith.constant 1.000000e+00 : f32
    %741 = vector.broadcast %cst_137 : f32 to vector<8x128xf32>
    %742 = arith.addf %741, %740 : vector<8x128xf32>
    %743 = arith.divf %741, %742 : vector<8x128xf32>
    %744 = vector.extract_strided_slice %733 {offsets = [0, 128], sizes = [8, 128], strides = [1, 1]} : vector<8x384xf32> to vector<8x128xf32>
    %745 = vector.extract_strided_slice %735 {offsets = [0, 128], sizes = [8, 128], strides = [1, 1]} : vector<8x384xf32> to vector<8x128xf32>
    %746 = arith.addf %744, %745 : vector<8x128xf32>
    %747 = arith.negf %746 : vector<8x128xf32>
    %748 = math.exp %747 : vector<8x128xf32>
    %cst_138 = arith.constant 1.000000e+00 : f32
    %749 = vector.broadcast %cst_138 : f32 to vector<8x128xf32>
    %750 = arith.addf %749, %748 : vector<8x128xf32>
    %751 = arith.divf %749, %750 : vector<8x128xf32>
    %752 = vector.extract_strided_slice %733 {offsets = [0, 256], sizes = [8, 128], strides = [1, 1]} : vector<8x384xf32> to vector<8x128xf32>
    %753 = vector.extract_strided_slice %735 {offsets = [0, 256], sizes = [8, 128], strides = [1, 1]} : vector<8x384xf32> to vector<8x128xf32>
    %754 = vector.broadcast %18 : vector<1x128xf32> to vector<8x128xf32>
    %755 = arith.addf %753, %754 : vector<8x128xf32>
    %756 = arith.mulf %743, %755 : vector<8x128xf32>
    %757 = arith.addf %752, %756 : vector<8x128xf32>
    %758 = math.tanh %757 : vector<8x128xf32>
    %759 = arith.subf %665, %758 : vector<8x128xf32>
    %760 = arith.mulf %751, %759 : vector<8x128xf32>
    %761 = arith.addf %758, %760 : vector<8x128xf32>
    %762 = arith.truncf %761 : vector<8x128xf32> to vector<8x128xbf16>
    %cst_139 = arith.constant dense<0.000000e+00> : vector<8x384xf32>
    %763 = tpu.matmul %762, %19, %cst_139 {dimension_numbers = #tpu.dot_dimension_numbers<[1], [0], [0], [1], [0, 0, 1, 1], [], []>} : vector<8x128xbf16>, vector<128x384xbf16>, vector<8x384xf32> -> vector<8x384xf32>
    %764 = vector.broadcast %20 : vector<1x384xf32> to vector<8x384xf32>
    %765 = arith.addf %763, %764 : vector<8x384xf32>
    %766 = arith.truncf %697 : vector<8x128xf32> to vector<8x128xbf16>
    %cst_140 = arith.constant dense<0.000000e+00> : vector<8x384xf32>
    %767 = tpu.matmul %766, %21, %cst_140 {dimension_numbers = #tpu.dot_dimension_numbers<[1], [0], [0], [1], [0, 0, 1, 1], [], []>} : vector<8x128xbf16>, vector<128x384xbf16>, vector<8x384xf32> -> vector<8x384xf32>
    %768 = vector.extract_strided_slice %765 {offsets = [0, 0], sizes = [8, 128], strides = [1, 1]} : vector<8x384xf32> to vector<8x128xf32>
    %769 = vector.extract_strided_slice %767 {offsets = [0, 0], sizes = [8, 128], strides = [1, 1]} : vector<8x384xf32> to vector<8x128xf32>
    %770 = arith.addf %768, %769 : vector<8x128xf32>
    %771 = arith.negf %770 : vector<8x128xf32>
    %772 = math.exp %771 : vector<8x128xf32>
    %cst_141 = arith.constant 1.000000e+00 : f32
    %773 = vector.broadcast %cst_141 : f32 to vector<8x128xf32>
    %774 = arith.addf %773, %772 : vector<8x128xf32>
    %775 = arith.divf %773, %774 : vector<8x128xf32>
    %776 = vector.extract_strided_slice %765 {offsets = [0, 128], sizes = [8, 128], strides = [1, 1]} : vector<8x384xf32> to vector<8x128xf32>
    %777 = vector.extract_strided_slice %767 {offsets = [0, 128], sizes = [8, 128], strides = [1, 1]} : vector<8x384xf32> to vector<8x128xf32>
    %778 = arith.addf %776, %777 : vector<8x128xf32>
    %779 = arith.negf %778 : vector<8x128xf32>
    %780 = math.exp %779 : vector<8x128xf32>
    %cst_142 = arith.constant 1.000000e+00 : f32
    %781 = vector.broadcast %cst_142 : f32 to vector<8x128xf32>
    %782 = arith.addf %781, %780 : vector<8x128xf32>
    %783 = arith.divf %781, %782 : vector<8x128xf32>
    %784 = vector.extract_strided_slice %765 {offsets = [0, 256], sizes = [8, 128], strides = [1, 1]} : vector<8x384xf32> to vector<8x128xf32>
    %785 = vector.extract_strided_slice %767 {offsets = [0, 256], sizes = [8, 128], strides = [1, 1]} : vector<8x384xf32> to vector<8x128xf32>
    %786 = vector.broadcast %22 : vector<1x128xf32> to vector<8x128xf32>
    %787 = arith.addf %785, %786 : vector<8x128xf32>
    %788 = arith.mulf %775, %787 : vector<8x128xf32>
    %789 = arith.addf %784, %788 : vector<8x128xf32>
    %790 = math.tanh %789 : vector<8x128xf32>
    %791 = arith.subf %697, %790 : vector<8x128xf32>
    %792 = arith.mulf %783, %791 : vector<8x128xf32>
    %793 = arith.addf %790, %792 : vector<8x128xf32>
    %794 = arith.addf %698, %793 : vector<8x128xf32>
    %c8_i32 = arith.constant 8 : i32
    %c0_143 = arith.constant 0 : index
    %c0_144 = arith.constant 0 : index
    %795 = vector.load %arg23[%c0_143, %c0_144] : memref<8x128xf32, #tpu.memory_space<vmem>>, vector<8x128xf32>
    tpu.vector_store %arg23[%c0_143, %c0_144], %729 {strides = array<i32>} : memref<8x128xf32, #tpu.memory_space<vmem>>, vector<8x128xf32>,
    %c0_145 = arith.constant 0 : index
    %c0_146 = arith.constant 0 : index
    %796 = vector.load %arg24[%c0_145, %c0_146] : memref<8x128xf32, #tpu.memory_space<vmem>>, vector<8x128xf32>
    tpu.vector_store %arg24[%c0_145, %c0_146], %761 {strides = array<i32>} : memref<8x128xf32, #tpu.memory_space<vmem>>, vector<8x128xf32>,
    %c0_147 = arith.constant 0 : index
    %c0_148 = arith.constant 0 : index
    %797 = vector.load %arg25[%c0_147, %c0_148] : memref<8x128xf32, #tpu.memory_space<vmem>>, vector<8x128xf32>
    tpu.vector_store %arg25[%c0_147, %c0_148], %793 {strides = array<i32>} : memref<8x128xf32, #tpu.memory_space<vmem>>, vector<8x128xf32>,
    %c0_149 = arith.constant 0 : index
    %c0_150 = arith.constant 0 : index
    %798 = vector.load %arg26[%c0_149, %c0_150] : memref<8x128xf32, #tpu.memory_space<vmem>>, vector<8x128xf32>
    tpu.vector_store %arg26[%c0_149, %c0_150], %794 {strides = array<i32>} : memref<8x128xf32, #tpu.memory_space<vmem>>, vector<8x128xf32>,
    %c1_i32_151 = arith.constant 1 : i32
    %799 = arith.cmpi eq, %arg1, %c1_i32_151 : i32
    %800 = arith.extui %799 : i1 to i32
    %c0_i32_152 = arith.constant 0 : i32
    %801 = arith.cmpi ne, %800, %c0_i32_152 : i32
    scf.if %801 {
      %cst_153 = arith.constant 6.250000e-02 : f32
      %802 = vector.broadcast %cst_153 : f32 to vector<8x128xf32>
      %803 = arith.mulf %794, %802 : vector<8x128xf32>
      %c0_154 = arith.constant 0 : index
      %c0_155 = arith.constant 0 : index
      %804 = vector.load %arg15[%c0_154, %c0_155] : memref<128x512xf32, #tpu.memory_space<vmem>>, vector<128x512xf32>
      %cst_156 = arith.constant dense<0.000000e+00> : vector<8x512xf32>
      %805 = tpu.matmul %803, %804, %cst_156 {dimension_numbers = #tpu.dot_dimension_numbers<[1], [0], [0], [1], [0, 0, 1, 1], [], []>} : vector<8x128xf32>, vector<128x512xf32>, vector<8x512xf32> -> vector<8x512xf32>
      %c0_157 = arith.constant 0 : index
      %c0_158 = arith.constant 0 : index
      %806 = vector.load %arg16[%c0_157, %c0_158] : memref<1x512xf32, #tpu.memory_space<vmem>>, vector<1x512xf32>
      %807 = vector.broadcast %806 : vector<1x512xf32> to vector<8x512xf32>
      %808 = arith.addf %805, %807 : vector<8x512xf32>
      %cst_159 = arith.constant 0.000000e+00 : f32
      %809 = vector.broadcast %cst_159 : f32 to vector<8x512xf32>
      %810 = arith.maximumf %808, %809 : vector<8x512xf32>
      %c0_160 = arith.constant 0 : index
      %c0_161 = arith.constant 0 : index
      %811 = vector.load %arg17[%c0_160, %c0_161] : memref<512x256xf32, #tpu.memory_space<vmem>>, vector<512x256xf32>
      %cst_162 = arith.constant dense<0.000000e+00> : vector<8x256xf32>
      %812 = tpu.matmul %810, %811, %cst_162 {dimension_numbers = #tpu.dot_dimension_numbers<[1], [0], [0], [1], [0, 0, 1, 1], [], []>} : vector<8x512xf32>, vector<512x256xf32>, vector<8x256xf32> -> vector<8x256xf32>
      %c0_163 = arith.constant 0 : index
      %c0_164 = arith.constant 0 : index
      %813 = vector.load %arg18[%c0_163, %c0_164] : memref<1x256xf32, #tpu.memory_space<vmem>>, vector<1x256xf32>
      %814 = vector.broadcast %813 : vector<1x256xf32> to vector<8x256xf32>
      %815 = arith.addf %812, %814 : vector<8x256xf32>
      %cst_165 = arith.constant 0.000000e+00 : f32
      %816 = vector.broadcast %cst_165 : f32 to vector<8x256xf32>
      %817 = arith.maximumf %815, %816 : vector<8x256xf32>
      %c0_166 = arith.constant 0 : index
      %c0_167 = arith.constant 0 : index
      %818 = vector.load %arg19[%c0_166, %c0_167] : memref<256x1xf32, #tpu.memory_space<vmem>>, vector<256x1xf32>
      %cst_168 = arith.constant dense<0.000000e+00> : vector<8x1xf32>
      %819 = tpu.matmul %817, %818, %cst_168 {dimension_numbers = #tpu.dot_dimension_numbers<[1], [0], [0], [1], [0, 0, 1, 1], [], []>} : vector<8x256xf32>, vector<256x1xf32>, vector<8x1xf32> -> vector<8x1xf32>
      %c0_169 = arith.constant 0 : index
      %c0_170 = arith.constant 0 : index
      %820 = vector.load %arg20[%c0_169, %c0_170] : memref<1x1xf32, #tpu.memory_space<vmem>>, vector<1x1xf32>
      %821 = vector.broadcast %820 : vector<1x1xf32> to vector<8x1xf32>
      %822 = arith.addf %819, %821 : vector<8x1xf32>
      %c0_171 = arith.constant 0 : index
      %c0_172 = arith.constant 0 : index
      %823 = vector.load %arg21[%c0_171, %c0_172] : memref<8x1xf32, #tpu.memory_space<vmem>>, vector<8x1xf32>
      tpu.vector_store %arg21[%c0_171, %c0_172], %822 {strides = array<i32>} : memref<8x1xf32, #tpu.memory_space<vmem>>, vector<8x1xf32>,
    } else {
    }
    return
  }
  func.func @transform_0(%arg0: i32, %arg1: i32) -> (i32, i32, i32) {
    %c0_i32 = arith.constant 0 : i32
    %c0_i32_0 = arith.constant 0 : i32
    return %arg1, %arg0, %c0_i32 : i32, i32, i32
  }
  func.func @transform_1(%arg0: i32, %arg1: i32) -> (i32, i32) {
    %c0_i32 = arith.constant 0 : i32
    %c0_i32_0 = arith.constant 0 : i32
    %c0_i32_1 = arith.constant 0 : i32
    return %c0_i32, %c0_i32_0 : i32, i32
  }
  func.func @transform_2(%arg0: i32, %arg1: i32) -> (i32, i32) {
    %c0_i32 = arith.constant 0 : i32
    %c0_i32_0 = arith.constant 0 : i32
    %c0_i32_1 = arith.constant 0 : i32
    return %c0_i32, %c0_i32_0 : i32, i32
  }
  func.func @transform_3(%arg0: i32, %arg1: i32) -> (i32, i32) {
    %c0_i32 = arith.constant 0 : i32
    %c0_i32_0 = arith.constant 0 : i32
    %c0_i32_1 = arith.constant 0 : i32
    return %c0_i32, %c0_i32_0 : i32, i32
  }
  func.func @transform_4(%arg0: i32, %arg1: i32) -> (i32, i32) {
    %c0_i32 = arith.constant 0 : i32
    %c0_i32_0 = arith.constant 0 : i32
    %c0_i32_1 = arith.constant 0 : i32
    return %c0_i32, %c0_i32_0 : i32, i32
  }
  func.func @transform_5(%arg0: i32, %arg1: i32) -> (i32, i32) {
    %c0_i32 = arith.constant 0 : i32
    %c0_i32_0 = arith.constant 0 : i32
    %c0_i32_1 = arith.constant 0 : i32
    return %c0_i32, %c0_i32_0 : i32, i32
  }
  func.func @transform_6(%arg0: i32, %arg1: i32) -> (i32, i32) {
    %c0_i32 = arith.constant 0 : i32
    %c0_i32_0 = arith.constant 0 : i32
    %c0_i32_1 = arith.constant 0 : i32
    return %c0_i32, %c0_i32_0 : i32, i32
  }
  func.func @transform_7(%arg0: i32, %arg1: i32) -> (i32, i32) {
    %c0_i32 = arith.constant 0 : i32
    %c0_i32_0 = arith.constant 0 : i32
    %c0_i32_1 = arith.constant 0 : i32
    return %c0_i32, %c0_i32_0 : i32, i32
  }
  func.func @transform_8(%arg0: i32, %arg1: i32) -> (i32, i32) {
    %c0_i32 = arith.constant 0 : i32
    %c0_i32_0 = arith.constant 0 : i32
    %c0_i32_1 = arith.constant 0 : i32
    return %c0_i32, %c0_i32_0 : i32, i32
  }
  func.func @transform_9(%arg0: i32, %arg1: i32) -> (i32, i32) {
    %c0_i32 = arith.constant 0 : i32
    %c0_i32_0 = arith.constant 0 : i32
    %c0_i32_1 = arith.constant 0 : i32
    return %c0_i32, %c0_i32_0 : i32, i32
  }
  func.func @transform_10(%arg0: i32, %arg1: i32) -> (i32, i32) {
    %c0_i32 = arith.constant 0 : i32
    %c0_i32_0 = arith.constant 0 : i32
    %c0_i32_1 = arith.constant 0 : i32
    return %c0_i32, %c0_i32_0 : i32, i32
  }
  func.func @transform_11(%arg0: i32, %arg1: i32) -> (i32, i32) {
    %c0_i32 = arith.constant 0 : i32
    %c0_i32_0 = arith.constant 0 : i32
    %c0_i32_1 = arith.constant 0 : i32
    return %c0_i32, %c0_i32_0 : i32, i32
  }
  func.func @transform_12(%arg0: i32, %arg1: i32) -> (i32, i32) {
    %c0_i32 = arith.constant 0 : i32
    %c0_i32_0 = arith.constant 0 : i32
    %c0_i32_1 = arith.constant 0 : i32
    return %c0_i32, %c0_i32_0 : i32, i32
  }
  func.func @transform_13(%arg0: i32, %arg1: i32) -> (i32, i32) {
    %c0_i32 = arith.constant 0 : i32
    %c0_i32_0 = arith.constant 0 : i32
    %c0_i32_1 = arith.constant 0 : i32
    return %c0_i32, %c0_i32_0 : i32, i32
  }
  func.func @transform_14(%arg0: i32, %arg1: i32) -> (i32, i32) {
    %c0_i32 = arith.constant 0 : i32
    %c0_i32_0 = arith.constant 0 : i32
    %c0_i32_1 = arith.constant 0 : i32
    return %c0_i32, %c0_i32_0 : i32, i32
  }
  func.func @transform_15(%arg0: i32, %arg1: i32) -> (i32, i32) {
    %c0_i32 = arith.constant 0 : i32
    %c0_i32_0 = arith.constant 0 : i32
    %c0_i32_1 = arith.constant 0 : i32
    return %c0_i32, %c0_i32_0 : i32, i32
  }
  func.func @transform_16(%arg0: i32, %arg1: i32) -> (i32, i32) {
    %c0_i32 = arith.constant 0 : i32
    %c0_i32_0 = arith.constant 0 : i32
    %c0_i32_1 = arith.constant 0 : i32
    return %c0_i32, %c0_i32_0 : i32, i32
  }
  func.func @transform_17(%arg0: i32, %arg1: i32) -> (i32, i32) {
    %c0_i32 = arith.constant 0 : i32
    %c0_i32_0 = arith.constant 0 : i32
    %c0_i32_1 = arith.constant 0 : i32
    return %c0_i32, %c0_i32_0 : i32, i32
  }
  func.func @transform_18(%arg0: i32, %arg1: i32) -> (i32, i32) {
    %c0_i32 = arith.constant 0 : i32
    %c0_i32_0 = arith.constant 0 : i32
    %c0_i32_1 = arith.constant 0 : i32
    return %c0_i32, %c0_i32_0 : i32, i32
  }
  func.func @transform_19(%arg0: i32, %arg1: i32) -> (i32, i32) {
    %c0_i32 = arith.constant 0 : i32
    %c0_i32_0 = arith.constant 0 : i32
    return %arg0, %c0_i32 : i32, i32
  }
}

</mosaic_0001>

<bundles_post_ra>
// kernel: gru_model.1
= control target key start
LH: loop header
LB: loop body
LE: loop exit
PB: predicated region body
PF: predicated region fallthrough
CT: control target
= control target key end

     0   :  { %s8912_s20 = smov 0   ;;  %s8914_s21 = smov 0   ;;  %s13920_s0 = inlined_call_operand.vmem [shape: f32[16,8,8], index: 0, kind: input, shape index: {}]   ;;  %s13921_s1 = inlined_call_operand.vmem [shape: bf16[8,384], index: 1, kind: input, shape index: {}]   ;;  %s13922_s2 = inlined_call_operand.vmem [shape: f32[1,384], index: 2, kind: input, shape index: {}]   ;;  %s13923_s3 = inlined_call_operand.vmem [shape: bf16[128,384], index: 3, kind: input, shape index: {}]   ;;  %s13924_s4 = inlined_call_operand.vmem [shape: f32[1,128], index: 4, kind: input, shape index: {}]   ;;  %s13925_s5 = inlined_call_operand.vmem [shape: bf16[128,384], index: 5, kind: input, shape index: {}]   ;;  %s13926_s6 = inlined_call_operand.vmem [shape: f32[1,384], index: 6, kind: input, shape index: {}]   ;;  %s13927_s7 = inlined_call_operand.vmem [shape: bf16[128,384], index: 7, kind: input, shape index: {}]   ;;  %s13928_s8 = inlined_call_operand.vmem [shape: f32[1,128], index: 8, kind: input, shape index: {}]   ;;  %s13929_s9 = inlined_call_operand.vmem [shape: bf16[128,384], index: 9, kind: input, shape index: {}]   ;;  %s13930_s10 = inlined_call_operand.vmem [shape: f32[1,384], index: 10, kind: input, shape index: {}]   ;;  %s13931_s11 = inlined_call_operand.vmem [shape: bf16[128,384], index: 11, kind: input, shape index: {}]   ;;  %s13932_s12 = inlined_call_operand.vmem [shape: f32[1,128], index: 12, kind: input, shape index: {}]   ;;  %s13933_s13 = inlined_call_operand.vmem [shape: f32[128,512], index: 13, kind: input, shape index: {}]   ;;  %s13934_s14 = inlined_call_operand.vmem [shape: f32[1,512], index: 14, kind: input, shape index: {}]   ;;  %s13935_s15 = inlined_call_operand.vmem [shape: f32[512,256], index: 15, kind: input, shape index: {}]   ;;  %s13936_s16 = inlined_call_operand.vmem [shape: f32[1,256], index: 16, kind: input, shape index: {}]   ;;  %s13937_s17 = inlined_call_operand.vmem [shape: f32[256,1], index: 17, kind: input, shape index: {}]   ;;  %s13938_s18 = inlined_call_operand.<no memory space> [shape: f32[1,1], index: 18, kind: input, shape index: {}]   ;;  %s13939_s19 = inlined_call_operand.vmem [shape: f32[8,1], index: 19, kind: output, shape index: {}]  }
   0x1   :  { %14228 = sst [smem:[#allocation105_spill]] %s13920_s0  ;;  %v24_v0 = vstv %s13938_s18 }
   0x2   :  { %14229 = sst [smem:[#allocation106_spill]] %s13921_s1  ;;  %25 = vst [vmem:[#allocation7] sm:$0x1] %v24_v0  ;;  %s8916_s1 = smov 0  }
   0x3   :  { %14230 = sst [smem:[#allocation107_spill]] %s13922_s2 }
   0x4   :  { %14231 = sst [smem:[#allocation108_spill]] %s13923_s3 }
   0x5 LB: > { %s40_s18 = sadd.s32 1, %s8798_s21  ;;  %p6230_p0 = scmp.ge.s32.totalorder %s8802_s1, 1  ;;  %s8802_s1 = sphi %s8916_s1, %s31_s1   ;;  %s8798_s21 = sphi %s8914_s21, %s14833_s21   ;;  %s8794_s20 = sphi %s8912_s20, %s14832_s20  }
   0x6   : > { %p41_p1 = scmp.ge.s32.totalorder %s40_s18, 2  ;;  %p557_p2 = scmp.lt.s32.totalorder %s8802_s1, 3 }
   0x8   : > { %s14835_s18 = smov (%p41_p1, %s40_s18), 0  ;;  %p558_p3 = pnand %p6230_p0, %p557_p2 }
   0xa   : > { %561 = sbr.rel (%p558_p3) target bundleno = 6023 (0x1787), region = 96 }
  0x11   : > { %s6231_s22 = sshll.u32 %s8794_s20, 3  ;;  %s14232_s25 = sld [smem:[#allocation105_spill]] }
  0x12   : > { %p616_p4 = scmp.lt.s32.totalorder %s6231_s22, 15  ;;  %p6233_p5 = scmp.ne.s32.totalorder %s8794_s20, 0 }
  0x13   : > { %v8804_v1 = vmov (!%p6233_p5), 0.0  }
  0x14   : > { %s14837_s22 = smov (!%p616_p4, %s6231_s22), 15  ;;  %632 = sbr.rel (%p6233_p5) target bundleno = 27 (0x1b), region = 100 }
  0x15   : > { %s6232_s2 = sshll.u32 %s14837_s22, 3  ;;  %633 = vst [vmem:[#allocation3] sm:$0xff] (!%p6233_p5), %v8804_v1  ;;  %634 = vst [vmem:[#allocation4] sm:$0xff] (!%p6233_p5), %v8804_v1 }
  0x16   : > { %635 = vst [vmem:[#allocation5] sm:$0xff] (!%p6233_p5), %v8804_v1  ;;  %636 = vst [vmem:[#allocation6] sm:$0xff] (!%p6233_p5), %v8804_v1 }
  0x17   : > { %s8936_s3 = scalar_lea.vmem %s14232_s25, %s6232_s2 }
  0x1b PF: > { %s14233_s28 = sld [smem:[#allocation106_spill]]  ;;  %vm689_vm0 = vcmask 1043456   ;;  %v637_v3 = vld [vmem:[%s8936_s3] sm:$0xff]  ;;  %v638_v4 = vld [vmem:[%s8936_s3 + $0x8] sm:$0xff]  ;;  %v13942_v7 = vmov 0   ;;  %s14234_s30 = sld [smem:[#allocation108_spill]] }
  0x1c   : > { %731 = vmatprep.mubr.bf16.mxu0 %v13942_v7  ;;  %v645_v8 = vpack.c.bf16 %v638_v4, %v637_v3  ;;  %vm676_vm1 = vcmask 64512   ;;  %v639_v14 = vld [vmem:[%s8936_s3 + $0x10] sm:$0xff]  ;;  %v640_v15 = vld [vmem:[%s8936_s3 + $0x18] sm:$0xff]  ;;  %v641_v22 = vld [vmem:[%s8936_s3 + $0x20] sm:$0xff]  ;;  %v13944_v24 = vmov 0.0   ;;  %vm8807_vm2 = vmmov 0  }
  0x1d   : > { %v646_v18 = vpack.c.bf16 %v640_v15, %v639_v14  ;;  %v642_v23 = vld [vmem:[%s8936_s3 + $0x28] sm:$0xff]  ;;  %v643_v29 = vld [vmem:[%s8936_s3 + $0x30] sm:$0xff]  ;;  %v644_v31 = vld [vmem:[%s8936_s3 + $0x38] sm:$0xff]  ;;  %s14237_s23 = sld [smem:[#allocation107_spill]]  ;;  %p6417_p6 = scmp.ne.s32.totalorder %s8794_s20, 1 }
  0x1e   : > { %6824 = vmatprep.mubr.msk.bf16.mxu1 %vm676_vm1, %v645_v8  ;;  %v647_v27 = vpack.c.bf16 %v642_v23, %v641_v22  ;;  %v648_v34 = vpack.c.bf16 %v644_v31, %v643_v29  ;;  %v9037_v43 = vld [vmem:[#allocation3] sm:$0xff]  ;;  %v9080_v50 = vld [vmem:[%s13925_s5 + $0x8] ss:$12 sps:$4 sm:$0xff]   ;;  %v9111_v55 = vld [vmem:[%s13925_s5 + $0x30] ss:$12 sps:$4 sm:$0xff]   ;;  %vm6163_vm3 = vcmask (!%p6417_p6), 7168  }
  0x1f   : > { %v1033_v45 = vpack.c.bf16 %v9037_v43, %v9037_v43  ;;  %v9069_v48 = vld [vmem:[%s13925_s5 + $0x4] ss:$12 sps:$4 sm:$0xff]   ;;  %v9074_v49 = vld [vmem:[%s13925_s5] ss:$12 sps:$4 sm:$0xff]   ;;  %v9085_v51 = vld [vmem:[%s13925_s5 + $0x1c] ss:$12 sps:$4 sm:$0xff]  }
  0x20   : > { %v9093_v52 = vld [vmem:[%s13925_s5 + $0x18] ss:$12 sps:$4 sm:$0xff]   ;;  %v9099_v53 = vld [vmem:[%s13925_s5 + $0x20] ss:$12 sps:$4 sm:$0xff]   ;;  %v9130_v58 = vld [vmem:[%s13925_s5 + $0x48] ss:$12 sps:$4 sm:$0xff]  }
  0x21   : > { %v649_v2 = vld [vmem:[%s14233_s28] sm:$0xff]  ;;  %v7991_v12 = vld [vmem:[%s14234_s30 + $0x1c] ss:$12 sps:$4 sm:$0xff]   ;;  %v7997_v20 = vld [vmem:[%s14234_s30 + $0x4c] ss:$12 sps:$4 sm:$0xff]  }
  0x22   : > { %v6235_v5 = vcombine.high %v649_v2, %v649_v2  ;;  %v6234_v6 = vcombine.low %v649_v2, %v649_v2  ;;  %v7988_v9 = vld [vmem:[%s14234_s30 + $0x4] ss:$12 sps:$4 sm:$0xff]   ;;  %v7990_v11 = vld [vmem:[%s14234_s30] ss:$12 sps:$4 sm:$0xff]   ;;  %v8003_v17 = vld [vmem:[%s14233_s28 + $0x8] ss:$0 sps:$4 sm:$0xff]  }
  0x23   : > { %v7993_v13 = vld [vmem:[%s14234_s30 + $0x18] ss:$12 sps:$4 sm:$0xff]   ;;  %v7994_v16 = vld [vmem:[%s14234_s30 + $0x34] ss:$12 sps:$4 sm:$0xff]   ;;  %v7996_v19 = vld [vmem:[%s14234_s30 + $0x30] ss:$12 sps:$4 sm:$0xff]   ;;  %7956 = vmatprep.subr.msk.bf16.mxu1 %vm689_vm0, %v8003_v17 }
  0x24   : > { %6237 = vmatprep.subr.msk.bf16.mxu0 %vm689_vm0, %v6235_v5  ;;  %v691_v10 = vsel %vm689_vm0, %v6234_v6, 0  ;;  %v697_v21 = vsel %vm689_vm0, %v8003_v17, 0  ;;  %v8010_v25 = vld [vmem:[%s14234_s30 + $0x8] ss:$12 sps:$4 sm:$0xff]   ;;  %v8000_v28 = vld [vmem:[%s14234_s30 + $0x64] ss:$12 sps:$4 sm:$0xff]  }
  0x25   : > { %700 = vmatpush1.bf16.msra.mxu0 %v691_v10  ;;  %6823 = vmatpush3.bf16.msra.mxu1 %v697_v21  ;;  %v7999_v26 = vld [vmem:[%s14234_s30 + $0x48] ss:$12 sps:$4 sm:$0xff]   ;;  %v8014_v30 = vld [vmem:[%s14234_s30 + $0x20] ss:$12 sps:$4 sm:$0xff]   ;;  %v8015_v35 = vld [vmem:[%s14234_s30 + $0x38] ss:$12 sps:$4 sm:$0xff]   ;;  %v653_v10 = vlaneseq }
  0x26   : > { %1162 = vmatprep.subr.bf16.mxu0 %v7988_v9  ;;  %6832 = vmatprep.subr.bf16.mxu1 %v13944_v24  ;;  %v8002_v32 = vld [vmem:[%s14234_s30 + $0x60] ss:$12 sps:$4 sm:$0xff]   ;;  %v8004_v33 = vld [vmem:[%s14234_s30 + $0x7c] ss:$12 sps:$4 sm:$0xff]   ;;  %v8006_v36 = vld [vmem:[%s14234_s30 + $0x78] ss:$12 sps:$4 sm:$0xff]  }
  0x27   : > { %v8007_v37 = vld [vmem:[%s14234_s30 + $0x94] ss:$12 sps:$4 sm:$0xff]   ;;  %v8016_v38 = vld [vmem:[%s14234_s30 + $0x50] ss:$12 sps:$4 sm:$0xff]   ;;  %v8011_v40 = vld [vmem:[%s14234_s30 + $0xac] ss:$12 sps:$4 sm:$0xff]  }
  0x28   : > { %6238 = vmatmul.mubr.msk.bf16.vlgmr.msra.gmra.mrb[0].mxu0 %vm676_vm1, %v645_v8  ;;  %6825 = vmatmul.mubr.msk.bf16.vlgmr.msra.gmra.mrb[0].mxu1 %vm676_vm1, %v646_v18  ;;  %v8009_v39 = vld [vmem:[%s14234_s30 + $0x90] ss:$12 sps:$4 sm:$0xff]   ;;  %v8017_v41 = vld [vmem:[%s14234_s30 + $0x68] ss:$12 sps:$4 sm:$0xff]   ;;  %v8018_v44 = vld [vmem:[%s14234_s30 + $0x80] ss:$12 sps:$4 sm:$0xff]  }
  0x29   : > { %1163 = vmatpush1.bf16.msra.mxu0 %v7990_v11  ;;  %741 = vmatprep.mubr.bf16.mxu0 %v13942_v7  ;;  %v8013_v42 = vld [vmem:[%s14234_s30 + $0xa8] ss:$12 sps:$4 sm:$0xff]   ;;  %v9051_v46 = vld [vmem:[%s14234_s30 + $0x98] ss:$12 sps:$4 sm:$0xff]   ;;  %v9057_v47 = vld [vmem:[%s14234_s30 + $0xb0] ss:$12 sps:$4 sm:$0xff]  }
  0x2a   : > { %1164 = vmatprep.subr.bf16.mxu0 %v7991_v12  ;;  %6833 = vmatpush3.bf16.msra.mxu1 %v8010_v25  ;;  %v9106_v54 = vld [vmem:[%s13925_s5 + $0x34] ss:$12 sps:$4 sm:$0xff]   ;;  %v9118_v56 = vld [vmem:[%s13925_s5 + $0x38] ss:$12 sps:$4 sm:$0xff]   ;;  %v9137_v59 = vld [vmem:[%s13925_s5 + $0x50] ss:$12 sps:$4 sm:$0xff]  }
  0x2b   : > { %6834 = vmatprep.subr.bf16.mxu1 %v13944_v24  ;;  %6828 = vmatprep.mubr.msk.bf16.mxu1 %vm676_vm1, %v647_v27  ;;  %v9125_v57 = vld [vmem:[%s13925_s5 + $0x4c] ss:$12 sps:$4 sm:$0xff]   ;;  %v9144_v60 = vld [vmem:[%s13925_s5 + $0x64] ss:$12 sps:$4 sm:$0xff]   ;;  %v9154_v62 = vld [vmem:[%s13925_s5 + $0x68] ss:$12 sps:$4 sm:$0xff]  }
  0x2c   : > { %v9149_v61 = vld [vmem:[%s13925_s5 + $0x60] ss:$12 sps:$4 sm:$0xff]   ;;  %v9160_v63 = vld [vmem:[%s13925_s5 + $0x7c] ss:$12 sps:$4 sm:$0xff]   ;;  %v9167_v0 = vld [vmem:[%s13925_s5 + $0x78] ss:$12 sps:$4 sm:$0xff]  }
  0x2d   : > { %1165 = vmatpush1.bf16.msra.mxu0 %v7993_v13  ;;  %v9174_v1 = vld [vmem:[%s13925_s5 + $0x80] ss:$12 sps:$4 sm:$0xff]   ;;  %v9186_v3 = vld [vmem:[%s13925_s5 + $0x90] ss:$12 sps:$4 sm:$0xff]   ;;  %v9193_v4 = vld [vmem:[%s13925_s5 + $0x98] ss:$12 sps:$4 sm:$0xff]  }
  0x2e   : > { %1166 = vmatprep.subr.bf16.mxu0 %v7994_v16  ;;  %6835 = vmatpush3.bf16.msra.mxu1 %v8014_v30  ;;  %v9179_v2 = vld [vmem:[%s13925_s5 + $0x94] ss:$12 sps:$4 sm:$0xff]   ;;  %v9198_v5 = vld [vmem:[%s13925_s5 + $0xac] ss:$12 sps:$4 sm:$0xff]   ;;  %v9212_v8 = vld [vmem:[%s13925_s5 + $0xb0] ss:$12 sps:$4 sm:$0xff]  }
  0x2f   : > { %6836 = vmatprep.subr.bf16.mxu1 %v13944_v24  ;;  %v9205_v6 = vld [vmem:[%s13925_s5 + $0xa8] ss:$12 sps:$4 sm:$0xff]   ;;  %v9217_v9 = vld [vmem:[%s13927_s7 + $0x4] ss:$12 sps:$4 sm:$0xff]   ;;  %v9224_v11 = vshrl.u32 %v653_v10, 7 }
  0x30   : > { %6239 = vmatmul.mubr.msk.bf16.gmra.mrb[4].mxu0 %vm676_vm1, %v646_v18  ;;  %6829 = vmatmul.mubr.msk.bf16.gmra.mrb[4].mxu1 %vm676_vm1, %v648_v34  ;;  %v651_v13 = vld [vmem:[%s14237_s23] sm:$0x7] }
  0x31   : > { %1167 = vmatpush1.bf16.msra.mxu0 %v7996_v19  ;;  %751 = vmatprep.mubr.bf16.mxu0 %v13942_v7  ;;  %14235 = vst [vmem:[#allocation8_spill] sm:$0xff] %v9224_v11  ;;  %v9227_v12 = vsub.s32 0, %v9224_v11  ;;  %v9233_v14 = vsub.s32 1, %v9224_v11  ;;  %v9237_v18 = vsub.s32 2, %v9224_v11 }
  0x32   : > { %1168 = vmatprep.subr.bf16.mxu0 %v7997_v20  ;;  %6837 = vmatpush3.bf16.msra.mxu1 %v8015_v35 }
  0x33   : > { %6838 = vmatprep.subr.bf16.mxu1 %v13944_v24  ;;  %6848 = vmatprep.mubr.msk.bf16.mxu1 %vm8807_vm2, %v13944_v24  ;;  %14236 = vst [vmem:[#allocation9_spill] sm:$0xff] %v9227_v12  ;;  %14238 = vst [vmem:[#allocation10_spill] sm:$0xff] %v9233_v14  ;;  %v656_v16 = vrot.slane %v651_v13, %v9227_v12  ;;  %v660_v19 = vrot.slane %v651_v13, %v9233_v14 }
  0x34   : > { %14239 = vst [vmem:[#allocation11_spill] sm:$0xff] %v9237_v18  ;;  %v9245_v25 = vrot.slane %v651_v13, %v9237_v18 }
  0x35   : > { %1169 = vmatpush1.bf16.msra.mxu0 %v7999_v26 }
  0x36   : > { %1170 = vmatprep.subr.bf16.mxu0 %v8000_v28  ;;  %6839 = vmatpush3.bf16.msra.mxu1 %v8016_v38 }
  0x37   : > { %6840 = vmatprep.subr.bf16.mxu1 %v13944_v24 }
  0x38   : > { %6240 = vmatmul.mubr.msk.bf16.gmra.mrb[8].mxu0 %vm676_vm1, %v647_v27 }
  0x39   : > { %1171 = vmatpush1.bf16.msra.mxu0 %v8002_v32  ;;  %761 = vmatprep.mubr.bf16.mxu0 %v13942_v7 }
  0x3a   : > { %1172 = vmatprep.subr.bf16.mxu0 %v8004_v33  ;;  %6841 = vmatpush3.bf16.msra.mxu1 %v8017_v41 }
  0x3b   : > { %6842 = vmatprep.subr.bf16.mxu1 %v13944_v24 }
  0x3d   : > { %1173 = vmatpush1.bf16.msra.mxu0 %v8006_v36 }
  0x3e   : > { %1174 = vmatprep.subr.bf16.mxu0 %v8007_v37  ;;  %6843 = vmatpush3.bf16.msra.mxu1 %v8018_v44 }
  0x3f   : > { %6844 = vmatprep.subr.bf16.mxu1 %v13944_v24 }
  0x40   : > { %6241 = vmatmul.mubr.msk.bf16.gmra.mrb[12].mxu0 %vm676_vm1, %v648_v34 }
  0x41   : > { %1175 = vmatpush1.bf16.msra.mxu0 %v8009_v39  ;;  %1194 = vmatprep.mubr.bf16.mxu0 %v13942_v7 }
  0x42   : > { %1176 = vmatprep.subr.bf16.mxu0 %v8011_v40  ;;  %6845 = vmatpush3.bf16.msra.mxu1 %v9051_v46 }
  0x43   : > { %6846 = vmatprep.subr.bf16.mxu1 %v13944_v24 }
  0x45   : > { %1177 = vmatpush1.bf16.msra.mxu0 %v8013_v42 }
  0x46   : > { %6847 = vmatpush3.bf16.msra.mxu1 %v9057_v47  ;;  %1415 = vmatprep.subr.bf16.mxu0 %v9069_v48 }
  0x47   : > { %6852 = vmatprep.subr.bf16.mxu1 %v13944_v24 }
  0x48   : > { %1195 = vmatmul.mubr.bf16.vlgmr.msra.gmra.mrb[16].mxu0 %v1033_v45 }
  0x49   : > { %1447 = vmatprep.mubr.bf16.mxu0 %v13942_v7  ;;  %6849 = vmatmul.mubr.bf16.vlgmr.msra.gmra.mrb[8].mxu1 %v1033_v45 }
  0x4a   : > { %6868 = vmatprep.mubr.msk.bf16.mxu1 %vm8807_vm2, %v13944_v24  ;;  %1416 = vmatpush1.bf16.msra.mxu0 %v9074_v49 }
  0x4b   : > { %6853 = vmatpush3.bf16.msra.mxu1 %v9080_v50  ;;  %1417 = vmatprep.subr.bf16.mxu0 %v9085_v51 }
  0x4c   : > { %6854 = vmatprep.subr.bf16.mxu1 %v13944_v24 }
  0x4e   : > { %1418 = vmatpush1.bf16.msra.mxu0 %v9093_v52 }
  0x4f   : > { %6855 = vmatpush3.bf16.msra.mxu1 %v9099_v53  ;;  %1419 = vmatprep.subr.bf16.mxu0 %v9106_v54 }
  0x50   : > { %6856 = vmatprep.subr.bf16.mxu1 %v13944_v24 }
  0x52   : > { %1420 = vmatpush1.bf16.msra.mxu0 %v9111_v55 }
  0x53   : > { %6857 = vmatpush3.bf16.msra.mxu1 %v9118_v56  ;;  %1421 = vmatprep.subr.bf16.mxu0 %v9125_v57 }
  0x54   : > { %6858 = vmatprep.subr.bf16.mxu1 %v13944_v24 }
  0x56   : > { %1422 = vmatpush1.bf16.msra.mxu0 %v9130_v58 }
  0x57   : > { %6859 = vmatpush3.bf16.msra.mxu1 %v9137_v59  ;;  %1423 = vmatprep.subr.bf16.mxu0 %v9144_v60 }
  0x58   : > { %6860 = vmatprep.subr.bf16.mxu1 %v13944_v24 }
  0x5a   : > { %1424 = vmatpush1.bf16.msra.mxu0 %v9149_v61 }
  0x5b   : > { %6861 = vmatpush3.bf16.msra.mxu1 %v9154_v62  ;;  %1425 = vmatprep.subr.bf16.mxu0 %v9160_v63 }
  0x5c   : > { %6862 = vmatprep.subr.bf16.mxu1 %v13944_v24 }
  0x5e   : > { %1426 = vmatpush1.bf16.msra.mxu0 %v9167_v0 }
  0x5f   : > { %6863 = vmatpush3.bf16.msra.mxu1 %v9174_v1  ;;  %1427 = vmatprep.subr.bf16.mxu0 %v9179_v2 }
  0x60   : > { %6864 = vmatprep.subr.bf16.mxu1 %v13944_v24 }
  0x62   : > { %1428 = vmatpush1.bf16.msra.mxu0 %v9186_v3 }
  0x63   : > { %6865 = vmatpush3.bf16.msra.mxu1 %v9193_v4  ;;  %1429 = vmatprep.subr.bf16.mxu0 %v9198_v5 }
  0x64   : > { %6866 = vmatprep.subr.bf16.mxu1 %v13944_v24 }
  0x66   : > { %1430 = vmatpush1.bf16.msra.mxu0 %v9205_v6 }
  0x67   : > { %6867 = vmatpush3.bf16.msra.mxu1 %v9212_v8  ;;  %1625 = vmatprep.subr.bf16.mxu0 %v9217_v9 }
  0x68   : > { %6872 = vmatprep.subr.bf16.mxu1 %v13944_v24 }
  0xfb   : > { %v733_v15 = vpop.f32.mrb[0].mxu0  ;;  %v6826_v27 = vpop.f32.mrb[0].mxu1 }
  0xfc   : > { %v735_v17 = vpop.f32.mrb[1].mxu0  ;;  %v9250_v30 = vadd.f32 %v6826_v27, %v9245_v25  ;;  %v806_v31 = vpop.f32.mrb[1].mxu1 }
  0xfd   : > { %v737_v20 = vpop.f32.mrb[2].mxu0  ;;  %v6827_v34 = vpop.f32.mrb[2].mxu1 }
  0xfe   : > { %v9240_v21 = vadd.f32 %v737_v20, %v656_v16  ;;  %v739_v22 = vpop.f32.mrb[3].mxu0  ;;  %14241 = vst [vmem:[#allocation13_spill] sm:$0xff] %v9250_v30  ;;  %v9257_v37 = vadd.f32 %v6827_v34, %v9245_v25  ;;  %v809_v38 = vpop.f32.mrb[3].mxu1  ;;  %v9452_v30 = vld [vmem:[%s13927_s7 + $0xb0] ss:$12 sps:$4 sm:$0xff]  }
  0xff   : > { %v9242_v23 = vadd.f32 %v739_v22, %v660_v19  ;;  %v9262_v40 = vadd.f32 %v809_v38, %v9245_v25  ;;  %14275 = vst [vmem:[#allocation45_spill] sm:$0xff] %v9452_v30 }
 0x100   : > { %14244 = vst [vmem:[#allocation16_spill] sm:$0xff] %v9257_v37  ;;  %v9437_v37 = vld [vmem:[%s13927_s7 + $0xac] ss:$12 sps:$4 sm:$0xff]  }
 0x101   : > { %14273 = vst [vmem:[#allocation43_spill] sm:$0xff] %v9437_v37 }
 0x103   : > { %v743_v26 = vpop.f32.mrb[4].mxu0  ;;  %v6830_v42 = vpop.f32.mrb[4].mxu1 }
 0x104   : > { %v9247_v28 = vadd.f32 %v743_v26, %v656_v16  ;;  %v745_v29 = vpop.f32.mrb[5].mxu0  ;;  %v9267_v10 = vadd.f32 %v6830_v42, %v9245_v25  ;;  %v822_v13 = vpop.f32.mrb[5].mxu1 }
 0x105   : > { %v9252_v32 = vadd.f32 %v745_v29, %v660_v19  ;;  %v747_v33 = vpop.f32.mrb[6].mxu0  ;;  %v9272_v26 = vadd.f32 %v822_v13, %v9245_v25  ;;  %v6831_v27 = vpop.f32.mrb[6].mxu1 }
 0x106   : > { %14240 = vst [vmem:[#allocation12_spill] sm:$0xff] %v9247_v28  ;;  %v9254_v35 = vadd.f32 %v747_v33, %v656_v16  ;;  %v749_v36 = vpop.f32.mrb[7].mxu0  ;;  %14247 = vst [vmem:[#allocation19_spill] sm:$0xff] %v9267_v10  ;;  %v9277_v34 = vadd.f32 %v6831_v27, %v9245_v25  ;;  %v734_v27 = vadd.f32 %v733_v15, %v656_v16  ;;  %v9295_v15 = vld [vmem:[%s13924_s4] ss:$0 sm:$0xff] }
 0x107   : > { %14242 = vst [vmem:[#allocation14_spill] sm:$0xff] %v9252_v32  ;;  %v9259_v39 = vadd.f32 %v749_v36, %v660_v19  ;;  %14249 = vst [vmem:[#allocation21_spill] sm:$0xff] %v9272_v26  ;;  %v825_v36 = vpop.f32.mrb[7].mxu1  ;;  %v9467_v28 = vld [vmem:[%s13929_s9 + $0x4] ss:$12 sps:$4 sm:$0xff]  }
 0x108   : > { %14243 = vst [vmem:[#allocation15_spill] sm:$0xff] %v9254_v35  ;;  %14251 = vst [vmem:[#allocation23_spill] sm:$0xff] %v9277_v34  ;;  %v736_v34 = vadd.f32 %v735_v17, %v660_v19  ;;  %v9446_v35 = vld [vmem:[#allocation4] sm:$0xff] }
 0x109   : > { %14245 = vst [vmem:[#allocation17_spill] sm:$0xff] %v9259_v39  ;;  %v9444_v39 = vld [vmem:[%s13927_s7 + $0xa8] ss:$12 sps:$4 sm:$0xff]   ;;  %v1496_v32 = vpack.c.bf16 %v9446_v35, %v9446_v35  ;;  %14276 = vst [vmem:[#allocation46_spill] sm:$0xff] %v9467_v28 }
 0x10a   : > { %14274 = vst [vmem:[#allocation44_spill] sm:$0xff] %v9444_v39 }
 0x10b   : > { %v753_v41 = vpop.f32.mrb[8].mxu0 }
 0x10c   : > { %v9264_v44 = vadd.f32 %v753_v41, %v656_v16  ;;  %v755_v45 = vpop.f32.mrb[9].mxu0  ;;  %v9282_v41 = vadd.f32 %v825_v36, %v9245_v25 }
 0x10d   : > { %v9269_v20 = vadd.f32 %v755_v45, %v660_v19  ;;  %v757_v22 = vpop.f32.mrb[10].mxu0 }
 0x10e   : > { %14246 = vst [vmem:[#allocation18_spill] sm:$0xff] %v9264_v44  ;;  %v9274_v29 = vadd.f32 %v757_v22, %v656_v16  ;;  %v759_v33 = vpop.f32.mrb[11].mxu0  ;;  %14253 = vst [vmem:[#allocation25_spill] sm:$0xff] %v9282_v41 }
 0x10f   : > { %14248 = vst [vmem:[#allocation20_spill] sm:$0xff] %v9269_v20  ;;  %v9279_v38 = vadd.f32 %v759_v33, %v660_v19 }
 0x110   : > { %14250 = vst [vmem:[#allocation22_spill] sm:$0xff] %v9274_v29 }
 0x111   : > { %14252 = vst [vmem:[#allocation24_spill] sm:$0xff] %v9279_v38 }
 0x113   : > { %v763_v42 = vpop.f32.mrb[12].mxu0 }
 0x114   : > { %v9284_v45 = vadd.f32 %v763_v42, %v656_v16  ;;  %v765_v7 = vpop.f32.mrb[13].mxu0 }
 0x115   : > { %v9286_v24 = vadd.f32 %v765_v7, %v660_v19  ;;  %v767_v13 = vpop.f32.mrb[14].mxu0 }
 0x116   : > { %14254 = vst [vmem:[#allocation26_spill] sm:$0xff] %v9284_v45  ;;  %v9288_v11 = vadd.f32 %v767_v13, %v656_v16  ;;  %v769_v22 = vpop.f32.mrb[15].mxu0 }
 0x117   : > { %14255 = vst [vmem:[#allocation27_spill] sm:$0xff] %v9286_v24  ;;  %v9290_v10 = vadd.f32 %v769_v22, %v660_v19  ;;  %v9327_v22 = vld [vmem:[%s13927_s7 + $0x18] ss:$12 sps:$4 sm:$0xff]  }
 0x118   : > { %14256 = vst [vmem:[#allocation28_spill] sm:$0xff] %v9288_v11 }
 0x119   : > { %14257 = vst [vmem:[#allocation29_spill] sm:$0xff] %v9290_v10  ;;  %v9431_v10 = vld [vmem:[%s13927_s7 + $0x98] ss:$12 sps:$4 sm:$0xff]  }
 0x11a   : > { %14272 = vst [vmem:[#allocation42_spill] sm:$0xff] %v9431_v10 }
 0x11b   : > { %v1196_v29 = vpop.f32.mrb[16].mxu0 }
 0x11c   : > { %v1243_v33 = vadd.f32 %v1196_v29, %v734_v27  ;;  %v1198_v38 = vpop.f32.mrb[17].mxu0  ;;  %v1237_v42 = vpop.f32.mrb[8].mxu1  ;;  %v9333_v27 = vld [vmem:[%s13927_s7 + $0x20] ss:$12 sps:$4 sm:$0xff]  }
 0x11d   : > { %v1250_v26 = vadd.f32 %v1198_v38, %v736_v34  ;;  %v1200_v36 = vpop.f32.mrb[18].mxu0  ;;  %v6850_v45 = vpop.f32.mrb[9].mxu1  ;;  %v1263_v16 = vadd.f32 %v9295_v15, %v1237_v42  ;;  %v14259_v42 = vmov 0  }
 0x11e   : > { %v6270_v41 = vmul.f32 -1.442695, %v1243_v33  ;;  %v1201_v20 = vpop.f32.mrb[19].mxu0  ;;  %v1240_v7 = vpop.f32.mrb[10].mxu1  ;;  %v9305_v45 = vld [vmem:[%s13927_s7] ss:$12 sps:$4 sm:$0xff]  }
 0x11f   : > { %v6851_v24 = vpop.f32.mrb[11].mxu1  ;;  %v6271_v44 = vmul.f32 -1.442695, %v1250_v26  ;;  %v807_v20 = vadd.f32 %v806_v31, %v9245_v25  ;;  %v9310_v25 = vld [vmem:[%s13927_s7 + $0x8] ss:$12 sps:$4 sm:$0xff]   ;;  %v14258_v36 = vmov 0.0  }
 0x120   : > { %8149 = vpow2.f32 %v6270_v41  ;;  %v9339_v33 = vld [vmem:[%s13927_s7 + $0x34] ss:$12 sps:$4 sm:$0xff]   ;;  %v9349_v7 = vld [vmem:[%s13927_s7 + $0x30] ss:$12 sps:$4 sm:$0xff]  }
 0x121   : > { %8151 = vpow2.f32 %v6271_v44 }
 0x12a   : > { %v8150_v13 = vpop.eup %8149 }
 0x12b   : > { %v1247_v11 = vadd.f32 1.0, %v8150_v13  ;;  %v8152_v17 = vpop.eup %8151  ;;  %v9355_v13 = vld [vmem:[%s13927_s7 + $0x38] ss:$12 sps:$4 sm:$0xff]  }
 0x12c   : > { %v1254_v34 = vadd.f32 1.0, %v8152_v17  ;;  %14260 = vst [vmem:[#allocation30_spill] sm:$0xff] %v9355_v13  ;;  %v9368_v17 = vld [vmem:[%s13927_s7 + $0x48] ss:$12 sps:$4 sm:$0xff]  }
 0x12d   : > { %8153 = vrcp.f32 %v1247_v11  ;;  %14262 = vst [vmem:[#allocation32_spill] sm:$0xff] %v9368_v17 }
 0x137   : > { %v8154_v19 = vpop.eup %8153 }
 0x138   : > { %v1264_v29 = vmul.f32 %v8154_v19, %v1263_v16  ;;  %v9361_v16 = vld [vmem:[%s13927_s7 + $0x4c] ss:$12 sps:$4 sm:$0xff]   ;;  %v9374_v19 = vld [vmem:[%s13927_s7 + $0x50] ss:$12 sps:$4 sm:$0xff]  }
 0x139   : > { %14261 = vst [vmem:[#allocation31_spill] sm:$0xff] %v9361_v16  ;;  %14263 = vst [vmem:[#allocation33_spill] sm:$0xff] %v9374_v19 }
 0x13a   : > { %v1265_v38 = vadd.f32 %v1264_v29, %v807_v20  ;;  %v9380_v20 = vld [vmem:[%s13927_s7 + $0x64] ss:$12 sps:$4 sm:$0xff]   ;;  %v9387_v29 = vld [vmem:[%s13927_s7 + $0x60] ss:$12 sps:$4 sm:$0xff]  }
 0x13b   : > { %14264 = vst [vmem:[#allocation34_spill] sm:$0xff] %v9380_v20  ;;  %14265 = vst [vmem:[#allocation35_spill] sm:$0xff] %v9387_v29 }
 0x13c   : > { %8155 = vtanh.f32 %v1265_v38  ;;  %v9399_v38 = vld [vmem:[%s13927_s7 + $0x7c] ss:$12 sps:$4 sm:$0xff]  }
 0x13d   : > { %8157 = vrcp.f32 %v1254_v34  ;;  %v9393_v34 = vld [vmem:[%s13927_s7 + $0x68] ss:$12 sps:$4 sm:$0xff]   ;;  %14267 = vst [vmem:[#allocation37_spill] sm:$0xff] %v9399_v38 }
 0x13e   : > { %14266 = vst [vmem:[#allocation36_spill] sm:$0xff] %v9393_v34 }
 0x146   : > { %v8156_v24 = vpop.eup %8155 }
 0x147   : > { %v1267_v44 = vsub.f32 %v9037_v43, %v8156_v24  ;;  %v8158_v11 = vpop.eup %8157  ;;  %v9319_v43 = vld [vmem:[%s13927_s7 + $0x1c] ss:$12 sps:$4 sm:$0xff]  }
 0x149   : > { %v1268_v26 = vmul.f32 %v8158_v11, %v1267_v44  ;;  %v9412_v44 = vld [vmem:[%s13927_s7 + $0x80] ss:$12 sps:$4 sm:$0xff]  }
 0x14a   : > { %14269 = vst [vmem:[#allocation39_spill] sm:$0xff] %v9412_v44  ;;  %v9418_v11 = vld [vmem:[%s13927_s7 + $0x94] ss:$12 sps:$4 sm:$0xff]  }
 0x14b   : > { %v9300_v41 = vadd.f32 %v8156_v24, %v1268_v26  ;;  %v9406_v24 = vld [vmem:[%s13927_s7 + $0x78] ss:$12 sps:$4 sm:$0xff]   ;;  %14270 = vst [vmem:[#allocation40_spill] sm:$0xff] %v9418_v11  ;;  %v9425_v26 = vld [vmem:[%s13927_s7 + $0x90] ss:$12 sps:$4 sm:$0xff]  }
 0x14c   : > { %14268 = vst [vmem:[#allocation38_spill] sm:$0xff] %v9406_v24  ;;  %14271 = vst [vmem:[#allocation41_spill] sm:$0xff] %v9425_v26 }
 0x14d   : > { %v9314_v31 = vpack.c.bf16 %v9300_v41, %v9300_v41 }
 0x14f   : > { %1448 = vmatmul.mubr.bf16.vlgmr.msra.gmra.mrb[20].mxu0 %v9314_v31  ;;  %6869 = vmatmul.mubr.bf16.vlgmr.msra.gmra.mrb[12].mxu1 %v9314_v31 }
 0x150   : > { %1626 = vmatpush1.bf16.msra.mxu0 %v9305_v45  ;;  %6873 = vmatpush3.bf16.msra.mxu1 %v9310_v25 }
 0x151   : > { %1627 = vmatprep.subr.bf16.mxu0 %v9319_v43  ;;  %6874 = vmatprep.subr.bf16.mxu1 %v14258_v36 }
 0x152   : > { %1657 = vmatprep.mubr.bf16.mxu0 %v14259_v42  ;;  %6888 = vmatprep.mubr.msk.bf16.mxu1 %vm8807_vm2, %v14258_v36 }
 0x154   : > { %1628 = vmatpush1.bf16.msra.mxu0 %v9327_v22  ;;  %6875 = vmatpush3.bf16.msra.mxu1 %v9333_v27 }
 0x155   : > { %1629 = vmatprep.subr.bf16.mxu0 %v9339_v33  ;;  %6876 = vmatprep.subr.bf16.mxu1 %v14258_v36 }
 0x158   : > { %1630 = vmatpush1.bf16.msra.mxu0 %v9349_v7  ;;  %6877 = vmatpush3.bf16.msra.mxu1 %v9355_v13 }
 0x159   : > { %1631 = vmatprep.subr.bf16.mxu0 %v9361_v16  ;;  %6878 = vmatprep.subr.bf16.mxu1 %v14258_v36 }
 0x15c   : > { %1632 = vmatpush1.bf16.msra.mxu0 %v9368_v17  ;;  %6879 = vmatpush3.bf16.msra.mxu1 %v9374_v19 }
 0x15d   : > { %1633 = vmatprep.subr.bf16.mxu0 %v9380_v20  ;;  %6880 = vmatprep.subr.bf16.mxu1 %v14258_v36 }
 0x160   : > { %1634 = vmatpush1.bf16.msra.mxu0 %v9387_v29  ;;  %6881 = vmatpush3.bf16.msra.mxu1 %v9393_v34 }
 0x161   : > { %1635 = vmatprep.subr.bf16.mxu0 %v9399_v38  ;;  %6882 = vmatprep.subr.bf16.mxu1 %v14258_v36 }
 0x164   : > { %1636 = vmatpush1.bf16.msra.mxu0 %v9406_v24  ;;  %6883 = vmatpush3.bf16.msra.mxu1 %v9412_v44 }
 0x165   : > { %1637 = vmatprep.subr.bf16.mxu0 %v9418_v11  ;;  %6884 = vmatprep.subr.bf16.mxu1 %v14258_v36 }
 0x168   : > { %1638 = vmatpush1.bf16.msra.mxu0 %v9425_v26  ;;  %6885 = vmatpush3.bf16.msra.mxu1 %v9431_v10  ;;  %v9571_v10 = vld [vmem:[%s13929_s9 + $0x80] ss:$12 sps:$4 sm:$0xff]  }
 0x169   : > { %1639 = vmatprep.subr.bf16.mxu0 %v9437_v37  ;;  %6886 = vmatprep.subr.bf16.mxu1 %v14258_v36  ;;  %v9492_v37 = vld [vmem:[%s13929_s9 + $0x18] ss:$12 sps:$4 sm:$0xff]   ;;  %14293 = vst [vmem:[#allocation63_spill] sm:$0xff] %v9571_v10 }
 0x16a   : > { %14280 = vst [vmem:[#allocation50_spill] sm:$0xff] %v9492_v37 }
 0x16c   : > { %1640 = vmatpush1.bf16.msra.mxu0 %v9444_v39  ;;  %6887 = vmatpush3.bf16.msra.mxu1 %v9452_v30  ;;  %v9472_v39 = vld [vmem:[%s13929_s9] ss:$12 sps:$4 sm:$0xff]   ;;  %v9477_v30 = vld [vmem:[%s13929_s9 + $0x8] ss:$12 sps:$4 sm:$0xff]  }
 0x16d   : > { %6892 = vmatprep.subr.bf16.mxu1 %v14258_v36  ;;  %14277 = vst [vmem:[#allocation47_spill] sm:$0xff] %v9472_v39  ;;  %14278 = vst [vmem:[#allocation48_spill] sm:$0xff] %v9477_v30  ;;  %1878 = vmatprep.subr.bf16.mxu0 %v9467_v28  ;;  %v9497_v28 = vld [vmem:[%s13929_s9 + $0x20] ss:$12 sps:$4 sm:$0xff]  }
 0x16e   : > { %14281 = vst [vmem:[#allocation51_spill] sm:$0xff] %v9497_v28 }
 0x16f   : > { %1658 = vmatmul.mubr.bf16.vlgmr.msra.gmra.mrb[20].mxu0 %v1496_v32  ;;  %6889 = vmatmul.mubr.bf16.vlgmr.msra.gmra.mrb[16].mxu1 %v1496_v32  ;;  %v9483_v32 = vld [vmem:[%s13929_s9 + $0x1c] ss:$12 sps:$4 sm:$0xff]  }
 0x170   : > { %1910 = vmatprep.mubr.bf16.mxu0 %v14259_v42  ;;  %6908 = vmatprep.mubr.msk.bf16.mxu1 %vm8807_vm2, %v14258_v36  ;;  %14279 = vst [vmem:[#allocation49_spill] sm:$0xff] %v9483_v32 }
 0x171   : > { %1879 = vmatpush1.bf16.msra.mxu0 %v9472_v39  ;;  %6893 = vmatpush3.bf16.msra.mxu1 %v9477_v30  ;;  %v9510_v30 = vld [vmem:[%s13929_s9 + $0x30] ss:$12 sps:$4 sm:$0xff]   ;;  %v9515_v39 = vld [vmem:[%s13929_s9 + $0x38] ss:$12 sps:$4 sm:$0xff]  }
 0x172   : > { %1880 = vmatprep.subr.bf16.mxu0 %v9483_v32  ;;  %6894 = vmatprep.subr.bf16.mxu1 %v14258_v36  ;;  %v9504_v32 = vld [vmem:[%s13929_s9 + $0x34] ss:$12 sps:$4 sm:$0xff]   ;;  %14283 = vst [vmem:[#allocation53_spill] sm:$0xff] %v9510_v30  ;;  %14284 = vst [vmem:[#allocation54_spill] sm:$0xff] %v9515_v39 }
 0x173   : > { %14282 = vst [vmem:[#allocation52_spill] sm:$0xff] %v9504_v32 }
 0x175   : > { %1881 = vmatpush1.bf16.msra.mxu0 %v9492_v37  ;;  %6895 = vmatpush3.bf16.msra.mxu1 %v9497_v28  ;;  %v9523_v28 = vld [vmem:[%s13929_s9 + $0x4c] ss:$12 sps:$4 sm:$0xff]   ;;  %v9529_v37 = vld [vmem:[%s13929_s9 + $0x48] ss:$12 sps:$4 sm:$0xff]  }
 0x176   : > { %6896 = vmatprep.subr.bf16.mxu1 %v14258_v36  ;;  %1882 = vmatprep.subr.bf16.mxu0 %v9504_v32  ;;  %14285 = vst [vmem:[#allocation55_spill] sm:$0xff] %v9523_v28  ;;  %14286 = vst [vmem:[#allocation56_spill] sm:$0xff] %v9529_v37  ;;  %v9534_v32 = vld [vmem:[%s13929_s9 + $0x50] ss:$12 sps:$4 sm:$0xff]  }
 0x177   : > { %14287 = vst [vmem:[#allocation57_spill] sm:$0xff] %v9534_v32 }
 0x179   : > { %1883 = vmatpush1.bf16.msra.mxu0 %v9510_v30  ;;  %6897 = vmatpush3.bf16.msra.mxu1 %v9515_v39  ;;  %v9542_v39 = vld [vmem:[%s13929_s9 + $0x64] ss:$12 sps:$4 sm:$0xff]   ;;  %v9548_v30 = vld [vmem:[%s13929_s9 + $0x60] ss:$12 sps:$4 sm:$0xff]  }
 0x17a   : > { %6898 = vmatprep.subr.bf16.mxu1 %v14258_v36  ;;  %1884 = vmatprep.subr.bf16.mxu0 %v9523_v28  ;;  %14288 = vst [vmem:[#allocation58_spill] sm:$0xff] %v9542_v39  ;;  %14289 = vst [vmem:[#allocation59_spill] sm:$0xff] %v9548_v30  ;;  %v9553_v28 = vld [vmem:[%s13929_s9 + $0x68] ss:$12 sps:$4 sm:$0xff]  }
 0x17b   : > { %14290 = vst [vmem:[#allocation60_spill] sm:$0xff] %v9553_v28 }
 0x17d   : > { %1885 = vmatpush1.bf16.msra.mxu0 %v9529_v37  ;;  %6899 = vmatpush3.bf16.msra.mxu1 %v9534_v32  ;;  %v9558_v32 = vld [vmem:[%s13929_s9 + $0x7c] ss:$12 sps:$4 sm:$0xff]   ;;  %v9566_v37 = vld [vmem:[%s13929_s9 + $0x78] ss:$12 sps:$4 sm:$0xff]  }
 0x17e   : > { %6900 = vmatprep.subr.bf16.mxu1 %v14258_v36  ;;  %14291 = vst [vmem:[#allocation61_spill] sm:$0xff] %v9558_v32  ;;  %1886 = vmatprep.subr.bf16.mxu0 %v9542_v39  ;;  %14292 = vst [vmem:[#allocation62_spill] sm:$0xff] %v9566_v37 }
 0x181   : > { %1887 = vmatpush1.bf16.msra.mxu0 %v9548_v30  ;;  %6901 = vmatpush3.bf16.msra.mxu1 %v9553_v28  ;;  %v9578_v30 = vld [vmem:[%s13929_s9 + $0x94] ss:$12 sps:$4 sm:$0xff]   ;;  %v9585_v28 = vld [vmem:[%s13929_s9 + $0x90] ss:$12 sps:$4 sm:$0xff]  }
 0x182   : > { %1888 = vmatprep.subr.bf16.mxu0 %v9558_v32  ;;  %6902 = vmatprep.subr.bf16.mxu1 %v14258_v36  ;;  %14294 = vst [vmem:[#allocation64_spill] sm:$0xff] %v9578_v30  ;;  %14295 = vst [vmem:[#allocation65_spill] sm:$0xff] %v9585_v28  ;;  %v9590_v32 = vld [vmem:[%s13929_s9 + $0x98] ss:$12 sps:$4 sm:$0xff]  }
 0x183   : > { %14296 = vst [vmem:[#allocation66_spill] sm:$0xff] %v9590_v32 }
 0x185   : > { %1889 = vmatpush1.bf16.msra.mxu0 %v9566_v37  ;;  %6903 = vmatpush3.bf16.msra.mxu1 %v9571_v10  ;;  %v9597_v37 = vld [vmem:[%s13929_s9 + $0xac] ss:$12 sps:$4 sm:$0xff]   ;;  %v9604_v10 = vld [vmem:[%s13929_s9 + $0xa8] ss:$12 sps:$4 sm:$0xff]  }
 0x186   : > { %1890 = vmatprep.subr.bf16.mxu0 %v9578_v30  ;;  %6904 = vmatprep.subr.bf16.mxu1 %v14258_v36  ;;  %14297 = vst [vmem:[#allocation67_spill] sm:$0xff] %v9597_v37  ;;  %14298 = vst [vmem:[#allocation68_spill] sm:$0xff] %v9604_v10  ;;  %v9609_v30 = vld [vmem:[%s13929_s9 + $0xb0] ss:$12 sps:$4 sm:$0xff]  }
 0x187   : > { %14299 = vst [vmem:[#allocation69_spill] sm:$0xff] %v9609_v30 }
 0x189   : > { %1891 = vmatpush1.bf16.msra.mxu0 %v9585_v28  ;;  %6905 = vmatpush3.bf16.msra.mxu1 %v9590_v32  ;;  %v9616_v28 = vld [vmem:[%s13931_s11 + $0x4] ss:$12 sps:$4 sm:$0xff]  }
 0x18a   : > { %1892 = vmatprep.subr.bf16.mxu0 %v9597_v37  ;;  %6906 = vmatprep.subr.bf16.mxu1 %v14258_v36  ;;  %14300 = vst [vmem:[#allocation70_spill] sm:$0xff] %v9616_v28  ;;  %v926_v37 = vld [vmem:[%s13926_s6] sm:$0x7] }
 0x18b   : > { %v9626_v44 = vrot.slane %v926_v37, %v9227_v12 }
 0x18d   : > { %1893 = vmatpush1.bf16.msra.mxu0 %v9604_v10  ;;  %6907 = vmatpush3.bf16.msra.mxu1 %v9609_v30 }
 0x18e   : > { %2088 = vmatprep.subr.bf16.mxu0 %v9616_v28  ;;  %6912 = vmatprep.subr.bf16.mxu1 %v14258_v36 }
 0x222   : > { %v1490_v32 = vpop.f32.mrb[12].mxu1 }
 0x223   : > { %v6870_v39 = vpop.f32.mrb[13].mxu1 }
 0x224   : > { %v1493_v26 = vpop.f32.mrb[14].mxu1 }
 0x225   : > { %v6871_v11 = vpop.f32.mrb[15].mxu1 }
 0x226   : > { %v9630_v11 = vrot.slane %v926_v37, %v9233_v14 }
 0x228   : > { %14301 = vst [vmem:[#allocation71_spill] sm:$0xff] %v9630_v11 }
 0x242   : > { %v1659_v24 = vpop.f32.mrb[20].mxu0  ;;  %v1700_v38 = vpop.f32.mrb[16].mxu1 }
 0x243   : > { %v7856_v10 = vadd.f32 %v1659_v24, %v9626_v44  ;;  %v1661_v30 = vpop.f32.mrb[21].mxu0  ;;  %v6890_v34 = vpop.f32.mrb[17].mxu1 }
 0x244   : > { %v1663_v28 = vpop.f32.mrb[22].mxu0  ;;  %v1703_v29 = vpop.f32.mrb[18].mxu1  ;;  %v7857_v26 = vadd.f32 %v1661_v30, %v9630_v11  ;;  %v9636_v34 = vld [vmem:[%s13928_s8] ss:$0 sm:$0xff] }
 0x245   : > { %v6321_v20 = vmul.f32 -1.442695, %v7856_v10  ;;  %v1664_v19 = vpop.f32.mrb[23].mxu0  ;;  %v6891_v39 = vpop.f32.mrb[19].mxu1  ;;  %v9639_v28 = vrot.slane %v926_v37, %v9237_v18  ;;  %v1726_v10 = vadd.f32 %v9636_v34, %v1700_v38  ;;  %v9649_v37 = vld [vmem:[%s13931_s11] ss:$12 sps:$4 sm:$0xff]  }
 0x246   : > { %v6322_v17 = vmul.f32 -1.442695, %v7857_v26  ;;  %v9654_v38 = vld [vmem:[%s13931_s11 + $0x8] ss:$12 sps:$4 sm:$0xff]  }
 0x247   : > { %8159 = vpow2.f32 %v6321_v20  ;;  %v1491_v29 = vadd.f32 %v1490_v32, %v9639_v28 }
 0x248   : > { %8161 = vpow2.f32 %v6322_v17 }
 0x251   : > { %v8160_v16 = vpop.eup %8159 }
 0x252   : > { %v1710_v13 = vadd.f32 1.0, %v8160_v16  ;;  %v8162_v19 = vpop.eup %8161 }
 0x253   : > { %v1717_v24 = vadd.f32 1.0, %v8162_v19  ;;  %v9677_v19 = vld [vmem:[%s13931_s11 + $0x20] ss:$12 sps:$4 sm:$0xff]  }
 0x254   : > { %8163 = vrcp.f32 %v1710_v13 }
 0x25e   : > { %v8164_v20 = vpop.eup %8163 }
 0x25f   : > { %v1727_v30 = vmul.f32 %v8164_v20, %v1726_v10  ;;  %v9672_v10 = vld [vmem:[%s13931_s11 + $0x18] ss:$12 sps:$4 sm:$0xff]   ;;  %v9684_v20 = vld [vmem:[%s13931_s11 + $0x34] ss:$12 sps:$4 sm:$0xff]  }
 0x261   : > { %v1728_v39 = vadd.f32 %v1727_v30, %v1491_v29  ;;  %v9694_v29 = vld [vmem:[%s13931_s11 + $0x30] ss:$12 sps:$4 sm:$0xff]   ;;  %v9699_v30 = vld [vmem:[%s13931_s11 + $0x38] ss:$12 sps:$4 sm:$0xff]  }
 0x263   : > { %8165 = vtanh.f32 %v1728_v39  ;;  %v9713_v39 = vld [vmem:[%s13931_s11 + $0x48] ss:$12 sps:$4 sm:$0xff]  }
 0x264   : > { %8167 = vrcp.f32 %v1717_v24  ;;  %v9706_v24 = vld [vmem:[%s13931_s11 + $0x4c] ss:$12 sps:$4 sm:$0xff]   ;;  %14303 = vst [vmem:[#allocation73_spill] sm:$0xff] %v9713_v39 }
 0x265   : > { %14302 = vst [vmem:[#allocation72_spill] sm:$0xff] %v9706_v24 }
 0x26d   : > { %v8166_v13 = vpop.eup %8165 }
 0x26e   : > { %v1730_v16 = vsub.f32 %v9446_v35, %v8166_v13  ;;  %v8168_v17 = vpop.eup %8167  ;;  %v9663_v35 = vld [vmem:[%s13931_s11 + $0x1c] ss:$12 sps:$4 sm:$0xff]  }
 0x270   : > { %v1731_v26 = vmul.f32 %v8168_v17, %v1730_v16  ;;  %v9725_v16 = vld [vmem:[%s13931_s11 + $0x64] ss:$12 sps:$4 sm:$0xff]   ;;  %v9732_v17 = vld [vmem:[%s13931_s11 + $0x60] ss:$12 sps:$4 sm:$0xff]  }
 0x271   : > { %14305 = vst [vmem:[#allocation75_spill] sm:$0xff] %v9725_v16  ;;  %14306 = vst [vmem:[#allocation76_spill] sm:$0xff] %v9732_v17 }
 0x272   : > { %v9644_v11 = vadd.f32 %v8166_v13, %v1731_v26  ;;  %v9718_v13 = vld [vmem:[%s13931_s11 + $0x50] ss:$12 sps:$4 sm:$0xff]   ;;  %v9737_v26 = vld [vmem:[%s13931_s11 + $0x68] ss:$12 sps:$4 sm:$0xff]  }
 0x273   : > { %14304 = vst [vmem:[#allocation74_spill] sm:$0xff] %v9718_v13  ;;  %14307 = vst [vmem:[#allocation77_spill] sm:$0xff] %v9737_v26 }
 0x274   : > { %v9658_v32 = vpack.c.bf16 %v9644_v11, %v9644_v11 }
 0x276   : > { %1911 = vmatmul.mubr.bf16.vlgmr.msra.gmra.mrb[24].mxu0 %v9658_v32  ;;  %6909 = vmatmul.mubr.bf16.vlgmr.msra.gmra.mrb[20].mxu1 %v9658_v32 }
 0x277   : > { %2089 = vmatpush1.bf16.msra.mxu0 %v9649_v37  ;;  %6913 = vmatpush3.bf16.msra.mxu1 %v9654_v38 }
 0x278   : > { %2090 = vmatprep.subr.bf16.mxu0 %v9663_v35  ;;  %6914 = vmatprep.subr.bf16.mxu1 %v14258_v36 }
 0x279   : > { %2120 = vmatprep.mubr.bf16.mxu0 %v14259_v42  ;;  %6928 = vmatprep.mubr.msk.bf16.mxu1 %vm8807_vm2, %v14258_v36 }
 0x27b   : > { %2091 = vmatpush1.bf16.msra.mxu0 %v9672_v10  ;;  %6915 = vmatpush3.bf16.msra.mxu1 %v9677_v19 }
 0x27c   : > { %2092 = vmatprep.subr.bf16.mxu0 %v9684_v20  ;;  %6916 = vmatprep.subr.bf16.mxu1 %v14258_v36 }
 0x27f   : > { %2093 = vmatpush1.bf16.msra.mxu0 %v9694_v29  ;;  %6917 = vmatpush3.bf16.msra.mxu1 %v9699_v30 }
 0x280   : > { %2094 = vmatprep.subr.bf16.mxu0 %v9706_v24  ;;  %6918 = vmatprep.subr.bf16.mxu1 %v14258_v36  ;;  %v9796_v24 = vld [vmem:[#allocation5] sm:$0xff] }
 0x283   : > { %2095 = vmatpush1.bf16.msra.mxu0 %v9713_v39  ;;  %6919 = vmatpush3.bf16.msra.mxu1 %v9718_v13  ;;  %v9744_v39 = vld [vmem:[%s13931_s11 + $0x7c] ss:$12 sps:$4 sm:$0xff]   ;;  %v9751_v13 = vld [vmem:[%s13931_s11 + $0x78] ss:$12 sps:$4 sm:$0xff]  }
 0x284   : > { %2096 = vmatprep.subr.bf16.mxu0 %v9725_v16  ;;  %6920 = vmatprep.subr.bf16.mxu1 %v14258_v36  ;;  %14308 = vst [vmem:[#allocation78_spill] sm:$0xff] %v9744_v39  ;;  %14309 = vst [vmem:[#allocation79_spill] sm:$0xff] %v9751_v13  ;;  %v9756_v16 = vld [vmem:[%s13931_s11 + $0x80] ss:$12 sps:$4 sm:$0xff]  }
 0x285   : > { %14310 = vst [vmem:[#allocation80_spill] sm:$0xff] %v9756_v16 }
 0x287   : > { %2097 = vmatpush1.bf16.msra.mxu0 %v9732_v17  ;;  %6921 = vmatpush3.bf16.msra.mxu1 %v9737_v26  ;;  %v9763_v17 = vld [vmem:[%s13931_s11 + $0x94] ss:$12 sps:$4 sm:$0xff]   ;;  %v9770_v26 = vld [vmem:[%s13931_s11 + $0x90] ss:$12 sps:$4 sm:$0xff]  }
 0x288   : > { %2098 = vmatprep.subr.bf16.mxu0 %v9744_v39  ;;  %6922 = vmatprep.subr.bf16.mxu1 %v14258_v36  ;;  %14311 = vst [vmem:[#allocation81_spill] sm:$0xff] %v9763_v17  ;;  %14312 = vst [vmem:[#allocation82_spill] sm:$0xff] %v9770_v26  ;;  %v9775_v39 = vld [vmem:[%s13931_s11 + $0x98] ss:$12 sps:$4 sm:$0xff]  }
 0x289   : > { %14313 = vst [vmem:[#allocation83_spill] sm:$0xff] %v9775_v39 }
 0x28b   : > { %2099 = vmatpush1.bf16.msra.mxu0 %v9751_v13  ;;  %6923 = vmatpush3.bf16.msra.mxu1 %v9756_v16  ;;  %v9782_v13 = vld [vmem:[%s13931_s11 + $0xac] ss:$12 sps:$4 sm:$0xff]   ;;  %v9789_v16 = vld [vmem:[%s13931_s11 + $0xa8] ss:$12 sps:$4 sm:$0xff]  }
 0x28c   : > { %2100 = vmatprep.subr.bf16.mxu0 %v9763_v17  ;;  %6924 = vmatprep.subr.bf16.mxu1 %v14258_v36  ;;  %14314 = vst [vmem:[#allocation84_spill] sm:$0xff] %v9782_v13  ;;  %v9794_v17 = vld [vmem:[%s13931_s11 + $0xb0] ss:$12 sps:$4 sm:$0xff]  }
 0x28d   : > { %14315 = vst [vmem:[#allocation85_spill] sm:$0xff] %v9794_v17 }
 0x28f   : > { %2101 = vmatpush1.bf16.msra.mxu0 %v9770_v26  ;;  %6925 = vmatpush3.bf16.msra.mxu1 %v9775_v39  ;;  %v1959_v26 = vpack.c.bf16 %v9796_v24, %v9796_v24  ;;  %v9807_v39 = vld [vmem:[%s14234_s30 + $0x4] ss:$12 sps:$4 sm:$0xff]  }
 0x290   : > { %2102 = vmatprep.subr.bf16.mxu0 %v9782_v13  ;;  %6926 = vmatprep.subr.bf16.mxu1 %v14258_v36  ;;  %14316 = vst [vmem:[#allocation86_spill] sm:$0xff] %v9807_v39  ;;  %v9814_v13 = vld [vmem:[%s14234_s30] ss:$12 sps:$4 sm:$0xff]  }
 0x293   : > { %2103 = vmatpush1.bf16.msra.mxu0 %v9789_v16  ;;  %6927 = vmatpush3.bf16.msra.mxu1 %v9794_v17  ;;  %v9820_v17 = vld [vmem:[%s14234_s30 + $0x8] ss:$12 sps:$4 sm:$0xff]  }
 0x294   : > { %2201 = vmatprep.subr.bf16.mxu0 %v9807_v39  ;;  %6932 = vmatprep.subr.bf16.mxu1 %v14258_v36  ;;  %14317 = vst [vmem:[#allocation87_spill] sm:$0xff] %v9820_v17  ;;  %v9826_v39 = vld [vmem:[%s14234_s30 + $0x1c] ss:$12 sps:$4 sm:$0xff]  }
 0x295   : > { %14318 = vst [vmem:[#allocation88_spill] sm:$0xff] %v9826_v39 }
 0x296   : > { %2121 = vmatmul.mubr.bf16.vlgmr.msra.gmra.mrb[24].mxu0 %v1959_v26  ;;  %6929 = vmatmul.mubr.bf16.vlgmr.msra.gmra.mrb[24].mxu1 %v1959_v26  ;;  %v9836_v26 = vld [vmem:[%s14234_s30 + $0x18] ss:$12 sps:$4 sm:$0xff]  }
 0x297   : > { %2202 = vmatpush1.bf16.msra.mxu0 %v9814_v13  ;;  %6933 = vmatpush3.bf16.msra.mxu1 %v9820_v17  ;;  %14319 = vst [vmem:[#allocation89_spill] sm:$0xff] %v9836_v26  ;;  %v9842_v17 = vld [vmem:[%s14234_s30 + $0x20] ss:$12 sps:$4 sm:$0xff]  }
 0x298   : > { %2203 = vmatprep.subr.bf16.mxu0 %v9826_v39  ;;  %6934 = vmatprep.subr.bf16.mxu1 %v14258_v36  ;;  %14320 = vst [vmem:[#allocation90_spill] sm:$0xff] %v9842_v17  ;;  %v9848_v39 = vld [vmem:[%s14234_s30 + $0x34] ss:$12 sps:$4 sm:$0xff]  }
 0x299   : > { %2233 = vmatprep.mubr.bf16.mxu0 %v14259_v42  ;;  %6948 = vmatprep.mubr.msk.bf16.mxu1 %vm8807_vm2, %v14258_v36  ;;  %14321 = vst [vmem:[#allocation91_spill] sm:$0xff] %v9848_v39 }
 0x29b   : > { %2204 = vmatpush1.bf16.msra.mxu0 %v9836_v26  ;;  %6935 = vmatpush3.bf16.msra.mxu1 %v9842_v17  ;;  %v9855_v26 = vld [vmem:[%s14234_s30 + $0x30] ss:$12 sps:$4 sm:$0xff]   ;;  %v9861_v17 = vld [vmem:[%s14234_s30 + $0x38] ss:$12 sps:$4 sm:$0xff]  }
 0x29c   : > { %2205 = vmatprep.subr.bf16.mxu0 %v9848_v39  ;;  %6936 = vmatprep.subr.bf16.mxu1 %v14258_v36  ;;  %14322 = vst [vmem:[#allocation92_spill] sm:$0xff] %v9855_v26  ;;  %14323 = vst [vmem:[#allocation93_spill] sm:$0xff] %v9861_v17  ;;  %v9867_v39 = vld [vmem:[%s14234_s30 + $0x4c] ss:$12 sps:$4 sm:$0xff]  }
 0x29d   : > { %14324 = vst [vmem:[#allocation94_spill] sm:$0xff] %v9867_v39 }
 0x29f   : > { %2206 = vmatpush1.bf16.msra.mxu0 %v9855_v26  ;;  %6937 = vmatpush3.bf16.msra.mxu1 %v9861_v17  ;;  %v9874_v26 = vld [vmem:[%s14234_s30 + $0x48] ss:$12 sps:$4 sm:$0xff]   ;;  %v9880_v17 = vld [vmem:[%s14234_s30 + $0x50] ss:$12 sps:$4 sm:$0xff]  }
 0x2a0   : > { %2207 = vmatprep.subr.bf16.mxu0 %v9867_v39  ;;  %6938 = vmatprep.subr.bf16.mxu1 %v14258_v36  ;;  %14325 = vst [vmem:[#allocation95_spill] sm:$0xff] %v9874_v26  ;;  %14326 = vst [vmem:[#allocation96_spill] sm:$0xff] %v9880_v17  ;;  %v9886_v39 = vld [vmem:[%s14234_s30 + $0x64] ss:$12 sps:$4 sm:$0xff]  }
 0x2a1   : > { %14327 = vst [vmem:[#allocation97_spill] sm:$0xff] %v9886_v39 }
 0x2a3   : > { %2208 = vmatpush1.bf16.msra.mxu0 %v9874_v26  ;;  %6939 = vmatpush3.bf16.msra.mxu1 %v9880_v17  ;;  %v9893_v26 = vld [vmem:[%s14234_s30 + $0x60] ss:$12 sps:$4 sm:$0xff]   ;;  %v9899_v17 = vld [vmem:[%s14234_s30 + $0x68] ss:$12 sps:$4 sm:$0xff]  }
 0x2a4   : > { %2209 = vmatprep.subr.bf16.mxu0 %v9886_v39  ;;  %6940 = vmatprep.subr.bf16.mxu1 %v14258_v36  ;;  %14328 = vst [vmem:[#allocation98_spill] sm:$0xff] %v9893_v26  ;;  %14329 = vst [vmem:[#allocation99_spill] sm:$0xff] %v9899_v17  ;;  %v9905_v39 = vld [vmem:[%s14234_s30 + $0x7c] ss:$12 sps:$4 sm:$0xff]  }
 0x2a5   : > { %14330 = vst [vmem:[#allocation100_spill] sm:$0xff] %v9905_v39 }
 0x2a7   : > { %2210 = vmatpush1.bf16.msra.mxu0 %v9893_v26  ;;  %6941 = vmatpush3.bf16.msra.mxu1 %v9899_v17  ;;  %v9912_v26 = vld [vmem:[%s14234_s30 + $0x78] ss:$12 sps:$4 sm:$0xff]   ;;  %v9918_v17 = vld [vmem:[%s14234_s30 + $0x80] ss:$12 sps:$4 sm:$0xff]  }
 0x2a8   : > { %2211 = vmatprep.subr.bf16.mxu0 %v9905_v39  ;;  %6942 = vmatprep.subr.bf16.mxu1 %v14258_v36  ;;  %14331 = vst [vmem:[#allocation101_spill] sm:$0xff] %v9912_v26  ;;  %14332 = vst [vmem:[#allocation102_spill] sm:$0xff] %v9918_v17  ;;  %v9924_v39 = vld [vmem:[%s14234_s30 + $0x94] ss:$12 sps:$4 sm:$0xff]  }
 0x2a9   : > { %14333 = vst [vmem:[#allocation103_spill] sm:$0xff] %v9924_v39 }
 0x2ab   : > { %2212 = vmatpush1.bf16.msra.mxu0 %v9912_v26  ;;  %6943 = vmatpush3.bf16.msra.mxu1 %v9918_v17  ;;  %v9931_v26 = vld [vmem:[%s14234_s30 + $0x90] ss:$12 sps:$4 sm:$0xff]   ;;  %v9938_v17 = vld [vmem:[%s14234_s30 + $0xac] ss:$12 sps:$4 sm:$0xff]  }
 0x2ac   : > { %2213 = vmatprep.subr.bf16.mxu0 %v9924_v39  ;;  %6944 = vmatprep.subr.bf16.mxu1 %v14258_v36  ;;  %v9945_v39 = vld [vmem:[%s14234_s30 + $0xa8] ss:$12 sps:$4 sm:$0xff]  }
 0x2af   : > { %2214 = vmatpush1.bf16.msra.mxu0 %v9931_v26  ;;  %6945 = vmatpush3.bf16.msra.mxu1 %v9051_v46 }
 0x2b0   : > { %2215 = vmatprep.subr.bf16.mxu0 %v9938_v17  ;;  %6946 = vmatprep.subr.bf16.mxu1 %v14258_v36 }
 0x2b3   : > { %2216 = vmatpush1.bf16.msra.mxu0 %v9945_v39  ;;  %6947 = vmatpush3.bf16.msra.mxu1 %v9057_v47 }
 0x2b4   : > { %2304 = vmatprep.subr.bf16.mxu0 %v9069_v48  ;;  %6952 = vmatprep.subr.bf16.mxu1 %v14258_v36 }
 0x2b6   : > { %2234 = vmatmul.mubr.bf16.vlgmr.msra.gmra.mrb[28].mxu0 %v9314_v31  ;;  %6949 = vmatmul.mubr.bf16.vlgmr.msra.gmra.mrb[28].mxu1 %v9314_v31 }
 0x2b7   : > { %2305 = vmatpush1.bf16.msra.mxu0 %v9074_v49  ;;  %6953 = vmatpush3.bf16.msra.mxu1 %v9080_v50  ;;  %v992_v50 = vld [vmem:[%s13930_s10] sm:$0x7] }
 0x2b8   : > { %2306 = vmatprep.subr.bf16.mxu0 %v9085_v51  ;;  %6954 = vmatprep.subr.bf16.mxu1 %v14258_v36  ;;  %v9992_v51 = vrot.slane %v992_v50, %v9227_v12  ;;  %v10518_v12 = vld [vmem:[%s13927_s7 + $0xa8] ss:$12 sps:$4 sm:$0xff]  }
 0x2b9   : > { %2336 = vmatprep.mubr.bf16.mxu0 %v14259_v42  ;;  %6968 = vmatprep.mubr.msk.bf16.mxu1 %vm8807_vm2, %v14258_v36 }
 0x2bb   : > { %2307 = vmatpush1.bf16.msra.mxu0 %v9093_v52  ;;  %6955 = vmatpush3.bf16.msra.mxu1 %v9099_v53 }
 0x2bc   : > { %2308 = vmatprep.subr.bf16.mxu0 %v9106_v54  ;;  %6956 = vmatprep.subr.bf16.mxu1 %v14258_v36 }
 0x2bf   : > { %2309 = vmatpush1.bf16.msra.mxu0 %v9111_v55  ;;  %6957 = vmatpush3.bf16.msra.mxu1 %v9118_v56 }
 0x2c0   : > { %2310 = vmatprep.subr.bf16.mxu0 %v9125_v57  ;;  %6958 = vmatprep.subr.bf16.mxu1 %v14258_v36 }
 0x2c3   : > { %2311 = vmatpush1.bf16.msra.mxu0 %v9130_v58  ;;  %6959 = vmatpush3.bf16.msra.mxu1 %v9137_v59 }
 0x2c4   : > { %2312 = vmatprep.subr.bf16.mxu0 %v9144_v60  ;;  %6960 = vmatprep.subr.bf16.mxu1 %v14258_v36 }
 0x2c7   : > { %2313 = vmatpush1.bf16.msra.mxu0 %v9149_v61  ;;  %6961 = vmatpush3.bf16.msra.mxu1 %v9154_v62  ;;  %v9996_v62 = vrot.slane %v992_v50, %v9233_v14  ;;  %v10511_v14 = vld [vmem:[%s13927_s7 + $0xac] ss:$12 sps:$4 sm:$0xff]  }
 0x2c8   : > { %2314 = vmatprep.subr.bf16.mxu0 %v9160_v63  ;;  %6962 = vmatprep.subr.bf16.mxu1 %v14258_v36 }
 0x2cb   : > { %2315 = vmatpush1.bf16.msra.mxu0 %v9167_v0  ;;  %6963 = vmatpush3.bf16.msra.mxu1 %v9174_v1 }
 0x2cc   : > { %2316 = vmatprep.subr.bf16.mxu0 %v9179_v2  ;;  %6964 = vmatprep.subr.bf16.mxu1 %v14258_v36 }
 0x2cf   : > { %2317 = vmatpush1.bf16.msra.mxu0 %v9186_v3  ;;  %6965 = vmatpush3.bf16.msra.mxu1 %v9193_v4  ;;  %v10002_v3 = vld [vmem:[%s13932_s12] ss:$0 sm:$0xff]  ;;  %v10005_v4 = vrot.slane %v992_v50, %v9237_v18  ;;  %v10505_v18 = vld [vmem:[%s13927_s7 + $0x98] ss:$12 sps:$4 sm:$0xff]  }
 0x2d0   : > { %2318 = vmatprep.subr.bf16.mxu0 %v9198_v5  ;;  %6966 = vmatprep.subr.bf16.mxu1 %v14258_v36 }
 0x2d3   : > { %2319 = vmatpush1.bf16.msra.mxu0 %v9205_v6  ;;  %6967 = vmatpush3.bf16.msra.mxu1 %v9212_v8 }
 0x2d4   : > { %2385 = vmatprep.subr.bf16.mxu0 %v9217_v9  ;;  %6972 = vmatprep.subr.bf16.mxu1 %v14258_v36 }
 0x349   : > { %v1953_v46 = vpop.f32.mrb[20].mxu1 }
 0x34a   : > { %v6910_v47 = vpop.f32.mrb[21].mxu1  ;;  %v1954_v9 = vadd.f32 %v1953_v46, %v10005_v4 }
 0x34b   : > { %v1956_v48 = vpop.f32.mrb[22].mxu1 }
 0x34c   : > { %v6911_v49 = vpop.f32.mrb[23].mxu1 }
 0x369   : > { %v2122_v52 = vpop.f32.mrb[24].mxu0  ;;  %v2163_v53 = vpop.f32.mrb[24].mxu1 }
 0x36a   : > { %v7858_v54 = vadd.f32 %v2122_v52, %v9992_v51  ;;  %v2124_v55 = vpop.f32.mrb[25].mxu0  ;;  %v6930_v56 = vpop.f32.mrb[25].mxu1  ;;  %v2189_v5 = vadd.f32 %v10002_v3, %v2163_v53 }
 0x36b   : > { %v2126_v57 = vpop.f32.mrb[26].mxu0  ;;  %v2166_v58 = vpop.f32.mrb[26].mxu1  ;;  %v7859_v63 = vadd.f32 %v2124_v55, %v9996_v62 }
 0x36c   : > { %v6372_v59 = vmul.f32 -1.442695, %v7858_v54  ;;  %v2127_v60 = vpop.f32.mrb[27].mxu0  ;;  %v6931_v61 = vpop.f32.mrb[27].mxu1 }
 0x36d   : > { %v6373_v0 = vmul.f32 -1.442695, %v7859_v63 }
 0x36e   : > { %8169 = vpow2.f32 %v6372_v59 }
 0x36f   : > { %8171 = vpow2.f32 %v6373_v0 }
 0x378   : > { %v8170_v1 = vpop.eup %8169 }
 0x379   : > { %v2173_v2 = vadd.f32 1.0, %v8170_v1  ;;  %v8172_v6 = vpop.eup %8171 }
 0x37a   : > { %v2180_v47 = vadd.f32 1.0, %v8172_v6 }
 0x37b   : > { %8173 = vrcp.f32 %v2173_v2 }
 0x385   : > { %v8174_v8 = vpop.eup %8173 }
 0x386   : > { %v2190_v31 = vmul.f32 %v8174_v8, %v2189_v5 }
 0x388   : > { %v2191_v48 = vadd.f32 %v2190_v31, %v1954_v9 }
 0x389   : > { %v2235_v49 = vpop.f32.mrb[28].mxu0  ;;  %v2276_v52 = vpop.f32.mrb[28].mxu1 }
 0x38a   : > { %8175 = vtanh.f32 %v2191_v48  ;;  %v2282_v54 = vadd.f32 %v2235_v49, %v9240_v21  ;;  %v2237_v55 = vpop.f32.mrb[29].mxu0  ;;  %v6950_v56 = vpop.f32.mrb[29].mxu1  ;;  %v2296_v6 = vadd.f32 %v9295_v15, %v2276_v52  ;;  %v14336_v15 = vld [vmem:[#allocation31_spill] sm:$0xff]  ;;  %v14345_v52 = vld [vmem:[#allocation40_spill] sm:$0xff] }
 0x38b   : > { %v2289_v57 = vadd.f32 %v2237_v55, %v9242_v23  ;;  %v2239_v50 = vpop.f32.mrb[30].mxu0  ;;  %v2279_v58 = vpop.f32.mrb[30].mxu1  ;;  %8177 = vrcp.f32 %v2180_v47 }
 0x38c   : > { %v6375_v53 = vmul.f32 -1.442695, %v2282_v54  ;;  %v2240_v59 = vpop.f32.mrb[31].mxu0  ;;  %v6951_v60 = vpop.f32.mrb[31].mxu1  ;;  %v14347_v50 = vld [vmem:[#allocation42_spill] sm:$0xff]  ;;  %v14348_v58 = vld [vmem:[#allocation43_spill] sm:$0xff] }
 0x38d   : > { %v6376_v0 = vmul.f32 -1.442695, %v2289_v57  ;;  %v14346_v57 = vld [vmem:[#allocation41_spill] sm:$0xff]  ;;  %v14351_v60 = vld [vmem:[#allocation46_spill] sm:$0xff] }
 0x38e   : > { %8179 = vpow2.f32 %v6375_v53  ;;  %v14349_v53 = vld [vmem:[#allocation44_spill] sm:$0xff]  ;;  %v14350_v59 = vld [vmem:[#allocation45_spill] sm:$0xff]  ;;  %14428 = vst [vmem:[#allocation46_spill] sm:$0xff] %v10518_v12 }
 0x38f   : > { %8181 = vpow2.f32 %v6376_v0  ;;  %v14355_v0 = vld [vmem:[#allocation50_spill] sm:$0xff]  ;;  %14426 = vst [vmem:[#allocation44_spill] sm:$0xff] %v10505_v18  ;;  %14427 = vst [vmem:[#allocation45_spill] sm:$0xff] %v10511_v14 }
 0x394   : > { %v8176_v46 = vpop.eup %8175 }
 0x395   : > { %v2193_v61 = vsub.f32 %v9796_v24, %v8176_v46  ;;  %v8178_v63 = vpop.eup %8177 }
 0x397   : > { %v2194_v1 = vmul.f32 %v8178_v63, %v2193_v61  ;;  %v14353_v61 = vld [vmem:[#allocation48_spill] sm:$0xff]  ;;  %v14354_v63 = vld [vmem:[#allocation49_spill] sm:$0xff] }
 0x398   : > { %v8180_v2 = vpop.eup %8179 }
 0x399   : > { %v2286_v5 = vadd.f32 1.0, %v8180_v2  ;;  %v10012_v21 = vadd.f32 %v8176_v46, %v2194_v1  ;;  %v8182_v23 = vpop.eup %8181  ;;  %v14352_v46 = vld [vmem:[#allocation47_spill] sm:$0xff]  ;;  %v14357_v2 = vld [vmem:[#allocation52_spill] sm:$0xff] }
 0x39a   : > { %v2293_v47 = vadd.f32 1.0, %v8182_v23  ;;  %v14356_v1 = vld [vmem:[#allocation51_spill] sm:$0xff] }
 0x39b   : > { %14334 = vst [vmem:[#allocation104_spill] sm:$0xff] %v10012_v21  ;;  %8183 = vrcp.f32 %v2286_v5  ;;  %v14359_v5 = vld [vmem:[#allocation54_spill] sm:$0xff]  ;;  %v14360_v23 = vld [vmem:[#allocation55_spill] sm:$0xff] }
 0x3a5   : > { %v8184_v8 = vpop.eup %8183 }
 0x3a6   : > { %v2297_v9 = vmul.f32 %v8184_v8, %v2296_v6  ;;  %v14361_v6 = vld [vmem:[#allocation56_spill] sm:$0xff]  ;;  %v14362_v8 = vld [vmem:[#allocation57_spill] sm:$0xff] }
 0x3a8   : > { %v2298_v31 = vadd.f32 %v2297_v9, %v9262_v40  ;;  %v14335_v40 = vld [vmem:[#allocation30_spill] sm:$0xff] }
 0x3a9   : > { %v14363_v9 = vld [vmem:[#allocation58_spill] sm:$0xff] }
 0x3aa   : > { %8185 = vtanh.f32 %v2298_v31  ;;  %v14364_v31 = vld [vmem:[#allocation59_spill] sm:$0xff] }
 0x3ab   : > { %8187 = vrcp.f32 %v2293_v47  ;;  %v14365_v47 = vld [vmem:[#allocation60_spill] sm:$0xff] }
 0x3b4   : > { %v8186_v24 = vpop.eup %8185 }
 0x3b5   : > { %v2300_v48 = vsub.f32 %v9300_v41, %v8186_v24  ;;  %v8188_v49 = vpop.eup %8187  ;;  %v14337_v41 = vld [vmem:[#allocation32_spill] sm:$0xff] }
 0x3b7   : > { %v2301_v54 = vmul.f32 %v8188_v49, %v2300_v48  ;;  %v14367_v48 = vld [vmem:[#allocation62_spill] sm:$0xff]  ;;  %v14368_v49 = vld [vmem:[#allocation63_spill] sm:$0xff] }
 0x3b9   : > { %v10017_v55 = vadd.f32 %v8186_v24, %v2301_v54  ;;  %v14366_v24 = vld [vmem:[#allocation61_spill] sm:$0xff]  ;;  %v14369_v54 = vld [vmem:[#allocation64_spill] sm:$0xff] }
 0x3bb   : > { %v10021_v56 = vpack.c.bf16 %v10017_v55, %v10017_v55 }
 0x3bd   : > { %2337 = vmatmul.mubr.bf16.vlgmr.msra.gmra.mrb[32].mxu0 %v10021_v56  ;;  %6969 = vmatmul.mubr.bf16.vlgmr.msra.gmra.mrb[32].mxu1 %v10021_v56 }
 0x3be   : > { %2386 = vmatpush1.bf16.msra.mxu0 %v9305_v45  ;;  %6973 = vmatpush3.bf16.msra.mxu1 %v9310_v25  ;;  %v14338_v45 = vld [vmem:[#allocation33_spill] sm:$0xff]  ;;  %v14339_v25 = vld [vmem:[#allocation34_spill] sm:$0xff] }
 0x3bf   : > { %2387 = vmatprep.subr.bf16.mxu0 %v9319_v43  ;;  %6974 = vmatprep.subr.bf16.mxu1 %v14258_v36  ;;  %v14340_v43 = vld [vmem:[#allocation35_spill] sm:$0xff] }
 0x3c0   : > { %2417 = vmatprep.mubr.bf16.mxu0 %v14259_v42  ;;  %6988 = vmatprep.mubr.msk.bf16.mxu1 %vm8807_vm2, %v14258_v36 }
 0x3c2   : > { %2388 = vmatpush1.bf16.msra.mxu0 %v9327_v22  ;;  %6975 = vmatpush3.bf16.msra.mxu1 %v9333_v27  ;;  %v14341_v22 = vld [vmem:[#allocation36_spill] sm:$0xff]  ;;  %v14342_v27 = vld [vmem:[#allocation37_spill] sm:$0xff] }
 0x3c3   : > { %2389 = vmatprep.subr.bf16.mxu0 %v9339_v33  ;;  %6976 = vmatprep.subr.bf16.mxu1 %v14258_v36  ;;  %v14343_v33 = vld [vmem:[#allocation38_spill] sm:$0xff] }
 0x3c6   : > { %2390 = vmatpush1.bf16.msra.mxu0 %v9349_v7  ;;  %6977 = vmatpush3.bf16.msra.mxu1 %v14335_v40  ;;  %v14344_v7 = vld [vmem:[#allocation39_spill] sm:$0xff]  ;;  %v14370_v40 = vld [vmem:[#allocation65_spill] sm:$0xff] }
 0x3c7   : > { %2391 = vmatprep.subr.bf16.mxu0 %v14336_v15  ;;  %6978 = vmatprep.subr.bf16.mxu1 %v14258_v36  ;;  %v14371_v15 = vld [vmem:[#allocation66_spill] sm:$0xff] }
 0x3ca   : > { %2392 = vmatpush1.bf16.msra.mxu0 %v14337_v41  ;;  %6979 = vmatpush3.bf16.msra.mxu1 %v14338_v45  ;;  %v14372_v41 = vld [vmem:[#allocation67_spill] sm:$0xff]  ;;  %v14373_v45 = vld [vmem:[#allocation68_spill] sm:$0xff] }
 0x3cb   : > { %2393 = vmatprep.subr.bf16.mxu0 %v14339_v25  ;;  %6980 = vmatprep.subr.bf16.mxu1 %v14258_v36  ;;  %v14374_v25 = vld [vmem:[#allocation69_spill] sm:$0xff] }
 0x3ce   : > { %2394 = vmatpush1.bf16.msra.mxu0 %v14340_v43  ;;  %6981 = vmatpush3.bf16.msra.mxu1 %v14341_v22  ;;  %v14375_v43 = vld [vmem:[#allocation70_spill] sm:$0xff] }
 0x3cf   : > { %2395 = vmatprep.subr.bf16.mxu0 %v14342_v27  ;;  %6982 = vmatprep.subr.bf16.mxu1 %v14258_v36 }
 0x3d2   : > { %2396 = vmatpush1.bf16.msra.mxu0 %v14343_v33  ;;  %6983 = vmatpush3.bf16.msra.mxu1 %v14344_v7 }
 0x3d3   : > { %2397 = vmatprep.subr.bf16.mxu0 %v14345_v52  ;;  %6984 = vmatprep.subr.bf16.mxu1 %v14258_v36 }
 0x3d6   : > { %2398 = vmatpush1.bf16.msra.mxu0 %v14346_v57  ;;  %6985 = vmatpush3.bf16.msra.mxu1 %v14347_v50 }
 0x3d7   : > { %2399 = vmatprep.subr.bf16.mxu0 %v14348_v58  ;;  %6986 = vmatprep.subr.bf16.mxu1 %v14258_v36 }
 0x3da   : > { %2400 = vmatpush1.bf16.msra.mxu0 %v14349_v53  ;;  %6987 = vmatpush3.bf16.msra.mxu1 %v14350_v59 }
 0x3db   : > { %2488 = vmatprep.subr.bf16.mxu0 %v14351_v60  ;;  %6992 = vmatprep.subr.bf16.mxu1 %v14258_v36 }
 0x3dd   : > { %2418 = vmatmul.mubr.bf16.vlgmr.msra.gmra.mrb[32].mxu0 %v9658_v32  ;;  %6989 = vmatmul.mubr.bf16.vlgmr.msra.gmra.mrb[36].mxu1 %v9658_v32  ;;  %v14358_v32 = vld [vmem:[#allocation53_spill] sm:$0xff] }
 0x3de   : > { %2489 = vmatpush1.bf16.msra.mxu0 %v14352_v46  ;;  %6993 = vmatpush3.bf16.msra.mxu1 %v14353_v61 }
 0x3df   : > { %2490 = vmatprep.subr.bf16.mxu0 %v14354_v63  ;;  %6994 = vmatprep.subr.bf16.mxu1 %v14258_v36 }
 0x3e0   : > { %2520 = vmatprep.mubr.bf16.mxu0 %v14259_v42  ;;  %7008 = vmatprep.mubr.msk.bf16.mxu1 %vm8807_vm2, %v14258_v36 }
 0x3e2   : > { %2491 = vmatpush1.bf16.msra.mxu0 %v14355_v0  ;;  %6995 = vmatpush3.bf16.msra.mxu1 %v14356_v1  ;;  %v14376_v0 = vld [vmem:[#allocation71_spill] sm:$0xff] }
 0x3e3   : > { %2492 = vmatprep.subr.bf16.mxu0 %v14357_v2  ;;  %6996 = vmatprep.subr.bf16.mxu1 %v14258_v36 }
 0x3e6   : > { %2493 = vmatpush1.bf16.msra.mxu0 %v14358_v32  ;;  %6997 = vmatpush3.bf16.msra.mxu1 %v14359_v5 }
 0x3e7   : > { %2494 = vmatprep.subr.bf16.mxu0 %v14360_v23  ;;  %6998 = vmatprep.subr.bf16.mxu1 %v14258_v36 }
 0x3ea   : > { %2495 = vmatpush1.bf16.msra.mxu0 %v14361_v6  ;;  %6999 = vmatpush3.bf16.msra.mxu1 %v14362_v8 }
 0x3eb   : > { %2496 = vmatprep.subr.bf16.mxu0 %v14363_v9  ;;  %7000 = vmatprep.subr.bf16.mxu1 %v14258_v36 }
 0x3ee   : > { %2497 = vmatpush1.bf16.msra.mxu0 %v14364_v31  ;;  %7001 = vmatpush3.bf16.msra.mxu1 %v14365_v47 }
 0x3ef   : > { %2498 = vmatprep.subr.bf16.mxu0 %v14366_v24  ;;  %7002 = vmatprep.subr.bf16.mxu1 %v14258_v36 }
 0x3f2   : > { %2499 = vmatpush1.bf16.msra.mxu0 %v14367_v48  ;;  %7003 = vmatpush3.bf16.msra.mxu1 %v14368_v49 }
 0x3f3   : > { %2500 = vmatprep.subr.bf16.mxu0 %v14369_v54  ;;  %7004 = vmatprep.subr.bf16.mxu1 %v14258_v36 }
 0x3f6   : > { %2501 = vmatpush1.bf16.msra.mxu0 %v14370_v40  ;;  %7005 = vmatpush3.bf16.msra.mxu1 %v14371_v15 }
 0x3f7   : > { %2502 = vmatprep.subr.bf16.mxu0 %v14372_v41  ;;  %7006 = vmatprep.subr.bf16.mxu1 %v14258_v36 }
 0x3fa   : > { %2503 = vmatpush1.bf16.msra.mxu0 %v14373_v45  ;;  %7007 = vmatpush3.bf16.msra.mxu1 %v14374_v25  ;;  %v14387_v45 = vld [vmem:[#allocation82_spill] sm:$0xff]  ;;  %v14388_v25 = vld [vmem:[#allocation83_spill] sm:$0xff] }
 0x3fb   : > { %2570 = vmatprep.subr.bf16.mxu0 %v14375_v43  ;;  %7012 = vmatprep.subr.bf16.mxu1 %v14258_v36  ;;  %v14389_v43 = vld [vmem:[#allocation84_spill] sm:$0xff] }
 0x490   : > { %v2379_v22 = vpop.f32.mrb[32].mxu1 }
 0x491   : > { %v6970_v27 = vpop.f32.mrb[33].mxu1  ;;  %v2380_v9 = vadd.f32 %v2379_v22, %v9639_v28  ;;  %v14390_v22 = vld [vmem:[#allocation85_spill] sm:$0xff] }
 0x492   : > { %v2382_v33 = vpop.f32.mrb[34].mxu1  ;;  %v2569_v27 = vpack.c.bf16 %v10012_v21, %v10012_v21 }
 0x493   : > { %v6971_v7 = vpop.f32.mrb[35].mxu1  ;;  %v14391_v33 = vld [vmem:[#allocation86_spill] sm:$0xff] }
 0x494   : > { %v14392_v7 = vld [vmem:[#allocation87_spill] sm:$0xff] }
 0x4b0   : > { %v2419_v52 = vpop.f32.mrb[32].mxu0  ;;  %v2460_v57 = vpop.f32.mrb[36].mxu1 }
 0x4b1   : > { %v7860_v50 = vadd.f32 %v2419_v52, %v9626_v44  ;;  %v2421_v58 = vpop.f32.mrb[33].mxu0  ;;  %v6990_v53 = vpop.f32.mrb[37].mxu1  ;;  %v2480_v6 = vadd.f32 %v9636_v34, %v2460_v57  ;;  %v14378_v34 = vld [vmem:[#allocation73_spill] sm:$0xff]  ;;  %v14393_v52 = vld [vmem:[#allocation88_spill] sm:$0xff]  ;;  %v14395_v57 = vld [vmem:[#allocation90_spill] sm:$0xff] }
 0x4b2   : > { %v2423_v59 = vpop.f32.mrb[34].mxu0  ;;  %v2463_v60 = vpop.f32.mrb[38].mxu1  ;;  %v7861_v1 = vadd.f32 %v2421_v58, %v14376_v0  ;;  %v14398_v58 = vld [vmem:[#allocation93_spill] sm:$0xff]  ;;  %v14399_v53 = vld [vmem:[#allocation94_spill] sm:$0xff] }
 0x4b3   : > { %v6377_v46 = vmul.f32 -1.442695, %v7860_v50  ;;  %v2424_v61 = vpop.f32.mrb[35].mxu0  ;;  %v6991_v63 = vpop.f32.mrb[39].mxu1  ;;  %v14396_v50 = vld [vmem:[#allocation91_spill] sm:$0xff]  ;;  %v14401_v60 = vld [vmem:[#allocation96_spill] sm:$0xff] }
 0x4b4   : > { %v6378_v2 = vmul.f32 -1.442695, %v7861_v1  ;;  %v14400_v59 = vld [vmem:[#allocation95_spill] sm:$0xff]  ;;  %v14403_v61 = vld [vmem:[#allocation98_spill] sm:$0xff]  ;;  %v14405_v1 = vld [vmem:[#allocation100_spill] sm:$0xff] }
 0x4b5   : > { %8189 = vpow2.f32 %v6377_v46  ;;  %v14402_v46 = vld [vmem:[#allocation97_spill] sm:$0xff]  ;;  %v14404_v63 = vld [vmem:[#allocation99_spill] sm:$0xff] }
 0x4b6   : > { %8191 = vpow2.f32 %v6378_v2  ;;  %v14406_v2 = vld [vmem:[#allocation101_spill] sm:$0xff] }
 0x4bf   : > { %v8190_v32 = vpop.eup %8189 }
 0x4c0   : > { %v2470_v5 = vadd.f32 1.0, %v8190_v32  ;;  %v8192_v23 = vpop.eup %8191  ;;  %v14407_v32 = vld [vmem:[#allocation102_spill] sm:$0xff] }
 0x4c1   : > { %v2477_v24 = vadd.f32 1.0, %v8192_v23  ;;  %v10178_v23 = vld [vmem:[%s14234_s30 + $0x98] ss:$12 sps:$4 sm:$0xff]  }
 0x4c2   : > { %8193 = vrcp.f32 %v2470_v5  ;;  %v14408_v5 = vld [vmem:[#allocation103_spill] sm:$0xff] }
 0x4cc   : > { %v8194_v8 = vpop.eup %8193 }
 0x4cd   : > { %v2481_v31 = vmul.f32 %v8194_v8, %v2480_v6  ;;  %v10187_v6 = vld [vmem:[%s14234_s30 + $0xb0] ss:$12 sps:$4 sm:$0xff]  }
 0x4ce   : > { %v10214_v8 = vld [vmem:[%s13925_s5 + $0x1c] ss:$12 sps:$4 sm:$0xff]  }
 0x4cf   : > { %v2482_v47 = vadd.f32 %v2481_v31, %v2380_v9  ;;  %v10230_v9 = vld [vmem:[%s13925_s5 + $0x20] ss:$12 sps:$4 sm:$0xff]  }
 0x4d0   : > { %v10236_v31 = vld [vmem:[%s13925_s5 + $0x34] ss:$12 sps:$4 sm:$0xff]  }
 0x4d1   : > { %8195 = vtanh.f32 %v2482_v47  ;;  %v10243_v47 = vld [vmem:[%s13925_s5 + $0x30] ss:$12 sps:$4 sm:$0xff]  }
 0x4d2   : > { %8197 = vrcp.f32 %v2477_v24  ;;  %v10249_v24 = vld [vmem:[%s13925_s5 + $0x38] ss:$12 sps:$4 sm:$0xff]  }
 0x4db   : > { %v8196_v48 = vpop.eup %8195 }
 0x4dc   : > { %v2484_v49 = vsub.f32 %v9644_v11, %v8196_v48  ;;  %v8198_v54 = vpop.eup %8197  ;;  %v14377_v11 = vld [vmem:[#allocation72_spill] sm:$0xff] }
 0x4de   : > { %v2485_v40 = vmul.f32 %v8198_v54, %v2484_v49  ;;  %v10262_v49 = vld [vmem:[%s13925_s5 + $0x48] ss:$12 sps:$4 sm:$0xff]   ;;  %v10268_v54 = vld [vmem:[%s13925_s5 + $0x50] ss:$12 sps:$4 sm:$0xff]  }
 0x4e0   : > { %v10102_v15 = vadd.f32 %v8196_v48, %v2485_v40  ;;  %v10255_v48 = vld [vmem:[%s13925_s5 + $0x4c] ss:$12 sps:$4 sm:$0xff]   ;;  %v10274_v40 = vld [vmem:[%s13925_s5 + $0x64] ss:$12 sps:$4 sm:$0xff]  }
 0x4e2   : > { %v10106_v41 = vpack.c.bf16 %v10102_v15, %v10102_v15 }
 0x4e4   : > { %2521 = vmatmul.mubr.bf16.vlgmr.msra.gmra.mrb[36].mxu0 %v10106_v41  ;;  %7009 = vmatmul.mubr.bf16.vlgmr.msra.gmra.mrb[40].mxu1 %v10106_v41 }
 0x4e5   : > { %2571 = vmatpush1.bf16.msra.mxu0 %v9649_v37  ;;  %7013 = vmatpush3.bf16.msra.mxu1 %v9654_v38  ;;  %v14379_v37 = vld [vmem:[#allocation74_spill] sm:$0xff]  ;;  %v14380_v38 = vld [vmem:[#allocation75_spill] sm:$0xff] }
 0x4e6   : > { %2572 = vmatprep.subr.bf16.mxu0 %v9663_v35  ;;  %7014 = vmatprep.subr.bf16.mxu1 %v14258_v36  ;;  %v14381_v35 = vld [vmem:[#allocation76_spill] sm:$0xff] }
 0x4e7   : > { %2602 = vmatprep.mubr.bf16.mxu0 %v14259_v42  ;;  %7028 = vmatprep.mubr.msk.bf16.mxu1 %vm8807_vm2, %v14258_v36 }
 0x4e9   : > { %2573 = vmatpush1.bf16.msra.mxu0 %v9672_v10  ;;  %7015 = vmatpush3.bf16.msra.mxu1 %v9677_v19  ;;  %v14382_v10 = vld [vmem:[#allocation77_spill] sm:$0xff]  ;;  %v14383_v19 = vld [vmem:[#allocation78_spill] sm:$0xff] }
 0x4ea   : > { %2574 = vmatprep.subr.bf16.mxu0 %v9684_v20  ;;  %7016 = vmatprep.subr.bf16.mxu1 %v14258_v36  ;;  %v14384_v20 = vld [vmem:[#allocation79_spill] sm:$0xff] }
 0x4ed   : > { %2575 = vmatpush1.bf16.msra.mxu0 %v9694_v29  ;;  %7017 = vmatpush3.bf16.msra.mxu1 %v9699_v30  ;;  %v14385_v29 = vld [vmem:[#allocation80_spill] sm:$0xff]  ;;  %v14386_v30 = vld [vmem:[#allocation81_spill] sm:$0xff] }
 0x4ee   : > { %2576 = vmatprep.subr.bf16.mxu0 %v14377_v11  ;;  %7018 = vmatprep.subr.bf16.mxu1 %v14258_v36  ;;  %v10281_v11 = vld [vmem:[%s13925_s5 + $0x60] ss:$12 sps:$4 sm:$0xff]  }
 0x4f1   : > { %2577 = vmatpush1.bf16.msra.mxu0 %v14378_v34  ;;  %7019 = vmatpush3.bf16.msra.mxu1 %v14379_v37  ;;  %v10287_v34 = vld [vmem:[%s13925_s5 + $0x68] ss:$12 sps:$4 sm:$0xff]  }
 0x4f2   : > { %2578 = vmatprep.subr.bf16.mxu0 %v14380_v38  ;;  %7020 = vmatprep.subr.bf16.mxu1 %v14258_v36  ;;  %v10293_v37 = vld [vmem:[%s13925_s5 + $0x7c] ss:$12 sps:$4 sm:$0xff]   ;;  %v10300_v38 = vld [vmem:[%s13925_s5 + $0x78] ss:$12 sps:$4 sm:$0xff]  }
 0x4f5   : > { %2579 = vmatpush1.bf16.msra.mxu0 %v14381_v35  ;;  %7021 = vmatpush3.bf16.msra.mxu1 %v14382_v10  ;;  %v10306_v35 = vld [vmem:[%s13925_s5 + $0x80] ss:$12 sps:$4 sm:$0xff]  }
 0x4f6   : > { %2580 = vmatprep.subr.bf16.mxu0 %v14383_v19  ;;  %7022 = vmatprep.subr.bf16.mxu1 %v14258_v36  ;;  %v10312_v10 = vld [vmem:[%s13925_s5 + $0x94] ss:$12 sps:$4 sm:$0xff]   ;;  %v10319_v19 = vld [vmem:[%s13925_s5 + $0x90] ss:$12 sps:$4 sm:$0xff]  }
 0x4f9   : > { %2581 = vmatpush1.bf16.msra.mxu0 %v14384_v20  ;;  %7023 = vmatpush3.bf16.msra.mxu1 %v14385_v29  ;;  %v10325_v20 = vld [vmem:[%s13925_s5 + $0x98] ss:$12 sps:$4 sm:$0xff]  }
 0x4fa   : > { %2582 = vmatprep.subr.bf16.mxu0 %v14386_v30  ;;  %7024 = vmatprep.subr.bf16.mxu1 %v14258_v36  ;;  %v10331_v29 = vld [vmem:[%s13925_s5 + $0xac] ss:$12 sps:$4 sm:$0xff]   ;;  %v10338_v30 = vld [vmem:[%s13925_s5 + $0xa8] ss:$12 sps:$4 sm:$0xff]  }
 0x4fd   : > { %2583 = vmatpush1.bf16.msra.mxu0 %v14387_v45  ;;  %7025 = vmatpush3.bf16.msra.mxu1 %v14388_v25  ;;  %v10344_v45 = vld [vmem:[%s13925_s5 + $0xb0] ss:$12 sps:$4 sm:$0xff]  }
 0x4fe   : > { %2584 = vmatprep.subr.bf16.mxu0 %v14389_v43  ;;  %7026 = vmatprep.subr.bf16.mxu1 %v14258_v36  ;;  %v10350_v25 = vld [vmem:[%s13927_s7 + $0x4] ss:$12 sps:$4 sm:$0xff]  }
 0x501   : > { %2585 = vmatpush1.bf16.msra.mxu0 %v9789_v16  ;;  %7027 = vmatpush3.bf16.msra.mxu1 %v14390_v22  ;;  %v14394_v16 = vld [vmem:[#allocation89_spill] sm:$0xff] }
 0x502   : > { %2677 = vmatprep.subr.bf16.mxu0 %v14391_v33  ;;  %7032 = vmatprep.subr.bf16.mxu1 %v14258_v36 }
 0x504   : > { %2603 = vmatmul.mubr.bf16.vlgmr.msra.gmra.mrb[36].mxu0 %v2569_v27  ;;  %7029 = vmatmul.mubr.bf16.vlgmr.msra.gmra.mrb[44].mxu1 %v2569_v27 }
 0x505   : > { %2678 = vmatpush1.bf16.msra.mxu0 %v9814_v13  ;;  %7033 = vmatpush3.bf16.msra.mxu1 %v14392_v7  ;;  %v14397_v13 = vld [vmem:[#allocation92_spill] sm:$0xff] }
 0x506   : > { %2679 = vmatprep.subr.bf16.mxu0 %v14393_v52  ;;  %7034 = vmatprep.subr.bf16.mxu1 %v14258_v36 }
 0x507   : > { %2709 = vmatprep.mubr.bf16.mxu0 %v14259_v42  ;;  %7048 = vmatprep.mubr.msk.bf16.mxu1 %vm8807_vm2, %v14258_v36 }
 0x509   : > { %2680 = vmatpush1.bf16.msra.mxu0 %v14394_v16  ;;  %7035 = vmatpush3.bf16.msra.mxu1 %v14395_v57 }
 0x50a   : > { %2681 = vmatprep.subr.bf16.mxu0 %v14396_v50  ;;  %7036 = vmatprep.subr.bf16.mxu1 %v14258_v36 }
 0x50d   : > { %2682 = vmatpush1.bf16.msra.mxu0 %v14397_v13  ;;  %7037 = vmatpush3.bf16.msra.mxu1 %v14398_v58 }
 0x50e   : > { %2683 = vmatprep.subr.bf16.mxu0 %v14399_v53  ;;  %7038 = vmatprep.subr.bf16.mxu1 %v14258_v36 }
 0x511   : > { %2684 = vmatpush1.bf16.msra.mxu0 %v14400_v59  ;;  %7039 = vmatpush3.bf16.msra.mxu1 %v14401_v60 }
 0x512   : > { %2685 = vmatprep.subr.bf16.mxu0 %v14402_v46  ;;  %7040 = vmatprep.subr.bf16.mxu1 %v14258_v36 }
 0x515   : > { %2686 = vmatpush1.bf16.msra.mxu0 %v14403_v61  ;;  %7041 = vmatpush3.bf16.msra.mxu1 %v14404_v63 }
 0x516   : > { %2687 = vmatprep.subr.bf16.mxu0 %v14405_v1  ;;  %7042 = vmatprep.subr.bf16.mxu1 %v14258_v36 }
 0x519   : > { %2688 = vmatpush1.bf16.msra.mxu0 %v14406_v2  ;;  %7043 = vmatpush3.bf16.msra.mxu1 %v14407_v32 }
 0x51a   : > { %2689 = vmatprep.subr.bf16.mxu0 %v14408_v5  ;;  %7044 = vmatprep.subr.bf16.mxu1 %v14258_v36 }
 0x51d   : > { %2690 = vmatpush1.bf16.msra.mxu0 %v9931_v26  ;;  %7045 = vmatpush3.bf16.msra.mxu1 %v10178_v23  ;;  %v10193_v26 = vld [vmem:[%s13925_s5 + $0x4] ss:$12 sps:$4 sm:$0xff]  }
 0x51e   : > { %2691 = vmatprep.subr.bf16.mxu0 %v9938_v17  ;;  %7046 = vmatprep.subr.bf16.mxu1 %v14258_v36  ;;  %v10208_v17 = vld [vmem:[%s13925_s5 + $0x8] ss:$12 sps:$4 sm:$0xff]  }
 0x521   : > { %2692 = vmatpush1.bf16.msra.mxu0 %v9945_v39  ;;  %7047 = vmatpush3.bf16.msra.mxu1 %v10187_v6  ;;  %v10202_v39 = vld [vmem:[%s13925_s5] ss:$12 sps:$4 sm:$0xff]  }
 0x522   : > { %2780 = vmatprep.subr.bf16.mxu0 %v10193_v26  ;;  %7052 = vmatprep.subr.bf16.mxu1 %v14258_v36 }
 0x524   : > { %2710 = vmatmul.mubr.bf16.vlgmr.msra.gmra.mrb[40].mxu0 %v10021_v56  ;;  %7049 = vmatmul.mubr.bf16.vlgmr.msra.gmra.mrb[48].mxu1 %v10021_v56  ;;  %v10224_v56 = vld [vmem:[%s13925_s5 + $0x18] ss:$12 sps:$4 sm:$0xff]  }
 0x525   : > { %2781 = vmatpush1.bf16.msra.mxu0 %v10202_v39  ;;  %7053 = vmatpush3.bf16.msra.mxu1 %v10208_v17 }
 0x526   : > { %2782 = vmatprep.subr.bf16.mxu0 %v10214_v8  ;;  %7054 = vmatprep.subr.bf16.mxu1 %v14258_v36 }
 0x527   : > { %2812 = vmatprep.mubr.bf16.mxu0 %v14259_v42  ;;  %7068 = vmatprep.mubr.msk.bf16.mxu1 %vm8807_vm2, %v14258_v36 }
 0x529   : > { %2783 = vmatpush1.bf16.msra.mxu0 %v10224_v56  ;;  %7055 = vmatpush3.bf16.msra.mxu1 %v10230_v9 }
 0x52a   : > { %2784 = vmatprep.subr.bf16.mxu0 %v10236_v31  ;;  %7056 = vmatprep.subr.bf16.mxu1 %v14258_v36 }
 0x52d   : > { %2785 = vmatpush1.bf16.msra.mxu0 %v10243_v47  ;;  %7057 = vmatpush3.bf16.msra.mxu1 %v10249_v24 }
 0x52e   : > { %2786 = vmatprep.subr.bf16.mxu0 %v10255_v48  ;;  %7058 = vmatprep.subr.bf16.mxu1 %v14258_v36 }
 0x531   : > { %2787 = vmatpush1.bf16.msra.mxu0 %v10262_v49  ;;  %7059 = vmatpush3.bf16.msra.mxu1 %v10268_v54 }
 0x532   : > { %2788 = vmatprep.subr.bf16.mxu0 %v10274_v40  ;;  %7060 = vmatprep.subr.bf16.mxu1 %v14258_v36 }
 0x535   : > { %2789 = vmatpush1.bf16.msra.mxu0 %v10281_v11  ;;  %7061 = vmatpush3.bf16.msra.mxu1 %v10287_v34 }
 0x536   : > { %2790 = vmatprep.subr.bf16.mxu0 %v10293_v37  ;;  %7062 = vmatprep.subr.bf16.mxu1 %v14258_v36 }
 0x539   : > { %2791 = vmatpush1.bf16.msra.mxu0 %v10300_v38  ;;  %7063 = vmatpush3.bf16.msra.mxu1 %v10306_v35 }
 0x53a   : > { %2792 = vmatprep.subr.bf16.mxu0 %v10312_v10  ;;  %7064 = vmatprep.subr.bf16.mxu1 %v14258_v36 }
 0x53d   : > { %2793 = vmatpush1.bf16.msra.mxu0 %v10319_v19  ;;  %7065 = vmatpush3.bf16.msra.mxu1 %v10325_v20 }
 0x53e   : > { %2794 = vmatprep.subr.bf16.mxu0 %v10331_v29  ;;  %7066 = vmatprep.subr.bf16.mxu1 %v14258_v36 }
 0x541   : > { %2795 = vmatpush1.bf16.msra.mxu0 %v10338_v30  ;;  %7067 = vmatpush3.bf16.msra.mxu1 %v10344_v45 }
 0x542   : > { %2861 = vmatprep.subr.bf16.mxu0 %v10350_v25  ;;  %7072 = vmatprep.subr.bf16.mxu1 %v14258_v36 }
 0x5b7   : > { %v2563_v43 = vpop.f32.mrb[40].mxu1 }
 0x5b8   : > { %v7010_v22 = vpop.f32.mrb[41].mxu1 }
 0x5b9   : > { %v2566_v27 = vpop.f32.mrb[42].mxu1  ;;  %v2564_v22 = vadd.f32 %v2563_v43, %v10005_v4 }
 0x5ba   : > { %v7011_v33 = vpop.f32.mrb[43].mxu1 }
 0x5d7   : > { %v2604_v7 = vpop.f32.mrb[36].mxu0  ;;  %v2645_v52 = vpop.f32.mrb[44].mxu1 }
 0x5d8   : > { %v7862_v16 = vadd.f32 %v2604_v7, %v9992_v51  ;;  %v2606_v57 = vpop.f32.mrb[37].mxu0  ;;  %v7030_v50 = vpop.f32.mrb[45].mxu1  ;;  %v2665_v32 = vadd.f32 %v10002_v3, %v2645_v52 }
 0x5d9   : > { %v2608_v13 = vpop.f32.mrb[38].mxu0  ;;  %v2648_v58 = vpop.f32.mrb[46].mxu1  ;;  %v7863_v46 = vadd.f32 %v2606_v57, %v9996_v62 }
 0x5da   : > { %v6379_v53 = vmul.f32 -1.442695, %v7862_v16  ;;  %v2609_v59 = vpop.f32.mrb[39].mxu0  ;;  %v7031_v60 = vpop.f32.mrb[47].mxu1  ;;  %v14409_v13 = vld [vmem:[#allocation12_spill] sm:$0xff] }
 0x5db   : > { %v6380_v61 = vmul.f32 -1.442695, %v7863_v46  ;;  %v14410_v59 = vld [vmem:[#allocation14_spill] sm:$0xff] }
 0x5dc   : > { %8199 = vpow2.f32 %v6379_v53 }
 0x5dd   : > { %8201 = vpow2.f32 %v6380_v61 }
 0x5e6   : > { %v8200_v63 = vpop.eup %8199 }
 0x5e7   : > { %v2655_v1 = vadd.f32 1.0, %v8200_v63  ;;  %v8202_v2 = vpop.eup %8201 }
 0x5e8   : > { %v2662_v7 = vadd.f32 1.0, %v8202_v2 }
 0x5e9   : > { %8203 = vrcp.f32 %v2655_v1 }
 0x5f3   : > { %v8204_v5 = vpop.eup %8203 }
 0x5f4   : > { %v2666_v27 = vmul.f32 %v8204_v5, %v2665_v32 }
 0x5f6   : > { %v2667_v33 = vadd.f32 %v2666_v27, %v2564_v22 }
 0x5f7   : > { %v2711_v16 = vpop.f32.mrb[40].mxu0  ;;  %v2752_v50 = vpop.f32.mrb[48].mxu1 }
 0x5f8   : > { %8205 = vtanh.f32 %v2667_v33  ;;  %v2758_v58 = vadd.f32 %v2711_v16, %v14409_v13  ;;  %v2713_v57 = vpop.f32.mrb[41].mxu0  ;;  %v7050_v53 = vpop.f32.mrb[49].mxu1 }
 0x5f9   : > { %v2765_v60 = vadd.f32 %v2713_v57, %v14410_v59  ;;  %v2715_v46 = vpop.f32.mrb[42].mxu0  ;;  %v2755_v61 = vpop.f32.mrb[50].mxu1  ;;  %8207 = vrcp.f32 %v2662_v7  ;;  %v10366_v7 = vld [vmem:[%s13924_s4] ss:$0 sm:$0xff]  ;;  %v14412_v53 = vld [vmem:[#allocation13_spill] sm:$0xff] }
 0x5fa   : > { %v6381_v63 = vmul.f32 -1.442695, %v2758_v58  ;;  %v2716_v3 = vpop.f32.mrb[43].mxu0  ;;  %v7051_v52 = vpop.f32.mrb[51].mxu1  ;;  %v2772_v13 = vadd.f32 %v10366_v7, %v2752_v50  ;;  %v10382_v50 = vld [vmem:[%s13927_s7] ss:$12 sps:$4 sm:$0xff]  }
 0x5fb   : > { %v6382_v32 = vmul.f32 -1.442695, %v2765_v60 }
 0x5fc   : > { %8209 = vpow2.f32 %v6381_v63 }
 0x5fd   : > { %8211 = vpow2.f32 %v6382_v32  ;;  %v10410_v32 = vld [vmem:[%s13927_s7 + $0x20] ss:$12 sps:$4 sm:$0xff]  }
 0x602   : > { %v8206_v43 = vpop.eup %8205 }
 0x603   : > { %v2669_v1 = vsub.f32 %v10012_v21, %v8206_v43  ;;  %v8208_v2 = vpop.eup %8207  ;;  %v10524_v21 = vld [vmem:[%s13927_s7 + $0xb0] ss:$12 sps:$4 sm:$0xff]  }
 0x604   : > { %14429 = vst [vmem:[#allocation47_spill] sm:$0xff] %v10524_v21 }
 0x605   : > { %v2670_v5 = vmul.f32 %v8208_v2, %v2669_v1  ;;  %v10394_v1 = vld [vmem:[%s13927_s7 + $0x1c] ss:$12 sps:$4 sm:$0xff]   ;;  %v10404_v2 = vld [vmem:[%s13927_s7 + $0x18] ss:$12 sps:$4 sm:$0xff]  }
 0x606   : > { %v8210_v22 = vpop.eup %8209 }
 0x607   : > { %v2762_v27 = vadd.f32 1.0, %v8210_v22  ;;  %v10361_v33 = vadd.f32 %v8206_v43, %v2670_v5  ;;  %v8212_v16 = vpop.eup %8211  ;;  %v10416_v5 = vld [vmem:[%s13927_s7 + $0x34] ss:$12 sps:$4 sm:$0xff]   ;;  %v10423_v22 = vld [vmem:[%s13927_s7 + $0x30] ss:$12 sps:$4 sm:$0xff]  }
 0x608   : > { %v2769_v60 = vadd.f32 1.0, %v8212_v16  ;;  %14413 = vst [vmem:[#allocation31_spill] sm:$0xff] %v10423_v22  ;;  %v10435_v16 = vld [vmem:[%s13927_s7 + $0x4c] ss:$12 sps:$4 sm:$0xff]  }
 0x609   : > { %14411 = vst [vmem:[#allocation30_spill] sm:$0xff] %v10361_v33  ;;  %8213 = vrcp.f32 %v2762_v27  ;;  %v10429_v27 = vld [vmem:[%s13927_s7 + $0x38] ss:$12 sps:$4 sm:$0xff]   ;;  %14415 = vst [vmem:[#allocation33_spill] sm:$0xff] %v10435_v16 }
 0x60a   : > { %14414 = vst [vmem:[#allocation32_spill] sm:$0xff] %v10429_v27 }
 0x613   : > { %v8214_v58 = vpop.eup %8213 }
 0x614   : > { %v2773_v57 = vmul.f32 %v8214_v58, %v2772_v13  ;;  %v10442_v13 = vld [vmem:[%s13927_s7 + $0x48] ss:$12 sps:$4 sm:$0xff]   ;;  %v10448_v58 = vld [vmem:[%s13927_s7 + $0x50] ss:$12 sps:$4 sm:$0xff]  }
 0x615   : > { %14416 = vst [vmem:[#allocation34_spill] sm:$0xff] %v10442_v13  ;;  %14417 = vst [vmem:[#allocation35_spill] sm:$0xff] %v10448_v58 }
 0x616   : > { %v2774_v59 = vadd.f32 %v2773_v57, %v14412_v53  ;;  %v10454_v57 = vld [vmem:[%s13927_s7 + $0x64] ss:$12 sps:$4 sm:$0xff]   ;;  %v10461_v53 = vld [vmem:[%s13927_s7 + $0x60] ss:$12 sps:$4 sm:$0xff]  }
 0x617   : > { %14418 = vst [vmem:[#allocation36_spill] sm:$0xff] %v10454_v57  ;;  %14419 = vst [vmem:[#allocation37_spill] sm:$0xff] %v10461_v53 }
 0x618   : > { %8215 = vtanh.f32 %v2774_v59  ;;  %v10467_v59 = vld [vmem:[%s13927_s7 + $0x68] ss:$12 sps:$4 sm:$0xff]  }
 0x619   : > { %8217 = vrcp.f32 %v2769_v60  ;;  %14420 = vst [vmem:[#allocation38_spill] sm:$0xff] %v10467_v59  ;;  %v10473_v60 = vld [vmem:[%s13927_s7 + $0x7c] ss:$12 sps:$4 sm:$0xff]  }
 0x61a   : > { %14421 = vst [vmem:[#allocation39_spill] sm:$0xff] %v10473_v60 }
 0x622   : > { %v8216_v46 = vpop.eup %8215 }
 0x623   : > { %v2776_v61 = vsub.f32 %v10017_v55, %v8216_v46  ;;  %v8218_v63 = vpop.eup %8217  ;;  %v10388_v55 = vld [vmem:[%s13927_s7 + $0x8] ss:$12 sps:$4 sm:$0xff]  }
 0x625   : > { %v2777_v3 = vmul.f32 %v8218_v63, %v2776_v61  ;;  %v10486_v61 = vld [vmem:[%s13927_s7 + $0x80] ss:$12 sps:$4 sm:$0xff]  }
 0x626   : > { %14423 = vst [vmem:[#allocation41_spill] sm:$0xff] %v10486_v61  ;;  %v10492_v63 = vld [vmem:[%s13927_s7 + $0x94] ss:$12 sps:$4 sm:$0xff]  }
 0x627   : > { %v10371_v52 = vadd.f32 %v8216_v46, %v2777_v3  ;;  %v10480_v46 = vld [vmem:[%s13927_s7 + $0x78] ss:$12 sps:$4 sm:$0xff]   ;;  %14424 = vst [vmem:[#allocation42_spill] sm:$0xff] %v10492_v63  ;;  %v10499_v3 = vld [vmem:[%s13927_s7 + $0x90] ss:$12 sps:$4 sm:$0xff]  }
 0x628   : > { %14422 = vst [vmem:[#allocation40_spill] sm:$0xff] %v10480_v46  ;;  %14425 = vst [vmem:[#allocation43_spill] sm:$0xff] %v10499_v3 }
 0x629   : > { %v10375_v43 = vpack.c.bf16 %v10371_v52, %v10371_v52 }
 0x62b   : > { %2813 = vmatmul.mubr.bf16.vlgmr.msra.gmra.mrb[44].mxu0 %v10375_v43  ;;  %7069 = vmatmul.mubr.bf16.vlgmr.msra.gmra.mrb[52].mxu1 %v10375_v43 }
 0x62c   : > { %2862 = vmatpush1.bf16.msra.mxu0 %v10382_v50  ;;  %7073 = vmatpush3.bf16.msra.mxu1 %v10388_v55 }
 0x62d   : > { %2863 = vmatprep.subr.bf16.mxu0 %v10394_v1  ;;  %7074 = vmatprep.subr.bf16.mxu1 %v14258_v36 }
 0x62e   : > { %2893 = vmatprep.mubr.bf16.mxu0 %v14259_v42  ;;  %7088 = vmatprep.mubr.msk.bf16.mxu1 %vm8807_vm2, %v14258_v36 }
 0x630   : > { %2864 = vmatpush1.bf16.msra.mxu0 %v10404_v2  ;;  %7075 = vmatpush3.bf16.msra.mxu1 %v10410_v32 }
 0x631   : > { %2865 = vmatprep.subr.bf16.mxu0 %v10416_v5  ;;  %7076 = vmatprep.subr.bf16.mxu1 %v14258_v36 }
 0x634   : > { %2866 = vmatpush1.bf16.msra.mxu0 %v10423_v22  ;;  %7077 = vmatpush3.bf16.msra.mxu1 %v10429_v27 }
 0x635   : > { %2867 = vmatprep.subr.bf16.mxu0 %v10435_v16  ;;  %7078 = vmatprep.subr.bf16.mxu1 %v14258_v36 }
 0x638   : > { %2868 = vmatpush1.bf16.msra.mxu0 %v10442_v13  ;;  %7079 = vmatpush3.bf16.msra.mxu1 %v10448_v58 }
 0x639   : > { %2869 = vmatprep.subr.bf16.mxu0 %v10454_v57  ;;  %7080 = vmatprep.subr.bf16.mxu1 %v14258_v36 }
 0x63c   : > { %2870 = vmatpush1.bf16.msra.mxu0 %v10461_v53  ;;  %7081 = vmatpush3.bf16.msra.mxu1 %v10467_v59 }
 0x63d   : > { %2871 = vmatprep.subr.bf16.mxu0 %v10473_v60  ;;  %7082 = vmatprep.subr.bf16.mxu1 %v14258_v36 }
 0x640   : > { %2872 = vmatpush1.bf16.msra.mxu0 %v10480_v46  ;;  %7083 = vmatpush3.bf16.msra.mxu1 %v10486_v61 }
 0x641   : > { %2873 = vmatprep.subr.bf16.mxu0 %v10492_v63  ;;  %7084 = vmatprep.subr.bf16.mxu1 %v14258_v36 }
 0x644   : > { %2874 = vmatpush1.bf16.msra.mxu0 %v10499_v3  ;;  %7085 = vmatpush3.bf16.msra.mxu1 %v10505_v18 }
 0x645   : > { %2875 = vmatprep.subr.bf16.mxu0 %v10511_v14  ;;  %7086 = vmatprep.subr.bf16.mxu1 %v14258_v36  ;;  %v10530_v14 = vld [vmem:[%s13929_s9 + $0x4] ss:$12 sps:$4 sm:$0xff]  }
 0x646   : > { %14430 = vst [vmem:[#allocation48_spill] sm:$0xff] %v10530_v14 }
 0x648   : > { %2876 = vmatpush1.bf16.msra.mxu0 %v10518_v12  ;;  %7087 = vmatpush3.bf16.msra.mxu1 %v10524_v21  ;;  %v10539_v12 = vld [vmem:[%s13929_s9] ss:$12 sps:$4 sm:$0xff]   ;;  %v10545_v21 = vld [vmem:[%s13929_s9 + $0x8] ss:$12 sps:$4 sm:$0xff]  }
 0x649   : > { %2964 = vmatprep.subr.bf16.mxu0 %v10530_v14  ;;  %7092 = vmatprep.subr.bf16.mxu1 %v14258_v36  ;;  %14431 = vst [vmem:[#allocation49_spill] sm:$0xff] %v10539_v12  ;;  %14432 = vst [vmem:[#allocation50_spill] sm:$0xff] %v10545_v21  ;;  %v10551_v14 = vld [vmem:[%s13929_s9 + $0x1c] ss:$12 sps:$4 sm:$0xff]  }
 0x64a   : > { %14433 = vst [vmem:[#allocation51_spill] sm:$0xff] %v10551_v14 }
 0x64b   : > { %2894 = vmatmul.mubr.bf16.vlgmr.msra.gmra.mrb[44].mxu0 %v10106_v41  ;;  %7089 = vmatmul.mubr.bf16.vlgmr.msra.gmra.mrb[56].mxu1 %v10106_v41  ;;  %v10561_v41 = vld [vmem:[%s13929_s9 + $0x18] ss:$12 sps:$4 sm:$0xff]  }
 0x64c   : > { %2965 = vmatpush1.bf16.msra.mxu0 %v10539_v12  ;;  %7093 = vmatpush3.bf16.msra.mxu1 %v10545_v21  ;;  %14434 = vst [vmem:[#allocation52_spill] sm:$0xff] %v10561_v41  ;;  %v10567_v21 = vld [vmem:[%s13929_s9 + $0x20] ss:$12 sps:$4 sm:$0xff]  }
 0x64d   : > { %2966 = vmatprep.subr.bf16.mxu0 %v10551_v14  ;;  %7094 = vmatprep.subr.bf16.mxu1 %v14258_v36  ;;  %14435 = vst [vmem:[#allocation53_spill] sm:$0xff] %v10567_v21  ;;  %v10573_v14 = vld [vmem:[%s13929_s9 + $0x34] ss:$12 sps:$4 sm:$0xff]  }
 0x64e   : > { %2996 = vmatprep.mubr.bf16.mxu0 %v14259_v42  ;;  %7108 = vmatprep.mubr.msk.bf16.mxu1 %vm8807_vm2, %v14258_v36  ;;  %14436 = vst [vmem:[#allocation54_spill] sm:$0xff] %v10573_v14 }
 0x650   : > { %2967 = vmatpush1.bf16.msra.mxu0 %v10561_v41  ;;  %7095 = vmatpush3.bf16.msra.mxu1 %v10567_v21  ;;  %v10580_v41 = vld [vmem:[%s13929_s9 + $0x30] ss:$12 sps:$4 sm:$0xff]   ;;  %v10586_v21 = vld [vmem:[%s13929_s9 + $0x38] ss:$12 sps:$4 sm:$0xff]  }
 0x651   : > { %2968 = vmatprep.subr.bf16.mxu0 %v10573_v14  ;;  %7096 = vmatprep.subr.bf16.mxu1 %v14258_v36  ;;  %14437 = vst [vmem:[#allocation55_spill] sm:$0xff] %v10580_v41  ;;  %14438 = vst [vmem:[#allocation56_spill] sm:$0xff] %v10586_v21  ;;  %v10592_v14 = vld [vmem:[%s13929_s9 + $0x4c] ss:$12 sps:$4 sm:$0xff]  }
 0x652   : > { %14439 = vst [vmem:[#allocation57_spill] sm:$0xff] %v10592_v14 }
 0x654   : > { %2969 = vmatpush1.bf16.msra.mxu0 %v10580_v41  ;;  %7097 = vmatpush3.bf16.msra.mxu1 %v10586_v21  ;;  %v10599_v41 = vld [vmem:[%s13929_s9 + $0x48] ss:$12 sps:$4 sm:$0xff]   ;;  %v10605_v21 = vld [vmem:[%s13929_s9 + $0x50] ss:$12 sps:$4 sm:$0xff]  }
 0x655   : > { %2970 = vmatprep.subr.bf16.mxu0 %v10592_v14  ;;  %7098 = vmatprep.subr.bf16.mxu1 %v14258_v36  ;;  %14440 = vst [vmem:[#allocation58_spill] sm:$0xff] %v10599_v41  ;;  %14441 = vst [vmem:[#allocation59_spill] sm:$0xff] %v10605_v21  ;;  %v10611_v14 = vld [vmem:[%s13929_s9 + $0x64] ss:$12 sps:$4 sm:$0xff]  }
 0x656   : > { %14442 = vst [vmem:[#allocation60_spill] sm:$0xff] %v10611_v14 }
 0x658   : > { %2971 = vmatpush1.bf16.msra.mxu0 %v10599_v41  ;;  %7099 = vmatpush3.bf16.msra.mxu1 %v10605_v21  ;;  %v10618_v41 = vld [vmem:[%s13929_s9 + $0x60] ss:$12 sps:$4 sm:$0xff]   ;;  %v10624_v21 = vld [vmem:[%s13929_s9 + $0x68] ss:$12 sps:$4 sm:$0xff]  }
 0x659   : > { %2972 = vmatprep.subr.bf16.mxu0 %v10611_v14  ;;  %7100 = vmatprep.subr.bf16.mxu1 %v14258_v36  ;;  %14443 = vst [vmem:[#allocation61_spill] sm:$0xff] %v10618_v41  ;;  %14444 = vst [vmem:[#allocation62_spill] sm:$0xff] %v10624_v21  ;;  %v10630_v14 = vld [vmem:[%s13929_s9 + $0x7c] ss:$12 sps:$4 sm:$0xff]  }
 0x65a   : > { %14445 = vst [vmem:[#allocation63_spill] sm:$0xff] %v10630_v14 }
 0x65c   : > { %2973 = vmatpush1.bf16.msra.mxu0 %v10618_v41  ;;  %7101 = vmatpush3.bf16.msra.mxu1 %v10624_v21  ;;  %v10637_v41 = vld [vmem:[%s13929_s9 + $0x78] ss:$12 sps:$4 sm:$0xff]   ;;  %v10643_v21 = vld [vmem:[%s13929_s9 + $0x80] ss:$12 sps:$4 sm:$0xff]  }
 0x65d   : > { %2974 = vmatprep.subr.bf16.mxu0 %v10630_v14  ;;  %7102 = vmatprep.subr.bf16.mxu1 %v14258_v36  ;;  %14446 = vst [vmem:[#allocation64_spill] sm:$0xff] %v10637_v41  ;;  %14447 = vst [vmem:[#allocation65_spill] sm:$0xff] %v10643_v21  ;;  %v10649_v14 = vld [vmem:[%s13929_s9 + $0x94] ss:$12 sps:$4 sm:$0xff]  }
 0x65e   : > { %14448 = vst [vmem:[#allocation66_spill] sm:$0xff] %v10649_v14 }
 0x660   : > { %2975 = vmatpush1.bf16.msra.mxu0 %v10637_v41  ;;  %7103 = vmatpush3.bf16.msra.mxu1 %v10643_v21  ;;  %v10656_v41 = vld [vmem:[%s13929_s9 + $0x90] ss:$12 sps:$4 sm:$0xff]   ;;  %v10662_v21 = vld [vmem:[%s13929_s9 + $0x98] ss:$12 sps:$4 sm:$0xff]  }
 0x661   : > { %2976 = vmatprep.subr.bf16.mxu0 %v10649_v14  ;;  %7104 = vmatprep.subr.bf16.mxu1 %v14258_v36  ;;  %14449 = vst [vmem:[#allocation67_spill] sm:$0xff] %v10656_v41  ;;  %14450 = vst [vmem:[#allocation68_spill] sm:$0xff] %v10662_v21  ;;  %v10668_v14 = vld [vmem:[%s13929_s9 + $0xac] ss:$12 sps:$4 sm:$0xff]  }
 0x662   : > { %14451 = vst [vmem:[#allocation69_spill] sm:$0xff] %v10668_v14 }
 0x664   : > { %2977 = vmatpush1.bf16.msra.mxu0 %v10656_v41  ;;  %7105 = vmatpush3.bf16.msra.mxu1 %v10662_v21  ;;  %v10675_v41 = vld [vmem:[%s13929_s9 + $0xa8] ss:$12 sps:$4 sm:$0xff]   ;;  %v10681_v21 = vld [vmem:[%s13929_s9 + $0xb0] ss:$12 sps:$4 sm:$0xff]  }
 0x665   : > { %2978 = vmatprep.subr.bf16.mxu0 %v10668_v14  ;;  %7106 = vmatprep.subr.bf16.mxu1 %v14258_v36  ;;  %14452 = vst [vmem:[#allocation70_spill] sm:$0xff] %v10675_v41  ;;  %14453 = vst [vmem:[#allocation71_spill] sm:$0xff] %v10681_v21  ;;  %v10687_v14 = vld [vmem:[%s13931_s11 + $0x4] ss:$12 sps:$4 sm:$0xff]  }
 0x666   : > { %14454 = vst [vmem:[#allocation72_spill] sm:$0xff] %v10687_v14 }
 0x668   : > { %2979 = vmatpush1.bf16.msra.mxu0 %v10675_v41  ;;  %7107 = vmatpush3.bf16.msra.mxu1 %v10681_v21 }
 0x669   : > { %3046 = vmatprep.subr.bf16.mxu0 %v10687_v14  ;;  %7112 = vmatprep.subr.bf16.mxu1 %v14258_v36 }
 0x6fe   : > { %v2855_v12 = vpop.f32.mrb[52].mxu1 }
 0x6ff   : > { %v7070_v18 = vpop.f32.mrb[53].mxu1 }
 0x700   : > { %v2858_v3 = vpop.f32.mrb[54].mxu1 }
 0x701   : > { %v7071_v41 = vpop.f32.mrb[55].mxu1  ;;  %v10734_v3 = vld [vmem:[%s13931_s11 + $0x18] ss:$12 sps:$4 sm:$0xff]  }
 0x702   : > { %v10740_v41 = vld [vmem:[%s13931_s11 + $0x20] ss:$12 sps:$4 sm:$0xff]  }
 0x71e   : > { %v2895_v63 = vpop.f32.mrb[44].mxu0  ;;  %v2936_v61 = vpop.f32.mrb[56].mxu1 }
 0x71f   : > { %v7864_v46 = vadd.f32 %v2895_v63, %v9626_v44  ;;  %v2897_v60 = vpop.f32.mrb[45].mxu0  ;;  %v7090_v59 = vpop.f32.mrb[57].mxu1  ;;  %v10696_v63 = vld [vmem:[%s13928_s8] ss:$0 sm:$0xff] }
 0x720   : > { %v2899_v21 = vpop.f32.mrb[46].mxu0  ;;  %v2939_v53 = vpop.f32.mrb[58].mxu1  ;;  %v7865_v14 = vadd.f32 %v2897_v60, %v14376_v0 }
 0x721   : > { %v6383_v57 = vmul.f32 -1.442695, %v7864_v46  ;;  %v2900_v58 = vpop.f32.mrb[47].mxu0  ;;  %v7091_v13 = vpop.f32.mrb[59].mxu1  ;;  %v2956_v21 = vadd.f32 %v10696_v63, %v2936_v61  ;;  %v10724_v61 = vld [vmem:[%s13931_s11 + $0x1c] ss:$12 sps:$4 sm:$0xff]  }
 0x722   : > { %v6384_v16 = vmul.f32 -1.442695, %v7865_v14  ;;  %v2856_v58 = vadd.f32 %v2855_v12, %v9639_v28  ;;  %v10712_v12 = vld [vmem:[%s13931_s11] ss:$12 sps:$4 sm:$0xff]  }
 0x723   : > { %8219 = vpow2.f32 %v6383_v57 }
 0x724   : > { %8221 = vpow2.f32 %v6384_v16 }
 0x72d   : > { %v8220_v27 = vpop.eup %8219 }
 0x72e   : > { %v2946_v22 = vadd.f32 1.0, %v8220_v27  ;;  %v8222_v18 = vpop.eup %8221 }
 0x72f   : > { %v2953_v59 = vadd.f32 1.0, %v8222_v18  ;;  %v10746_v18 = vld [vmem:[%s13931_s11 + $0x34] ss:$12 sps:$4 sm:$0xff]  }
 0x730   : > { %8223 = vrcp.f32 %v2946_v22 }
 0x73a   : > { %v8224_v53 = vpop.eup %8223 }
 0x73b   : > { %v2957_v13 = vmul.f32 %v8224_v53, %v2956_v21  ;;  %v10753_v21 = vld [vmem:[%s13931_s11 + $0x30] ss:$12 sps:$4 sm:$0xff]   ;;  %v10759_v53 = vld [vmem:[%s13931_s11 + $0x38] ss:$12 sps:$4 sm:$0xff]  }
 0x73d   : > { %v2958_v57 = vadd.f32 %v2957_v13, %v2856_v58  ;;  %v10765_v58 = vld [vmem:[%s13931_s11 + $0x4c] ss:$12 sps:$4 sm:$0xff]   ;;  %v10772_v13 = vld [vmem:[%s13931_s11 + $0x48] ss:$12 sps:$4 sm:$0xff]  }
 0x73f   : > { %8225 = vtanh.f32 %v2958_v57  ;;  %v10778_v57 = vld [vmem:[%s13931_s11 + $0x50] ss:$12 sps:$4 sm:$0xff]  }
 0x740   : > { %8227 = vrcp.f32 %v2953_v59  ;;  %v10784_v59 = vld [vmem:[%s13931_s11 + $0x64] ss:$12 sps:$4 sm:$0xff]  }
 0x749   : > { %v8226_v14 = vpop.eup %8225 }
 0x74a   : > { %v2960_v27 = vsub.f32 %v10102_v15, %v8226_v14  ;;  %v8228_v22 = vpop.eup %8227  ;;  %v10718_v15 = vld [vmem:[%s13931_s11 + $0x8] ss:$12 sps:$4 sm:$0xff]  }
 0x74c   : > { %v2961_v16 = vmul.f32 %v8228_v22, %v2960_v27  ;;  %v10797_v27 = vld [vmem:[%s13931_s11 + $0x68] ss:$12 sps:$4 sm:$0xff]  }
 0x74d   : > { %14456 = vst [vmem:[#allocation74_spill] sm:$0xff] %v10797_v27  ;;  %v10803_v22 = vld [vmem:[%s13931_s11 + $0x7c] ss:$12 sps:$4 sm:$0xff]  }
 0x74e   : > { %v10701_v60 = vadd.f32 %v8226_v14, %v2961_v16  ;;  %v10791_v14 = vld [vmem:[%s13931_s11 + $0x60] ss:$12 sps:$4 sm:$0xff]   ;;  %14457 = vst [vmem:[#allocation75_spill] sm:$0xff] %v10803_v22  ;;  %v10810_v16 = vld [vmem:[%s13931_s11 + $0x78] ss:$12 sps:$4 sm:$0xff]  }
 0x74f   : > { %14455 = vst [vmem:[#allocation73_spill] sm:$0xff] %v10791_v14  ;;  %14458 = vst [vmem:[#allocation76_spill] sm:$0xff] %v10810_v16 }
 0x750   : > { %v10705_v46 = vpack.c.bf16 %v10701_v60, %v10701_v60 }
 0x752   : > { %2997 = vmatmul.mubr.bf16.vlgmr.msra.gmra.mrb[48].mxu0 %v10705_v46  ;;  %7109 = vmatmul.mubr.bf16.vlgmr.msra.gmra.mrb[60].mxu1 %v10705_v46 }
 0x753   : > { %3047 = vmatpush1.bf16.msra.mxu0 %v10712_v12  ;;  %7113 = vmatpush3.bf16.msra.mxu1 %v10718_v15 }
 0x754   : > { %3048 = vmatprep.subr.bf16.mxu0 %v10724_v61  ;;  %7114 = vmatprep.subr.bf16.mxu1 %v14258_v36 }
 0x755   : > { %3078 = vmatprep.mubr.bf16.mxu0 %v14259_v42  ;;  %7128 = vmatprep.mubr.msk.bf16.mxu1 %vm8807_vm2, %v14258_v36 }
 0x757   : > { %3049 = vmatpush1.bf16.msra.mxu0 %v10734_v3  ;;  %7115 = vmatpush3.bf16.msra.mxu1 %v10740_v41 }
 0x758   : > { %3050 = vmatprep.subr.bf16.mxu0 %v10746_v18  ;;  %7116 = vmatprep.subr.bf16.mxu1 %v14258_v36 }
 0x75b   : > { %3051 = vmatpush1.bf16.msra.mxu0 %v10753_v21  ;;  %7117 = vmatpush3.bf16.msra.mxu1 %v10759_v53 }
 0x75c   : > { %3052 = vmatprep.subr.bf16.mxu0 %v10765_v58  ;;  %7118 = vmatprep.subr.bf16.mxu1 %v14258_v36 }
 0x75f   : > { %3053 = vmatpush1.bf16.msra.mxu0 %v10772_v13  ;;  %7119 = vmatpush3.bf16.msra.mxu1 %v10778_v57 }
 0x760   : > { %3054 = vmatprep.subr.bf16.mxu0 %v10784_v59  ;;  %7120 = vmatprep.subr.bf16.mxu1 %v14258_v36 }
 0x763   : > { %3055 = vmatpush1.bf16.msra.mxu0 %v10791_v14  ;;  %7121 = vmatpush3.bf16.msra.mxu1 %v10797_v27  ;;  %v10816_v27 = vld [vmem:[%s13931_s11 + $0x80] ss:$12 sps:$4 sm:$0xff]   ;;  %v3045_v14 = vpack.c.bf16 %v10361_v33, %v10361_v33 }
 0x764   : > { %3056 = vmatprep.subr.bf16.mxu0 %v10803_v22  ;;  %7122 = vmatprep.subr.bf16.mxu1 %v14258_v36  ;;  %14459 = vst [vmem:[#allocation77_spill] sm:$0xff] %v10816_v27  ;;  %v10822_v22 = vld [vmem:[%s13931_s11 + $0x94] ss:$12 sps:$4 sm:$0xff]  }
 0x765   : > { %14460 = vst [vmem:[#allocation78_spill] sm:$0xff] %v10822_v22 }
 0x767   : > { %3057 = vmatpush1.bf16.msra.mxu0 %v10810_v16  ;;  %7123 = vmatpush3.bf16.msra.mxu1 %v10816_v27  ;;  %v10829_v16 = vld [vmem:[%s13931_s11 + $0x90] ss:$12 sps:$4 sm:$0xff]   ;;  %v10835_v27 = vld [vmem:[%s13931_s11 + $0x98] ss:$12 sps:$4 sm:$0xff]  }
 0x768   : > { %3058 = vmatprep.subr.bf16.mxu0 %v10822_v22  ;;  %7124 = vmatprep.subr.bf16.mxu1 %v14258_v36  ;;  %14461 = vst [vmem:[#allocation79_spill] sm:$0xff] %v10829_v16  ;;  %14462 = vst [vmem:[#allocation80_spill] sm:$0xff] %v10835_v27  ;;  %v10841_v22 = vld [vmem:[%s13931_s11 + $0xac] ss:$12 sps:$4 sm:$0xff]  }
 0x769   : > { %14463 = vst [vmem:[#allocation81_spill] sm:$0xff] %v10841_v22 }
 0x76b   : > { %3059 = vmatpush1.bf16.msra.mxu0 %v10829_v16  ;;  %7125 = vmatpush3.bf16.msra.mxu1 %v10835_v27  ;;  %v10848_v16 = vld [vmem:[%s13931_s11 + $0xa8] ss:$12 sps:$4 sm:$0xff]   ;;  %v10854_v27 = vld [vmem:[%s13931_s11 + $0xb0] ss:$12 sps:$4 sm:$0xff]  }
 0x76c   : > { %3060 = vmatprep.subr.bf16.mxu0 %v10841_v22  ;;  %7126 = vmatprep.subr.bf16.mxu1 %v14258_v36  ;;  %14464 = vst [vmem:[#allocation82_spill] sm:$0xff] %v10848_v16  ;;  %14465 = vst [vmem:[#allocation83_spill] sm:$0xff] %v10854_v27  ;;  %v10862_v22 = vld [vmem:[%s14234_s30 + $0x4] ss:$12 sps:$4 sm:$0xff]  }
 0x76d   : > { %14466 = vst [vmem:[#allocation84_spill] sm:$0xff] %v10862_v22 }
 0x76f   : > { %3061 = vmatpush1.bf16.msra.mxu0 %v10848_v16  ;;  %7127 = vmatpush3.bf16.msra.mxu1 %v10854_v27  ;;  %v10869_v16 = vld [vmem:[%s14234_s30] ss:$12 sps:$4 sm:$0xff]   ;;  %v10875_v27 = vld [vmem:[%s14234_s30 + $0x8] ss:$12 sps:$4 sm:$0xff]  }
 0x770   : > { %3153 = vmatprep.subr.bf16.mxu0 %v10862_v22  ;;  %7132 = vmatprep.subr.bf16.mxu1 %v14258_v36  ;;  %14467 = vst [vmem:[#allocation85_spill] sm:$0xff] %v10875_v27  ;;  %v10881_v22 = vld [vmem:[%s14234_s30 + $0x1c] ss:$12 sps:$4 sm:$0xff]  }
 0x771   : > { %14468 = vst [vmem:[#allocation86_spill] sm:$0xff] %v10881_v22 }
 0x772   : > { %3079 = vmatmul.mubr.bf16.vlgmr.msra.gmra.mrb[48].mxu0 %v3045_v14  ;;  %7129 = vmatmul.mubr.bf16.vlgmr.msra.gmra.mrb[64].mxu1 %v3045_v14  ;;  %v10891_v14 = vld [vmem:[%s14234_s30 + $0x18] ss:$12 sps:$4 sm:$0xff]  }
 0x773   : > { %3154 = vmatpush1.bf16.msra.mxu0 %v10869_v16  ;;  %7133 = vmatpush3.bf16.msra.mxu1 %v10875_v27  ;;  %14469 = vst [vmem:[#allocation87_spill] sm:$0xff] %v10891_v14  ;;  %v10897_v27 = vld [vmem:[%s14234_s30 + $0x20] ss:$12 sps:$4 sm:$0xff]  }
 0x774   : > { %3155 = vmatprep.subr.bf16.mxu0 %v10881_v22  ;;  %7134 = vmatprep.subr.bf16.mxu1 %v14258_v36  ;;  %14470 = vst [vmem:[#allocation88_spill] sm:$0xff] %v10897_v27  ;;  %v10903_v22 = vld [vmem:[%s14234_s30 + $0x34] ss:$12 sps:$4 sm:$0xff]  }
 0x775   : > { %3185 = vmatprep.mubr.bf16.mxu0 %v14259_v42  ;;  %7148 = vmatprep.mubr.msk.bf16.mxu1 %vm8807_vm2, %v14258_v36  ;;  %14471 = vst [vmem:[#allocation89_spill] sm:$0xff] %v10903_v22 }
 0x777   : > { %3156 = vmatpush1.bf16.msra.mxu0 %v10891_v14  ;;  %7135 = vmatpush3.bf16.msra.mxu1 %v10897_v27  ;;  %v10910_v14 = vld [vmem:[%s14234_s30 + $0x30] ss:$12 sps:$4 sm:$0xff]   ;;  %v10916_v27 = vld [vmem:[%s14234_s30 + $0x38] ss:$12 sps:$4 sm:$0xff]  }
 0x778   : > { %3157 = vmatprep.subr.bf16.mxu0 %v10903_v22  ;;  %7136 = vmatprep.subr.bf16.mxu1 %v14258_v36  ;;  %14472 = vst [vmem:[#allocation90_spill] sm:$0xff] %v10910_v14  ;;  %14473 = vst [vmem:[#allocation91_spill] sm:$0xff] %v10916_v27  ;;  %v10922_v22 = vld [vmem:[%s14234_s30 + $0x4c] ss:$12 sps:$4 sm:$0xff]  }
 0x779   : > { %14474 = vst [vmem:[#allocation92_spill] sm:$0xff] %v10922_v22 }
 0x77b   : > { %3158 = vmatpush1.bf16.msra.mxu0 %v10910_v14  ;;  %7137 = vmatpush3.bf16.msra.mxu1 %v10916_v27  ;;  %v10929_v14 = vld [vmem:[%s14234_s30 + $0x48] ss:$12 sps:$4 sm:$0xff]   ;;  %v10935_v27 = vld [vmem:[%s14234_s30 + $0x50] ss:$12 sps:$4 sm:$0xff]  }
 0x77c   : > { %3159 = vmatprep.subr.bf16.mxu0 %v10922_v22  ;;  %7138 = vmatprep.subr.bf16.mxu1 %v14258_v36  ;;  %14475 = vst [vmem:[#allocation93_spill] sm:$0xff] %v10929_v14  ;;  %14476 = vst [vmem:[#allocation94_spill] sm:$0xff] %v10935_v27  ;;  %v10941_v22 = vld [vmem:[%s14234_s30 + $0x64] ss:$12 sps:$4 sm:$0xff]  }
 0x77d   : > { %14477 = vst [vmem:[#allocation95_spill] sm:$0xff] %v10941_v22 }
 0x77f   : > { %3160 = vmatpush1.bf16.msra.mxu0 %v10929_v14  ;;  %7139 = vmatpush3.bf16.msra.mxu1 %v10935_v27  ;;  %v10948_v14 = vld [vmem:[%s14234_s30 + $0x60] ss:$12 sps:$4 sm:$0xff]   ;;  %v10954_v27 = vld [vmem:[%s14234_s30 + $0x68] ss:$12 sps:$4 sm:$0xff]  }
 0x780   : > { %3161 = vmatprep.subr.bf16.mxu0 %v10941_v22  ;;  %7140 = vmatprep.subr.bf16.mxu1 %v14258_v36  ;;  %14478 = vst [vmem:[#allocation96_spill] sm:$0xff] %v10948_v14  ;;  %14479 = vst [vmem:[#allocation97_spill] sm:$0xff] %v10954_v27  ;;  %v10960_v22 = vld [vmem:[%s14234_s30 + $0x7c] ss:$12 sps:$4 sm:$0xff]  }
 0x781   : > { %14480 = vst [vmem:[#allocation98_spill] sm:$0xff] %v10960_v22 }
 0x783   : > { %3162 = vmatpush1.bf16.msra.mxu0 %v10948_v14  ;;  %7141 = vmatpush3.bf16.msra.mxu1 %v10954_v27  ;;  %v10967_v14 = vld [vmem:[%s14234_s30 + $0x78] ss:$12 sps:$4 sm:$0xff]   ;;  %v10973_v27 = vld [vmem:[%s14234_s30 + $0x80] ss:$12 sps:$4 sm:$0xff]  }
 0x784   : > { %3163 = vmatprep.subr.bf16.mxu0 %v10960_v22  ;;  %7142 = vmatprep.subr.bf16.mxu1 %v14258_v36  ;;  %14481 = vst [vmem:[#allocation99_spill] sm:$0xff] %v10967_v14  ;;  %14482 = vst [vmem:[#allocation100_spill] sm:$0xff] %v10973_v27  ;;  %v10979_v22 = vld [vmem:[%s14234_s30 + $0x94] ss:$12 sps:$4 sm:$0xff]  }
 0x785   : > { %14483 = vst [vmem:[#allocation101_spill] sm:$0xff] %v10979_v22 }
 0x787   : > { %3164 = vmatpush1.bf16.msra.mxu0 %v10967_v14  ;;  %7143 = vmatpush3.bf16.msra.mxu1 %v10973_v27  ;;  %v10986_v14 = vld [vmem:[%s14234_s30 + $0x90] ss:$12 sps:$4 sm:$0xff]   ;;  %v10993_v27 = vld [vmem:[%s14234_s30 + $0xac] ss:$12 sps:$4 sm:$0xff]  }
 0x788   : > { %3165 = vmatprep.subr.bf16.mxu0 %v10979_v22  ;;  %7144 = vmatprep.subr.bf16.mxu1 %v14258_v36  ;;  %v11000_v22 = vld [vmem:[%s14234_s30 + $0xa8] ss:$12 sps:$4 sm:$0xff]  }
 0x78b   : > { %3166 = vmatpush1.bf16.msra.mxu0 %v10986_v14  ;;  %7145 = vmatpush3.bf16.msra.mxu1 %v10178_v23 }
 0x78c   : > { %3167 = vmatprep.subr.bf16.mxu0 %v10993_v27  ;;  %7146 = vmatprep.subr.bf16.mxu1 %v14258_v36 }
 0x78f   : > { %3168 = vmatpush1.bf16.msra.mxu0 %v11000_v22  ;;  %7147 = vmatpush3.bf16.msra.mxu1 %v10187_v6 }
 0x790   : > { %3256 = vmatprep.subr.bf16.mxu0 %v10193_v26  ;;  %7152 = vmatprep.subr.bf16.mxu1 %v14258_v36 }
 0x792   : > { %3186 = vmatmul.mubr.bf16.vlgmr.msra.gmra.mrb[52].mxu0 %v10375_v43  ;;  %7149 = vmatmul.mubr.bf16.vlgmr.msra.gmra.mrb[68].mxu1 %v10375_v43 }
 0x793   : > { %3257 = vmatpush1.bf16.msra.mxu0 %v10202_v39  ;;  %7153 = vmatpush3.bf16.msra.mxu1 %v10208_v17 }
 0x794   : > { %3258 = vmatprep.subr.bf16.mxu0 %v10214_v8  ;;  %7154 = vmatprep.subr.bf16.mxu1 %v14258_v36 }
 0x795   : > { %3288 = vmatprep.mubr.bf16.mxu0 %v14259_v42  ;;  %7168 = vmatprep.mubr.msk.bf16.mxu1 %vm8807_vm2, %v14258_v36 }
 0x797   : > { %3259 = vmatpush1.bf16.msra.mxu0 %v10224_v56  ;;  %7155 = vmatpush3.bf16.msra.mxu1 %v10230_v9 }
 0x798   : > { %3260 = vmatprep.subr.bf16.mxu0 %v10236_v31  ;;  %7156 = vmatprep.subr.bf16.mxu1 %v14258_v36 }
 0x79b   : > { %3261 = vmatpush1.bf16.msra.mxu0 %v10243_v47  ;;  %7157 = vmatpush3.bf16.msra.mxu1 %v10249_v24 }
 0x79c   : > { %3262 = vmatprep.subr.bf16.mxu0 %v10255_v48  ;;  %7158 = vmatprep.subr.bf16.mxu1 %v14258_v36 }
 0x79f   : > { %3263 = vmatpush1.bf16.msra.mxu0 %v10262_v49  ;;  %7159 = vmatpush3.bf16.msra.mxu1 %v10268_v54 }
 0x7a0   : > { %3264 = vmatprep.subr.bf16.mxu0 %v10274_v40  ;;  %7160 = vmatprep.subr.bf16.mxu1 %v14258_v36 }
 0x7a3   : > { %3265 = vmatpush1.bf16.msra.mxu0 %v10281_v11  ;;  %7161 = vmatpush3.bf16.msra.mxu1 %v10287_v34 }
 0x7a4   : > { %3266 = vmatprep.subr.bf16.mxu0 %v10293_v37  ;;  %7162 = vmatprep.subr.bf16.mxu1 %v14258_v36 }
 0x7a7   : > { %3267 = vmatpush1.bf16.msra.mxu0 %v10300_v38  ;;  %7163 = vmatpush3.bf16.msra.mxu1 %v10306_v35  ;;  %v11048_v35 = vld [vmem:[%s13932_s12] ss:$0 sm:$0xff] }
 0x7a8   : > { %3268 = vmatprep.subr.bf16.mxu0 %v10312_v10  ;;  %7164 = vmatprep.subr.bf16.mxu1 %v14258_v36 }
 0x7ab   : > { %3269 = vmatpush1.bf16.msra.mxu0 %v10319_v19  ;;  %7165 = vmatpush3.bf16.msra.mxu1 %v10325_v20 }
 0x7ac   : > { %3270 = vmatprep.subr.bf16.mxu0 %v10331_v29  ;;  %7166 = vmatprep.subr.bf16.mxu1 %v14258_v36 }
 0x7af   : > { %3271 = vmatpush1.bf16.msra.mxu0 %v10338_v30  ;;  %7167 = vmatpush3.bf16.msra.mxu1 %v10344_v45 }
 0x7b0   : > { %3337 = vmatprep.subr.bf16.mxu0 %v10350_v25  ;;  %7172 = vmatprep.subr.bf16.mxu1 %v14258_v36 }
 0x825   : > { %v3039_v23 = vpop.f32.mrb[60].mxu1 }
 0x826   : > { %v7110_v6 = vpop.f32.mrb[61].mxu1  ;;  %v3040_v20 = vadd.f32 %v3039_v23, %v10005_v4 }
 0x827   : > { %v3042_v26 = vpop.f32.mrb[62].mxu1  ;;  %v14484_v6 = vld [vmem:[#allocation15_spill] sm:$0xff] }
 0x828   : > { %v7111_v39 = vpop.f32.mrb[63].mxu1 }
 0x845   : > { %v3080_v17 = vpop.f32.mrb[48].mxu0  ;;  %v3121_v8 = vpop.f32.mrb[64].mxu1 }
 0x846   : > { %v7866_v56 = vadd.f32 %v3080_v17, %v9992_v51  ;;  %v3082_v9 = vpop.f32.mrb[49].mxu0  ;;  %v7130_v31 = vpop.f32.mrb[65].mxu1  ;;  %v3141_v10 = vadd.f32 %v11048_v35, %v3121_v8 }
 0x847   : > { %v3084_v47 = vpop.f32.mrb[50].mxu0  ;;  %v3124_v24 = vpop.f32.mrb[66].mxu1  ;;  %v7867_v40 = vadd.f32 %v3082_v9, %v9996_v62 }
 0x848   : > { %v6385_v48 = vmul.f32 -1.442695, %v7866_v56  ;;  %v3085_v49 = vpop.f32.mrb[51].mxu0  ;;  %v7131_v54 = vpop.f32.mrb[67].mxu1  ;;  %v14485_v56 = vld [vmem:[#allocation17_spill] sm:$0xff] }
 0x849   : > { %v6386_v11 = vmul.f32 -1.442695, %v7867_v40 }
 0x84a   : > { %8229 = vpow2.f32 %v6385_v48 }
 0x84b   : > { %8231 = vpow2.f32 %v6386_v11 }
 0x854   : > { %v8230_v34 = vpop.eup %8229 }
 0x855   : > { %v3131_v37 = vadd.f32 1.0, %v8230_v34  ;;  %v8232_v38 = vpop.eup %8231 }
 0x856   : > { %v3138_v45 = vadd.f32 1.0, %v8232_v38 }
 0x857   : > { %8233 = vrcp.f32 %v3131_v37 }
 0x861   : > { %v8234_v19 = vpop.eup %8233 }
 0x862   : > { %v3142_v29 = vmul.f32 %v8234_v19, %v3141_v10 }
 0x864   : > { %v3143_v30 = vadd.f32 %v3142_v29, %v3040_v20 }
 0x865   : > { %v3187_v25 = vpop.f32.mrb[52].mxu0  ;;  %v3228_v43 = vpop.f32.mrb[68].mxu1 }
 0x866   : > { %8235 = vtanh.f32 %v3143_v30  ;;  %v3234_v26 = vadd.f32 %v3187_v25, %v14484_v6  ;;  %v3189_v39 = vpop.f32.mrb[53].mxu0  ;;  %v7150_v17 = vpop.f32.mrb[69].mxu1  ;;  %v3248_v19 = vadd.f32 %v10366_v7, %v3228_v43  ;;  %v14487_v30 = vld [vmem:[#allocation16_spill] sm:$0xff]  ;;  %v14488_v7 = vld [vmem:[#allocation31_spill] sm:$0xff] }
 0x867   : > { %v3241_v9 = vadd.f32 %v3189_v39, %v14485_v56  ;;  %v3191_v31 = vpop.f32.mrb[54].mxu0  ;;  %v3231_v47 = vpop.f32.mrb[70].mxu1  ;;  %8237 = vrcp.f32 %v3138_v45  ;;  %v14493_v43 = vld [vmem:[#allocation36_spill] sm:$0xff] }
 0x868   : > { %v6387_v24 = vmul.f32 -1.442695, %v3234_v26  ;;  %v3192_v8 = vpop.f32.mrb[55].mxu0  ;;  %v7151_v48 = vpop.f32.mrb[71].mxu1  ;;  %v14497_v31 = vld [vmem:[#allocation40_spill] sm:$0xff]  ;;  %v14498_v47 = vld [vmem:[#allocation41_spill] sm:$0xff] }
 0x869   : > { %v6388_v40 = vmul.f32 -1.442695, %v3241_v9  ;;  %v14500_v8 = vld [vmem:[#allocation43_spill] sm:$0xff]  ;;  %v14501_v48 = vld [vmem:[#allocation44_spill] sm:$0xff] }
 0x86a   : > { %8239 = vpow2.f32 %v6387_v24  ;;  %v14499_v24 = vld [vmem:[#allocation42_spill] sm:$0xff] }
 0x86b   : > { %8241 = vpow2.f32 %v6388_v40  ;;  %v14505_v40 = vld [vmem:[#allocation48_spill] sm:$0xff] }
 0x870   : > { %v8236_v23 = vpop.eup %8235 }
 0x871   : > { %v3145_v49 = vsub.f32 %v10361_v33, %v8236_v23  ;;  %v8238_v54 = vpop.eup %8237  ;;  %v11567_v33 = vld [vmem:[%s13927_s7 + $0xb0] ss:$12 sps:$4 sm:$0xff]  }
 0x872   : > { %14579 = vst [vmem:[#allocation41_spill] sm:$0xff] %v11567_v33 }
 0x873   : > { %v3146_v11 = vmul.f32 %v8238_v54, %v3145_v49  ;;  %v14503_v49 = vld [vmem:[#allocation46_spill] sm:$0xff]  ;;  %v14504_v54 = vld [vmem:[#allocation47_spill] sm:$0xff] }
 0x874   : > { %v8240_v34 = vpop.eup %8239 }
 0x875   : > { %v3238_v37 = vadd.f32 1.0, %v8240_v34  ;;  %v11055_v38 = vadd.f32 %v8236_v23, %v3146_v11  ;;  %v8242_v10 = vpop.eup %8241  ;;  %v14502_v23 = vld [vmem:[#allocation45_spill] sm:$0xff]  ;;  %v14507_v34 = vld [vmem:[#allocation50_spill] sm:$0xff] }
 0x876   : > { %v3245_v25 = vadd.f32 1.0, %v8242_v10  ;;  %v14506_v11 = vld [vmem:[#allocation49_spill] sm:$0xff]  ;;  %v14509_v10 = vld [vmem:[#allocation52_spill] sm:$0xff] }
 0x877   : > { %14486 = vst [vmem:[#allocation102_spill] sm:$0xff] %v11055_v38  ;;  %8243 = vrcp.f32 %v3238_v37  ;;  %v14508_v37 = vld [vmem:[#allocation51_spill] sm:$0xff] }
 0x881   : > { %v8244_v20 = vpop.eup %8243 }
 0x882   : > { %v3249_v29 = vmul.f32 %v8244_v20, %v3248_v19  ;;  %v14510_v19 = vld [vmem:[#allocation53_spill] sm:$0xff]  ;;  %v14511_v20 = vld [vmem:[#allocation54_spill] sm:$0xff] }
 0x884   : > { %v3250_v45 = vadd.f32 %v3249_v29, %v14487_v30  ;;  %v14513_v29 = vld [vmem:[#allocation56_spill] sm:$0xff]  ;;  %v14514_v30 = vld [vmem:[#allocation57_spill] sm:$0xff] }
 0x886   : > { %8245 = vtanh.f32 %v3250_v45  ;;  %v14515_v45 = vld [vmem:[#allocation58_spill] sm:$0xff] }
 0x887   : > { %8247 = vrcp.f32 %v3245_v25  ;;  %v14516_v25 = vld [vmem:[#allocation59_spill] sm:$0xff] }
 0x890   : > { %v8246_v6 = vpop.eup %8245 }
 0x891   : > { %v3252_v26 = vsub.f32 %v10371_v52, %v8246_v6  ;;  %v8248_v39 = vpop.eup %8247  ;;  %v14489_v52 = vld [vmem:[#allocation32_spill] sm:$0xff] }
 0x893   : > { %v3253_v17 = vmul.f32 %v8248_v39, %v3252_v26  ;;  %v14518_v26 = vld [vmem:[#allocation61_spill] sm:$0xff]  ;;  %v14519_v39 = vld [vmem:[#allocation62_spill] sm:$0xff] }
 0x895   : > { %v11060_v56 = vadd.f32 %v8246_v6, %v3253_v17  ;;  %v14517_v6 = vld [vmem:[#allocation60_spill] sm:$0xff]  ;;  %v14520_v17 = vld [vmem:[#allocation63_spill] sm:$0xff] }
 0x897   : > { %v11064_v9 = vpack.c.bf16 %v11060_v56, %v11060_v56 }
 0x899   : > { %3289 = vmatmul.mubr.bf16.vlgmr.msra.gmra.mrb[56].mxu0 %v11064_v9  ;;  %7169 = vmatmul.mubr.bf16.vlgmr.msra.gmra.mrb[72].mxu1 %v11064_v9 }
 0x89a   : > { %3338 = vmatpush1.bf16.msra.mxu0 %v10382_v50  ;;  %7173 = vmatpush3.bf16.msra.mxu1 %v10388_v55  ;;  %v14490_v50 = vld [vmem:[#allocation33_spill] sm:$0xff]  ;;  %v14491_v55 = vld [vmem:[#allocation34_spill] sm:$0xff] }
 0x89b   : > { %3339 = vmatprep.subr.bf16.mxu0 %v10394_v1  ;;  %7174 = vmatprep.subr.bf16.mxu1 %v14258_v36  ;;  %v14492_v1 = vld [vmem:[#allocation35_spill] sm:$0xff] }
 0x89c   : > { %3369 = vmatprep.mubr.bf16.mxu0 %v14259_v42  ;;  %7188 = vmatprep.mubr.msk.bf16.mxu1 %vm8807_vm2, %v14258_v36 }
 0x89e   : > { %3340 = vmatpush1.bf16.msra.mxu0 %v10404_v2  ;;  %7175 = vmatpush3.bf16.msra.mxu1 %v10410_v32  ;;  %v14494_v2 = vld [vmem:[#allocation37_spill] sm:$0xff]  ;;  %v14495_v32 = vld [vmem:[#allocation38_spill] sm:$0xff] }
 0x89f   : > { %3341 = vmatprep.subr.bf16.mxu0 %v10416_v5  ;;  %7176 = vmatprep.subr.bf16.mxu1 %v14258_v36  ;;  %v14496_v5 = vld [vmem:[#allocation39_spill] sm:$0xff] }
 0x8a2   : > { %3342 = vmatpush1.bf16.msra.mxu0 %v14488_v7  ;;  %7177 = vmatpush3.bf16.msra.mxu1 %v14489_v52  ;;  %v14521_v7 = vld [vmem:[#allocation64_spill] sm:$0xff]  ;;  %v14522_v52 = vld [vmem:[#allocation65_spill] sm:$0xff] }
 0x8a3   : > { %3343 = vmatprep.subr.bf16.mxu0 %v14490_v50  ;;  %7178 = vmatprep.subr.bf16.mxu1 %v14258_v36  ;;  %v14523_v50 = vld [vmem:[#allocation66_spill] sm:$0xff] }
 0x8a6   : > { %3344 = vmatpush1.bf16.msra.mxu0 %v14491_v55  ;;  %7179 = vmatpush3.bf16.msra.mxu1 %v14492_v1  ;;  %v14524_v55 = vld [vmem:[#allocation67_spill] sm:$0xff]  ;;  %v14525_v1 = vld [vmem:[#allocation68_spill] sm:$0xff] }
 0x8a7   : > { %3345 = vmatprep.subr.bf16.mxu0 %v14493_v43  ;;  %7180 = vmatprep.subr.bf16.mxu1 %v14258_v36  ;;  %v14526_v43 = vld [vmem:[#allocation69_spill] sm:$0xff] }
 0x8aa   : > { %3346 = vmatpush1.bf16.msra.mxu0 %v14494_v2  ;;  %7181 = vmatpush3.bf16.msra.mxu1 %v14495_v32  ;;  %v14527_v2 = vld [vmem:[#allocation70_spill] sm:$0xff]  ;;  %v14528_v32 = vld [vmem:[#allocation71_spill] sm:$0xff] }
 0x8ab   : > { %3347 = vmatprep.subr.bf16.mxu0 %v14496_v5  ;;  %7182 = vmatprep.subr.bf16.mxu1 %v14258_v36  ;;  %v14529_v5 = vld [vmem:[#allocation72_spill] sm:$0xff] }
 0x8ae   : > { %3348 = vmatpush1.bf16.msra.mxu0 %v14497_v31  ;;  %7183 = vmatpush3.bf16.msra.mxu1 %v14498_v47 }
 0x8af   : > { %3349 = vmatprep.subr.bf16.mxu0 %v14499_v24  ;;  %7184 = vmatprep.subr.bf16.mxu1 %v14258_v36 }
 0x8b2   : > { %3350 = vmatpush1.bf16.msra.mxu0 %v14500_v8  ;;  %7185 = vmatpush3.bf16.msra.mxu1 %v14501_v48 }
 0x8b3   : > { %3351 = vmatprep.subr.bf16.mxu0 %v14502_v23  ;;  %7186 = vmatprep.subr.bf16.mxu1 %v14258_v36 }
 0x8b6   : > { %3352 = vmatpush1.bf16.msra.mxu0 %v14503_v49  ;;  %7187 = vmatpush3.bf16.msra.mxu1 %v14504_v54 }
 0x8b7   : > { %3440 = vmatprep.subr.bf16.mxu0 %v14505_v40  ;;  %7192 = vmatprep.subr.bf16.mxu1 %v14258_v36 }
 0x8b9   : > { %3370 = vmatmul.mubr.bf16.vlgmr.msra.gmra.mrb[56].mxu0 %v10705_v46  ;;  %7189 = vmatmul.mubr.bf16.vlgmr.msra.gmra.mrb[76].mxu1 %v10705_v46  ;;  %v14512_v46 = vld [vmem:[#allocation55_spill] sm:$0xff] }
 0x8ba   : > { %3441 = vmatpush1.bf16.msra.mxu0 %v14506_v11  ;;  %7193 = vmatpush3.bf16.msra.mxu1 %v14507_v34 }
 0x8bb   : > { %3442 = vmatprep.subr.bf16.mxu0 %v14508_v37  ;;  %7194 = vmatprep.subr.bf16.mxu1 %v14258_v36 }
 0x8bc   : > { %3472 = vmatprep.mubr.bf16.mxu0 %v14259_v42  ;;  %7208 = vmatprep.mubr.msk.bf16.mxu1 %vm8807_vm2, %v14258_v36 }
 0x8be   : > { %3443 = vmatpush1.bf16.msra.mxu0 %v14509_v10  ;;  %7195 = vmatpush3.bf16.msra.mxu1 %v14510_v19 }
 0x8bf   : > { %3444 = vmatprep.subr.bf16.mxu0 %v14511_v20  ;;  %7196 = vmatprep.subr.bf16.mxu1 %v14258_v36 }
 0x8c2   : > { %3445 = vmatpush1.bf16.msra.mxu0 %v14512_v46  ;;  %7197 = vmatpush3.bf16.msra.mxu1 %v14513_v29 }
 0x8c3   : > { %3446 = vmatprep.subr.bf16.mxu0 %v14514_v30  ;;  %7198 = vmatprep.subr.bf16.mxu1 %v14258_v36 }
 0x8c6   : > { %3447 = vmatpush1.bf16.msra.mxu0 %v14515_v45  ;;  %7199 = vmatpush3.bf16.msra.mxu1 %v14516_v25 }
 0x8c7   : > { %3448 = vmatprep.subr.bf16.mxu0 %v14517_v6  ;;  %7200 = vmatprep.subr.bf16.mxu1 %v14258_v36 }
 0x8ca   : > { %3449 = vmatpush1.bf16.msra.mxu0 %v14518_v26  ;;  %7201 = vmatpush3.bf16.msra.mxu1 %v14519_v39 }
 0x8cb   : > { %3450 = vmatprep.subr.bf16.mxu0 %v14520_v17  ;;  %7202 = vmatprep.subr.bf16.mxu1 %v14258_v36 }
 0x8ce   : > { %3451 = vmatpush1.bf16.msra.mxu0 %v14521_v7  ;;  %7203 = vmatpush3.bf16.msra.mxu1 %v14522_v52 }
 0x8cf   : > { %3452 = vmatprep.subr.bf16.mxu0 %v14523_v50  ;;  %7204 = vmatprep.subr.bf16.mxu1 %v14258_v36 }
 0x8d2   : > { %3453 = vmatpush1.bf16.msra.mxu0 %v14524_v55  ;;  %7205 = vmatpush3.bf16.msra.mxu1 %v14525_v1 }
 0x8d3   : > { %3454 = vmatprep.subr.bf16.mxu0 %v14526_v43  ;;  %7206 = vmatprep.subr.bf16.mxu1 %v14258_v36 }
 0x8d6   : > { %3455 = vmatpush1.bf16.msra.mxu0 %v14527_v2  ;;  %7207 = vmatpush3.bf16.msra.mxu1 %v14528_v32  ;;  %v14543_v32 = vld [vmem:[#allocation86_spill] sm:$0xff] }
 0x8d7   : > { %3522 = vmatprep.subr.bf16.mxu0 %v14529_v5  ;;  %7212 = vmatprep.subr.bf16.mxu1 %v14258_v36  ;;  %v14544_v5 = vld [vmem:[#allocation87_spill] sm:$0xff] }
 0x96c   : > { %v3331_v31 = vpop.f32.mrb[72].mxu1 }
 0x96d   : > { %v7170_v47 = vpop.f32.mrb[73].mxu1  ;;  %v3332_v26 = vadd.f32 %v3331_v31, %v9639_v28  ;;  %v14545_v31 = vld [vmem:[#allocation88_spill] sm:$0xff] }
 0x96e   : > { %v3334_v24 = vpop.f32.mrb[74].mxu1  ;;  %v14546_v47 = vld [vmem:[#allocation89_spill] sm:$0xff] }
 0x96f   : > { %v7171_v8 = vpop.f32.mrb[75].mxu1  ;;  %v14548_v24 = vld [vmem:[#allocation91_spill] sm:$0xff] }
 0x970   : > { %v14549_v8 = vld [vmem:[#allocation92_spill] sm:$0xff] }
 0x98c   : > { %v3371_v48 = vpop.f32.mrb[56].mxu0  ;;  %v3412_v23 = vpop.f32.mrb[76].mxu1 }
 0x98d   : > { %v7868_v49 = vadd.f32 %v3371_v48, %v9626_v44  ;;  %v3373_v54 = vpop.f32.mrb[57].mxu0  ;;  %v7190_v40 = vpop.f32.mrb[77].mxu1  ;;  %v3432_v25 = vadd.f32 %v10696_v63, %v3412_v23  ;;  %v14530_v63 = vld [vmem:[#allocation73_spill] sm:$0xff]  ;;  %v14551_v23 = vld [vmem:[#allocation94_spill] sm:$0xff] }
 0x98e   : > { %v3375_v11 = vpop.f32.mrb[58].mxu0  ;;  %v3415_v34 = vpop.f32.mrb[78].mxu1  ;;  %v7869_v20 = vadd.f32 %v3373_v54, %v14376_v0  ;;  %v14550_v48 = vld [vmem:[#allocation93_spill] sm:$0xff]  ;;  %v14553_v54 = vld [vmem:[#allocation96_spill] sm:$0xff] }
 0x98f   : > { %v6389_v37 = vmul.f32 -1.442695, %v7868_v49  ;;  %v3376_v10 = vpop.f32.mrb[59].mxu0  ;;  %v7191_v19 = vpop.f32.mrb[79].mxu1  ;;  %v14552_v49 = vld [vmem:[#allocation95_spill] sm:$0xff]  ;;  %v14554_v40 = vld [vmem:[#allocation97_spill] sm:$0xff] }
 0x990   : > { %v6390_v46 = vmul.f32 -1.442695, %v7869_v20  ;;  %v14555_v11 = vld [vmem:[#allocation98_spill] sm:$0xff]  ;;  %v14556_v34 = vld [vmem:[#allocation99_spill] sm:$0xff]  ;;  %v14558_v10 = vld [vmem:[#allocation101_spill] sm:$0xff] }
 0x991   : > { %8249 = vpow2.f32 %v6389_v37  ;;  %v14557_v37 = vld [vmem:[#allocation100_spill] sm:$0xff]  ;;  %v11230_v20 = vld [vmem:[%s14234_s30 + $0xb0] ss:$12 sps:$4 sm:$0xff]  }
 0x992   : > { %8251 = vpow2.f32 %v6390_v46  ;;  %v11221_v19 = vld [vmem:[%s14234_s30 + $0x98] ss:$12 sps:$4 sm:$0xff]   ;;  %v11257_v46 = vld [vmem:[%s13925_s5 + $0x1c] ss:$12 sps:$4 sm:$0xff]  }
 0x99b   : > { %v8250_v29 = vpop.eup %8249 }
 0x99c   : > { %v3422_v30 = vadd.f32 1.0, %v8250_v29  ;;  %v8252_v45 = vpop.eup %8251  ;;  %v11273_v29 = vld [vmem:[%s13925_s5 + $0x20] ss:$12 sps:$4 sm:$0xff]  }
 0x99d   : > { %v3429_v7 = vadd.f32 1.0, %v8252_v45  ;;  %v11286_v45 = vld [vmem:[%s13925_s5 + $0x30] ss:$12 sps:$4 sm:$0xff]  }
 0x99e   : > { %8253 = vrcp.f32 %v3422_v30  ;;  %v11279_v30 = vld [vmem:[%s13925_s5 + $0x34] ss:$12 sps:$4 sm:$0xff]  }
 0x9a8   : > { %v8254_v6 = vpop.eup %8253 }
 0x9a9   : > { %v3433_v39 = vmul.f32 %v8254_v6, %v3432_v25  ;;  %v11292_v25 = vld [vmem:[%s13925_s5 + $0x38] ss:$12 sps:$4 sm:$0xff]  }
 0x9aa   : > { %v11298_v6 = vld [vmem:[%s13925_s5 + $0x4c] ss:$12 sps:$4 sm:$0xff]  }
 0x9ab   : > { %v3434_v17 = vadd.f32 %v3433_v39, %v3332_v26  ;;  %v11305_v26 = vld [vmem:[%s13925_s5 + $0x48] ss:$12 sps:$4 sm:$0xff]   ;;  %v11311_v39 = vld [vmem:[%s13925_s5 + $0x50] ss:$12 sps:$4 sm:$0xff]  }
 0x9ad   : > { %8255 = vtanh.f32 %v3434_v17  ;;  %v11317_v17 = vld [vmem:[%s13925_s5 + $0x64] ss:$12 sps:$4 sm:$0xff]  }
 0x9ae   : > { %8257 = vrcp.f32 %v3429_v7  ;;  %v11324_v7 = vld [vmem:[%s13925_s5 + $0x60] ss:$12 sps:$4 sm:$0xff]  }
 0x9b7   : > { %v8256_v52 = vpop.eup %8255 }
 0x9b8   : > { %v3436_v50 = vsub.f32 %v10701_v60, %v8256_v52  ;;  %v8258_v55 = vpop.eup %8257  ;;  %v14531_v60 = vld [vmem:[#allocation74_spill] sm:$0xff] }
 0x9ba   : > { %v3437_v1 = vmul.f32 %v8258_v55, %v3436_v50  ;;  %v11336_v50 = vld [vmem:[%s13925_s5 + $0x7c] ss:$12 sps:$4 sm:$0xff]   ;;  %v11343_v55 = vld [vmem:[%s13925_s5 + $0x78] ss:$12 sps:$4 sm:$0xff]  }
 0x9bc   : > { %v11145_v43 = vadd.f32 %v8256_v52, %v3437_v1  ;;  %v11330_v52 = vld [vmem:[%s13925_s5 + $0x68] ss:$12 sps:$4 sm:$0xff]   ;;  %v11349_v1 = vld [vmem:[%s13925_s5 + $0x80] ss:$12 sps:$4 sm:$0xff]  }
 0x9be   : > { %v11149_v2 = vpack.c.bf16 %v11145_v43, %v11145_v43 }
 0x9c0   : > { %3473 = vmatmul.mubr.bf16.vlgmr.msra.gmra.mrb[60].mxu0 %v11149_v2  ;;  %7209 = vmatmul.mubr.bf16.vlgmr.msra.gmra.mrb[80].mxu1 %v11149_v2 }
 0x9c1   : > { %3523 = vmatpush1.bf16.msra.mxu0 %v10712_v12  ;;  %7213 = vmatpush3.bf16.msra.mxu1 %v10718_v15  ;;  %v14532_v12 = vld [vmem:[#allocation75_spill] sm:$0xff]  ;;  %v14533_v15 = vld [vmem:[#allocation76_spill] sm:$0xff] }
 0x9c2   : > { %3524 = vmatprep.subr.bf16.mxu0 %v10724_v61  ;;  %7214 = vmatprep.subr.bf16.mxu1 %v14258_v36  ;;  %v14534_v61 = vld [vmem:[#allocation77_spill] sm:$0xff] }
 0x9c3   : > { %3554 = vmatprep.mubr.bf16.mxu0 %v14259_v42  ;;  %7228 = vmatprep.mubr.msk.bf16.mxu1 %vm8807_vm2, %v14258_v36 }
 0x9c5   : > { %3525 = vmatpush1.bf16.msra.mxu0 %v10734_v3  ;;  %7215 = vmatpush3.bf16.msra.mxu1 %v10740_v41  ;;  %v14535_v3 = vld [vmem:[#allocation78_spill] sm:$0xff]  ;;  %v14536_v41 = vld [vmem:[#allocation79_spill] sm:$0xff] }
 0x9c6   : > { %3526 = vmatprep.subr.bf16.mxu0 %v10746_v18  ;;  %7216 = vmatprep.subr.bf16.mxu1 %v14258_v36  ;;  %v14537_v18 = vld [vmem:[#allocation80_spill] sm:$0xff] }
 0x9c9   : > { %3527 = vmatpush1.bf16.msra.mxu0 %v10753_v21  ;;  %7217 = vmatpush3.bf16.msra.mxu1 %v10759_v53  ;;  %v14538_v21 = vld [vmem:[#allocation81_spill] sm:$0xff]  ;;  %v14539_v53 = vld [vmem:[#allocation82_spill] sm:$0xff] }
 0x9ca   : > { %3528 = vmatprep.subr.bf16.mxu0 %v10765_v58  ;;  %7218 = vmatprep.subr.bf16.mxu1 %v14258_v36  ;;  %v14540_v58 = vld [vmem:[#allocation83_spill] sm:$0xff] }
 0x9cd   : > { %3529 = vmatpush1.bf16.msra.mxu0 %v10772_v13  ;;  %7219 = vmatpush3.bf16.msra.mxu1 %v10778_v57  ;;  %v3521_v13 = vpack.c.bf16 %v11055_v38, %v11055_v38  ;;  %v14541_v57 = vld [vmem:[#allocation84_spill] sm:$0xff] }
 0x9ce   : > { %3530 = vmatprep.subr.bf16.mxu0 %v10784_v59  ;;  %7220 = vmatprep.subr.bf16.mxu1 %v14258_v36  ;;  %v14542_v59 = vld [vmem:[#allocation85_spill] sm:$0xff] }
 0x9d1   : > { %3531 = vmatpush1.bf16.msra.mxu0 %v14530_v63  ;;  %7221 = vmatpush3.bf16.msra.mxu1 %v14531_v60  ;;  %v11355_v63 = vld [vmem:[%s13925_s5 + $0x94] ss:$12 sps:$4 sm:$0xff]   ;;  %v11362_v60 = vld [vmem:[%s13925_s5 + $0x90] ss:$12 sps:$4 sm:$0xff]  }
 0x9d2   : > { %3532 = vmatprep.subr.bf16.mxu0 %v14532_v12  ;;  %7222 = vmatprep.subr.bf16.mxu1 %v14258_v36  ;;  %v11368_v12 = vld [vmem:[%s13925_s5 + $0x98] ss:$12 sps:$4 sm:$0xff]  }
 0x9d5   : > { %3533 = vmatpush1.bf16.msra.mxu0 %v14533_v15  ;;  %7223 = vmatpush3.bf16.msra.mxu1 %v14534_v61  ;;  %v11374_v15 = vld [vmem:[%s13925_s5 + $0xac] ss:$12 sps:$4 sm:$0xff]   ;;  %v11381_v61 = vld [vmem:[%s13925_s5 + $0xa8] ss:$12 sps:$4 sm:$0xff]  }
 0x9d6   : > { %3534 = vmatprep.subr.bf16.mxu0 %v14535_v3  ;;  %7224 = vmatprep.subr.bf16.mxu1 %v14258_v36  ;;  %v11387_v3 = vld [vmem:[%s13925_s5 + $0xb0] ss:$12 sps:$4 sm:$0xff]  }
 0x9d9   : > { %3535 = vmatpush1.bf16.msra.mxu0 %v14536_v41  ;;  %7225 = vmatpush3.bf16.msra.mxu1 %v14537_v18  ;;  %v11393_v41 = vld [vmem:[%s13927_s7 + $0x4] ss:$12 sps:$4 sm:$0xff]  }
 0x9da   : > { %3536 = vmatprep.subr.bf16.mxu0 %v14538_v21  ;;  %7226 = vmatprep.subr.bf16.mxu1 %v14258_v36 }
 0x9dd   : > { %3537 = vmatpush1.bf16.msra.mxu0 %v14539_v53  ;;  %7227 = vmatpush3.bf16.msra.mxu1 %v14540_v58 }
 0x9de   : > { %3629 = vmatprep.subr.bf16.mxu0 %v14541_v57  ;;  %7232 = vmatprep.subr.bf16.mxu1 %v14258_v36 }
 0x9e0   : > { %3555 = vmatmul.mubr.bf16.vlgmr.msra.gmra.mrb[60].mxu0 %v3521_v13  ;;  %7229 = vmatmul.mubr.bf16.vlgmr.msra.gmra.mrb[84].mxu1 %v3521_v13 }
 0x9e1   : > { %3630 = vmatpush1.bf16.msra.mxu0 %v10869_v16  ;;  %7233 = vmatpush3.bf16.msra.mxu1 %v14542_v59  ;;  %v14547_v16 = vld [vmem:[#allocation90_spill] sm:$0xff] }
 0x9e2   : > { %3631 = vmatprep.subr.bf16.mxu0 %v14543_v32  ;;  %7234 = vmatprep.subr.bf16.mxu1 %v14258_v36 }
 0x9e3   : > { %3661 = vmatprep.mubr.bf16.mxu0 %v14259_v42  ;;  %7248 = vmatprep.mubr.msk.bf16.mxu1 %vm8807_vm2, %v14258_v36 }
 0x9e5   : > { %3632 = vmatpush1.bf16.msra.mxu0 %v14544_v5  ;;  %7235 = vmatpush3.bf16.msra.mxu1 %v14545_v31 }
 0x9e6   : > { %3633 = vmatprep.subr.bf16.mxu0 %v14546_v47  ;;  %7236 = vmatprep.subr.bf16.mxu1 %v14258_v36 }
 0x9e9   : > { %3634 = vmatpush1.bf16.msra.mxu0 %v14547_v16  ;;  %7237 = vmatpush3.bf16.msra.mxu1 %v14548_v24 }
 0x9ea   : > { %3635 = vmatprep.subr.bf16.mxu0 %v14549_v8  ;;  %7238 = vmatprep.subr.bf16.mxu1 %v14258_v36 }
 0x9ed   : > { %3636 = vmatpush1.bf16.msra.mxu0 %v14550_v48  ;;  %7239 = vmatpush3.bf16.msra.mxu1 %v14551_v23 }
 0x9ee   : > { %3637 = vmatprep.subr.bf16.mxu0 %v14552_v49  ;;  %7240 = vmatprep.subr.bf16.mxu1 %v14258_v36 }
 0x9f1   : > { %3638 = vmatpush1.bf16.msra.mxu0 %v14553_v54  ;;  %7241 = vmatpush3.bf16.msra.mxu1 %v14554_v40 }
 0x9f2   : > { %3639 = vmatprep.subr.bf16.mxu0 %v14555_v11  ;;  %7242 = vmatprep.subr.bf16.mxu1 %v14258_v36 }
 0x9f5   : > { %3640 = vmatpush1.bf16.msra.mxu0 %v14556_v34  ;;  %7243 = vmatpush3.bf16.msra.mxu1 %v14557_v37 }
 0x9f6   : > { %3641 = vmatprep.subr.bf16.mxu0 %v14558_v10  ;;  %7244 = vmatprep.subr.bf16.mxu1 %v14258_v36 }
 0x9f9   : > { %3642 = vmatpush1.bf16.msra.mxu0 %v10986_v14  ;;  %7245 = vmatpush3.bf16.msra.mxu1 %v11221_v19  ;;  %v11236_v14 = vld [vmem:[%s13925_s5 + $0x4] ss:$12 sps:$4 sm:$0xff]  }
 0x9fa   : > { %3643 = vmatprep.subr.bf16.mxu0 %v10993_v27  ;;  %7246 = vmatprep.subr.bf16.mxu1 %v14258_v36  ;;  %v11245_v27 = vld [vmem:[%s13925_s5] ss:$12 sps:$4 sm:$0xff]  }
 0x9fd   : > { %3644 = vmatpush1.bf16.msra.mxu0 %v11000_v22  ;;  %7247 = vmatpush3.bf16.msra.mxu1 %v11230_v20  ;;  %v11251_v22 = vld [vmem:[%s13925_s5 + $0x8] ss:$12 sps:$4 sm:$0xff]  }
 0x9fe   : > { %3732 = vmatprep.subr.bf16.mxu0 %v11236_v14  ;;  %7252 = vmatprep.subr.bf16.mxu1 %v14258_v36 }
 0xa00   : > { %3662 = vmatmul.mubr.bf16.vlgmr.msra.gmra.mrb[64].mxu0 %v11064_v9  ;;  %7249 = vmatmul.mubr.bf16.vlgmr.msra.gmra.mrb[88].mxu1 %v11064_v9  ;;  %v11267_v9 = vld [vmem:[%s13925_s5 + $0x18] ss:$12 sps:$4 sm:$0xff]  }
 0xa01   : > { %3733 = vmatpush1.bf16.msra.mxu0 %v11245_v27  ;;  %7253 = vmatpush3.bf16.msra.mxu1 %v11251_v22 }
 0xa02   : > { %3734 = vmatprep.subr.bf16.mxu0 %v11257_v46  ;;  %7254 = vmatprep.subr.bf16.mxu1 %v14258_v36 }
 0xa03   : > { %3764 = vmatprep.mubr.bf16.mxu0 %v14259_v42  ;;  %7268 = vmatprep.mubr.msk.bf16.mxu1 %vm8807_vm2, %v14258_v36 }
 0xa05   : > { %3735 = vmatpush1.bf16.msra.mxu0 %v11267_v9  ;;  %7255 = vmatpush3.bf16.msra.mxu1 %v11273_v29 }
 0xa06   : > { %3736 = vmatprep.subr.bf16.mxu0 %v11279_v30  ;;  %7256 = vmatprep.subr.bf16.mxu1 %v14258_v36 }
 0xa09   : > { %3737 = vmatpush1.bf16.msra.mxu0 %v11286_v45  ;;  %7257 = vmatpush3.bf16.msra.mxu1 %v11292_v25 }
 0xa0a   : > { %3738 = vmatprep.subr.bf16.mxu0 %v11298_v6  ;;  %7258 = vmatprep.subr.bf16.mxu1 %v14258_v36 }
 0xa0d   : > { %3739 = vmatpush1.bf16.msra.mxu0 %v11305_v26  ;;  %7259 = vmatpush3.bf16.msra.mxu1 %v11311_v39 }
 0xa0e   : > { %3740 = vmatprep.subr.bf16.mxu0 %v11317_v17  ;;  %7260 = vmatprep.subr.bf16.mxu1 %v14258_v36 }
 0xa11   : > { %3741 = vmatpush1.bf16.msra.mxu0 %v11324_v7  ;;  %7261 = vmatpush3.bf16.msra.mxu1 %v11330_v52 }
 0xa12   : > { %3742 = vmatprep.subr.bf16.mxu0 %v11336_v50  ;;  %7262 = vmatprep.subr.bf16.mxu1 %v14258_v36 }
 0xa15   : > { %3743 = vmatpush1.bf16.msra.mxu0 %v11343_v55  ;;  %7263 = vmatpush3.bf16.msra.mxu1 %v11349_v1 }
 0xa16   : > { %3744 = vmatprep.subr.bf16.mxu0 %v11355_v63  ;;  %7264 = vmatprep.subr.bf16.mxu1 %v14258_v36 }
 0xa19   : > { %3745 = vmatpush1.bf16.msra.mxu0 %v11362_v60  ;;  %7265 = vmatpush3.bf16.msra.mxu1 %v11368_v12 }
 0xa1a   : > { %3746 = vmatprep.subr.bf16.mxu0 %v11374_v15  ;;  %7266 = vmatprep.subr.bf16.mxu1 %v14258_v36 }
 0xa1d   : > { %3747 = vmatpush1.bf16.msra.mxu0 %v11381_v61  ;;  %7267 = vmatpush3.bf16.msra.mxu1 %v11387_v3 }
 0xa1e   : > { %3813 = vmatprep.subr.bf16.mxu0 %v11393_v41  ;;  %7272 = vmatprep.subr.bf16.mxu1 %v14258_v36 }
 0xa93   : > { %v3515_v18 = vpop.f32.mrb[80].mxu1 }
 0xa94   : > { %v7210_v21 = vpop.f32.mrb[81].mxu1  ;;  %v3516_v37 = vadd.f32 %v3515_v18, %v10005_v4 }
 0xa95   : > { %v3518_v53 = vpop.f32.mrb[82].mxu1 }
 0xa96   : > { %v7211_v58 = vpop.f32.mrb[83].mxu1 }
 0xab3   : > { %v3556_v13 = vpop.f32.mrb[60].mxu0  ;;  %v3597_v57 = vpop.f32.mrb[84].mxu1 }
 0xab4   : > { %v7870_v59 = vadd.f32 %v3556_v13, %v9992_v51  ;;  %v3558_v32 = vpop.f32.mrb[61].mxu0  ;;  %v7230_v5 = vpop.f32.mrb[85].mxu1  ;;  %v3617_v11 = vadd.f32 %v11048_v35, %v3597_v57 }
 0xab5   : > { %v3560_v31 = vpop.f32.mrb[62].mxu0  ;;  %v3600_v47 = vpop.f32.mrb[86].mxu1  ;;  %v7871_v48 = vadd.f32 %v3558_v32, %v9996_v62 }
 0xab6   : > { %v6391_v16 = vmul.f32 -1.442695, %v7870_v59  ;;  %v3561_v24 = vpop.f32.mrb[63].mxu0  ;;  %v7231_v8 = vpop.f32.mrb[87].mxu1  ;;  %v14559_v59 = vld [vmem:[#allocation18_spill] sm:$0xff]  ;;  %v14560_v47 = vld [vmem:[#allocation20_spill] sm:$0xff] }
 0xab7   : > { %v6392_v23 = vmul.f32 -1.442695, %v7871_v48 }
 0xab8   : > { %8259 = vpow2.f32 %v6391_v16 }
 0xab9   : > { %8261 = vpow2.f32 %v6392_v23 }
 0xac2   : > { %v8260_v49 = vpop.eup %8259 }
 0xac3   : > { %v3607_v54 = vadd.f32 1.0, %v8260_v49  ;;  %v8262_v40 = vpop.eup %8261 }
 0xac4   : > { %v3614_v53 = vadd.f32 1.0, %v8262_v40 }
 0xac5   : > { %8263 = vrcp.f32 %v3607_v54 }
 0xacf   : > { %v8264_v34 = vpop.eup %8263 }
 0xad0   : > { %v3618_v10 = vmul.f32 %v8264_v34, %v3617_v11 }
 0xad2   : > { %v3619_v21 = vadd.f32 %v3618_v10, %v3516_v37 }
 0xad3   : > { %v3663_v58 = vpop.f32.mrb[64].mxu0  ;;  %v3704_v13 = vpop.f32.mrb[88].mxu1 }
 0xad4   : > { %8265 = vtanh.f32 %v3619_v21  ;;  %v3710_v5 = vadd.f32 %v3663_v58, %v14559_v59  ;;  %v3665_v32 = vpop.f32.mrb[65].mxu0  ;;  %v7250_v31 = vpop.f32.mrb[89].mxu1  ;;  %v11409_v21 = vld [vmem:[%s13924_s4] ss:$0 sm:$0xff] }
 0xad5   : > { %v3717_v16 = vadd.f32 %v3665_v32, %v14560_v47  ;;  %v3667_v24 = vpop.f32.mrb[66].mxu0  ;;  %v3707_v8 = vpop.f32.mrb[90].mxu1  ;;  %8267 = vrcp.f32 %v3614_v53  ;;  %v3724_v53 = vadd.f32 %v11409_v21, %v3704_v13  ;;  %v11425_v13 = vld [vmem:[%s13927_s7] ss:$12 sps:$4 sm:$0xff]  }
 0xad6   : > { %v6393_v48 = vmul.f32 -1.442695, %v3710_v5  ;;  %v3668_v35 = vpop.f32.mrb[67].mxu0  ;;  %v7251_v57 = vpop.f32.mrb[91].mxu1  ;;  %v14562_v5 = vld [vmem:[#allocation21_spill] sm:$0xff] }
 0xad7   : > { %v6394_v54 = vmul.f32 -1.442695, %v3717_v16  ;;  %v11437_v57 = vld [vmem:[%s13927_s7 + $0x1c] ss:$12 sps:$4 sm:$0xff]  }
 0xad8   : > { %8269 = vpow2.f32 %v6393_v48 }
 0xad9   : > { %8271 = vpow2.f32 %v6394_v54  ;;  %v11466_v54 = vld [vmem:[%s13927_s7 + $0x30] ss:$12 sps:$4 sm:$0xff]  }
 0xada   : > { %14563 = vst [vmem:[#allocation12_spill] sm:$0xff] %v11466_v54 }
 0xade   : > { %v8266_v18 = vpop.eup %8265 }
 0xadf   : > { %v3621_v23 = vsub.f32 %v11055_v38, %v8266_v18  ;;  %v8268_v49 = vpop.eup %8267  ;;  %v11561_v38 = vld [vmem:[%s13927_s7 + $0xa8] ss:$12 sps:$4 sm:$0xff]  }
 0xae0   : > { %14578 = vst [vmem:[#allocation40_spill] sm:$0xff] %v11561_v38 }
 0xae1   : > { %v3622_v40 = vmul.f32 %v8268_v49, %v3621_v23  ;;  %v11453_v23 = vld [vmem:[%s13927_s7 + $0x20] ss:$12 sps:$4 sm:$0xff]  }
 0xae2   : > { %v8270_v11 = vpop.eup %8269  ;;  %v11459_v49 = vld [vmem:[%s13927_s7 + $0x34] ss:$12 sps:$4 sm:$0xff]  }
 0xae3   : > { %v3714_v34 = vadd.f32 1.0, %v8270_v11  ;;  %v11404_v37 = vadd.f32 %v8266_v18, %v3622_v40  ;;  %v8272_v10 = vpop.eup %8271  ;;  %v11447_v18 = vld [vmem:[%s13927_s7 + $0x18] ss:$12 sps:$4 sm:$0xff]  }
 0xae4   : > { %v3721_v31 = vadd.f32 1.0, %v8272_v10  ;;  %v11472_v40 = vld [vmem:[%s13927_s7 + $0x38] ss:$12 sps:$4 sm:$0xff]   ;;  %v11491_v10 = vld [vmem:[%s13927_s7 + $0x50] ss:$12 sps:$4 sm:$0xff]  }
 0xae5   : > { %14561 = vst [vmem:[#allocation103_spill] sm:$0xff] %v11404_v37  ;;  %8273 = vrcp.f32 %v3714_v34  ;;  %14564 = vst [vmem:[#allocation14_spill] sm:$0xff] %v11472_v40  ;;  %v11478_v11 = vld [vmem:[%s13927_s7 + $0x4c] ss:$12 sps:$4 sm:$0xff]   ;;  %v11485_v34 = vld [vmem:[%s13927_s7 + $0x48] ss:$12 sps:$4 sm:$0xff]  }
 0xae6   : > { %14565 = vst [vmem:[#allocation13_spill] sm:$0xff] %v11478_v11  ;;  %14566 = vst [vmem:[#allocation15_spill] sm:$0xff] %v11485_v34 }
 0xae7   : > { %14567 = vst [vmem:[#allocation17_spill] sm:$0xff] %v11491_v10 }
 0xaef   : > { %v8274_v58 = vpop.eup %8273 }
 0xaf0   : > { %v3725_v59 = vmul.f32 %v8274_v58, %v3724_v53  ;;  %v11497_v53 = vld [vmem:[%s13927_s7 + $0x64] ss:$12 sps:$4 sm:$0xff]   ;;  %v11504_v58 = vld [vmem:[%s13927_s7 + $0x60] ss:$12 sps:$4 sm:$0xff]  }
 0xaf1   : > { %14568 = vst [vmem:[#allocation16_spill] sm:$0xff] %v11497_v53  ;;  %14569 = vst [vmem:[#allocation31_spill] sm:$0xff] %v11504_v58 }
 0xaf2   : > { %v3726_v32 = vadd.f32 %v3725_v59, %v14562_v5  ;;  %v11510_v59 = vld [vmem:[%s13927_s7 + $0x68] ss:$12 sps:$4 sm:$0xff]  }
 0xaf3   : > { %14570 = vst [vmem:[#allocation32_spill] sm:$0xff] %v11510_v59  ;;  %v11516_v5 = vld [vmem:[%s13927_s7 + $0x7c] ss:$12 sps:$4 sm:$0xff]  }
 0xaf4   : > { %8275 = vtanh.f32 %v3726_v32  ;;  %14571 = vst [vmem:[#allocation33_spill] sm:$0xff] %v11516_v5  ;;  %v11523_v32 = vld [vmem:[%s13927_s7 + $0x78] ss:$12 sps:$4 sm:$0xff]  }
 0xaf5   : > { %8277 = vrcp.f32 %v3721_v31  ;;  %14572 = vst [vmem:[#allocation34_spill] sm:$0xff] %v11523_v32  ;;  %v11529_v31 = vld [vmem:[%s13927_s7 + $0x80] ss:$12 sps:$4 sm:$0xff]  }
 0xaf6   : > { %14573 = vst [vmem:[#allocation35_spill] sm:$0xff] %v11529_v31 }
 0xafe   : > { %v8276_v47 = vpop.eup %8275 }
 0xaff   : > { %v3728_v16 = vsub.f32 %v11060_v56, %v8276_v47  ;;  %v8278_v24 = vpop.eup %8277  ;;  %v11431_v56 = vld [vmem:[%s13927_s7 + $0x8] ss:$12 sps:$4 sm:$0xff]  }
 0xb01   : > { %v3729_v8 = vmul.f32 %v8278_v24, %v3728_v16  ;;  %v11542_v16 = vld [vmem:[%s13927_s7 + $0x90] ss:$12 sps:$4 sm:$0xff]   ;;  %v11548_v24 = vld [vmem:[%s13927_s7 + $0x98] ss:$12 sps:$4 sm:$0xff]  }
 0xb02   : > { %14575 = vst [vmem:[#allocation37_spill] sm:$0xff] %v11542_v16  ;;  %14576 = vst [vmem:[#allocation38_spill] sm:$0xff] %v11548_v24 }
 0xb03   : > { %v11414_v48 = vadd.f32 %v8276_v47, %v3729_v8  ;;  %v11535_v47 = vld [vmem:[%s13927_s7 + $0x94] ss:$12 sps:$4 sm:$0xff]   ;;  %v11554_v8 = vld [vmem:[%s13927_s7 + $0xac] ss:$12 sps:$4 sm:$0xff]  }
 0xb04   : > { %14574 = vst [vmem:[#allocation36_spill] sm:$0xff] %v11535_v47  ;;  %14577 = vst [vmem:[#allocation39_spill] sm:$0xff] %v11554_v8 }
 0xb05   : > { %v11418_v35 = vpack.c.bf16 %v11414_v48, %v11414_v48 }
 0xb07   : > { %3765 = vmatmul.mubr.bf16.vlgmr.msra.gmra.mrb[68].mxu0 %v11418_v35  ;;  %7269 = vmatmul.mubr.bf16.vlgmr.msra.gmra.mrb[92].mxu1 %v11418_v35 }
 0xb08   : > { %3814 = vmatpush1.bf16.msra.mxu0 %v11425_v13  ;;  %7273 = vmatpush3.bf16.msra.mxu1 %v11431_v56 }
 0xb09   : > { %3815 = vmatprep.subr.bf16.mxu0 %v11437_v57  ;;  %7274 = vmatprep.subr.bf16.mxu1 %v14258_v36 }
 0xb0a   : > { %3845 = vmatprep.mubr.bf16.mxu0 %v14259_v42  ;;  %7288 = vmatprep.mubr.msk.bf16.mxu1 %vm8807_vm2, %v14258_v36 }
 0xb0c   : > { %3816 = vmatpush1.bf16.msra.mxu0 %v11447_v18  ;;  %7275 = vmatpush3.bf16.msra.mxu1 %v11453_v23 }
 0xb0d   : > { %3817 = vmatprep.subr.bf16.mxu0 %v11459_v49  ;;  %7276 = vmatprep.subr.bf16.mxu1 %v14258_v36 }
 0xb10   : > { %3818 = vmatpush1.bf16.msra.mxu0 %v11466_v54  ;;  %7277 = vmatpush3.bf16.msra.mxu1 %v11472_v40 }
 0xb11   : > { %3819 = vmatprep.subr.bf16.mxu0 %v11478_v11  ;;  %7278 = vmatprep.subr.bf16.mxu1 %v14258_v36 }
 0xb14   : > { %3820 = vmatpush1.bf16.msra.mxu0 %v11485_v34  ;;  %7279 = vmatpush3.bf16.msra.mxu1 %v11491_v10 }
 0xb15   : > { %3821 = vmatprep.subr.bf16.mxu0 %v11497_v53  ;;  %7280 = vmatprep.subr.bf16.mxu1 %v14258_v36 }
 0xb18   : > { %3822 = vmatpush1.bf16.msra.mxu0 %v11504_v58  ;;  %7281 = vmatpush3.bf16.msra.mxu1 %v11510_v59 }
 0xb19   : > { %3823 = vmatprep.subr.bf16.mxu0 %v11516_v5  ;;  %7282 = vmatprep.subr.bf16.mxu1 %v14258_v36 }
 0xb1c   : > { %3824 = vmatpush1.bf16.msra.mxu0 %v11523_v32  ;;  %7283 = vmatpush3.bf16.msra.mxu1 %v11529_v31 }
 0xb1d   : > { %3825 = vmatprep.subr.bf16.mxu0 %v11535_v47  ;;  %7284 = vmatprep.subr.bf16.mxu1 %v14258_v36 }
 0xb20   : > { %3826 = vmatpush1.bf16.msra.mxu0 %v11542_v16  ;;  %7285 = vmatpush3.bf16.msra.mxu1 %v11548_v24 }
 0xb21   : > { %3827 = vmatprep.subr.bf16.mxu0 %v11554_v8  ;;  %7286 = vmatprep.subr.bf16.mxu1 %v14258_v36  ;;  %v11573_v8 = vld [vmem:[%s13929_s9 + $0x4] ss:$12 sps:$4 sm:$0xff]  }
 0xb22   : > { %14580 = vst [vmem:[#allocation42_spill] sm:$0xff] %v11573_v8 }
 0xb24   : > { %3828 = vmatpush1.bf16.msra.mxu0 %v11561_v38  ;;  %7287 = vmatpush3.bf16.msra.mxu1 %v11567_v33  ;;  %v11582_v38 = vld [vmem:[%s13929_s9] ss:$12 sps:$4 sm:$0xff]   ;;  %v11588_v33 = vld [vmem:[%s13929_s9 + $0x8] ss:$12 sps:$4 sm:$0xff]  }
 0xb25   : > { %3916 = vmatprep.subr.bf16.mxu0 %v11573_v8  ;;  %7292 = vmatprep.subr.bf16.mxu1 %v14258_v36  ;;  %14581 = vst [vmem:[#allocation43_spill] sm:$0xff] %v11582_v38  ;;  %14582 = vst [vmem:[#allocation44_spill] sm:$0xff] %v11588_v33  ;;  %v11594_v8 = vld [vmem:[%s13929_s9 + $0x1c] ss:$12 sps:$4 sm:$0xff]  }
 0xb26   : > { %14583 = vst [vmem:[#allocation45_spill] sm:$0xff] %v11594_v8 }
 0xb27   : > { %3846 = vmatmul.mubr.bf16.vlgmr.msra.gmra.mrb[68].mxu0 %v11149_v2  ;;  %7289 = vmatmul.mubr.bf16.vlgmr.msra.gmra.mrb[96].mxu1 %v11149_v2  ;;  %v11604_v2 = vld [vmem:[%s13929_s9 + $0x18] ss:$12 sps:$4 sm:$0xff]  }
 0xb28   : > { %3917 = vmatpush1.bf16.msra.mxu0 %v11582_v38  ;;  %7293 = vmatpush3.bf16.msra.mxu1 %v11588_v33  ;;  %14584 = vst [vmem:[#allocation46_spill] sm:$0xff] %v11604_v2  ;;  %v11610_v33 = vld [vmem:[%s13929_s9 + $0x20] ss:$12 sps:$4 sm:$0xff]  }
 0xb29   : > { %3918 = vmatprep.subr.bf16.mxu0 %v11594_v8  ;;  %7294 = vmatprep.subr.bf16.mxu1 %v14258_v36  ;;  %14585 = vst [vmem:[#allocation47_spill] sm:$0xff] %v11610_v33  ;;  %v11616_v8 = vld [vmem:[%s13929_s9 + $0x34] ss:$12 sps:$4 sm:$0xff]  }
 0xb2a   : > { %3948 = vmatprep.mubr.bf16.mxu0 %v14259_v42  ;;  %7308 = vmatprep.mubr.msk.bf16.mxu1 %vm8807_vm2, %v14258_v36  ;;  %14586 = vst [vmem:[#allocation48_spill] sm:$0xff] %v11616_v8 }
 0xb2c   : > { %3919 = vmatpush1.bf16.msra.mxu0 %v11604_v2  ;;  %7295 = vmatpush3.bf16.msra.mxu1 %v11610_v33  ;;  %v11623_v2 = vld [vmem:[%s13929_s9 + $0x30] ss:$12 sps:$4 sm:$0xff]   ;;  %v11629_v33 = vld [vmem:[%s13929_s9 + $0x38] ss:$12 sps:$4 sm:$0xff]  }
 0xb2d   : > { %3920 = vmatprep.subr.bf16.mxu0 %v11616_v8  ;;  %7296 = vmatprep.subr.bf16.mxu1 %v14258_v36  ;;  %14587 = vst [vmem:[#allocation49_spill] sm:$0xff] %v11623_v2  ;;  %14588 = vst [vmem:[#allocation50_spill] sm:$0xff] %v11629_v33  ;;  %v11635_v8 = vld [vmem:[%s13929_s9 + $0x4c] ss:$12 sps:$4 sm:$0xff]  }
 0xb2e   : > { %14589 = vst [vmem:[#allocation51_spill] sm:$0xff] %v11635_v8 }
 0xb30   : > { %3921 = vmatpush1.bf16.msra.mxu0 %v11623_v2  ;;  %7297 = vmatpush3.bf16.msra.mxu1 %v11629_v33  ;;  %v11642_v2 = vld [vmem:[%s13929_s9 + $0x48] ss:$12 sps:$4 sm:$0xff]   ;;  %v11648_v33 = vld [vmem:[%s13929_s9 + $0x50] ss:$12 sps:$4 sm:$0xff]  }
 0xb31   : > { %3922 = vmatprep.subr.bf16.mxu0 %v11635_v8  ;;  %7298 = vmatprep.subr.bf16.mxu1 %v14258_v36  ;;  %14590 = vst [vmem:[#allocation52_spill] sm:$0xff] %v11642_v2  ;;  %14591 = vst [vmem:[#allocation53_spill] sm:$0xff] %v11648_v33  ;;  %v11654_v8 = vld [vmem:[%s13929_s9 + $0x64] ss:$12 sps:$4 sm:$0xff]  }
 0xb32   : > { %14592 = vst [vmem:[#allocation54_spill] sm:$0xff] %v11654_v8 }
 0xb34   : > { %3923 = vmatpush1.bf16.msra.mxu0 %v11642_v2  ;;  %7299 = vmatpush3.bf16.msra.mxu1 %v11648_v33  ;;  %v11661_v2 = vld [vmem:[%s13929_s9 + $0x60] ss:$12 sps:$4 sm:$0xff]   ;;  %v11667_v33 = vld [vmem:[%s13929_s9 + $0x68] ss:$12 sps:$4 sm:$0xff]  }
 0xb35   : > { %3924 = vmatprep.subr.bf16.mxu0 %v11654_v8  ;;  %7300 = vmatprep.subr.bf16.mxu1 %v14258_v36  ;;  %14593 = vst [vmem:[#allocation55_spill] sm:$0xff] %v11661_v2  ;;  %14594 = vst [vmem:[#allocation56_spill] sm:$0xff] %v11667_v33  ;;  %v11673_v8 = vld [vmem:[%s13929_s9 + $0x7c] ss:$12 sps:$4 sm:$0xff]  }
 0xb36   : > { %14595 = vst [vmem:[#allocation57_spill] sm:$0xff] %v11673_v8 }
 0xb38   : > { %3925 = vmatpush1.bf16.msra.mxu0 %v11661_v2  ;;  %7301 = vmatpush3.bf16.msra.mxu1 %v11667_v33  ;;  %v11680_v2 = vld [vmem:[%s13929_s9 + $0x78] ss:$12 sps:$4 sm:$0xff]   ;;  %v11686_v33 = vld [vmem:[%s13929_s9 + $0x80] ss:$12 sps:$4 sm:$0xff]  }
 0xb39   : > { %3926 = vmatprep.subr.bf16.mxu0 %v11673_v8  ;;  %7302 = vmatprep.subr.bf16.mxu1 %v14258_v36  ;;  %14596 = vst [vmem:[#allocation58_spill] sm:$0xff] %v11680_v2  ;;  %14597 = vst [vmem:[#allocation59_spill] sm:$0xff] %v11686_v33  ;;  %v11692_v8 = vld [vmem:[%s13929_s9 + $0x94] ss:$12 sps:$4 sm:$0xff]  }
 0xb3a   : > { %14598 = vst [vmem:[#allocation60_spill] sm:$0xff] %v11692_v8 }
 0xb3c   : > { %3927 = vmatpush1.bf16.msra.mxu0 %v11680_v2  ;;  %7303 = vmatpush3.bf16.msra.mxu1 %v11686_v33  ;;  %v11699_v2 = vld [vmem:[%s13929_s9 + $0x90] ss:$12 sps:$4 sm:$0xff]   ;;  %v11705_v33 = vld [vmem:[%s13929_s9 + $0x98] ss:$12 sps:$4 sm:$0xff]  }
 0xb3d   : > { %3928 = vmatprep.subr.bf16.mxu0 %v11692_v8  ;;  %7304 = vmatprep.subr.bf16.mxu1 %v14258_v36  ;;  %14599 = vst [vmem:[#allocation61_spill] sm:$0xff] %v11699_v2  ;;  %14600 = vst [vmem:[#allocation62_spill] sm:$0xff] %v11705_v33  ;;  %v11711_v8 = vld [vmem:[%s13929_s9 + $0xac] ss:$12 sps:$4 sm:$0xff]  }
 0xb3e   : > { %14601 = vst [vmem:[#allocation63_spill] sm:$0xff] %v11711_v8 }
 0xb40   : > { %3929 = vmatpush1.bf16.msra.mxu0 %v11699_v2  ;;  %7305 = vmatpush3.bf16.msra.mxu1 %v11705_v33  ;;  %v11718_v2 = vld [vmem:[%s13929_s9 + $0xa8] ss:$12 sps:$4 sm:$0xff]   ;;  %v11724_v33 = vld [vmem:[%s13929_s9 + $0xb0] ss:$12 sps:$4 sm:$0xff]  }
 0xb41   : > { %3930 = vmatprep.subr.bf16.mxu0 %v11711_v8  ;;  %7306 = vmatprep.subr.bf16.mxu1 %v14258_v36  ;;  %14602 = vst [vmem:[#allocation64_spill] sm:$0xff] %v11718_v2  ;;  %14603 = vst [vmem:[#allocation65_spill] sm:$0xff] %v11724_v33  ;;  %v11730_v8 = vld [vmem:[%s13931_s11 + $0x4] ss:$12 sps:$4 sm:$0xff]  }
 0xb42   : > { %14604 = vst [vmem:[#allocation66_spill] sm:$0xff] %v11730_v8 }
 0xb44   : > { %3931 = vmatpush1.bf16.msra.mxu0 %v11718_v2  ;;  %7307 = vmatpush3.bf16.msra.mxu1 %v11724_v33 }
 0xb45   : > { %3998 = vmatprep.subr.bf16.mxu0 %v11730_v8  ;;  %7312 = vmatprep.subr.bf16.mxu1 %v14258_v36 }
 0xbda   : > { %v3807_v38 = vpop.f32.mrb[92].mxu1 }
 0xbdb   : > { %v7270_v24 = vpop.f32.mrb[93].mxu1 }
 0xbdc   : > { %v3810_v16 = vpop.f32.mrb[94].mxu1 }
 0xbdd   : > { %v7271_v2 = vpop.f32.mrb[95].mxu1 }
 0xbde   : > { %v11783_v2 = vld [vmem:[%s13931_s11 + $0x20] ss:$12 sps:$4 sm:$0xff]  }
 0xbfa   : > { %v3847_v47 = vpop.f32.mrb[68].mxu0  ;;  %v3888_v31 = vpop.f32.mrb[96].mxu1 }
 0xbfb   : > { %v7872_v32 = vadd.f32 %v3847_v47, %v9626_v44  ;;  %v3849_v5 = vpop.f32.mrb[69].mxu0  ;;  %v7290_v59 = vpop.f32.mrb[97].mxu1  ;;  %v11739_v47 = vld [vmem:[%s13928_s8] ss:$0 sm:$0xff] }
 0xbfc   : > { %v3851_v33 = vpop.f32.mrb[70].mxu0  ;;  %v3891_v58 = vpop.f32.mrb[98].mxu1  ;;  %v7873_v8 = vadd.f32 %v3849_v5, %v14376_v0 }
 0xbfd   : > { %v6395_v53 = vmul.f32 -1.442695, %v7872_v32  ;;  %v3852_v10 = vpop.f32.mrb[71].mxu0  ;;  %v7291_v34 = vpop.f32.mrb[99].mxu1  ;;  %v3908_v33 = vadd.f32 %v11739_v47, %v3888_v31  ;;  %v11767_v31 = vld [vmem:[%s13931_s11 + $0x1c] ss:$12 sps:$4 sm:$0xff]  }
 0xbfe   : > { %v6396_v11 = vmul.f32 -1.442695, %v7873_v8  ;;  %v3808_v10 = vadd.f32 %v3807_v38, %v9639_v28  ;;  %v11755_v38 = vld [vmem:[%s13931_s11] ss:$12 sps:$4 sm:$0xff]   ;;  %v11777_v8 = vld [vmem:[%s13931_s11 + $0x18] ss:$12 sps:$4 sm:$0xff]  }
 0xbff   : > { %8279 = vpow2.f32 %v6395_v53 }
 0xc00   : > { %8281 = vpow2.f32 %v6396_v11 }
 0xc09   : > { %v8280_v40 = vpop.eup %8279 }
 0xc0a   : > { %v3898_v54 = vadd.f32 1.0, %v8280_v40  ;;  %v8282_v16 = vpop.eup %8281 }
 0xc0b   : > { %v3905_v59 = vadd.f32 1.0, %v8282_v16  ;;  %v11789_v16 = vld [vmem:[%s13931_s11 + $0x34] ss:$12 sps:$4 sm:$0xff]  }
 0xc0c   : > { %8283 = vrcp.f32 %v3898_v54 }
 0xc16   : > { %v8284_v58 = vpop.eup %8283 }
 0xc17   : > { %v3909_v34 = vmul.f32 %v8284_v58, %v3908_v33  ;;  %v11796_v33 = vld [vmem:[%s13931_s11 + $0x30] ss:$12 sps:$4 sm:$0xff]   ;;  %v11802_v58 = vld [vmem:[%s13931_s11 + $0x38] ss:$12 sps:$4 sm:$0xff]  }
 0xc19   : > { %v3910_v53 = vadd.f32 %v3909_v34, %v3808_v10  ;;  %v11808_v10 = vld [vmem:[%s13931_s11 + $0x4c] ss:$12 sps:$4 sm:$0xff]   ;;  %v11815_v34 = vld [vmem:[%s13931_s11 + $0x48] ss:$12 sps:$4 sm:$0xff]  }
 0xc1b   : > { %8285 = vtanh.f32 %v3910_v53  ;;  %v11821_v53 = vld [vmem:[%s13931_s11 + $0x50] ss:$12 sps:$4 sm:$0xff]  }
 0xc1c   : > { %8287 = vrcp.f32 %v3905_v59  ;;  %v11827_v59 = vld [vmem:[%s13931_s11 + $0x64] ss:$12 sps:$4 sm:$0xff]  }
 0xc25   : > { %v8286_v5 = vpop.eup %8285 }
 0xc26   : > { %v3912_v40 = vsub.f32 %v11145_v43, %v8286_v5  ;;  %v8288_v54 = vpop.eup %8287  ;;  %v11761_v43 = vld [vmem:[%s13931_s11 + $0x8] ss:$12 sps:$4 sm:$0xff]  }
 0xc28   : > { %v3913_v11 = vmul.f32 %v8288_v54, %v3912_v40  ;;  %v11840_v40 = vld [vmem:[%s13931_s11 + $0x68] ss:$12 sps:$4 sm:$0xff]  }
 0xc29   : > { %14606 = vst [vmem:[#allocation68_spill] sm:$0xff] %v11840_v40  ;;  %v11846_v54 = vld [vmem:[%s13931_s11 + $0x7c] ss:$12 sps:$4 sm:$0xff]  }
 0xc2a   : > { %v11744_v32 = vadd.f32 %v8286_v5, %v3913_v11  ;;  %v11834_v5 = vld [vmem:[%s13931_s11 + $0x60] ss:$12 sps:$4 sm:$0xff]   ;;  %14607 = vst [vmem:[#allocation69_spill] sm:$0xff] %v11846_v54  ;;  %v11853_v11 = vld [vmem:[%s13931_s11 + $0x78] ss:$12 sps:$4 sm:$0xff]  }
 0xc2b   : > { %14605 = vst [vmem:[#allocation67_spill] sm:$0xff] %v11834_v5  ;;  %14608 = vst [vmem:[#allocation70_spill] sm:$0xff] %v11853_v11 }
 0xc2c   : > { %v11748_v24 = vpack.c.bf16 %v11744_v32, %v11744_v32 }
 0xc2e   : > { %3949 = vmatmul.mubr.bf16.vlgmr.msra.gmra.mrb[72].mxu0 %v11748_v24  ;;  %7309 = vmatmul.mubr.bf16.vlgmr.msra.gmra.mrb[100].mxu1 %v11748_v24 }
 0xc2f   : > { %3999 = vmatpush1.bf16.msra.mxu0 %v11755_v38  ;;  %7313 = vmatpush3.bf16.msra.mxu1 %v11761_v43 }
 0xc30   : > { %4000 = vmatprep.subr.bf16.mxu0 %v11767_v31  ;;  %7314 = vmatprep.subr.bf16.mxu1 %v14258_v36 }
 0xc31   : > { %4030 = vmatprep.mubr.bf16.mxu0 %v14259_v42  ;;  %7328 = vmatprep.mubr.msk.bf16.mxu1 %vm8807_vm2, %v14258_v36 }
 0xc33   : > { %4001 = vmatpush1.bf16.msra.mxu0 %v11777_v8  ;;  %7315 = vmatpush3.bf16.msra.mxu1 %v11783_v2 }
 0xc34   : > { %4002 = vmatprep.subr.bf16.mxu0 %v11789_v16  ;;  %7316 = vmatprep.subr.bf16.mxu1 %v14258_v36 }
 0xc37   : > { %4003 = vmatpush1.bf16.msra.mxu0 %v11796_v33  ;;  %7317 = vmatpush3.bf16.msra.mxu1 %v11802_v58 }
 0xc38   : > { %4004 = vmatprep.subr.bf16.mxu0 %v11808_v10  ;;  %7318 = vmatprep.subr.bf16.mxu1 %v14258_v36 }
 0xc3b   : > { %4005 = vmatpush1.bf16.msra.mxu0 %v11815_v34  ;;  %7319 = vmatpush3.bf16.msra.mxu1 %v11821_v53 }
 0xc3c   : > { %4006 = vmatprep.subr.bf16.mxu0 %v11827_v59  ;;  %7320 = vmatprep.subr.bf16.mxu1 %v14258_v36 }
 0xc3f   : > { %4007 = vmatpush1.bf16.msra.mxu0 %v11834_v5  ;;  %7321 = vmatpush3.bf16.msra.mxu1 %v11840_v40  ;;  %v11859_v40 = vld [vmem:[%s13931_s11 + $0x80] ss:$12 sps:$4 sm:$0xff]   ;;  %v3997_v5 = vpack.c.bf16 %v11404_v37, %v11404_v37 }
 0xc40   : > { %4008 = vmatprep.subr.bf16.mxu0 %v11846_v54  ;;  %7322 = vmatprep.subr.bf16.mxu1 %v14258_v36  ;;  %14609 = vst [vmem:[#allocation71_spill] sm:$0xff] %v11859_v40  ;;  %v11865_v54 = vld [vmem:[%s13931_s11 + $0x94] ss:$12 sps:$4 sm:$0xff]  }
 0xc41   : > { %14610 = vst [vmem:[#allocation72_spill] sm:$0xff] %v11865_v54 }
 0xc43   : > { %4009 = vmatpush1.bf16.msra.mxu0 %v11853_v11  ;;  %7323 = vmatpush3.bf16.msra.mxu1 %v11859_v40  ;;  %v11872_v11 = vld [vmem:[%s13931_s11 + $0x90] ss:$12 sps:$4 sm:$0xff]   ;;  %v11878_v40 = vld [vmem:[%s13931_s11 + $0x98] ss:$12 sps:$4 sm:$0xff]  }
 0xc44   : > { %4010 = vmatprep.subr.bf16.mxu0 %v11865_v54  ;;  %7324 = vmatprep.subr.bf16.mxu1 %v14258_v36  ;;  %14611 = vst [vmem:[#allocation73_spill] sm:$0xff] %v11872_v11  ;;  %14612 = vst [vmem:[#allocation74_spill] sm:$0xff] %v11878_v40  ;;  %v11884_v54 = vld [vmem:[%s13931_s11 + $0xac] ss:$12 sps:$4 sm:$0xff]  }
 0xc45   : > { %14613 = vst [vmem:[#allocation75_spill] sm:$0xff] %v11884_v54 }
 0xc47   : > { %4011 = vmatpush1.bf16.msra.mxu0 %v11872_v11  ;;  %7325 = vmatpush3.bf16.msra.mxu1 %v11878_v40  ;;  %v11891_v11 = vld [vmem:[%s13931_s11 + $0xa8] ss:$12 sps:$4 sm:$0xff]   ;;  %v11897_v40 = vld [vmem:[%s13931_s11 + $0xb0] ss:$12 sps:$4 sm:$0xff]  }
 0xc48   : > { %4012 = vmatprep.subr.bf16.mxu0 %v11884_v54  ;;  %7326 = vmatprep.subr.bf16.mxu1 %v14258_v36  ;;  %14614 = vst [vmem:[#allocation76_spill] sm:$0xff] %v11891_v11  ;;  %14615 = vst [vmem:[#allocation77_spill] sm:$0xff] %v11897_v40  ;;  %v11905_v54 = vld [vmem:[%s14234_s30 + $0x4] ss:$12 sps:$4 sm:$0xff]  }
 0xc49   : > { %14616 = vst [vmem:[#allocation78_spill] sm:$0xff] %v11905_v54 }
 0xc4b   : > { %4013 = vmatpush1.bf16.msra.mxu0 %v11891_v11  ;;  %7327 = vmatpush3.bf16.msra.mxu1 %v11897_v40  ;;  %v11912_v11 = vld [vmem:[%s14234_s30] ss:$12 sps:$4 sm:$0xff]   ;;  %v11918_v40 = vld [vmem:[%s14234_s30 + $0x8] ss:$12 sps:$4 sm:$0xff]  }
 0xc4c   : > { %4105 = vmatprep.subr.bf16.mxu0 %v11905_v54  ;;  %7332 = vmatprep.subr.bf16.mxu1 %v14258_v36  ;;  %14617 = vst [vmem:[#allocation79_spill] sm:$0xff] %v11918_v40  ;;  %v11924_v54 = vld [vmem:[%s14234_s30 + $0x1c] ss:$12 sps:$4 sm:$0xff]  }
 0xc4d   : > { %14618 = vst [vmem:[#allocation80_spill] sm:$0xff] %v11924_v54 }
 0xc4e   : > { %4031 = vmatmul.mubr.bf16.vlgmr.msra.gmra.mrb[72].mxu0 %v3997_v5  ;;  %7329 = vmatmul.mubr.bf16.vlgmr.msra.gmra.mrb[104].mxu1 %v3997_v5  ;;  %v11934_v5 = vld [vmem:[%s14234_s30 + $0x18] ss:$12 sps:$4 sm:$0xff]  }
 0xc4f   : > { %4106 = vmatpush1.bf16.msra.mxu0 %v11912_v11  ;;  %7333 = vmatpush3.bf16.msra.mxu1 %v11918_v40  ;;  %14619 = vst [vmem:[#allocation81_spill] sm:$0xff] %v11934_v5  ;;  %v11940_v40 = vld [vmem:[%s14234_s30 + $0x20] ss:$12 sps:$4 sm:$0xff]  }
 0xc50   : > { %4107 = vmatprep.subr.bf16.mxu0 %v11924_v54  ;;  %7334 = vmatprep.subr.bf16.mxu1 %v14258_v36  ;;  %14620 = vst [vmem:[#allocation82_spill] sm:$0xff] %v11940_v40  ;;  %v11946_v54 = vld [vmem:[%s14234_s30 + $0x34] ss:$12 sps:$4 sm:$0xff]  }
 0xc51   : > { %4137 = vmatprep.mubr.bf16.mxu0 %v14259_v42  ;;  %7348 = vmatprep.mubr.msk.bf16.mxu1 %vm8807_vm2, %v14258_v36  ;;  %14621 = vst [vmem:[#allocation83_spill] sm:$0xff] %v11946_v54 }
 0xc53   : > { %4108 = vmatpush1.bf16.msra.mxu0 %v11934_v5  ;;  %7335 = vmatpush3.bf16.msra.mxu1 %v11940_v40  ;;  %v11953_v5 = vld [vmem:[%s14234_s30 + $0x30] ss:$12 sps:$4 sm:$0xff]   ;;  %v11959_v40 = vld [vmem:[%s14234_s30 + $0x38] ss:$12 sps:$4 sm:$0xff]  }
 0xc54   : > { %4109 = vmatprep.subr.bf16.mxu0 %v11946_v54  ;;  %7336 = vmatprep.subr.bf16.mxu1 %v14258_v36  ;;  %14622 = vst [vmem:[#allocation84_spill] sm:$0xff] %v11953_v5  ;;  %14623 = vst [vmem:[#allocation85_spill] sm:$0xff] %v11959_v40  ;;  %v11965_v54 = vld [vmem:[%s14234_s30 + $0x4c] ss:$12 sps:$4 sm:$0xff]  }
 0xc55   : > { %14624 = vst [vmem:[#allocation86_spill] sm:$0xff] %v11965_v54 }
 0xc57   : > { %4110 = vmatpush1.bf16.msra.mxu0 %v11953_v5  ;;  %7337 = vmatpush3.bf16.msra.mxu1 %v11959_v40  ;;  %v11972_v5 = vld [vmem:[%s14234_s30 + $0x48] ss:$12 sps:$4 sm:$0xff]   ;;  %v11978_v40 = vld [vmem:[%s14234_s30 + $0x50] ss:$12 sps:$4 sm:$0xff]  }
 0xc58   : > { %4111 = vmatprep.subr.bf16.mxu0 %v11965_v54  ;;  %7338 = vmatprep.subr.bf16.mxu1 %v14258_v36  ;;  %14625 = vst [vmem:[#allocation87_spill] sm:$0xff] %v11972_v5  ;;  %14626 = vst [vmem:[#allocation88_spill] sm:$0xff] %v11978_v40  ;;  %v11984_v54 = vld [vmem:[%s14234_s30 + $0x64] ss:$12 sps:$4 sm:$0xff]  }
 0xc59   : > { %14627 = vst [vmem:[#allocation89_spill] sm:$0xff] %v11984_v54 }
 0xc5b   : > { %4112 = vmatpush1.bf16.msra.mxu0 %v11972_v5  ;;  %7339 = vmatpush3.bf16.msra.mxu1 %v11978_v40  ;;  %v11991_v5 = vld [vmem:[%s14234_s30 + $0x60] ss:$12 sps:$4 sm:$0xff]   ;;  %v11997_v40 = vld [vmem:[%s14234_s30 + $0x68] ss:$12 sps:$4 sm:$0xff]  }
 0xc5c   : > { %4113 = vmatprep.subr.bf16.mxu0 %v11984_v54  ;;  %7340 = vmatprep.subr.bf16.mxu1 %v14258_v36  ;;  %14628 = vst [vmem:[#allocation90_spill] sm:$0xff] %v11991_v5  ;;  %14629 = vst [vmem:[#allocation91_spill] sm:$0xff] %v11997_v40  ;;  %v12003_v54 = vld [vmem:[%s14234_s30 + $0x7c] ss:$12 sps:$4 sm:$0xff]  }
 0xc5d   : > { %14630 = vst [vmem:[#allocation92_spill] sm:$0xff] %v12003_v54 }
 0xc5f   : > { %4114 = vmatpush1.bf16.msra.mxu0 %v11991_v5  ;;  %7341 = vmatpush3.bf16.msra.mxu1 %v11997_v40  ;;  %v12010_v5 = vld [vmem:[%s14234_s30 + $0x78] ss:$12 sps:$4 sm:$0xff]   ;;  %v12016_v40 = vld [vmem:[%s14234_s30 + $0x80] ss:$12 sps:$4 sm:$0xff]  }
 0xc60   : > { %4115 = vmatprep.subr.bf16.mxu0 %v12003_v54  ;;  %7342 = vmatprep.subr.bf16.mxu1 %v14258_v36  ;;  %14631 = vst [vmem:[#allocation93_spill] sm:$0xff] %v12010_v5  ;;  %14632 = vst [vmem:[#allocation94_spill] sm:$0xff] %v12016_v40  ;;  %v12022_v54 = vld [vmem:[%s14234_s30 + $0x94] ss:$12 sps:$4 sm:$0xff]  }
 0xc61   : > { %14633 = vst [vmem:[#allocation95_spill] sm:$0xff] %v12022_v54 }
 0xc63   : > { %4116 = vmatpush1.bf16.msra.mxu0 %v12010_v5  ;;  %7343 = vmatpush3.bf16.msra.mxu1 %v12016_v40  ;;  %v12029_v5 = vld [vmem:[%s14234_s30 + $0x90] ss:$12 sps:$4 sm:$0xff]   ;;  %v12036_v40 = vld [vmem:[%s14234_s30 + $0xac] ss:$12 sps:$4 sm:$0xff]  }
 0xc64   : > { %4117 = vmatprep.subr.bf16.mxu0 %v12022_v54  ;;  %7344 = vmatprep.subr.bf16.mxu1 %v14258_v36  ;;  %v12043_v54 = vld [vmem:[%s14234_s30 + $0xa8] ss:$12 sps:$4 sm:$0xff]  }
 0xc67   : > { %4118 = vmatpush1.bf16.msra.mxu0 %v12029_v5  ;;  %7345 = vmatpush3.bf16.msra.mxu1 %v11221_v19 }
 0xc68   : > { %4119 = vmatprep.subr.bf16.mxu0 %v12036_v40  ;;  %7346 = vmatprep.subr.bf16.mxu1 %v14258_v36 }
 0xc6b   : > { %4120 = vmatpush1.bf16.msra.mxu0 %v12043_v54  ;;  %7347 = vmatpush3.bf16.msra.mxu1 %v11230_v20 }
 0xc6c   : > { %4208 = vmatprep.subr.bf16.mxu0 %v11236_v14  ;;  %7352 = vmatprep.subr.bf16.mxu1 %v14258_v36 }
 0xc6e   : > { %4138 = vmatmul.mubr.bf16.vlgmr.msra.gmra.mrb[76].mxu0 %v11418_v35  ;;  %7349 = vmatmul.mubr.bf16.vlgmr.msra.gmra.mrb[108].mxu1 %v11418_v35 }
 0xc6f   : > { %4209 = vmatpush1.bf16.msra.mxu0 %v11245_v27  ;;  %7353 = vmatpush3.bf16.msra.mxu1 %v11251_v22 }
 0xc70   : > { %4210 = vmatprep.subr.bf16.mxu0 %v11257_v46  ;;  %7354 = vmatprep.subr.bf16.mxu1 %v14258_v36 }
 0xc71   : > { %4240 = vmatprep.mubr.bf16.mxu0 %v14259_v42  ;;  %7368 = vmatprep.mubr.msk.bf16.mxu1 %vm8807_vm2, %v14258_v36 }
 0xc73   : > { %4211 = vmatpush1.bf16.msra.mxu0 %v11267_v9  ;;  %7355 = vmatpush3.bf16.msra.mxu1 %v11273_v29 }
 0xc74   : > { %4212 = vmatprep.subr.bf16.mxu0 %v11279_v30  ;;  %7356 = vmatprep.subr.bf16.mxu1 %v14258_v36 }
 0xc77   : > { %4213 = vmatpush1.bf16.msra.mxu0 %v11286_v45  ;;  %7357 = vmatpush3.bf16.msra.mxu1 %v11292_v25 }
 0xc78   : > { %4214 = vmatprep.subr.bf16.mxu0 %v11298_v6  ;;  %7358 = vmatprep.subr.bf16.mxu1 %v14258_v36 }
 0xc7b   : > { %4215 = vmatpush1.bf16.msra.mxu0 %v11305_v26  ;;  %7359 = vmatpush3.bf16.msra.mxu1 %v11311_v39 }
 0xc7c   : > { %4216 = vmatprep.subr.bf16.mxu0 %v11317_v17  ;;  %7360 = vmatprep.subr.bf16.mxu1 %v14258_v36 }
 0xc7f   : > { %4217 = vmatpush1.bf16.msra.mxu0 %v11324_v7  ;;  %7361 = vmatpush3.bf16.msra.mxu1 %v11330_v52 }
 0xc80   : > { %4218 = vmatprep.subr.bf16.mxu0 %v11336_v50  ;;  %7362 = vmatprep.subr.bf16.mxu1 %v14258_v36 }
 0xc83   : > { %4219 = vmatpush1.bf16.msra.mxu0 %v11343_v55  ;;  %7363 = vmatpush3.bf16.msra.mxu1 %v11349_v1  ;;  %v12091_v1 = vld [vmem:[%s13932_s12] ss:$0 sm:$0xff] }
 0xc84   : > { %4220 = vmatprep.subr.bf16.mxu0 %v11355_v63  ;;  %7364 = vmatprep.subr.bf16.mxu1 %v14258_v36 }
 0xc87   : > { %4221 = vmatpush1.bf16.msra.mxu0 %v11362_v60  ;;  %7365 = vmatpush3.bf16.msra.mxu1 %v11368_v12 }
 0xc88   : > { %4222 = vmatprep.subr.bf16.mxu0 %v11374_v15  ;;  %7366 = vmatprep.subr.bf16.mxu1 %v14258_v36 }
 0xc8b   : > { %4223 = vmatpush1.bf16.msra.mxu0 %v11381_v61  ;;  %7367 = vmatpush3.bf16.msra.mxu1 %v11387_v3 }
 0xc8c   : > { %4289 = vmatprep.subr.bf16.mxu0 %v11393_v41  ;;  %7372 = vmatprep.subr.bf16.mxu1 %v14258_v36 }
 0xd01   : > { %v3991_v19 = vpop.f32.mrb[100].mxu1 }
 0xd02   : > { %v7310_v20 = vpop.f32.mrb[101].mxu1  ;;  %v3992_v12 = vadd.f32 %v3991_v19, %v10005_v4 }
 0xd03   : > { %v3994_v14 = vpop.f32.mrb[102].mxu1  ;;  %v14634_v20 = vld [vmem:[#allocation22_spill] sm:$0xff] }
 0xd04   : > { %v7311_v27 = vpop.f32.mrb[103].mxu1 }
 0xd21   : > { %v4032_v22 = vpop.f32.mrb[72].mxu0  ;;  %v4073_v46 = vpop.f32.mrb[104].mxu1 }
 0xd22   : > { %v7874_v9 = vadd.f32 %v4032_v22, %v9992_v51  ;;  %v4034_v29 = vpop.f32.mrb[73].mxu0  ;;  %v7330_v30 = vpop.f32.mrb[105].mxu1  ;;  %v4093_v63 = vadd.f32 %v12091_v1, %v4073_v46 }
 0xd23   : > { %v4036_v45 = vpop.f32.mrb[74].mxu0  ;;  %v4076_v25 = vpop.f32.mrb[106].mxu1  ;;  %v7875_v17 = vadd.f32 %v4034_v29, %v9996_v62 }
 0xd24   : > { %v6397_v6 = vmul.f32 -1.442695, %v7874_v9  ;;  %v4037_v26 = vpop.f32.mrb[75].mxu0  ;;  %v7331_v39 = vpop.f32.mrb[107].mxu1  ;;  %v14635_v9 = vld [vmem:[#allocation24_spill] sm:$0xff] }
 0xd25   : > { %v6398_v7 = vmul.f32 -1.442695, %v7875_v17 }
 0xd26   : > { %8289 = vpow2.f32 %v6397_v6 }
 0xd27   : > { %8291 = vpow2.f32 %v6398_v7 }
 0xd30   : > { %v8290_v52 = vpop.eup %8289 }
 0xd31   : > { %v4083_v50 = vadd.f32 1.0, %v8290_v52  ;;  %v8292_v55 = vpop.eup %8291 }
 0xd32   : > { %v4090_v3 = vadd.f32 1.0, %v8292_v55 }
 0xd33   : > { %8293 = vrcp.f32 %v4083_v50 }
 0xd3d   : > { %v8294_v60 = vpop.eup %8293 }
 0xd3e   : > { %v4094_v15 = vmul.f32 %v8294_v60, %v4093_v63 }
 0xd40   : > { %v4095_v61 = vadd.f32 %v4094_v15, %v3992_v12 }
 0xd41   : > { %v4139_v41 = vpop.f32.mrb[76].mxu0  ;;  %v4180_v35 = vpop.f32.mrb[108].mxu1 }
 0xd42   : > { %8295 = vtanh.f32 %v4095_v61  ;;  %v4186_v14 = vadd.f32 %v4139_v41, %v14634_v20  ;;  %v4141_v27 = vpop.f32.mrb[77].mxu0  ;;  %v7350_v22 = vpop.f32.mrb[109].mxu1  ;;  %v4200_v60 = vadd.f32 %v11409_v21, %v4180_v35  ;;  %v14637_v61 = vld [vmem:[#allocation25_spill] sm:$0xff]  ;;  %v14638_v21 = vld [vmem:[#allocation12_spill] sm:$0xff] }
 0xd43   : > { %v4193_v29 = vadd.f32 %v4141_v27, %v14635_v9  ;;  %v4143_v30 = vpop.f32.mrb[78].mxu0  ;;  %v4183_v45 = vpop.f32.mrb[110].mxu1  ;;  %8297 = vrcp.f32 %v4090_v3  ;;  %v14643_v35 = vld [vmem:[#allocation16_spill] sm:$0xff] }
 0xd44   : > { %v6399_v25 = vmul.f32 -1.442695, %v4186_v14  ;;  %v4144_v46 = vpop.f32.mrb[79].mxu0  ;;  %v7351_v6 = vpop.f32.mrb[111].mxu1  ;;  %v14647_v30 = vld [vmem:[#allocation34_spill] sm:$0xff]  ;;  %v14648_v45 = vld [vmem:[#allocation35_spill] sm:$0xff] }
 0xd45   : > { %v6400_v17 = vmul.f32 -1.442695, %v4193_v29  ;;  %v14650_v46 = vld [vmem:[#allocation37_spill] sm:$0xff]  ;;  %v14651_v6 = vld [vmem:[#allocation38_spill] sm:$0xff] }
 0xd46   : > { %8299 = vpow2.f32 %v6399_v25  ;;  %v14649_v25 = vld [vmem:[#allocation36_spill] sm:$0xff] }
 0xd47   : > { %8301 = vpow2.f32 %v6400_v17  ;;  %v14655_v17 = vld [vmem:[#allocation42_spill] sm:$0xff] }
 0xd4c   : > { %v8296_v19 = vpop.eup %8295 }
 0xd4d   : > { %v4097_v26 = vsub.f32 %v11404_v37, %v8296_v19  ;;  %v8298_v39 = vpop.eup %8297  ;;  %v12610_v37 = vld [vmem:[%s13927_s7 + $0xb0] ss:$12 sps:$4 sm:$0xff]  }
 0xd4e   : > { %14728 = vst [vmem:[#allocation16_spill] sm:$0xff] %v12610_v37 }
 0xd4f   : > { %v4098_v7 = vmul.f32 %v8298_v39, %v4097_v26  ;;  %v14653_v26 = vld [vmem:[#allocation40_spill] sm:$0xff]  ;;  %v14654_v39 = vld [vmem:[#allocation41_spill] sm:$0xff] }
 0xd50   : > { %v8300_v52 = vpop.eup %8299 }
 0xd51   : > { %v4190_v50 = vadd.f32 1.0, %v8300_v52  ;;  %v12098_v55 = vadd.f32 %v8296_v19, %v4098_v7  ;;  %v8302_v63 = vpop.eup %8301  ;;  %v14652_v19 = vld [vmem:[#allocation39_spill] sm:$0xff]  ;;  %v14657_v52 = vld [vmem:[#allocation44_spill] sm:$0xff] }
 0xd52   : > { %v4197_v41 = vadd.f32 1.0, %v8302_v63  ;;  %v14656_v7 = vld [vmem:[#allocation43_spill] sm:$0xff]  ;;  %v14659_v63 = vld [vmem:[#allocation46_spill] sm:$0xff] }
 0xd53   : > { %14636 = vst [vmem:[#allocation96_spill] sm:$0xff] %v12098_v55  ;;  %8303 = vrcp.f32 %v4190_v50  ;;  %v14658_v50 = vld [vmem:[#allocation45_spill] sm:$0xff] }
 0xd5d   : > { %v8304_v12 = vpop.eup %8303 }
 0xd5e   : > { %v4201_v15 = vmul.f32 %v8304_v12, %v4200_v60  ;;  %v14660_v60 = vld [vmem:[#allocation47_spill] sm:$0xff]  ;;  %v14661_v12 = vld [vmem:[#allocation48_spill] sm:$0xff] }
 0xd60   : > { %v4202_v3 = vadd.f32 %v4201_v15, %v14637_v61  ;;  %v14663_v15 = vld [vmem:[#allocation50_spill] sm:$0xff]  ;;  %v14664_v61 = vld [vmem:[#allocation51_spill] sm:$0xff] }
 0xd62   : > { %8305 = vtanh.f32 %v4202_v3  ;;  %v14665_v3 = vld [vmem:[#allocation52_spill] sm:$0xff] }
 0xd63   : > { %8307 = vrcp.f32 %v4197_v41  ;;  %v14666_v41 = vld [vmem:[#allocation53_spill] sm:$0xff] }
 0xd6c   : > { %v8306_v20 = vpop.eup %8305 }
 0xd6d   : > { %v4204_v14 = vsub.f32 %v11414_v48, %v8306_v20  ;;  %v8308_v27 = vpop.eup %8307  ;;  %v14639_v48 = vld [vmem:[#allocation14_spill] sm:$0xff] }
 0xd6f   : > { %v4205_v22 = vmul.f32 %v8308_v27, %v4204_v14  ;;  %v14668_v14 = vld [vmem:[#allocation55_spill] sm:$0xff]  ;;  %v14669_v27 = vld [vmem:[#allocation56_spill] sm:$0xff] }
 0xd71   : > { %v12103_v9 = vadd.f32 %v8306_v20, %v4205_v22  ;;  %v14667_v20 = vld [vmem:[#allocation54_spill] sm:$0xff]  ;;  %v14670_v22 = vld [vmem:[#allocation57_spill] sm:$0xff] }
 0xd73   : > { %v12107_v29 = vpack.c.bf16 %v12103_v9, %v12103_v9 }
 0xd75   : > { %4241 = vmatmul.mubr.bf16.vlgmr.msra.gmra.mrb[80].mxu0 %v12107_v29  ;;  %7369 = vmatmul.mubr.bf16.vlgmr.msra.gmra.mrb[112].mxu1 %v12107_v29 }
 0xd76   : > { %4290 = vmatpush1.bf16.msra.mxu0 %v11425_v13  ;;  %7373 = vmatpush3.bf16.msra.mxu1 %v11431_v56  ;;  %v14640_v13 = vld [vmem:[#allocation13_spill] sm:$0xff]  ;;  %v14641_v56 = vld [vmem:[#allocation15_spill] sm:$0xff] }
 0xd77   : > { %4291 = vmatprep.subr.bf16.mxu0 %v11437_v57  ;;  %7374 = vmatprep.subr.bf16.mxu1 %v14258_v36  ;;  %v14642_v57 = vld [vmem:[#allocation17_spill] sm:$0xff] }
 0xd78   : > { %4321 = vmatprep.mubr.bf16.mxu0 %v14259_v42  ;;  %7388 = vmatprep.mubr.msk.bf16.mxu1 %vm8807_vm2, %v14258_v36 }
 0xd7a   : > { %4292 = vmatpush1.bf16.msra.mxu0 %v11447_v18  ;;  %7375 = vmatpush3.bf16.msra.mxu1 %v11453_v23  ;;  %v14644_v18 = vld [vmem:[#allocation31_spill] sm:$0xff]  ;;  %v14645_v23 = vld [vmem:[#allocation32_spill] sm:$0xff] }
 0xd7b   : > { %4293 = vmatprep.subr.bf16.mxu0 %v11459_v49  ;;  %7376 = vmatprep.subr.bf16.mxu1 %v14258_v36  ;;  %v14646_v49 = vld [vmem:[#allocation33_spill] sm:$0xff] }
 0xd7e   : > { %4294 = vmatpush1.bf16.msra.mxu0 %v14638_v21  ;;  %7377 = vmatpush3.bf16.msra.mxu1 %v14639_v48  ;;  %v14671_v21 = vld [vmem:[#allocation58_spill] sm:$0xff]  ;;  %v14672_v48 = vld [vmem:[#allocation59_spill] sm:$0xff] }
 0xd7f   : > { %4295 = vmatprep.subr.bf16.mxu0 %v14640_v13  ;;  %7378 = vmatprep.subr.bf16.mxu1 %v14258_v36  ;;  %v14673_v13 = vld [vmem:[#allocation60_spill] sm:$0xff] }
 0xd82   : > { %4296 = vmatpush1.bf16.msra.mxu0 %v14641_v56  ;;  %7379 = vmatpush3.bf16.msra.mxu1 %v14642_v57  ;;  %v14674_v56 = vld [vmem:[#allocation61_spill] sm:$0xff]  ;;  %v14675_v57 = vld [vmem:[#allocation62_spill] sm:$0xff] }
 0xd83   : > { %4297 = vmatprep.subr.bf16.mxu0 %v14643_v35  ;;  %7380 = vmatprep.subr.bf16.mxu1 %v14258_v36  ;;  %v14676_v35 = vld [vmem:[#allocation63_spill] sm:$0xff] }
 0xd86   : > { %4298 = vmatpush1.bf16.msra.mxu0 %v14644_v18  ;;  %7381 = vmatpush3.bf16.msra.mxu1 %v14645_v23  ;;  %v14677_v18 = vld [vmem:[#allocation64_spill] sm:$0xff]  ;;  %v14678_v23 = vld [vmem:[#allocation65_spill] sm:$0xff] }
 0xd87   : > { %4299 = vmatprep.subr.bf16.mxu0 %v14646_v49  ;;  %7382 = vmatprep.subr.bf16.mxu1 %v14258_v36  ;;  %v14679_v49 = vld [vmem:[#allocation66_spill] sm:$0xff] }
 0xd8a   : > { %4300 = vmatpush1.bf16.msra.mxu0 %v14647_v30  ;;  %7383 = vmatpush3.bf16.msra.mxu1 %v14648_v45 }
 0xd8b   : > { %4301 = vmatprep.subr.bf16.mxu0 %v14649_v25  ;;  %7384 = vmatprep.subr.bf16.mxu1 %v14258_v36 }
 0xd8e   : > { %4302 = vmatpush1.bf16.msra.mxu0 %v14650_v46  ;;  %7385 = vmatpush3.bf16.msra.mxu1 %v14651_v6 }
 0xd8f   : > { %4303 = vmatprep.subr.bf16.mxu0 %v14652_v19  ;;  %7386 = vmatprep.subr.bf16.mxu1 %v14258_v36 }
 0xd92   : > { %4304 = vmatpush1.bf16.msra.mxu0 %v14653_v26  ;;  %7387 = vmatpush3.bf16.msra.mxu1 %v14654_v39 }
 0xd93   : > { %4392 = vmatprep.subr.bf16.mxu0 %v14655_v17  ;;  %7392 = vmatprep.subr.bf16.mxu1 %v14258_v36 }
 0xd95   : > { %4322 = vmatmul.mubr.bf16.vlgmr.msra.gmra.mrb[80].mxu0 %v11748_v24  ;;  %7389 = vmatmul.mubr.bf16.vlgmr.msra.gmra.mrb[116].mxu1 %v11748_v24  ;;  %v14662_v24 = vld [vmem:[#allocation49_spill] sm:$0xff] }
 0xd96   : > { %4393 = vmatpush1.bf16.msra.mxu0 %v14656_v7  ;;  %7393 = vmatpush3.bf16.msra.mxu1 %v14657_v52 }
 0xd97   : > { %4394 = vmatprep.subr.bf16.mxu0 %v14658_v50  ;;  %7394 = vmatprep.subr.bf16.mxu1 %v14258_v36 }
 0xd98   : > { %4424 = vmatprep.mubr.bf16.mxu0 %v14259_v42  ;;  %7408 = vmatprep.mubr.msk.bf16.mxu1 %vm8807_vm2, %v14258_v36 }
 0xd9a   : > { %4395 = vmatpush1.bf16.msra.mxu0 %v14659_v63  ;;  %7395 = vmatpush3.bf16.msra.mxu1 %v14660_v60 }
 0xd9b   : > { %4396 = vmatprep.subr.bf16.mxu0 %v14661_v12  ;;  %7396 = vmatprep.subr.bf16.mxu1 %v14258_v36 }
 0xd9e   : > { %4397 = vmatpush1.bf16.msra.mxu0 %v14662_v24  ;;  %7397 = vmatpush3.bf16.msra.mxu1 %v14663_v15 }
 0xd9f   : > { %4398 = vmatprep.subr.bf16.mxu0 %v14664_v61  ;;  %7398 = vmatprep.subr.bf16.mxu1 %v14258_v36 }
 0xda2   : > { %4399 = vmatpush1.bf16.msra.mxu0 %v14665_v3  ;;  %7399 = vmatpush3.bf16.msra.mxu1 %v14666_v41 }
 0xda3   : > { %4400 = vmatprep.subr.bf16.mxu0 %v14667_v20  ;;  %7400 = vmatprep.subr.bf16.mxu1 %v14258_v36 }
 0xda6   : > { %4401 = vmatpush1.bf16.msra.mxu0 %v14668_v14  ;;  %7401 = vmatpush3.bf16.msra.mxu1 %v14669_v27 }
 0xda7   : > { %4402 = vmatprep.subr.bf16.mxu0 %v14670_v22  ;;  %7402 = vmatprep.subr.bf16.mxu1 %v14258_v36 }
 0xdaa   : > { %4403 = vmatpush1.bf16.msra.mxu0 %v14671_v21  ;;  %7403 = vmatpush3.bf16.msra.mxu1 %v14672_v48 }
 0xdab   : > { %4404 = vmatprep.subr.bf16.mxu0 %v14673_v13  ;;  %7404 = vmatprep.subr.bf16.mxu1 %v14258_v36 }
 0xdae   : > { %4405 = vmatpush1.bf16.msra.mxu0 %v14674_v56  ;;  %7405 = vmatpush3.bf16.msra.mxu1 %v14675_v57 }
 0xdaf   : > { %4406 = vmatprep.subr.bf16.mxu0 %v14676_v35  ;;  %7406 = vmatprep.subr.bf16.mxu1 %v14258_v36 }
 0xdb2   : > { %4407 = vmatpush1.bf16.msra.mxu0 %v14677_v18  ;;  %7407 = vmatpush3.bf16.msra.mxu1 %v14678_v23  ;;  %v14693_v23 = vld [vmem:[#allocation80_spill] sm:$0xff] }
 0xdb3   : > { %4474 = vmatprep.subr.bf16.mxu0 %v14679_v49  ;;  %7412 = vmatprep.subr.bf16.mxu1 %v14258_v36  ;;  %v14694_v49 = vld [vmem:[#allocation81_spill] sm:$0xff] }
 0xe48   : > { %v4283_v30 = vpop.f32.mrb[112].mxu1 }
 0xe49   : > { %v7370_v45 = vpop.f32.mrb[113].mxu1  ;;  %v4284_v14 = vadd.f32 %v4283_v30, %v9639_v28  ;;  %v14695_v30 = vld [vmem:[#allocation82_spill] sm:$0xff] }
 0xe4a   : > { %v4286_v25 = vpop.f32.mrb[114].mxu1  ;;  %v14696_v45 = vld [vmem:[#allocation83_spill] sm:$0xff] }
 0xe4b   : > { %v7371_v46 = vpop.f32.mrb[115].mxu1  ;;  %v14698_v25 = vld [vmem:[#allocation85_spill] sm:$0xff] }
 0xe4c   : > { %v14699_v46 = vld [vmem:[#allocation86_spill] sm:$0xff] }
 0xe68   : > { %v4323_v6 = vpop.f32.mrb[80].mxu0  ;;  %v4364_v19 = vpop.f32.mrb[116].mxu1 }
 0xe69   : > { %v7876_v26 = vadd.f32 %v4323_v6, %v9626_v44  ;;  %v4325_v39 = vpop.f32.mrb[81].mxu0  ;;  %v7390_v17 = vpop.f32.mrb[117].mxu1  ;;  %v4384_v41 = vadd.f32 %v11739_v47, %v4364_v19  ;;  %v14680_v47 = vld [vmem:[#allocation67_spill] sm:$0xff]  ;;  %v14701_v19 = vld [vmem:[#allocation88_spill] sm:$0xff] }
 0xe6a   : > { %v4327_v7 = vpop.f32.mrb[82].mxu0  ;;  %v4367_v52 = vpop.f32.mrb[118].mxu1  ;;  %v7877_v12 = vadd.f32 %v4325_v39, %v14376_v0  ;;  %v14700_v6 = vld [vmem:[#allocation87_spill] sm:$0xff]  ;;  %v14703_v39 = vld [vmem:[#allocation90_spill] sm:$0xff] }
 0xe6b   : > { %v6401_v50 = vmul.f32 -1.442695, %v7876_v26  ;;  %v4328_v63 = vpop.f32.mrb[83].mxu0  ;;  %v7391_v60 = vpop.f32.mrb[119].mxu1  ;;  %v14702_v26 = vld [vmem:[#allocation89_spill] sm:$0xff]  ;;  %v14704_v17 = vld [vmem:[#allocation91_spill] sm:$0xff] }
 0xe6c   : > { %v6402_v24 = vmul.f32 -1.442695, %v7877_v12  ;;  %v14705_v7 = vld [vmem:[#allocation92_spill] sm:$0xff]  ;;  %v14706_v52 = vld [vmem:[#allocation93_spill] sm:$0xff]  ;;  %v14708_v63 = vld [vmem:[#allocation95_spill] sm:$0xff] }
 0xe6d   : > { %8309 = vpow2.f32 %v6401_v50  ;;  %v14707_v50 = vld [vmem:[#allocation94_spill] sm:$0xff] }
 0xe6e   : > { %8311 = vpow2.f32 %v6402_v24  ;;  %v12264_v60 = vld [vmem:[%s14234_s30 + $0x98] ss:$12 sps:$4 sm:$0xff]   ;;  %v12273_v12 = vld [vmem:[%s14234_s30 + $0xb0] ss:$12 sps:$4 sm:$0xff]  }
 0xe6f   : > { %v12300_v24 = vld [vmem:[%s13925_s5 + $0x1c] ss:$12 sps:$4 sm:$0xff]  }
 0xe77   : > { %v8310_v15 = vpop.eup %8309 }
 0xe78   : > { %v4374_v61 = vadd.f32 1.0, %v8310_v15  ;;  %v8312_v3 = vpop.eup %8311  ;;  %v12316_v15 = vld [vmem:[%s13925_s5 + $0x20] ss:$12 sps:$4 sm:$0xff]  }
 0xe79   : > { %v4381_v21 = vadd.f32 1.0, %v8312_v3  ;;  %v12329_v3 = vld [vmem:[%s13925_s5 + $0x30] ss:$12 sps:$4 sm:$0xff]  }
 0xe7a   : > { %8313 = vrcp.f32 %v4374_v61  ;;  %v12322_v61 = vld [vmem:[%s13925_s5 + $0x34] ss:$12 sps:$4 sm:$0xff]  }
 0xe84   : > { %v8314_v20 = vpop.eup %8313 }
 0xe85   : > { %v4385_v27 = vmul.f32 %v8314_v20, %v4384_v41  ;;  %v12335_v41 = vld [vmem:[%s13925_s5 + $0x38] ss:$12 sps:$4 sm:$0xff]  }
 0xe86   : > { %v12341_v20 = vld [vmem:[%s13925_s5 + $0x4c] ss:$12 sps:$4 sm:$0xff]  }
 0xe87   : > { %v4386_v22 = vadd.f32 %v4385_v27, %v4284_v14  ;;  %v12348_v14 = vld [vmem:[%s13925_s5 + $0x48] ss:$12 sps:$4 sm:$0xff]   ;;  %v12354_v27 = vld [vmem:[%s13925_s5 + $0x50] ss:$12 sps:$4 sm:$0xff]  }
 0xe89   : > { %8315 = vtanh.f32 %v4386_v22  ;;  %v12360_v22 = vld [vmem:[%s13925_s5 + $0x64] ss:$12 sps:$4 sm:$0xff]  }
 0xe8a   : > { %8317 = vrcp.f32 %v4381_v21  ;;  %v12367_v21 = vld [vmem:[%s13925_s5 + $0x60] ss:$12 sps:$4 sm:$0xff]  }
 0xe93   : > { %v8316_v48 = vpop.eup %8315 }
 0xe94   : > { %v4388_v13 = vsub.f32 %v11744_v32, %v8316_v48  ;;  %v8318_v56 = vpop.eup %8317  ;;  %v14681_v32 = vld [vmem:[#allocation68_spill] sm:$0xff] }
 0xe96   : > { %v4389_v57 = vmul.f32 %v8318_v56, %v4388_v13  ;;  %v12379_v13 = vld [vmem:[%s13925_s5 + $0x7c] ss:$12 sps:$4 sm:$0xff]   ;;  %v12386_v56 = vld [vmem:[%s13925_s5 + $0x78] ss:$12 sps:$4 sm:$0xff]  }
 0xe98   : > { %v12188_v35 = vadd.f32 %v8316_v48, %v4389_v57  ;;  %v12373_v48 = vld [vmem:[%s13925_s5 + $0x68] ss:$12 sps:$4 sm:$0xff]   ;;  %v12392_v57 = vld [vmem:[%s13925_s5 + $0x80] ss:$12 sps:$4 sm:$0xff]  }
 0xe9a   : > { %v12192_v18 = vpack.c.bf16 %v12188_v35, %v12188_v35 }
 0xe9c   : > { %4425 = vmatmul.mubr.bf16.vlgmr.msra.gmra.mrb[84].mxu0 %v12192_v18  ;;  %7409 = vmatmul.mubr.bf16.vlgmr.msra.gmra.mrb[120].mxu1 %v12192_v18 }
 0xe9d   : > { %4475 = vmatpush1.bf16.msra.mxu0 %v11755_v38  ;;  %7413 = vmatpush3.bf16.msra.mxu1 %v11761_v43  ;;  %v14682_v38 = vld [vmem:[#allocation69_spill] sm:$0xff]  ;;  %v14683_v43 = vld [vmem:[#allocation70_spill] sm:$0xff] }
 0xe9e   : > { %4476 = vmatprep.subr.bf16.mxu0 %v11767_v31  ;;  %7414 = vmatprep.subr.bf16.mxu1 %v14258_v36  ;;  %v14684_v31 = vld [vmem:[#allocation71_spill] sm:$0xff] }
 0xe9f   : > { %4506 = vmatprep.mubr.bf16.mxu0 %v14259_v42  ;;  %7428 = vmatprep.mubr.msk.bf16.mxu1 %vm8807_vm2, %v14258_v36 }
 0xea1   : > { %4477 = vmatpush1.bf16.msra.mxu0 %v11777_v8  ;;  %7415 = vmatpush3.bf16.msra.mxu1 %v11783_v2  ;;  %v14685_v8 = vld [vmem:[#allocation72_spill] sm:$0xff]  ;;  %v14686_v2 = vld [vmem:[#allocation73_spill] sm:$0xff] }
 0xea2   : > { %4478 = vmatprep.subr.bf16.mxu0 %v11789_v16  ;;  %7416 = vmatprep.subr.bf16.mxu1 %v14258_v36  ;;  %v14687_v16 = vld [vmem:[#allocation74_spill] sm:$0xff] }
 0xea5   : > { %4479 = vmatpush1.bf16.msra.mxu0 %v11796_v33  ;;  %7417 = vmatpush3.bf16.msra.mxu1 %v11802_v58  ;;  %v14688_v33 = vld [vmem:[#allocation75_spill] sm:$0xff]  ;;  %v14689_v58 = vld [vmem:[#allocation76_spill] sm:$0xff] }
 0xea6   : > { %4480 = vmatprep.subr.bf16.mxu0 %v11808_v10  ;;  %7418 = vmatprep.subr.bf16.mxu1 %v14258_v36  ;;  %v14690_v10 = vld [vmem:[#allocation77_spill] sm:$0xff] }
 0xea9   : > { %4481 = vmatpush1.bf16.msra.mxu0 %v11815_v34  ;;  %7419 = vmatpush3.bf16.msra.mxu1 %v11821_v53  ;;  %v4473_v34 = vpack.c.bf16 %v12098_v55, %v12098_v55  ;;  %v14691_v53 = vld [vmem:[#allocation78_spill] sm:$0xff] }
 0xeaa   : > { %4482 = vmatprep.subr.bf16.mxu0 %v11827_v59  ;;  %7420 = vmatprep.subr.bf16.mxu1 %v14258_v36  ;;  %v14692_v59 = vld [vmem:[#allocation79_spill] sm:$0xff] }
 0xead   : > { %4483 = vmatpush1.bf16.msra.mxu0 %v14680_v47  ;;  %7421 = vmatpush3.bf16.msra.mxu1 %v14681_v32  ;;  %v12398_v47 = vld [vmem:[%s13925_s5 + $0x94] ss:$12 sps:$4 sm:$0xff]   ;;  %v12405_v32 = vld [vmem:[%s13925_s5 + $0x90] ss:$12 sps:$4 sm:$0xff]  }
 0xeae   : > { %4484 = vmatprep.subr.bf16.mxu0 %v14682_v38  ;;  %7422 = vmatprep.subr.bf16.mxu1 %v14258_v36  ;;  %v12411_v38 = vld [vmem:[%s13925_s5 + $0x98] ss:$12 sps:$4 sm:$0xff]  }
 0xeb1   : > { %4485 = vmatpush1.bf16.msra.mxu0 %v14683_v43  ;;  %7423 = vmatpush3.bf16.msra.mxu1 %v14684_v31  ;;  %v12417_v43 = vld [vmem:[%s13925_s5 + $0xac] ss:$12 sps:$4 sm:$0xff]   ;;  %v12424_v31 = vld [vmem:[%s13925_s5 + $0xa8] ss:$12 sps:$4 sm:$0xff]  }
 0xeb2   : > { %4486 = vmatprep.subr.bf16.mxu0 %v14685_v8  ;;  %7424 = vmatprep.subr.bf16.mxu1 %v14258_v36  ;;  %v12430_v8 = vld [vmem:[%s13925_s5 + $0xb0] ss:$12 sps:$4 sm:$0xff]  }
 0xeb5   : > { %4487 = vmatpush1.bf16.msra.mxu0 %v14686_v2  ;;  %7425 = vmatpush3.bf16.msra.mxu1 %v14687_v16  ;;  %v12436_v2 = vld [vmem:[%s13927_s7 + $0x4] ss:$12 sps:$4 sm:$0xff]  }
 0xeb6   : > { %4488 = vmatprep.subr.bf16.mxu0 %v14688_v33  ;;  %7426 = vmatprep.subr.bf16.mxu1 %v14258_v36 }
 0xeb9   : > { %4489 = vmatpush1.bf16.msra.mxu0 %v14689_v58  ;;  %7427 = vmatpush3.bf16.msra.mxu1 %v14690_v10 }
 0xeba   : > { %4581 = vmatprep.subr.bf16.mxu0 %v14691_v53  ;;  %7432 = vmatprep.subr.bf16.mxu1 %v14258_v36 }
 0xebc   : > { %4507 = vmatmul.mubr.bf16.vlgmr.msra.gmra.mrb[84].mxu0 %v4473_v34  ;;  %7429 = vmatmul.mubr.bf16.vlgmr.msra.gmra.mrb[124].mxu1 %v4473_v34 }
 0xebd   : > { %4582 = vmatpush1.bf16.msra.mxu0 %v11912_v11  ;;  %7433 = vmatpush3.bf16.msra.mxu1 %v14692_v59  ;;  %v14697_v11 = vld [vmem:[#allocation84_spill] sm:$0xff] }
 0xebe   : > { %4583 = vmatprep.subr.bf16.mxu0 %v14693_v23  ;;  %7434 = vmatprep.subr.bf16.mxu1 %v14258_v36 }
 0xebf   : > { %4613 = vmatprep.mubr.bf16.mxu0 %v14259_v42  ;;  %7448 = vmatprep.mubr.msk.bf16.mxu1 %vm8807_vm2, %v14258_v36 }
 0xec1   : > { %4584 = vmatpush1.bf16.msra.mxu0 %v14694_v49  ;;  %7435 = vmatpush3.bf16.msra.mxu1 %v14695_v30 }
 0xec2   : > { %4585 = vmatprep.subr.bf16.mxu0 %v14696_v45  ;;  %7436 = vmatprep.subr.bf16.mxu1 %v14258_v36 }
 0xec5   : > { %4586 = vmatpush1.bf16.msra.mxu0 %v14697_v11  ;;  %7437 = vmatpush3.bf16.msra.mxu1 %v14698_v25 }
 0xec6   : > { %4587 = vmatprep.subr.bf16.mxu0 %v14699_v46  ;;  %7438 = vmatprep.subr.bf16.mxu1 %v14258_v36 }
 0xec9   : > { %4588 = vmatpush1.bf16.msra.mxu0 %v14700_v6  ;;  %7439 = vmatpush3.bf16.msra.mxu1 %v14701_v19 }
 0xeca   : > { %4589 = vmatprep.subr.bf16.mxu0 %v14702_v26  ;;  %7440 = vmatprep.subr.bf16.mxu1 %v14258_v36 }
 0xecd   : > { %4590 = vmatpush1.bf16.msra.mxu0 %v14703_v39  ;;  %7441 = vmatpush3.bf16.msra.mxu1 %v14704_v17 }
 0xece   : > { %4591 = vmatprep.subr.bf16.mxu0 %v14705_v7  ;;  %7442 = vmatprep.subr.bf16.mxu1 %v14258_v36 }
 0xed1   : > { %4592 = vmatpush1.bf16.msra.mxu0 %v14706_v52  ;;  %7443 = vmatpush3.bf16.msra.mxu1 %v14707_v50 }
 0xed2   : > { %4593 = vmatprep.subr.bf16.mxu0 %v14708_v63  ;;  %7444 = vmatprep.subr.bf16.mxu1 %v14258_v36 }
 0xed5   : > { %4594 = vmatpush1.bf16.msra.mxu0 %v12029_v5  ;;  %7445 = vmatpush3.bf16.msra.mxu1 %v12264_v60  ;;  %v12279_v5 = vld [vmem:[%s13925_s5 + $0x4] ss:$12 sps:$4 sm:$0xff]  }
 0xed6   : > { %4595 = vmatprep.subr.bf16.mxu0 %v12036_v40  ;;  %7446 = vmatprep.subr.bf16.mxu1 %v14258_v36  ;;  %v12288_v40 = vld [vmem:[%s13925_s5] ss:$12 sps:$4 sm:$0xff]  }
 0xed9   : > { %4596 = vmatpush1.bf16.msra.mxu0 %v12043_v54  ;;  %7447 = vmatpush3.bf16.msra.mxu1 %v12273_v12  ;;  %v12294_v54 = vld [vmem:[%s13925_s5 + $0x8] ss:$12 sps:$4 sm:$0xff]  }
 0xeda   : > { %4684 = vmatprep.subr.bf16.mxu0 %v12279_v5  ;;  %7452 = vmatprep.subr.bf16.mxu1 %v14258_v36 }
 0xedc   : > { %4614 = vmatmul.mubr.bf16.vlgmr.msra.gmra.mrb[88].mxu0 %v12107_v29  ;;  %7449 = vmatmul.mubr.bf16.vlgmr.msra.gmra.mrb[128].mxu1 %v12107_v29  ;;  %v12310_v29 = vld [vmem:[%s13925_s5 + $0x18] ss:$12 sps:$4 sm:$0xff]  }
 0xedd   : > { %4685 = vmatpush1.bf16.msra.mxu0 %v12288_v40  ;;  %7453 = vmatpush3.bf16.msra.mxu1 %v12294_v54 }
 0xede   : > { %4686 = vmatprep.subr.bf16.mxu0 %v12300_v24  ;;  %7454 = vmatprep.subr.bf16.mxu1 %v14258_v36 }
 0xedf   : > { %4716 = vmatprep.mubr.bf16.mxu0 %v14259_v42  ;;  %7468 = vmatprep.mubr.msk.bf16.mxu1 %vm8807_vm2, %v14258_v36 }
 0xee1   : > { %4687 = vmatpush1.bf16.msra.mxu0 %v12310_v29  ;;  %7455 = vmatpush3.bf16.msra.mxu1 %v12316_v15 }
 0xee2   : > { %4688 = vmatprep.subr.bf16.mxu0 %v12322_v61  ;;  %7456 = vmatprep.subr.bf16.mxu1 %v14258_v36 }
 0xee5   : > { %4689 = vmatpush1.bf16.msra.mxu0 %v12329_v3  ;;  %7457 = vmatpush3.bf16.msra.mxu1 %v12335_v41 }
 0xee6   : > { %4690 = vmatprep.subr.bf16.mxu0 %v12341_v20  ;;  %7458 = vmatprep.subr.bf16.mxu1 %v14258_v36 }
 0xee9   : > { %4691 = vmatpush1.bf16.msra.mxu0 %v12348_v14  ;;  %7459 = vmatpush3.bf16.msra.mxu1 %v12354_v27 }
 0xeea   : > { %4692 = vmatprep.subr.bf16.mxu0 %v12360_v22  ;;  %7460 = vmatprep.subr.bf16.mxu1 %v14258_v36 }
 0xeed   : > { %4693 = vmatpush1.bf16.msra.mxu0 %v12367_v21  ;;  %7461 = vmatpush3.bf16.msra.mxu1 %v12373_v48 }
 0xeee   : > { %4694 = vmatprep.subr.bf16.mxu0 %v12379_v13  ;;  %7462 = vmatprep.subr.bf16.mxu1 %v14258_v36 }
 0xef1   : > { %4695 = vmatpush1.bf16.msra.mxu0 %v12386_v56  ;;  %7463 = vmatpush3.bf16.msra.mxu1 %v12392_v57 }
 0xef2   : > { %4696 = vmatprep.subr.bf16.mxu0 %v12398_v47  ;;  %7464 = vmatprep.subr.bf16.mxu1 %v14258_v36 }
 0xef5   : > { %4697 = vmatpush1.bf16.msra.mxu0 %v12405_v32  ;;  %7465 = vmatpush3.bf16.msra.mxu1 %v12411_v38 }
 0xef6   : > { %4698 = vmatprep.subr.bf16.mxu0 %v12417_v43  ;;  %7466 = vmatprep.subr.bf16.mxu1 %v14258_v36 }
 0xef9   : > { %4699 = vmatpush1.bf16.msra.mxu0 %v12424_v31  ;;  %7467 = vmatpush3.bf16.msra.mxu1 %v12430_v8 }
 0xefa   : > { %4765 = vmatprep.subr.bf16.mxu0 %v12436_v2  ;;  %7472 = vmatprep.subr.bf16.mxu1 %v14258_v36 }
 0xf6f   : > { %v4467_v16 = vpop.f32.mrb[120].mxu1 }
 0xf70   : > { %v7410_v33 = vpop.f32.mrb[121].mxu1  ;;  %v4468_v50 = vadd.f32 %v4467_v16, %v10005_v4 }
 0xf71   : > { %v4470_v58 = vpop.f32.mrb[122].mxu1 }
 0xf72   : > { %v7411_v10 = vpop.f32.mrb[123].mxu1 }
 0xf8f   : > { %v4508_v34 = vpop.f32.mrb[84].mxu0  ;;  %v4549_v53 = vpop.f32.mrb[124].mxu1 }
 0xf90   : > { %v7878_v59 = vadd.f32 %v4508_v34, %v9992_v51  ;;  %v4510_v23 = vpop.f32.mrb[85].mxu0  ;;  %v7430_v49 = vpop.f32.mrb[125].mxu1  ;;  %v4569_v7 = vadd.f32 %v12091_v1, %v4549_v53 }
 0xf91   : > { %v4512_v30 = vpop.f32.mrb[86].mxu0  ;;  %v4552_v45 = vpop.f32.mrb[126].mxu1  ;;  %v7879_v6 = vadd.f32 %v4510_v23, %v9996_v62 }
 0xf92   : > { %v6403_v11 = vmul.f32 -1.442695, %v7878_v59  ;;  %v4513_v25 = vpop.f32.mrb[87].mxu0  ;;  %v7431_v46 = vpop.f32.mrb[127].mxu1  ;;  %v14709_v59 = vld [vmem:[#allocation26_spill] sm:$0xff]  ;;  %v14710_v45 = vld [vmem:[#allocation27_spill] sm:$0xff] }
 0xf93   : > { %v6404_v19 = vmul.f32 -1.442695, %v7879_v6 }
 0xf94   : > { %8319 = vpow2.f32 %v6403_v11 }
 0xf95   : > { %8321 = vpow2.f32 %v6404_v19 }
 0xf9e   : > { %v8320_v26 = vpop.eup %8319 }
 0xf9f   : > { %v4559_v39 = vadd.f32 1.0, %v8320_v26  ;;  %v8322_v17 = vpop.eup %8321 }
 0xfa0   : > { %v4566_v58 = vadd.f32 1.0, %v8322_v17 }
 0xfa1   : > { %8323 = vrcp.f32 %v4559_v39 }
 0xfab   : > { %v8324_v52 = vpop.eup %8323 }
 0xfac   : > { %v4570_v63 = vmul.f32 %v8324_v52, %v4569_v7 }
 0xfae   : > { %v4571_v33 = vadd.f32 %v4570_v63, %v4468_v50 }
 0xfaf   : > { %v4615_v10 = vpop.f32.mrb[88].mxu0  ;;  %v4656_v34 = vpop.f32.mrb[128].mxu1 }
 0xfb0   : > { %8325 = vtanh.f32 %v4571_v33  ;;  %v4662_v49 = vadd.f32 %v4615_v10, %v14709_v59  ;;  %v4617_v23 = vpop.f32.mrb[89].mxu0  ;;  %v7450_v30 = vpop.f32.mrb[129].mxu1  ;;  %v12452_v33 = vld [vmem:[%s13924_s4] ss:$0 sm:$0xff] }
 0xfb1   : > { %v4669_v11 = vadd.f32 %v4617_v23, %v14710_v45  ;;  %v4619_v25 = vpop.f32.mrb[90].mxu0  ;;  %v4659_v46 = vpop.f32.mrb[130].mxu1  ;;  %8327 = vrcp.f32 %v4566_v58  ;;  %v4676_v58 = vadd.f32 %v12452_v33, %v4656_v34  ;;  %v12468_v34 = vld [vmem:[%s13927_s7] ss:$12 sps:$4 sm:$0xff]  }
 0xfb2   : > { %v6405_v6 = vmul.f32 -1.442695, %v4662_v49  ;;  %v4620_v1 = vpop.f32.mrb[91].mxu0  ;;  %v7451_v53 = vpop.f32.mrb[131].mxu1  ;;  %v14711_v49 = vld [vmem:[#allocation19_spill] sm:$0xff] }
 0xfb3   : > { %v6406_v39 = vmul.f32 -1.442695, %v4669_v11  ;;  %v12480_v53 = vld [vmem:[%s13927_s7 + $0x1c] ss:$12 sps:$4 sm:$0xff]  }
 0xfb4   : > { %8329 = vpow2.f32 %v6405_v6 }
 0xfb5   : > { %8331 = vpow2.f32 %v6406_v39  ;;  %v12509_v39 = vld [vmem:[%s13927_s7 + $0x30] ss:$12 sps:$4 sm:$0xff]  }
 0xfb6   : > { %14712 = vst [vmem:[#allocation97_spill] sm:$0xff] %v12509_v39 }
 0xfba   : > { %v8326_v16 = vpop.eup %8325 }
 0xfbb   : > { %v4573_v19 = vsub.f32 %v12098_v55, %v8326_v16  ;;  %v8328_v26 = vpop.eup %8327  ;;  %v12604_v55 = vld [vmem:[%s13927_s7 + $0xa8] ss:$12 sps:$4 sm:$0xff]  }
 0xfbc   : > { %14727 = vst [vmem:[#allocation17_spill] sm:$0xff] %v12604_v55 }
 0xfbd   : > { %v4574_v17 = vmul.f32 %v8328_v26, %v4573_v19  ;;  %v12496_v19 = vld [vmem:[%s13927_s7 + $0x20] ss:$12 sps:$4 sm:$0xff]  }
 0xfbe   : > { %v8330_v7 = vpop.eup %8329  ;;  %v12502_v26 = vld [vmem:[%s13927_s7 + $0x34] ss:$12 sps:$4 sm:$0xff]  }
 0xfbf   : > { %v4666_v52 = vadd.f32 1.0, %v8330_v7  ;;  %v12447_v50 = vadd.f32 %v8326_v16, %v4574_v17  ;;  %v8332_v63 = vpop.eup %8331  ;;  %v12490_v16 = vld [vmem:[%s13927_s7 + $0x18] ss:$12 sps:$4 sm:$0xff]  }
 0xfc0   : > { %v4673_v30 = vadd.f32 1.0, %v8332_v63  ;;  %v12515_v17 = vld [vmem:[%s13927_s7 + $0x38] ss:$12 sps:$4 sm:$0xff]   ;;  %v12534_v63 = vld [vmem:[%s13927_s7 + $0x50] ss:$12 sps:$4 sm:$0xff]  }
 0xfc1   : > { %8333 = vrcp.f32 %v4666_v52  ;;  %14713 = vst [vmem:[#allocation98_spill] sm:$0xff] %v12515_v17  ;;  %v12521_v7 = vld [vmem:[%s13927_s7 + $0x4c] ss:$12 sps:$4 sm:$0xff]   ;;  %v12528_v52 = vld [vmem:[%s13927_s7 + $0x48] ss:$12 sps:$4 sm:$0xff]   ;;  %14716 = vst [vmem:[#allocation101_spill] sm:$0xff] %v12534_v63 }
 0xfc2   : > { %14714 = vst [vmem:[#allocation99_spill] sm:$0xff] %v12521_v7  ;;  %14715 = vst [vmem:[#allocation100_spill] sm:$0xff] %v12528_v52 }
 0xfcb   : > { %v8334_v10 = vpop.eup %8333 }
 0xfcc   : > { %v4677_v59 = vmul.f32 %v8334_v10, %v4676_v58  ;;  %v12540_v58 = vld [vmem:[%s13927_s7 + $0x64] ss:$12 sps:$4 sm:$0xff]   ;;  %v12547_v10 = vld [vmem:[%s13927_s7 + $0x60] ss:$12 sps:$4 sm:$0xff]  }
 0xfcd   : > { %14717 = vst [vmem:[#allocation18_spill] sm:$0xff] %v12540_v58  ;;  %14718 = vst [vmem:[#allocation20_spill] sm:$0xff] %v12547_v10 }
 0xfce   : > { %v4678_v23 = vadd.f32 %v4677_v59, %v14711_v49  ;;  %v12553_v59 = vld [vmem:[%s13927_s7 + $0x68] ss:$12 sps:$4 sm:$0xff]  }
 0xfcf   : > { %14719 = vst [vmem:[#allocation21_spill] sm:$0xff] %v12553_v59  ;;  %v12559_v49 = vld [vmem:[%s13927_s7 + $0x7c] ss:$12 sps:$4 sm:$0xff]  }
 0xfd0   : > { %8335 = vtanh.f32 %v4678_v23  ;;  %14720 = vst [vmem:[#allocation22_spill] sm:$0xff] %v12559_v49  ;;  %v12566_v23 = vld [vmem:[%s13927_s7 + $0x78] ss:$12 sps:$4 sm:$0xff]  }
 0xfd1   : > { %8337 = vrcp.f32 %v4673_v30  ;;  %14721 = vst [vmem:[#allocation24_spill] sm:$0xff] %v12566_v23  ;;  %v12572_v30 = vld [vmem:[%s13927_s7 + $0x80] ss:$12 sps:$4 sm:$0xff]  }
 0xfd2   : > { %14722 = vst [vmem:[#allocation25_spill] sm:$0xff] %v12572_v30 }
 0xfda   : > { %v8336_v45 = vpop.eup %8335 }
 0xfdb   : > { %v4680_v11 = vsub.f32 %v12103_v9, %v8336_v45  ;;  %v8338_v25 = vpop.eup %8337  ;;  %v12474_v9 = vld [vmem:[%s13927_s7 + $0x8] ss:$12 sps:$4 sm:$0xff]  }
 0xfdd   : > { %v4681_v46 = vmul.f32 %v8338_v25, %v4680_v11  ;;  %v12585_v11 = vld [vmem:[%s13927_s7 + $0x90] ss:$12 sps:$4 sm:$0xff]   ;;  %v12591_v25 = vld [vmem:[%s13927_s7 + $0x98] ss:$12 sps:$4 sm:$0xff]  }
 0xfde   : > { %14724 = vst [vmem:[#allocation14_spill] sm:$0xff] %v12585_v11  ;;  %14725 = vst [vmem:[#allocation13_spill] sm:$0xff] %v12591_v25 }
 0xfdf   : > { %v12457_v6 = vadd.f32 %v8336_v45, %v4681_v46  ;;  %v12578_v45 = vld [vmem:[%s13927_s7 + $0x94] ss:$12 sps:$4 sm:$0xff]   ;;  %v12597_v46 = vld [vmem:[%s13927_s7 + $0xac] ss:$12 sps:$4 sm:$0xff]  }
 0xfe0   : > { %14723 = vst [vmem:[#allocation12_spill] sm:$0xff] %v12578_v45  ;;  %14726 = vst [vmem:[#allocation15_spill] sm:$0xff] %v12597_v46 }
 0xfe1   : > { %v12461_v1 = vpack.c.bf16 %v12457_v6, %v12457_v6 }
 0xfe3   : > { %4717 = vmatmul.mubr.bf16.vlgmr.msra.gmra.mrb[92].mxu0 %v12461_v1  ;;  %7469 = vmatmul.mubr.bf16.vlgmr.msra.gmra.mrb[132].mxu1 %v12461_v1 }
 0xfe4   : > { %4766 = vmatpush1.bf16.msra.mxu0 %v12468_v34  ;;  %7473 = vmatpush3.bf16.msra.mxu1 %v12474_v9 }
 0xfe5   : > { %4767 = vmatprep.subr.bf16.mxu0 %v12480_v53  ;;  %7474 = vmatprep.subr.bf16.mxu1 %v14258_v36 }
 0xfe6   : > { %4797 = vmatprep.mubr.bf16.mxu0 %v14259_v42  ;;  %7488 = vmatprep.mubr.msk.bf16.mxu1 %vm8807_vm2, %v14258_v36 }
 0xfe8   : > { %4768 = vmatpush1.bf16.msra.mxu0 %v12490_v16  ;;  %7475 = vmatpush3.bf16.msra.mxu1 %v12496_v19 }
 0xfe9   : > { %4769 = vmatprep.subr.bf16.mxu0 %v12502_v26  ;;  %7476 = vmatprep.subr.bf16.mxu1 %v14258_v36 }
 0xfec   : > { %4770 = vmatpush1.bf16.msra.mxu0 %v12509_v39  ;;  %7477 = vmatpush3.bf16.msra.mxu1 %v12515_v17 }
 0xfed   : > { %4771 = vmatprep.subr.bf16.mxu0 %v12521_v7  ;;  %7478 = vmatprep.subr.bf16.mxu1 %v14258_v36 }
 0xff0   : > { %4772 = vmatpush1.bf16.msra.mxu0 %v12528_v52  ;;  %7479 = vmatpush3.bf16.msra.mxu1 %v12534_v63 }
 0xff1   : > { %4773 = vmatprep.subr.bf16.mxu0 %v12540_v58  ;;  %7480 = vmatprep.subr.bf16.mxu1 %v14258_v36 }
 0xff4   : > { %4774 = vmatpush1.bf16.msra.mxu0 %v12547_v10  ;;  %7481 = vmatpush3.bf16.msra.mxu1 %v12553_v59 }
 0xff5   : > { %4775 = vmatprep.subr.bf16.mxu0 %v12559_v49  ;;  %7482 = vmatprep.subr.bf16.mxu1 %v14258_v36 }
 0xff8   : > { %4776 = vmatpush1.bf16.msra.mxu0 %v12566_v23  ;;  %7483 = vmatpush3.bf16.msra.mxu1 %v12572_v30 }
 0xff9   : > { %4777 = vmatprep.subr.bf16.mxu0 %v12578_v45  ;;  %7484 = vmatprep.subr.bf16.mxu1 %v14258_v36 }
 0xffc   : > { %4778 = vmatpush1.bf16.msra.mxu0 %v12585_v11  ;;  %7485 = vmatpush3.bf16.msra.mxu1 %v12591_v25 }
 0xffd   : > { %4779 = vmatprep.subr.bf16.mxu0 %v12597_v46  ;;  %7486 = vmatprep.subr.bf16.mxu1 %v14258_v36  ;;  %v12616_v46 = vld [vmem:[%s13929_s9 + $0x4] ss:$12 sps:$4 sm:$0xff]  }
 0xffe   : > { %14729 = vst [vmem:[#allocation31_spill] sm:$0xff] %v12616_v46 }
0x1000   : > { %4780 = vmatpush1.bf16.msra.mxu0 %v12604_v55  ;;  %7487 = vmatpush3.bf16.msra.mxu1 %v12610_v37  ;;  %v12625_v55 = vld [vmem:[%s13929_s9] ss:$12 sps:$4 sm:$0xff]   ;;  %v12631_v37 = vld [vmem:[%s13929_s9 + $0x8] ss:$12 sps:$4 sm:$0xff]  }
0x1001   : > { %4868 = vmatprep.subr.bf16.mxu0 %v12616_v46  ;;  %7492 = vmatprep.subr.bf16.mxu1 %v14258_v36  ;;  %14730 = vst [vmem:[#allocation32_spill] sm:$0xff] %v12625_v55  ;;  %14731 = vst [vmem:[#allocation33_spill] sm:$0xff] %v12631_v37  ;;  %v12637_v46 = vld [vmem:[%s13929_s9 + $0x1c] ss:$12 sps:$4 sm:$0xff]  }
0x1002   : > { %14732 = vst [vmem:[#allocation34_spill] sm:$0xff] %v12637_v46 }
0x1003   : > { %4798 = vmatmul.mubr.bf16.vlgmr.msra.gmra.mrb[92].mxu0 %v12192_v18  ;;  %7489 = vmatmul.mubr.bf16.vlgmr.msra.gmra.mrb[136].mxu1 %v12192_v18  ;;  %v12647_v18 = vld [vmem:[%s13929_s9 + $0x18] ss:$12 sps:$4 sm:$0xff]  }
0x1004   : > { %4869 = vmatpush1.bf16.msra.mxu0 %v12625_v55  ;;  %7493 = vmatpush3.bf16.msra.mxu1 %v12631_v37  ;;  %14733 = vst [vmem:[#allocation35_spill] sm:$0xff] %v12647_v18  ;;  %v12653_v37 = vld [vmem:[%s13929_s9 + $0x20] ss:$12 sps:$4 sm:$0xff]  }
0x1005   : > { %4870 = vmatprep.subr.bf16.mxu0 %v12637_v46  ;;  %7494 = vmatprep.subr.bf16.mxu1 %v14258_v36  ;;  %14734 = vst [vmem:[#allocation36_spill] sm:$0xff] %v12653_v37  ;;  %v12659_v46 = vld [vmem:[%s13929_s9 + $0x34] ss:$12 sps:$4 sm:$0xff]  }
0x1006   : > { %4900 = vmatprep.mubr.bf16.mxu0 %v14259_v42  ;;  %7508 = vmatprep.mubr.msk.bf16.mxu1 %vm8807_vm2, %v14258_v36  ;;  %14735 = vst [vmem:[#allocation37_spill] sm:$0xff] %v12659_v46 }
0x1008   : > { %4871 = vmatpush1.bf16.msra.mxu0 %v12647_v18  ;;  %7495 = vmatpush3.bf16.msra.mxu1 %v12653_v37  ;;  %v12666_v18 = vld [vmem:[%s13929_s9 + $0x30] ss:$12 sps:$4 sm:$0xff]   ;;  %v12672_v37 = vld [vmem:[%s13929_s9 + $0x38] ss:$12 sps:$4 sm:$0xff]  }
0x1009   : > { %4872 = vmatprep.subr.bf16.mxu0 %v12659_v46  ;;  %7496 = vmatprep.subr.bf16.mxu1 %v14258_v36  ;;  %14736 = vst [vmem:[#allocation38_spill] sm:$0xff] %v12666_v18  ;;  %14737 = vst [vmem:[#allocation39_spill] sm:$0xff] %v12672_v37  ;;  %v12678_v46 = vld [vmem:[%s13929_s9 + $0x4c] ss:$12 sps:$4 sm:$0xff]  }
0x100a   : > { %14738 = vst [vmem:[#allocation40_spill] sm:$0xff] %v12678_v46 }
0x100c   : > { %4873 = vmatpush1.bf16.msra.mxu0 %v12666_v18  ;;  %7497 = vmatpush3.bf16.msra.mxu1 %v12672_v37  ;;  %v12685_v18 = vld [vmem:[%s13929_s9 + $0x48] ss:$12 sps:$4 sm:$0xff]   ;;  %v12691_v37 = vld [vmem:[%s13929_s9 + $0x50] ss:$12 sps:$4 sm:$0xff]  }
0x100d   : > { %4874 = vmatprep.subr.bf16.mxu0 %v12678_v46  ;;  %7498 = vmatprep.subr.bf16.mxu1 %v14258_v36  ;;  %14739 = vst [vmem:[#allocation41_spill] sm:$0xff] %v12685_v18  ;;  %14740 = vst [vmem:[#allocation42_spill] sm:$0xff] %v12691_v37  ;;  %v12697_v46 = vld [vmem:[%s13929_s9 + $0x64] ss:$12 sps:$4 sm:$0xff]  }
0x100e   : > { %14741 = vst [vmem:[#allocation43_spill] sm:$0xff] %v12697_v46 }
0x1010   : > { %4875 = vmatpush1.bf16.msra.mxu0 %v12685_v18  ;;  %7499 = vmatpush3.bf16.msra.mxu1 %v12691_v37  ;;  %v12704_v18 = vld [vmem:[%s13929_s9 + $0x60] ss:$12 sps:$4 sm:$0xff]   ;;  %v12710_v37 = vld [vmem:[%s13929_s9 + $0x68] ss:$12 sps:$4 sm:$0xff]  }
0x1011   : > { %4876 = vmatprep.subr.bf16.mxu0 %v12697_v46  ;;  %7500 = vmatprep.subr.bf16.mxu1 %v14258_v36  ;;  %14742 = vst [vmem:[#allocation44_spill] sm:$0xff] %v12704_v18  ;;  %14743 = vst [vmem:[#allocation45_spill] sm:$0xff] %v12710_v37  ;;  %v12716_v46 = vld [vmem:[%s13929_s9 + $0x7c] ss:$12 sps:$4 sm:$0xff]  }
0x1012   : > { %14744 = vst [vmem:[#allocation46_spill] sm:$0xff] %v12716_v46 }
0x1014   : > { %4877 = vmatpush1.bf16.msra.mxu0 %v12704_v18  ;;  %7501 = vmatpush3.bf16.msra.mxu1 %v12710_v37  ;;  %v12723_v18 = vld [vmem:[%s13929_s9 + $0x78] ss:$12 sps:$4 sm:$0xff]   ;;  %v12729_v37 = vld [vmem:[%s13929_s9 + $0x80] ss:$12 sps:$4 sm:$0xff]  }
0x1015   : > { %4878 = vmatprep.subr.bf16.mxu0 %v12716_v46  ;;  %7502 = vmatprep.subr.bf16.mxu1 %v14258_v36  ;;  %14745 = vst [vmem:[#allocation47_spill] sm:$0xff] %v12723_v18  ;;  %14746 = vst [vmem:[#allocation48_spill] sm:$0xff] %v12729_v37  ;;  %v12735_v46 = vld [vmem:[%s13929_s9 + $0x94] ss:$12 sps:$4 sm:$0xff]  }
0x1016   : > { %14747 = vst [vmem:[#allocation49_spill] sm:$0xff] %v12735_v46 }
0x1018   : > { %4879 = vmatpush1.bf16.msra.mxu0 %v12723_v18  ;;  %7503 = vmatpush3.bf16.msra.mxu1 %v12729_v37  ;;  %v12742_v18 = vld [vmem:[%s13929_s9 + $0x90] ss:$12 sps:$4 sm:$0xff]   ;;  %v12748_v37 = vld [vmem:[%s13929_s9 + $0x98] ss:$12 sps:$4 sm:$0xff]  }
0x1019   : > { %4880 = vmatprep.subr.bf16.mxu0 %v12735_v46  ;;  %7504 = vmatprep.subr.bf16.mxu1 %v14258_v36  ;;  %14748 = vst [vmem:[#allocation50_spill] sm:$0xff] %v12742_v18  ;;  %14749 = vst [vmem:[#allocation51_spill] sm:$0xff] %v12748_v37  ;;  %v12754_v46 = vld [vmem:[%s13929_s9 + $0xac] ss:$12 sps:$4 sm:$0xff]  }
0x101a   : > { %14750 = vst [vmem:[#allocation52_spill] sm:$0xff] %v12754_v46 }
0x101c   : > { %4881 = vmatpush1.bf16.msra.mxu0 %v12742_v18  ;;  %7505 = vmatpush3.bf16.msra.mxu1 %v12748_v37  ;;  %v12761_v18 = vld [vmem:[%s13929_s9 + $0xa8] ss:$12 sps:$4 sm:$0xff]   ;;  %v12767_v37 = vld [vmem:[%s13929_s9 + $0xb0] ss:$12 sps:$4 sm:$0xff]  }
0x101d   : > { %4882 = vmatprep.subr.bf16.mxu0 %v12754_v46  ;;  %7506 = vmatprep.subr.bf16.mxu1 %v14258_v36  ;;  %14751 = vst [vmem:[#allocation53_spill] sm:$0xff] %v12761_v18  ;;  %14752 = vst [vmem:[#allocation54_spill] sm:$0xff] %v12767_v37  ;;  %v12773_v46 = vld [vmem:[%s13931_s11 + $0x4] ss:$12 sps:$4 sm:$0xff]  }
0x101e   : > { %14753 = vst [vmem:[#allocation55_spill] sm:$0xff] %v12773_v46 }
0x1020   : > { %4883 = vmatpush1.bf16.msra.mxu0 %v12761_v18  ;;  %7507 = vmatpush3.bf16.msra.mxu1 %v12767_v37 }
0x1021   : > { %4950 = vmatprep.subr.bf16.mxu0 %v12773_v46  ;;  %7512 = vmatprep.subr.bf16.mxu1 %v14258_v36 }
0x10b6   : > { %v4759_v55 = vpop.f32.mrb[132].mxu1 }
0x10b7   : > { %v7470_v25 = vpop.f32.mrb[133].mxu1 }
0x10b8   : > { %v4762_v11 = vpop.f32.mrb[134].mxu1 }
0x10b9   : > { %v7471_v18 = vpop.f32.mrb[135].mxu1 }
0x10ba   : > { %v12826_v18 = vld [vmem:[%s13931_s11 + $0x20] ss:$12 sps:$4 sm:$0xff]  }
0x10d6   : > { %v4799_v45 = vpop.f32.mrb[92].mxu0  ;;  %v4840_v30 = vpop.f32.mrb[136].mxu1 }
0x10d7   : > { %v7880_v23 = vadd.f32 %v4799_v45, %v9626_v44  ;;  %v4801_v49 = vpop.f32.mrb[93].mxu0  ;;  %v7490_v59 = vpop.f32.mrb[137].mxu1  ;;  %v12782_v45 = vld [vmem:[%s13928_s8] ss:$0 sm:$0xff] }
0x10d8   : > { %v4803_v37 = vpop.f32.mrb[94].mxu0  ;;  %v4843_v10 = vpop.f32.mrb[138].mxu1  ;;  %v7881_v46 = vadd.f32 %v4801_v49, %v14376_v0 }
0x10d9   : > { %v6407_v58 = vmul.f32 -1.442695, %v7880_v23  ;;  %v4804_v63 = vpop.f32.mrb[95].mxu0  ;;  %v7491_v52 = vpop.f32.mrb[139].mxu1  ;;  %v4860_v37 = vadd.f32 %v12782_v45, %v4840_v30  ;;  %v12810_v30 = vld [vmem:[%s13931_s11 + $0x1c] ss:$12 sps:$4 sm:$0xff]  }
0x10da   : > { %v6408_v7 = vmul.f32 -1.442695, %v7881_v46  ;;  %v4760_v63 = vadd.f32 %v4759_v55, %v9639_v28  ;;  %v12798_v55 = vld [vmem:[%s13931_s11] ss:$12 sps:$4 sm:$0xff]   ;;  %v12820_v46 = vld [vmem:[%s13931_s11 + $0x18] ss:$12 sps:$4 sm:$0xff]  }
0x10db   : > { %8339 = vpow2.f32 %v6407_v58 }
0x10dc   : > { %8341 = vpow2.f32 %v6408_v7 }
0x10e5   : > { %v8340_v17 = vpop.eup %8339 }
0x10e6   : > { %v4850_v39 = vadd.f32 1.0, %v8340_v17  ;;  %v8342_v11 = vpop.eup %8341 }
0x10e7   : > { %v4857_v59 = vadd.f32 1.0, %v8342_v11  ;;  %v12832_v11 = vld [vmem:[%s13931_s11 + $0x34] ss:$12 sps:$4 sm:$0xff]  }
0x10e8   : > { %8343 = vrcp.f32 %v4850_v39 }
0x10f2   : > { %v8344_v10 = vpop.eup %8343 }
0x10f3   : > { %v4861_v52 = vmul.f32 %v8344_v10, %v4860_v37  ;;  %v12839_v37 = vld [vmem:[%s13931_s11 + $0x30] ss:$12 sps:$4 sm:$0xff]   ;;  %v12845_v10 = vld [vmem:[%s13931_s11 + $0x38] ss:$12 sps:$4 sm:$0xff]  }
0x10f5   : > { %v4862_v58 = vadd.f32 %v4861_v52, %v4760_v63  ;;  %v12851_v63 = vld [vmem:[%s13931_s11 + $0x4c] ss:$12 sps:$4 sm:$0xff]   ;;  %v12858_v52 = vld [vmem:[%s13931_s11 + $0x48] ss:$12 sps:$4 sm:$0xff]  }
0x10f7   : > { %8345 = vtanh.f32 %v4862_v58  ;;  %v12864_v58 = vld [vmem:[%s13931_s11 + $0x50] ss:$12 sps:$4 sm:$0xff]  }
0x10f8   : > { %8347 = vrcp.f32 %v4857_v59  ;;  %v12870_v59 = vld [vmem:[%s13931_s11 + $0x64] ss:$12 sps:$4 sm:$0xff]  }
0x10f9   : > { %14754 = vst [vmem:[#allocation56_spill] sm:$0xff] %v12870_v59 }
0x1101   : > { %v8346_v49 = vpop.eup %8345 }
0x1102   : > { %v4864_v17 = vsub.f32 %v12188_v35, %v8346_v49  ;;  %v8348_v39 = vpop.eup %8347  ;;  %v12804_v35 = vld [vmem:[%s13931_s11 + $0x8] ss:$12 sps:$4 sm:$0xff]  }
0x1104   : > { %v4865_v7 = vmul.f32 %v8348_v39, %v4864_v17  ;;  %v12883_v17 = vld [vmem:[%s13931_s11 + $0x68] ss:$12 sps:$4 sm:$0xff]  }
0x1105   : > { %14756 = vst [vmem:[#allocation58_spill] sm:$0xff] %v12883_v17  ;;  %v12889_v39 = vld [vmem:[%s13931_s11 + $0x7c] ss:$12 sps:$4 sm:$0xff]  }
0x1106   : > { %v12787_v23 = vadd.f32 %v8346_v49, %v4865_v7  ;;  %v12877_v49 = vld [vmem:[%s13931_s11 + $0x60] ss:$12 sps:$4 sm:$0xff]   ;;  %14757 = vst [vmem:[#allocation59_spill] sm:$0xff] %v12889_v39  ;;  %v12896_v7 = vld [vmem:[%s13931_s11 + $0x78] ss:$12 sps:$4 sm:$0xff]  }
0x1107   : > { %14755 = vst [vmem:[#allocation57_spill] sm:$0xff] %v12877_v49  ;;  %14758 = vst [vmem:[#allocation60_spill] sm:$0xff] %v12896_v7 }
0x1108   : > { %v12791_v25 = vpack.c.bf16 %v12787_v23, %v12787_v23 }
0x110a   : > { %4901 = vmatmul.mubr.bf16.vlgmr.msra.gmra.mrb[96].mxu0 %v12791_v25  ;;  %7509 = vmatmul.mubr.bf16.vlgmr.msra.gmra.mrb[140].mxu1 %v12791_v25 }
0x110b   : > { %4951 = vmatpush1.bf16.msra.mxu0 %v12798_v55  ;;  %7513 = vmatpush3.bf16.msra.mxu1 %v12804_v35 }
0x110c   : > { %4952 = vmatprep.subr.bf16.mxu0 %v12810_v30  ;;  %7514 = vmatprep.subr.bf16.mxu1 %v14258_v36 }
0x110d   : > { %4982 = vmatprep.mubr.bf16.mxu0 %v14259_v42  ;;  %7528 = vmatprep.mubr.msk.bf16.mxu1 %vm8807_vm2, %v14258_v36 }
0x110f   : > { %4953 = vmatpush1.bf16.msra.mxu0 %v12820_v46  ;;  %7515 = vmatpush3.bf16.msra.mxu1 %v12826_v18 }
0x1110   : > { %4954 = vmatprep.subr.bf16.mxu0 %v12832_v11  ;;  %7516 = vmatprep.subr.bf16.mxu1 %v14258_v36 }
0x1113   : > { %4955 = vmatpush1.bf16.msra.mxu0 %v12839_v37  ;;  %7517 = vmatpush3.bf16.msra.mxu1 %v12845_v10 }
0x1114   : > { %4956 = vmatprep.subr.bf16.mxu0 %v12851_v63  ;;  %7518 = vmatprep.subr.bf16.mxu1 %v14258_v36 }
0x1117   : > { %4957 = vmatpush1.bf16.msra.mxu0 %v12858_v52  ;;  %7519 = vmatpush3.bf16.msra.mxu1 %v12864_v58 }
0x1118   : > { %4958 = vmatprep.subr.bf16.mxu0 %v12870_v59  ;;  %7520 = vmatprep.subr.bf16.mxu1 %v14258_v36  ;;  %v8760_v59 = vld [vmem:[%s14234_s30 + $0x1c] ss:$12 sps:$4 sm:$0xff]  }
0x111b   : > { %4959 = vmatpush1.bf16.msra.mxu0 %v12877_v49  ;;  %7521 = vmatpush3.bf16.msra.mxu1 %v12883_v17  ;;  %v12902_v17 = vld [vmem:[%s13931_s11 + $0x80] ss:$12 sps:$4 sm:$0xff]   ;;  %v4949_v49 = vpack.c.bf16 %v12447_v50, %v12447_v50 }
0x111c   : > { %4960 = vmatprep.subr.bf16.mxu0 %v12889_v39  ;;  %7522 = vmatprep.subr.bf16.mxu1 %v14258_v36  ;;  %14759 = vst [vmem:[#allocation61_spill] sm:$0xff] %v12902_v17  ;;  %v12908_v39 = vld [vmem:[%s13931_s11 + $0x94] ss:$12 sps:$4 sm:$0xff]  }
0x111d   : > { %14760 = vst [vmem:[#allocation62_spill] sm:$0xff] %v12908_v39 }
0x111f   : > { %4961 = vmatpush1.bf16.msra.mxu0 %v12896_v7  ;;  %7523 = vmatpush3.bf16.msra.mxu1 %v12902_v17  ;;  %v12915_v7 = vld [vmem:[%s13931_s11 + $0x90] ss:$12 sps:$4 sm:$0xff]   ;;  %v12921_v17 = vld [vmem:[%s13931_s11 + $0x98] ss:$12 sps:$4 sm:$0xff]  }
0x1120   : > { %4962 = vmatprep.subr.bf16.mxu0 %v12908_v39  ;;  %7524 = vmatprep.subr.bf16.mxu1 %v14258_v36  ;;  %14761 = vst [vmem:[#allocation63_spill] sm:$0xff] %v12915_v7  ;;  %14762 = vst [vmem:[#allocation64_spill] sm:$0xff] %v12921_v17  ;;  %v12927_v39 = vld [vmem:[%s13931_s11 + $0xac] ss:$12 sps:$4 sm:$0xff]  }
0x1121   : > { %14763 = vst [vmem:[#allocation65_spill] sm:$0xff] %v12927_v39 }
0x1123   : > { %4963 = vmatpush1.bf16.msra.mxu0 %v12915_v7  ;;  %7525 = vmatpush3.bf16.msra.mxu1 %v12921_v17  ;;  %v12934_v7 = vld [vmem:[%s13931_s11 + $0xa8] ss:$12 sps:$4 sm:$0xff]   ;;  %v12940_v17 = vld [vmem:[%s13931_s11 + $0xb0] ss:$12 sps:$4 sm:$0xff]  }
0x1124   : > { %4964 = vmatprep.subr.bf16.mxu0 %v12927_v39  ;;  %7526 = vmatprep.subr.bf16.mxu1 %v14258_v36  ;;  %14764 = vst [vmem:[#allocation66_spill] sm:$0xff] %v12934_v7  ;;  %14765 = vst [vmem:[#allocation67_spill] sm:$0xff] %v12940_v17  ;;  %v8757_v39 = vld [vmem:[%s14234_s30 + $0x4] ss:$12 sps:$4 sm:$0xff]  }
0x1127   : > { %4965 = vmatpush1.bf16.msra.mxu0 %v12934_v7  ;;  %7527 = vmatpush3.bf16.msra.mxu1 %v12940_v17  ;;  %v8758_v7 = vld [vmem:[%s14234_s30] ss:$12 sps:$4 sm:$0xff]   ;;  %v8759_v17 = vld [vmem:[%s14234_s30 + $0x8] ss:$12 sps:$4 sm:$0xff]  }
0x1128   : > { %5057 = vmatprep.subr.bf16.mxu0 %v8757_v39  ;;  %7532 = vmatprep.subr.bf16.mxu1 %v14258_v36  ;;  %v8764_v39 = vld [vmem:[%s14234_s30 + $0x30] ss:$12 sps:$4 sm:$0xff]  }
0x112a   : > { %4983 = vmatmul.mubr.bf16.vlgmr.msra.gmra.mrb[96].mxu0 %v4949_v49  ;;  %7529 = vmatmul.mubr.bf16.vlgmr.msra.gmra.mrb[144].mxu1 %v4949_v49  ;;  %v8761_v49 = vld [vmem:[%s14234_s30 + $0x18] ss:$12 sps:$4 sm:$0xff]  }
0x112b   : > { %5058 = vmatpush1.bf16.msra.mxu0 %v8758_v7  ;;  %7533 = vmatpush3.bf16.msra.mxu1 %v8759_v17  ;;  %v8762_v17 = vld [vmem:[%s14234_s30 + $0x20] ss:$12 sps:$4 sm:$0xff]   ;;  %v8765_v7 = vld [vmem:[%s14234_s30 + $0x38] ss:$12 sps:$4 sm:$0xff]  }
0x112c   : > { %5059 = vmatprep.subr.bf16.mxu0 %v8760_v59  ;;  %7534 = vmatprep.subr.bf16.mxu1 %v14258_v36  ;;  %v8763_v59 = vld [vmem:[%s14234_s30 + $0x34] ss:$12 sps:$4 sm:$0xff]  }
0x112d   : > { %5089 = vmatprep.mubr.bf16.mxu0 %v14259_v42  ;;  %7548 = vmatprep.mubr.msk.bf16.mxu1 %vm8807_vm2, %v14258_v36 }
0x112f   : > { %5060 = vmatpush1.bf16.msra.mxu0 %v8761_v49  ;;  %7535 = vmatpush3.bf16.msra.mxu1 %v8762_v17  ;;  %v8766_v49 = vld [vmem:[%s14234_s30 + $0x4c] ss:$12 sps:$4 sm:$0xff]   ;;  %v8767_v17 = vld [vmem:[%s14234_s30 + $0x48] ss:$12 sps:$4 sm:$0xff]  }
0x1130   : > { %5061 = vmatprep.subr.bf16.mxu0 %v8763_v59  ;;  %7536 = vmatprep.subr.bf16.mxu1 %v14258_v36  ;;  %v8768_v59 = vld [vmem:[%s14234_s30 + $0x50] ss:$12 sps:$4 sm:$0xff]  }
0x1133   : > { %5062 = vmatpush1.bf16.msra.mxu0 %v8764_v39  ;;  %7537 = vmatpush3.bf16.msra.mxu1 %v8765_v7  ;;  %v8769_v39 = vld [vmem:[%s14234_s30 + $0x64] ss:$12 sps:$4 sm:$0xff]   ;;  %v8770_v7 = vld [vmem:[%s14234_s30 + $0x60] ss:$12 sps:$4 sm:$0xff]  }
0x1134   : > { %5063 = vmatprep.subr.bf16.mxu0 %v8766_v49  ;;  %7538 = vmatprep.subr.bf16.mxu1 %v14258_v36  ;;  %v8771_v49 = vld [vmem:[%s14234_s30 + $0x68] ss:$12 sps:$4 sm:$0xff]  }
0x1137   : > { %5064 = vmatpush1.bf16.msra.mxu0 %v8767_v17  ;;  %7539 = vmatpush3.bf16.msra.mxu1 %v8768_v59  ;;  %v8772_v17 = vld [vmem:[%s14234_s30 + $0x7c] ss:$12 sps:$4 sm:$0xff]   ;;  %v8773_v59 = vld [vmem:[%s14234_s30 + $0x78] ss:$12 sps:$4 sm:$0xff]  }
0x1138   : > { %5065 = vmatprep.subr.bf16.mxu0 %v8769_v39  ;;  %7540 = vmatprep.subr.bf16.mxu1 %v14258_v36  ;;  %v8774_v39 = vld [vmem:[%s14234_s30 + $0x80] ss:$12 sps:$4 sm:$0xff]  }
0x113b   : > { %5066 = vmatpush1.bf16.msra.mxu0 %v8770_v7  ;;  %7541 = vmatpush3.bf16.msra.mxu1 %v8771_v49  ;;  %v8775_v7 = vld [vmem:[%s14234_s30 + $0x94] ss:$12 sps:$4 sm:$0xff]   ;;  %v8776_v49 = vld [vmem:[%s14234_s30 + $0x90] ss:$12 sps:$4 sm:$0xff]  }
0x113c   : > { %5067 = vmatprep.subr.bf16.mxu0 %v8772_v17  ;;  %7542 = vmatprep.subr.bf16.mxu1 %v14258_v36  ;;  %v8777_v17 = vld [vmem:[%s14234_s30 + $0xac] ss:$12 sps:$4 sm:$0xff]  }
0x113f   : > { %5068 = vmatpush1.bf16.msra.mxu0 %v8773_v59  ;;  %7543 = vmatpush3.bf16.msra.mxu1 %v8774_v39  ;;  %v8778_v59 = vld [vmem:[%s14234_s30 + $0xa8] ss:$12 sps:$4 sm:$0xff]  }
0x1140   : > { %5069 = vmatprep.subr.bf16.mxu0 %v8775_v7  ;;  %7544 = vmatprep.subr.bf16.mxu1 %v14258_v36  ;;  %v14766_v39 = vld [vmem:[#allocation28_spill] sm:$0xff] }
0x1143   : > { %5070 = vmatpush1.bf16.msra.mxu0 %v8776_v49  ;;  %7545 = vmatpush3.bf16.msra.mxu1 %v12264_v60 }
0x1144   : > { %5071 = vmatprep.subr.bf16.mxu0 %v8777_v17  ;;  %7546 = vmatprep.subr.bf16.mxu1 %v14258_v36 }
0x1147   : > { %5072 = vmatpush1.bf16.msra.mxu0 %v8778_v59  ;;  %7547 = vmatpush3.bf16.msra.mxu1 %v12273_v12  ;;  %v14767_v59 = vld [vmem:[#allocation29_spill] sm:$0xff] }
0x1148   : > { %5160 = vmatprep.subr.bf16.mxu0 %v12279_v5  ;;  %7552 = vmatprep.subr.bf16.mxu1 %v14258_v36 }
0x114a   : > { %5090 = vmatmul.mubr.bf16.vlgmr.msra.gmra.mrb[100].mxu0 %v12461_v1  ;;  %7549 = vmatmul.mubr.bf16.vlgmr.msra.gmra.mrb[148].mxu1 %v12461_v1 }
0x114b   : > { %5161 = vmatpush1.bf16.msra.mxu0 %v12288_v40  ;;  %7553 = vmatpush3.bf16.msra.mxu1 %v12294_v54 }
0x114c   : > { %5162 = vmatprep.subr.bf16.mxu0 %v12300_v24  ;;  %7554 = vmatprep.subr.bf16.mxu1 %v14258_v36 }
0x114d   : > { %5192 = vmatprep.mubr.bf16.mxu0 %v14259_v42  ;;  %7568 = vmatprep.mubr.msk.bf16.mxu1 %vm8807_vm2, %v14258_v36 }
0x114f   : > { %5163 = vmatpush1.bf16.msra.mxu0 %v12310_v29  ;;  %7555 = vmatpush3.bf16.msra.mxu1 %v12316_v15 }
0x1150   : > { %5164 = vmatprep.subr.bf16.mxu0 %v12322_v61  ;;  %7556 = vmatprep.subr.bf16.mxu1 %v14258_v36 }
0x1153   : > { %5165 = vmatpush1.bf16.msra.mxu0 %v12329_v3  ;;  %7557 = vmatpush3.bf16.msra.mxu1 %v12335_v41 }
0x1154   : > { %5166 = vmatprep.subr.bf16.mxu0 %v12341_v20  ;;  %7558 = vmatprep.subr.bf16.mxu1 %v14258_v36 }
0x1157   : > { %5167 = vmatpush1.bf16.msra.mxu0 %v12348_v14  ;;  %7559 = vmatpush3.bf16.msra.mxu1 %v12354_v27 }
0x1158   : > { %5168 = vmatprep.subr.bf16.mxu0 %v12360_v22  ;;  %7560 = vmatprep.subr.bf16.mxu1 %v14258_v36 }
0x115b   : > { %5169 = vmatpush1.bf16.msra.mxu0 %v12367_v21  ;;  %7561 = vmatpush3.bf16.msra.mxu1 %v12373_v48 }
0x115c   : > { %5170 = vmatprep.subr.bf16.mxu0 %v12379_v13  ;;  %7562 = vmatprep.subr.bf16.mxu1 %v14258_v36 }
0x115f   : > { %5171 = vmatpush1.bf16.msra.mxu0 %v12386_v56  ;;  %7563 = vmatpush3.bf16.msra.mxu1 %v12392_v57  ;;  %v13068_v57 = vld [vmem:[%s13932_s12] ss:$0 sm:$0xff] }
0x1160   : > { %5172 = vmatprep.subr.bf16.mxu0 %v12398_v47  ;;  %7564 = vmatprep.subr.bf16.mxu1 %v14258_v36 }
0x1163   : > { %5173 = vmatpush1.bf16.msra.mxu0 %v12405_v32  ;;  %7565 = vmatpush3.bf16.msra.mxu1 %v12411_v38 }
0x1164   : > { %5174 = vmatprep.subr.bf16.mxu0 %v12417_v43  ;;  %7566 = vmatprep.subr.bf16.mxu1 %v14258_v36 }
0x1167   : > { %5175 = vmatpush1.bf16.msra.mxu0 %v12424_v31  ;;  %7567 = vmatpush3.bf16.msra.mxu1 %v12430_v8 }
0x1168   : > { %5241 = vmatprep.subr.bf16.mxu0 %v12436_v2  ;;  %7572 = vmatprep.subr.bf16.mxu1 %v14258_v36 }
0x11dd   : > { %v4943_v60 = vpop.f32.mrb[140].mxu1 }
0x11de   : > { %v7510_v12 = vpop.f32.mrb[141].mxu1  ;;  %v4944_v38 = vadd.f32 %v4943_v60, %v10005_v4 }
0x11df   : > { %v4946_v5 = vpop.f32.mrb[142].mxu1 }
0x11e0   : > { %v7511_v40 = vpop.f32.mrb[143].mxu1 }
0x11fd   : > { %v4984_v54 = vpop.f32.mrb[96].mxu0  ;;  %v5025_v24 = vpop.f32.mrb[144].mxu1 }
0x11fe   : > { %v7882_v29 = vadd.f32 %v4984_v54, %v9992_v51  ;;  %v4986_v15 = vpop.f32.mrb[97].mxu0  ;;  %v7530_v61 = vpop.f32.mrb[145].mxu1  ;;  %v5045_v47 = vadd.f32 %v13068_v57, %v5025_v24 }
0x11ff   : > { %v4988_v3 = vpop.f32.mrb[98].mxu0  ;;  %v5028_v41 = vpop.f32.mrb[146].mxu1  ;;  %v7883_v22 = vadd.f32 %v4986_v15, %v9996_v62 }
0x1200   : > { %v6409_v20 = vmul.f32 -1.442695, %v7882_v29  ;;  %v4989_v14 = vpop.f32.mrb[99].mxu0  ;;  %v7531_v27 = vpop.f32.mrb[147].mxu1 }
0x1201   : > { %v6410_v21 = vmul.f32 -1.442695, %v7883_v22 }
0x1202   : > { %8349 = vpow2.f32 %v6409_v20 }
0x1203   : > { %8351 = vpow2.f32 %v6410_v21 }
0x120c   : > { %v8350_v48 = vpop.eup %8349 }
0x120d   : > { %v5035_v13 = vadd.f32 1.0, %v8350_v48  ;;  %v8352_v56 = vpop.eup %8351 }
0x120e   : > { %v5042_v8 = vadd.f32 1.0, %v8352_v56  ;;  %v14768_v56 = vld [vmem:[#allocation23_spill] sm:$0xff] }
0x120f   : > { %8353 = vrcp.f32 %v5035_v13 }
0x1219   : > { %v8354_v32 = vpop.eup %8353 }
0x121a   : > { %v5046_v43 = vmul.f32 %v8354_v32, %v5045_v47 }
0x121c   : > { %v5047_v31 = vadd.f32 %v5046_v43, %v4944_v38 }
0x121d   : > { %v5091_v2 = vpop.f32.mrb[100].mxu0  ;;  %v5132_v1 = vpop.f32.mrb[148].mxu1 }
0x121e   : > { %8355 = vtanh.f32 %v5047_v31  ;;  %v5138_v7 = vadd.f32 %v5091_v2, %v14766_v39  ;;  %v5093_v49 = vpop.f32.mrb[101].mxu0  ;;  %v7550_v17 = vpop.f32.mrb[149].mxu1  ;;  %v5152_v21 = vadd.f32 %v12452_v33, %v5132_v1  ;;  %v14769_v33 = vld [vmem:[#allocation97_spill] sm:$0xff]  ;;  %v14774_v1 = vld [vmem:[#allocation18_spill] sm:$0xff] }
0x121f   : > { %v5145_v12 = vadd.f32 %v5093_v49, %v14767_v59  ;;  %v5095_v5 = vpop.f32.mrb[102].mxu0  ;;  %v5135_v40 = vpop.f32.mrb[150].mxu1  ;;  %8357 = vrcp.f32 %v5042_v8  ;;  %v14779_v49 = vld [vmem:[#allocation25_spill] sm:$0xff]  ;;  %v14780_v17 = vld [vmem:[#allocation12_spill] sm:$0xff]  ;;  %v14781_v59 = vld [vmem:[#allocation14_spill] sm:$0xff] }
0x1220   : > { %v6411_v54 = vmul.f32 -1.442695, %v5138_v7  ;;  %v5096_v24 = vpop.f32.mrb[103].mxu0  ;;  %v7551_v29 = vpop.f32.mrb[151].mxu1  ;;  %v14778_v7 = vld [vmem:[#allocation24_spill] sm:$0xff]  ;;  %v14783_v5 = vld [vmem:[#allocation15_spill] sm:$0xff] }
0x1221   : > { %v6412_v3 = vmul.f32 -1.442695, %v5145_v12  ;;  %v14782_v12 = vld [vmem:[#allocation13_spill] sm:$0xff]  ;;  %v14786_v24 = vld [vmem:[#allocation31_spill] sm:$0xff]  ;;  %v14787_v29 = vld [vmem:[#allocation32_spill] sm:$0xff] }
0x1222   : > { %8359 = vpow2.f32 %v6411_v54  ;;  %v14784_v40 = vld [vmem:[#allocation17_spill] sm:$0xff]  ;;  %v14785_v54 = vld [vmem:[#allocation16_spill] sm:$0xff] }
0x1223   : > { %8361 = vpow2.f32 %v6412_v3  ;;  %v14791_v3 = vld [vmem:[#allocation36_spill] sm:$0xff] }
0x1228   : > { %v8356_v60 = vpop.eup %8355 }
0x1229   : > { %v5049_v15 = vsub.f32 %v12447_v50, %v8356_v60  ;;  %v8358_v61 = vpop.eup %8357 }
0x122b   : > { %v5050_v41 = vmul.f32 %v8358_v61, %v5049_v15  ;;  %v14789_v15 = vld [vmem:[#allocation34_spill] sm:$0xff]  ;;  %v14790_v61 = vld [vmem:[#allocation35_spill] sm:$0xff] }
0x122c   : > { %v8360_v20 = vpop.eup %8359 }
0x122d   : > { %v5142_v14 = vadd.f32 1.0, %v8360_v20  ;;  %v13075_v27 = vadd.f32 %v8356_v60, %v5050_v41  ;;  %v8362_v22 = vpop.eup %8361  ;;  %v14788_v60 = vld [vmem:[#allocation33_spill] sm:$0xff]  ;;  %v14794_v20 = vld [vmem:[#allocation39_spill] sm:$0xff] }
0x122e   : > { %v5149_v32 = vadd.f32 1.0, %v8362_v22  ;;  %v14792_v41 = vld [vmem:[#allocation37_spill] sm:$0xff] }
0x122f   : > { %8363 = vrcp.f32 %v5142_v14  ;;  %v14795_v14 = vld [vmem:[#allocation40_spill] sm:$0xff]  ;;  %v14796_v22 = vld [vmem:[#allocation41_spill] sm:$0xff] }
0x1239   : > { %v8364_v48 = vpop.eup %8363 }
0x123a   : > { %v5153_v13 = vmul.f32 %v8364_v48, %v5152_v21  ;;  %v14797_v21 = vld [vmem:[#allocation42_spill] sm:$0xff]  ;;  %v14798_v48 = vld [vmem:[#allocation43_spill] sm:$0xff] }
0x123c   : > { %v5154_v47 = vadd.f32 %v5153_v13, %v14768_v56  ;;  %v14799_v13 = vld [vmem:[#allocation44_spill] sm:$0xff]  ;;  %v14800_v56 = vld [vmem:[#allocation45_spill] sm:$0xff] }
0x123e   : > { %8365 = vtanh.f32 %v5154_v47  ;;  %v14801_v47 = vld [vmem:[#allocation46_spill] sm:$0xff] }
0x123f   : > { %8367 = vrcp.f32 %v5149_v32  ;;  %v14802_v32 = vld [vmem:[#allocation47_spill] sm:$0xff] }
0x1248   : > { %v8366_v38 = vpop.eup %8365 }
0x1249   : > { %v5156_v43 = vsub.f32 %v12457_v6, %v8366_v38  ;;  %v8368_v31 = vpop.eup %8367  ;;  %v14770_v6 = vld [vmem:[#allocation98_spill] sm:$0xff] }
0x124b   : > { %v5157_v8 = vmul.f32 %v8368_v31, %v5156_v43  ;;  %v14804_v43 = vld [vmem:[#allocation49_spill] sm:$0xff]  ;;  %v14805_v31 = vld [vmem:[#allocation50_spill] sm:$0xff] }
0x124d   : > { %v5158_v2 = vadd.f32 %v8366_v38, %v5157_v8  ;;  %v14803_v38 = vld [vmem:[#allocation48_spill] sm:$0xff]  ;;  %v14806_v8 = vld [vmem:[#allocation51_spill] sm:$0xff] }
0x124f   : > { %v5159_v39 = vpack.c.bf16 %v5158_v2, %v5158_v2  ;;  %5529 = vst [vmem:[#allocation3] sm:$0xff] %v5158_v2  ;;  %v14807_v2 = vld [vmem:[#allocation52_spill] sm:$0xff] }
0x1251   : > { %5193 = vmatmul.mubr.bf16.vlgmr.msra.gmra.mrb[104].mxu0 %v5159_v39  ;;  %7569 = vmatmul.mubr.bf16.vlgmr.msra.gmra.mrb[152].mxu1 %v5159_v39  ;;  %v14808_v39 = vld [vmem:[#allocation53_spill] sm:$0xff] }
0x1252   : > { %5242 = vmatpush1.bf16.msra.mxu0 %v12468_v34  ;;  %7573 = vmatpush3.bf16.msra.mxu1 %v12474_v9  ;;  %v14771_v34 = vld [vmem:[#allocation99_spill] sm:$0xff]  ;;  %v14772_v9 = vld [vmem:[#allocation100_spill] sm:$0xff] }
0x1253   : > { %5243 = vmatprep.subr.bf16.mxu0 %v12480_v53  ;;  %7574 = vmatprep.subr.bf16.mxu1 %v14258_v36  ;;  %v14773_v53 = vld [vmem:[#allocation101_spill] sm:$0xff] }
0x1254   : > { %5273 = vmatprep.mubr.bf16.mxu0 %v14259_v42  ;;  %7588 = vmatprep.mubr.msk.bf16.mxu1 %vm8807_vm2, %v14258_v36 }
0x1256   : > { %5244 = vmatpush1.bf16.msra.mxu0 %v12490_v16  ;;  %7575 = vmatpush3.bf16.msra.mxu1 %v12496_v19  ;;  %v14775_v16 = vld [vmem:[#allocation20_spill] sm:$0xff]  ;;  %v14776_v19 = vld [vmem:[#allocation21_spill] sm:$0xff] }
0x1257   : > { %5245 = vmatprep.subr.bf16.mxu0 %v12502_v26  ;;  %7576 = vmatprep.subr.bf16.mxu1 %v14258_v36  ;;  %v14777_v26 = vld [vmem:[#allocation22_spill] sm:$0xff] }
0x125a   : > { %5246 = vmatpush1.bf16.msra.mxu0 %v14769_v33  ;;  %7577 = vmatpush3.bf16.msra.mxu1 %v14770_v6  ;;  %v14809_v33 = vld [vmem:[#allocation54_spill] sm:$0xff]  ;;  %v14810_v6 = vld [vmem:[#allocation55_spill] sm:$0xff] }
0x125b   : > { %5247 = vmatprep.subr.bf16.mxu0 %v14771_v34  ;;  %7578 = vmatprep.subr.bf16.mxu1 %v14258_v36 }
0x125e   : > { %5248 = vmatpush1.bf16.msra.mxu0 %v14772_v9  ;;  %7579 = vmatpush3.bf16.msra.mxu1 %v14773_v53 }
0x125f   : > { %5249 = vmatprep.subr.bf16.mxu0 %v14774_v1  ;;  %7580 = vmatprep.subr.bf16.mxu1 %v14258_v36 }
0x1262   : > { %5250 = vmatpush1.bf16.msra.mxu0 %v14775_v16  ;;  %7581 = vmatpush3.bf16.msra.mxu1 %v14776_v19 }
0x1263   : > { %5251 = vmatprep.subr.bf16.mxu0 %v14777_v26  ;;  %7582 = vmatprep.subr.bf16.mxu1 %v14258_v36 }
0x1266   : > { %5252 = vmatpush1.bf16.msra.mxu0 %v14778_v7  ;;  %7583 = vmatpush3.bf16.msra.mxu1 %v14779_v49 }
0x1267   : > { %5253 = vmatprep.subr.bf16.mxu0 %v14780_v17  ;;  %7584 = vmatprep.subr.bf16.mxu1 %v14258_v36 }
0x126a   : > { %5254 = vmatpush1.bf16.msra.mxu0 %v14781_v59  ;;  %7585 = vmatpush3.bf16.msra.mxu1 %v14782_v12 }
0x126b   : > { %5255 = vmatprep.subr.bf16.mxu0 %v14783_v5  ;;  %7586 = vmatprep.subr.bf16.mxu1 %v14258_v36 }
0x126e   : > { %5256 = vmatpush1.bf16.msra.mxu0 %v14784_v40  ;;  %7587 = vmatpush3.bf16.msra.mxu1 %v14785_v54 }
0x126f   : > { %5344 = vmatprep.subr.bf16.mxu0 %v14786_v24  ;;  %7592 = vmatprep.subr.bf16.mxu1 %v14258_v36 }
0x1271   : > { %5274 = vmatmul.mubr.bf16.vlgmr.msra.gmra.mrb[104].mxu0 %v12791_v25  ;;  %7589 = vmatmul.mubr.bf16.vlgmr.msra.gmra.mrb[156].mxu1 %v12791_v25  ;;  %v14793_v25 = vld [vmem:[#allocation38_spill] sm:$0xff] }
0x1272   : > { %5345 = vmatpush1.bf16.msra.mxu0 %v14787_v29  ;;  %7593 = vmatpush3.bf16.msra.mxu1 %v14788_v60 }
0x1273   : > { %5346 = vmatprep.subr.bf16.mxu0 %v14789_v15  ;;  %7594 = vmatprep.subr.bf16.mxu1 %v14258_v36 }
0x1274   : > { %5376 = vmatprep.mubr.bf16.mxu0 %v14259_v42  ;;  %7608 = vmatprep.mubr.msk.bf16.mxu1 %vm8807_vm2, %v14258_v36 }
0x1276   : > { %5347 = vmatpush1.bf16.msra.mxu0 %v14790_v61  ;;  %7595 = vmatpush3.bf16.msra.mxu1 %v14791_v3 }
0x1277   : > { %5348 = vmatprep.subr.bf16.mxu0 %v14792_v41  ;;  %7596 = vmatprep.subr.bf16.mxu1 %v14258_v36 }
0x127a   : > { %5349 = vmatpush1.bf16.msra.mxu0 %v14793_v25  ;;  %7597 = vmatpush3.bf16.msra.mxu1 %v14794_v20 }
0x127b   : > { %5350 = vmatprep.subr.bf16.mxu0 %v14795_v14  ;;  %7598 = vmatprep.subr.bf16.mxu1 %v14258_v36 }
0x127e   : > { %5351 = vmatpush1.bf16.msra.mxu0 %v14796_v22  ;;  %7599 = vmatpush3.bf16.msra.mxu1 %v14797_v21 }
0x127f   : > { %5352 = vmatprep.subr.bf16.mxu0 %v14798_v48  ;;  %7600 = vmatprep.subr.bf16.mxu1 %v14258_v36 }
0x1282   : > { %5353 = vmatpush1.bf16.msra.mxu0 %v14799_v13  ;;  %7601 = vmatpush3.bf16.msra.mxu1 %v14800_v56 }
0x1283   : > { %5354 = vmatprep.subr.bf16.mxu0 %v14801_v47  ;;  %7602 = vmatprep.subr.bf16.mxu1 %v14258_v36 }
0x1286   : > { %5355 = vmatpush1.bf16.msra.mxu0 %v14802_v32  ;;  %7603 = vmatpush3.bf16.msra.mxu1 %v14803_v38 }
0x1287   : > { %5356 = vmatprep.subr.bf16.mxu0 %v14804_v43  ;;  %7604 = vmatprep.subr.bf16.mxu1 %v14258_v36 }
0x128a   : > { %5357 = vmatpush1.bf16.msra.mxu0 %v14805_v31  ;;  %7605 = vmatpush3.bf16.msra.mxu1 %v14806_v8 }
0x128b   : > { %5358 = vmatprep.subr.bf16.mxu0 %v14807_v2  ;;  %7606 = vmatprep.subr.bf16.mxu1 %v14258_v36 }
0x128e   : > { %5359 = vmatpush1.bf16.msra.mxu0 %v14808_v39  ;;  %7607 = vmatpush3.bf16.msra.mxu1 %v14809_v33 }
0x128f   : > { %5426 = vmatprep.subr.bf16.mxu0 %v14810_v6  ;;  %7612 = vmatprep.subr.bf16.mxu1 %v14258_v36 }
0x1324   : > { %v5235_v34 = vpop.f32.mrb[152].mxu1 }
0x1325   : > { %v7570_v9 = vpop.f32.mrb[153].mxu1 }
0x1326   : > { %v5238_v53 = vpop.f32.mrb[154].mxu1 }
0x1327   : > { %v7571_v1 = vpop.f32.mrb[155].mxu1 }
0x1344   : > { %v5275_v16 = vpop.f32.mrb[104].mxu0  ;;  %v5316_v19 = vpop.f32.mrb[156].mxu1 }
0x1345   : > { %v7884_v26 = vadd.f32 %v5275_v16, %v9626_v44  ;;  %v5277_v7 = vpop.f32.mrb[105].mxu0  ;;  %v7590_v49 = vpop.f32.mrb[157].mxu1  ;;  %v5336_v61 = vadd.f32 %v12782_v45, %v5316_v19  ;;  %v5236_v44 = vadd.f32 %v5235_v34, %v9639_v28  ;;  %v14812_v28 = vld [vmem:[#allocation57_spill] sm:$0xff]  ;;  %v14813_v45 = vld [vmem:[#allocation58_spill] sm:$0xff] }
0x1346   : > { %v5279_v17 = vpop.f32.mrb[106].mxu0  ;;  %v5319_v59 = vpop.f32.mrb[158].mxu1  ;;  %v7885_v54 = vadd.f32 %v5277_v7, %v14376_v0 }
0x1347   : > { %v6413_v12 = vmul.f32 -1.442695, %v7884_v26  ;;  %v5280_v5 = vpop.f32.mrb[107].mxu0  ;;  %v7591_v40 = vpop.f32.mrb[159].mxu1  ;;  %v1029_v59 = vld [vmem:[#allocation6] sm:$0xff] }
0x1348   : > { %v6414_v24 = vmul.f32 -1.442695, %v7885_v54  ;;  %v14825_v54 = vld [vmem:[#allocation102_spill] sm:$0xff] }
0x1349   : > { %8369 = vpow2.f32 %v6413_v12  ;;  %v14823_v12 = vld [vmem:[#allocation104_spill] sm:$0xff] }
0x134a   : > { %8371 = vpow2.f32 %v6414_v24  ;;  %v2196_v5 = vadd.f32 %v14823_v12, %v1029_v59  ;;  %v5773_v59 = vld [vmem:[%s13935_s15 + $0x18] sm:$0xff] (!%p6417_p6) }
0x1353   : > { %v8370_v29 = vpop.eup %8369 }
0x1354   : > { %v5326_v60 = vadd.f32 1.0, %v8370_v29  ;;  %v8372_v15 = vpop.eup %8371  ;;  %v14826_v29 = vld [vmem:[#allocation103_spill] sm:$0xff] }
0x1355   : > { %v5333_v20 = vadd.f32 1.0, %v8372_v15 }
0x1356   : > { %8373 = vrcp.f32 %v5326_v60 }
0x1360   : > { %v8374_v3 = vpop.eup %8373 }
0x1361   : > { %v5337_v41 = vmul.f32 %v8374_v3, %v5336_v61  ;;  %v14827_v61 = vld [vmem:[#allocation96_spill] sm:$0xff] }
0x1363   : > { %v5338_v25 = vadd.f32 %v5337_v41, %v5236_v44 }
0x1365   : > { %8375 = vtanh.f32 %v5338_v25 }
0x1366   : > { %8377 = vrcp.f32 %v5333_v20 }
0x136f   : > { %v8376_v14 = vpop.eup %8375 }
0x1370   : > { %v5340_v22 = vsub.f32 %v12787_v23, %v8376_v14  ;;  %v8378_v0 = vpop.eup %8377  ;;  %v14814_v23 = vld [vmem:[#allocation59_spill] sm:$0xff] }
0x1372   : > { %v5341_v21 = vmul.f32 %v8378_v0, %v5340_v22  ;;  %v5539_v22 = vld [vmem:[%s13933_s13 + $0x8] sm:$0xff] (!%p6417_p6) }
0x1374   : > { %v5342_v48 = vadd.f32 %v8376_v14, %v5341_v21  ;;  %v5542_v21 = vld [vmem:[%s13933_s13 + $0x20] sm:$0xff] (!%p6417_p6) }
0x1376   : > { %v5343_v13 = vpack.c.bf16 %v5342_v48, %v5342_v48  ;;  %5530 = vst [vmem:[#allocation4] sm:$0xff] %v5342_v48  ;;  %v5547_v48 = vld [vmem:[%s13933_s13 + $0x48] sm:$0xff] (!%p6417_p6) }
0x1378   : > { %5377 = vmatmul.mubr.bf16.vlgmr.msra.gmra.mrb[108].mxu0 %v5343_v13  ;;  %7609 = vmatmul.mubr.bf16.vlgmr.msra.gmra.mrb[160].mxu1 %v5343_v13  ;;  %v5551_v13 = vld [vmem:[%s13933_s13 + $0x68] sm:$0xff] (!%p6417_p6) }
0x1379   : > { %5427 = vmatpush1.bf16.msra.mxu0 %v12798_v55  ;;  %7613 = vmatpush3.bf16.msra.mxu1 %v12804_v35  ;;  %v14815_v55 = vld [vmem:[#allocation60_spill] sm:$0xff]  ;;  %v14816_v35 = vld [vmem:[#allocation61_spill] sm:$0xff] }
0x137a   : > { %5428 = vmatprep.subr.bf16.mxu0 %v12810_v30  ;;  %7614 = vmatprep.subr.bf16.mxu1 %v14258_v36  ;;  %v14817_v30 = vld [vmem:[#allocation62_spill] sm:$0xff] }
0x137b   : > { %5458 = vmatprep.mubr.bf16.mxu0 %v14259_v42  ;;  %7628 = vmatprep.mubr.msk.bf16.mxu1 %vm8807_vm2, %v14258_v36  ;;  %v14811_v42 = vld [vmem:[#allocation56_spill] sm:$0xff] }
0x137d   : > { %5429 = vmatpush1.bf16.msra.mxu0 %v12820_v46  ;;  %7615 = vmatpush3.bf16.msra.mxu1 %v12826_v18  ;;  %v14818_v46 = vld [vmem:[#allocation63_spill] sm:$0xff]  ;;  %v14819_v18 = vld [vmem:[#allocation64_spill] sm:$0xff] }
0x137e   : > { %5430 = vmatprep.subr.bf16.mxu0 %v12832_v11  ;;  %7616 = vmatprep.subr.bf16.mxu1 %v14258_v36  ;;  %v14820_v11 = vld [vmem:[#allocation65_spill] sm:$0xff] }
0x1381   : > { %5431 = vmatpush1.bf16.msra.mxu0 %v12839_v37  ;;  %7617 = vmatpush3.bf16.msra.mxu1 %v12845_v10  ;;  %v14821_v37 = vld [vmem:[#allocation66_spill] sm:$0xff]  ;;  %v14822_v10 = vld [vmem:[#allocation67_spill] sm:$0xff] }
0x1382   : > { %5432 = vmatprep.subr.bf16.mxu0 %v12851_v63  ;;  %7618 = vmatprep.subr.bf16.mxu1 %v14258_v36  ;;  %v5425_v63 = vpack.c.bf16 %v13075_v27, %v13075_v27 }
0x1385   : > { %5433 = vmatpush1.bf16.msra.mxu0 %v12858_v52  ;;  %7619 = vmatpush3.bf16.msra.mxu1 %v12864_v58 }
0x1386   : > { %5434 = vmatprep.subr.bf16.mxu0 %v14811_v42  ;;  %7620 = vmatprep.subr.bf16.mxu1 %v14258_v36  ;;  %v8808_v42 = vmov (!%p6417_p6), 0.0  }
0x1389   : > { %5435 = vmatpush1.bf16.msra.mxu0 %v14812_v28  ;;  %7621 = vmatpush3.bf16.msra.mxu1 %v14813_v45  ;;  %v7636_v45 = vpack.c.bf16 (!%p6417_p6), %v5551_v13, %v5547_v48  ;;  %v5785_v48 = vld [vmem:[%s13935_s15 + $0x78] sm:$0xff] (!%p6417_p6) }
0x138a   : > { %5436 = vmatprep.subr.bf16.mxu0 %v14814_v23  ;;  %7622 = vmatprep.subr.bf16.mxu1 %v14258_v36  ;;  %v5546_v23 = vld [vmem:[%s13933_s13 + $0x40] sm:$0xff] (!%p6417_p6) }
0x138d   : > { %5437 = vmatpush1.bf16.msra.mxu0 %v14815_v55  ;;  %7623 = vmatpush3.bf16.msra.mxu1 %v14816_v35  ;;  %v5550_v55 = vld [vmem:[%s13933_s13 + $0x60] sm:$0xff] (!%p6417_p6)  ;;  %v5555_v35 = vld [vmem:[%s13933_s13 + $0x88] sm:$0xff] (!%p6417_p6) }
0x138e   : > { %5438 = vmatprep.subr.bf16.mxu0 %v14817_v30  ;;  %7624 = vmatprep.subr.bf16.mxu1 %v14258_v36  ;;  %v5559_v30 = vld [vmem:[%s13933_s13 + $0xa8] sm:$0xff] (!%p6417_p6) }
0x1391   : > { %5439 = vmatpush1.bf16.msra.mxu0 %v14818_v46  ;;  %7625 = vmatpush3.bf16.msra.mxu1 %v14819_v18  ;;  %v7638_v46 = vpack.c.bf16 (!%p6417_p6), %v5550_v55, %v5546_v23  ;;  %v7640_v18 = vpack.c.bf16 (!%p6417_p6), %v5559_v30, %v5555_v35  ;;  %v5544_v23 = vld [vmem:[%s13933_s13 + $0x30] sm:$0xff] (!%p6417_p6)  ;;  %v5549_v55 = vld [vmem:[%s13933_s13 + $0x58] sm:$0xff] (!%p6417_p6) }
0x1392   : > { %5440 = vmatprep.subr.bf16.mxu0 %v14820_v11  ;;  %7626 = vmatprep.subr.bf16.mxu1 %v14258_v36  ;;  %v5554_v11 = vld [vmem:[%s13933_s13 + $0x80] sm:$0xff] (!%p6417_p6)  ;;  %v5553_v30 = vld [vmem:[%s13933_s13 + $0x78] sm:$0xff] (!%p6417_p6) }
0x1395   : > { %5441 = vmatpush1.bf16.msra.mxu0 %v14821_v37  ;;  %7627 = vmatpush3.bf16.msra.mxu1 %v14822_v10  ;;  %v5558_v37 = vld [vmem:[%s13933_s13 + $0xa0] sm:$0xff] (!%p6417_p6)  ;;  %v5563_v10 = vld [vmem:[%s13933_s13 + $0xc8] sm:$0xff] (!%p6417_p6) }
0x1398   : > { %5459 = vmatmul.mubr.bf16.vlgmr.msra.gmra.mrb[108].mxu0 %v5425_v63  ;;  %7629 = vmatmul.mubr.bf16.vlgmr.msra.gmra.mrb[164].mxu1 %v5425_v63  ;;  %v5567_v63 = vld [vmem:[%s13933_s13 + $0xe8] sm:$0xff] (!%p6417_p6) }
0x1399   : > { %5688 = vmatprep.mubr.f32.mxu1 (!%p6417_p6), %v8808_v42 }
0x144b   : > { %v5419_v52 = vpop.f32.mrb[160].mxu1 }
0x144c   : > { %v7610_v58 = vpop.f32.mrb[161].mxu1 }
0x144d   : > { %v5422_v56 = vpop.f32.mrb[162].mxu1  ;;  %v7644_v58 = vpack.c.bf16 (!%p6417_p6), %v5567_v63, %v5563_v10  ;;  %v5787_v10 = vld [vmem:[%s13935_s15 + $0x88] sm:$0xff] (!%p6417_p6)  ;;  %v5789_v63 = vld [vmem:[%s13935_s15 + $0x98] sm:$0xff] (!%p6417_p6) }
0x144e   : > { %v7611_v47 = vpop.f32.mrb[163].mxu1  ;;  %v5562_v56 = vld [vmem:[%s13933_s13 + $0xc0] sm:$0xff] (!%p6417_p6) }
0x144f   : > { %v5566_v47 = vld [vmem:[%s13933_s13 + $0xe0] sm:$0xff] (!%p6417_p6) }
0x146b   : > { %v5460_v32 = vpop.f32.mrb[108].mxu0  ;;  %v5501_v38 = vpop.f32.mrb[164].mxu1 }
0x146c   : > { %v7886_v43 = vadd.f32 %v5460_v32, %v9992_v51  ;;  %v5462_v31 = vpop.f32.mrb[109].mxu0  ;;  %v7630_v8 = vpop.f32.mrb[165].mxu1  ;;  %v5521_v19 = vadd.f32 %v13068_v57, %v5501_v38  ;;  %v5420_v51 = vadd.f32 %v5419_v52, %v10005_v4  ;;  %v7642_v52 = vpack.c.bf16 (!%p6417_p6), %v5558_v37, %v5554_v11  ;;  %v5571_v32 = vld [vmem:[%s13933_s13 + $0x108] sm:$0xff] (!%p6417_p6)  ;;  %v5784_v11 = vld [vmem:[%s13935_s15 + $0x70] sm:$0xff] (!%p6417_p6) }
0x146d   : > { %v5464_v36 = vpop.f32.mrb[110].mxu0  ;;  %v5504_v2 = vpop.f32.mrb[166].mxu1  ;;  %v7887_v34 = vadd.f32 %v5462_v31, %v9996_v62  ;;  %v14824_v62 = vld [vmem:[#allocation30_spill] sm:$0xff]  ;;  %v5575_v38 = vld [vmem:[%s13933_s13 + $0x128] sm:$0xff] (!%p6417_p6)  ;;  %v5570_v8 = vld [vmem:[%s13933_s13 + $0x100] sm:$0xff] (!%p6417_p6) }
0x146e   : > { %v6415_v39 = vmul.f32 -1.442695, %v7886_v43  ;;  %v5465_v33 = vpop.f32.mrb[111].mxu0  ;;  %v7631_v6 = vpop.f32.mrb[167].mxu1  ;;  %v2672_v40 = vadd.f32 %v14824_v62, %v2196_v5  ;;  %v7646_v43 = vpack.c.bf16 (!%p6417_p6), %v5566_v47, %v5562_v56  ;;  %v7648_v31 = vpack.c.bf16 (!%p6417_p6), %v5575_v38, %v5571_v32  ;;  %v5574_v36 = vld [vmem:[%s13933_s13 + $0x120] sm:$0xff] (!%p6417_p6)  ;;  %v5579_v2 = vld [vmem:[%s13933_s13 + $0x148] sm:$0xff] (!%p6417_p6) }
0x146f   : > { %v6416_v9 = vmul.f32 -1.442695, %v7887_v34  ;;  %v7650_v33 = vpack.c.bf16 (!%p6417_p6), %v5574_v36, %v5570_v8  ;;  %v5578_v34 = vld [vmem:[%s13933_s13 + $0x140] sm:$0xff] (!%p6417_p6)  ;;  %v5772_v62 = vld [vmem:[%s13935_s15 + $0x10] sm:$0xff] (!%p6417_p6)  ;;  %v5557_v47 = vld [vmem:[%s13933_s13 + $0x98] sm:$0xff] (!%p6417_p6) }
0x1470   : > { %8379 = vpow2.f32 %v6415_v39  ;;  %v3148_v24 = vadd.f32 %v14825_v54, %v2672_v40  ;;  %v5583_v39 = vld [vmem:[%s13933_s13 + $0x168] sm:$0xff] (!%p6417_p6)  ;;  %v5770_v5 = vld [vmem:[%s13935_s15] sm:$0xff] (!%p6417_p6)  ;;  %v5548_v56 = vld [vmem:[%s13933_s13 + $0x50] sm:$0xff] (!%p6417_p6) }
0x1471   : > { %8381 = vpow2.f32 %v6416_v9  ;;  %v7652_v6 = vpack.c.bf16 (!%p6417_p6), %v5583_v39, %v5579_v2  ;;  %v5582_v9 = vld [vmem:[%s13933_s13 + $0x160] sm:$0xff] (!%p6417_p6)  ;;  %v5775_v40 = vld [vmem:[%s13935_s15 + $0x28] sm:$0xff] (!%p6417_p6)  ;;  %v7698_v54 = vpack.c.bf16 (!%p6417_p6), %v5772_v62, %v5770_v5  ;;  %v5561_v38 = vld [vmem:[%s13933_s13 + $0xb8] sm:$0xff] (!%p6417_p6) }
0x1472   : > { %v3624_v60 = vadd.f32 %v14826_v29, %v3148_v24  ;;  %v5777_v24 = vld [vmem:[%s13935_s15 + $0x38] sm:$0xff] (!%p6417_p6)  ;;  %v5774_v29 = vld [vmem:[%s13935_s15 + $0x20] sm:$0xff] (!%p6417_p6)  ;;  %v5788_v8 = vld [vmem:[%s13935_s15 + $0x90] sm:$0xff] (!%p6417_p6) }
0x1473   : > { %v5791_v36 = vld [vmem:[%s13935_s15 + $0xa8] sm:$0xff] (!%p6417_p6)  ;;  %v5793_v2 = vld [vmem:[%s13935_s15 + $0xb8] sm:$0xff] (!%p6417_p6) }
0x1474   : > { %v4100_v57 = vadd.f32 %v14827_v61, %v3624_v60  ;;  %v5776_v60 = vld [vmem:[%s13935_s15 + $0x30] sm:$0xff] (!%p6417_p6)  ;;  %v7700_v61 = vpack.c.bf16 (!%p6417_p6), %v5777_v24, %v5775_v40  ;;  %v5577_v62 = vld [vmem:[%s13933_s13 + $0x138] sm:$0xff] (!%p6417_p6) }
0x1475   : > { %v5796_v24 = vld [vmem:[%s13935_s15 + $0xd0] sm:$0xff] (!%p6417_p6) }
0x1476   : > { %v4576_v44 = vadd.f32 %v12447_v50, %v4100_v57  ;;  %v5543_v50 = vld [vmem:[%s13933_s13 + $0x28] sm:$0xff] (!%p6417_p6) }
0x1477   : > { %v7632_v0 = vpack.c.bf16 (!%p6417_p6), %v5543_v50, %v5539_v22  ;;  %v5779_v57 = vld [vmem:[%s13935_s15 + $0x48] sm:$0xff] (!%p6417_p6)  ;;  %v5545_v22 = vld [vmem:[%s13933_s13 + $0x38] sm:$0xff] (!%p6417_p6) }
0x1478   : > { %v5052_v25 = vadd.f32 %v13075_v27, %v4576_v44  ;;  %v5594_v44 = vld [vmem:[%s13933_s13 + $0x1c0] sm:$0xff] (!%p6417_p6) }
0x1479   : > { %7633 = vmatprep.subr.bf16.mxu1 (!%p6417_p6), %v7632_v0  ;;  %v5780_v0 = vld [vmem:[%s13935_s15 + $0x50] sm:$0xff] (!%p6417_p6) }
0x147a   : > { %v8380_v53 = vpop.eup %8379 }
0x147b   : > { %v5511_v1 = vadd.f32 1.0, %v8380_v53  ;;  %v8382_v16 = vpop.eup %8381  ;;  %v5587_v53 = vld [vmem:[%s13933_s13 + $0x188] sm:$0xff] (!%p6417_p6) }
0x147c   : > { %v5518_v17 = vadd.f32 1.0, %v8382_v16  ;;  %v7654_v16 = vpack.c.bf16 (!%p6417_p6), %v5582_v9, %v5578_v34  ;;  %v5560_v34 = vld [vmem:[%s13933_s13 + $0xb0] sm:$0xff] (!%p6417_p6)  ;;  %v5565_v9 = vld [vmem:[%s13933_s13 + $0xd8] sm:$0xff] (!%p6417_p6) }
0x147d   : > { %8383 = vrcp.f32 %v5511_v1  ;;  %v5591_v1 = vld [vmem:[%s13933_s13 + $0x1a8] sm:$0xff] (!%p6417_p6) }
0x1487   : > { %v8384_v26 = vpop.eup %8383 }
0x1488   : > { %v5522_v7 = vmul.f32 %v8384_v26, %v5521_v19  ;;  %v5586_v19 = vld [vmem:[%s13933_s13 + $0x180] sm:$0xff] (!%p6417_p6) }
0x1489   : > { %v5590_v26 = vld [vmem:[%s13933_s13 + $0x1a0] sm:$0xff] (!%p6417_p6) }
0x148a   : > { %v5523_v49 = vadd.f32 %v5522_v7, %v5420_v51  ;;  %v5595_v51 = vld [vmem:[%s13933_s13 + $0x1c8] sm:$0xff] (!%p6417_p6)  ;;  %v7656_v7 = vpack.c.bf16 (!%p6417_p6), %v5591_v1, %v5587_v53  ;;  %v7716_v1 = vpack.c.bf16 (!%p6417_p6), %v5793_v2, %v5791_v36  ;;  %v5596_v2 = vld [vmem:[%s13933_s13 + $0x1d0] sm:$0xff] (!%p6417_p6) }
0x148c   : > { %8385 = vtanh.f32 %v5523_v49  ;;  %v5599_v49 = vld [vmem:[%s13933_s13 + $0x1e8] sm:$0xff] (!%p6417_p6) }
0x148d   : > { %8387 = vrcp.f32 %v5518_v17  ;;  %v5771_v17 = vld [vmem:[%s13935_s15 + $0x8] sm:$0xff] (!%p6417_p6) }
0x148e   : > { %v7696_v12 = vpack.c.bf16 (!%p6417_p6), %v5773_v59, %v5771_v17  ;;  %v5564_v17 = vld [vmem:[%s13933_s13 + $0xd0] sm:$0xff] (!%p6417_p6) }
0x148f   : > { %v5568_v59 = vld [vmem:[%s13933_s13 + $0xf0] sm:$0xff] (!%p6417_p6) }
0x1490   : > { %7697 = vmatprep.subr.bf16.mxu0 (!%p6417_p6), %v7696_v12  ;;  %v5573_v12 = vld [vmem:[%s13933_s13 + $0x118] sm:$0xff] (!%p6417_p6) }
0x1491   : > { %7699 = vmatpush1.bf16.msra.mxu0 (!%p6417_p6), %v7698_v54  ;;  %v5794_v54 = vld [vmem:[%s13935_s15 + $0xc0] sm:$0xff] (!%p6417_p6) }
0x1492   : > { %7701 = vmatprep.subr.bf16.mxu0 (!%p6417_p6), %v7700_v61  ;;  %v7680_v61 = vpack.c.bf16 (!%p6417_p6), %v5577_v62, %v5573_v12  ;;  %v5818_v12 = vld [vmem:[%s13935_s15 + $0x180] sm:$0xff] (!%p6417_p6)  ;;  %v5823_v62 = vld [vmem:[%s13935_s15 + $0x1a8] sm:$0xff] (!%p6417_p6) }
0x1496   : > { %v8386_v15 = vpop.eup %8385 }
0x1497   : > { %v5525_v3 = vsub.f32 %v13075_v27, %v8386_v15  ;;  %v8388_v4 = vpop.eup %8387  ;;  %v5538_v27 = vld [vmem:[%s13933_s13] sm:$0xff] (!%p6417_p6) }
0x1498   : > { %v7634_v28 = vpack.c.bf16 (!%p6417_p6), %v5542_v21, %v5538_v27  ;;  %v5778_v27 = vld [vmem:[%s13935_s15 + $0x40] sm:$0xff] (!%p6417_p6)  ;;  %v5783_v21 = vld [vmem:[%s13935_s15 + $0x68] sm:$0xff] (!%p6417_p6) }
0x1499   : > { %v5526_v41 = vmul.f32 %v8388_v4, %v5525_v3  ;;  %5536 = sbr.rel (%p6417_p6) target bundleno = 6023 (0x1787), region = 104  ;;  %v5781_v3 = vld [vmem:[%s13935_s15 + $0x58] sm:$0xff] (!%p6417_p6)  ;;  %v7660_v4 = vpack.c.bf16 (!%p6417_p6), %v5599_v49, %v5595_v51  ;;  %v7706_v35 = vpack.c.bf16 (!%p6417_p6), %v5780_v0, %v5778_v27 }
0x149a   : > { %7635 = vmatpush1.bf16.msra.mxu1 (!%p6417_p6), %v7634_v28  ;;  %v7704_v50 = vpack.c.bf16 (!%p6417_p6), %v5781_v3, %v5779_v57  ;;  %v5797_v51 = vld [vmem:[%s13935_s15 + $0xd8] sm:$0xff] (!%p6417_p6)  ;;  %v5572_v57 = vld [vmem:[%s13933_s13 + $0x110] sm:$0xff] (!%p6417_p6) }
0x149b   : > { %v5527_v20 = vadd.f32 %v8386_v15, %v5526_v41  ;;  %7637 = vmatprep.subr.bf16.mxu1 (!%p6417_p6), %v7636_v45  ;;  %v7658_v15 = vpack.c.bf16 (!%p6417_p6), %v5590_v26, %v5586_v19  ;;  %v5598_v41 = vld [vmem:[%s13933_s13 + $0x1e0] sm:$0xff] (!%p6417_p6)  ;;  %v5540_v45 = vld [vmem:[%s13933_s13 + $0x10] sm:$0xff] (!%p6417_p6)  ;;  %v5795_v26 = vld [vmem:[%s13935_s15 + $0xc8] sm:$0xff] (!%p6417_p6) }
0x149c   : > { %v7662_v13 = vpack.c.bf16 (!%p6417_p6), %v5598_v41, %v5594_v44  ;;  %v5792_v19 = vld [vmem:[%s13935_s15 + $0xb0] sm:$0xff] (!%p6417_p6)  ;;  %v7720_v40 = vpack.c.bf16 (!%p6417_p6), %v5797_v51, %v5795_v26  ;;  %v7722_v44 = vpack.c.bf16 (!%p6417_p6), %v5796_v24, %v5794_v54  ;;  %v5585_v41 = vld [vmem:[%s13933_s13 + $0x178] sm:$0xff] (!%p6417_p6)  ;;  %v5814_v26 = vld [vmem:[%s13935_s15 + $0x160] sm:$0xff] (!%p6417_p6) }
0x149d   : > { %v13204_v14 = vadd.f32 %v5527_v20, %v5052_v25  ;;  %5531 = vst [vmem:[#allocation5] sm:$0xff] %v5527_v20  ;;  %v5541_v25 = vld [vmem:[%s13933_s13 + $0x18] sm:$0xff] (!%p6417_p6)  ;;  %v7702_v20 = vpack.c.bf16 (!%p6417_p6), %v5776_v60, %v5774_v29  ;;  %v5799_v29 = vld [vmem:[%s13935_s15 + $0xe8] sm:$0xff] (!%p6417_p6)  ;;  %v5576_v3 = vld [vmem:[%s13933_s13 + $0x130] sm:$0xff] (!%p6417_p6) }
0x149e   : > { %7639 = vmatpush1.bf16.msra.mxu1 (!%p6417_p6), %v7638_v46  ;;  %v7664_v28 = vpack.c.bf16 (!%p6417_p6), %v5545_v22, %v5541_v25  ;;  %v7708_v46 = vpack.c.bf16 (!%p6417_p6), %v5785_v48, %v5783_v21  ;;  %v5801_v60 = vld [vmem:[%s13935_s15 + $0xf8] sm:$0xff] (!%p6417_p6)  ;;  %v5800_v22 = vld [vmem:[%s13935_s15 + $0xf0] sm:$0xff] (!%p6417_p6)  ;;  %v7682_v0 = vpack.c.bf16 (!%p6417_p6), %v5576_v3, %v5572_v57  ;;  %v5826_v3 = vld [vmem:[%s13935_s15 + $0x1c0] sm:$0xff] (!%p6417_p6) }
0x149f   : > { %5532 = vst [vmem:[#allocation6] sm:$0xff] %v13204_v14  ;;  %7641 = vmatprep.subr.bf16.mxu1 (!%p6417_p6), %v7640_v18  ;;  %7703 = vmatpush1.bf16.msra.mxu0 (!%p6417_p6), %v7702_v20  ;;  %v5782_v18 = vld [vmem:[%s13935_s15 + $0x60] sm:$0xff] (!%p6417_p6)  ;;  %v13372_v37 = vmul.f32 (!%p6417_p6), 0.0625, %v13204_v14  ;;  %v5552_v14 = vld [vmem:[%s13933_s13 + $0x70] sm:$0xff] (!%p6417_p6)  ;;  %v7724_v25 = vpack.c.bf16 (!%p6417_p6), %v5801_v60, %v5799_v29  ;;  %v5805_v27 = vld [vmem:[%s13935_s15 + $0x118] sm:$0xff] (!%p6417_p6) }
0x14a0   : > { %7705 = vmatprep.subr.bf16.mxu0 %v7704_v50  ;;  %v7710_v32 = vpack.c.bf16 %v5784_v11, %v5782_v18  ;;  %v7670_v39 = vpack.c.bf16 %v5552_v14, %v5548_v56  ;;  %v5798_v20 = vld [vmem:[%s13935_s15 + $0xe0] sm:$0xff]  ;;  %v5803_v50 = vld [vmem:[%s13935_s15 + $0x108] sm:$0xff]  ;;  %v5580_v48 = vld [vmem:[%s13933_s13 + $0x150] sm:$0xff] }
0x14a1   : > { %v5809_v18 = vld [vmem:[%s13935_s15 + $0x138] sm:$0xff]  ;;  %v5816_v51 = vld [vmem:[%s13935_s15 + $0x170] sm:$0xff]  ;;  %v5822_v29 = vld [vmem:[%s13935_s15 + $0x1a0] sm:$0xff] }
0x14a2   : > { %7643 = vmatpush1.bf16.msra.mxu1 %v7642_v52  ;;  %v7666_v52 = vpack.c.bf16 %v5544_v23, %v5540_v45  ;;  %v7726_v45 = vpack.c.bf16 %v5800_v22, %v5798_v20  ;;  %v5593_v23 = vld [vmem:[%s13933_s13 + $0x1b8] sm:$0xff]  ;;  %v5827_v60 = vld [vmem:[%s13935_s15 + $0x1c8] sm:$0xff]  ;;  %v5830_v22 = vld [vmem:[%s13935_s15 + $0x1e0] sm:$0xff] }
0x14a3   : > { %7645 = vmatprep.subr.bf16.mxu1 %v7644_v58  ;;  %v7668_v58 = vpack.c.bf16 %v5553_v30, %v5549_v55  ;;  %7707 = vmatpush1.bf16.msra.mxu0 %v7706_v35  ;;  %v7728_v55 = vpack.c.bf16 %v5805_v27, %v5803_v50  ;;  %v5802_v35 = vld [vmem:[%s13935_s15 + $0x100] sm:$0xff]  ;;  %v5804_v30 = vld [vmem:[%s13935_s15 + $0x110] sm:$0xff]  ;;  %v5601_v14 = vld [vmem:[%s13933_s13 + $0x1f8] sm:$0xff] }
0x14a4   : > { %7709 = vmatprep.subr.bf16.mxu0 %v7708_v46  ;;  %v5807_v46 = vld [vmem:[%s13935_s15 + $0x128] sm:$0xff]  ;;  %v7730_v56 = vpack.c.bf16 %v5804_v30, %v5802_v35  ;;  %v5832_v50 = vld [vmem:[%s13935_s15 + $0x1f0] sm:$0xff]  ;;  %v6073_v30 = vld [vmem:[%s13937_s17 + $0x98] sm:$0xff] }
0x14a5   : > { %v7758_v27 = vpack.c.bf16 %v5832_v50, %v5830_v22  ;;  %v6072_v35 = vld [vmem:[%s13937_s17 + $0x90] sm:$0xff]  ;;  %v5843_v22 = vld [vmem:[%s13935_s15 + $0x248] sm:$0xff]  ;;  %v5845_v50 = vld [vmem:[%s13935_s15 + $0x258] sm:$0xff] }
0x14a6   : > { %7647 = vmatpush1.bf16.msra.mxu1 %v7646_v43  ;;  %v7712_v43 = vpack.c.bf16 %v5789_v63, %v5787_v10  ;;  %v5588_v63 = vld [vmem:[%s13933_s13 + $0x190] sm:$0xff] }
0x14a7   : > { %7649 = vmatprep.subr.bf16.mxu1 %v7648_v31  ;;  %v5786_v31 = vld [vmem:[%s13935_s15 + $0x80] sm:$0xff]  ;;  %7711 = vmatpush1.bf16.msra.mxu0 %v7710_v32 }
0x14a8   : > { %v7714_v53 = vpack.c.bf16 %v5788_v8, %v5786_v31  ;;  %7713 = vmatprep.subr.bf16.mxu0 %v7712_v43  ;;  %v5806_v32 = vld [vmem:[%s13935_s15 + $0x120] sm:$0xff]  ;;  %v5811_v43 = vld [vmem:[%s13935_s15 + $0x148] sm:$0xff]  ;;  %v5813_v31 = vld [vmem:[%s13935_s15 + $0x158] sm:$0xff] }
0x14aa   : > { %7651 = vmatpush1.bf16.msra.mxu1 %v7650_v33  ;;  %v7672_v33 = vpack.c.bf16 %v5561_v38, %v5557_v47  ;;  %v7732_v47 = vpack.c.bf16 %v5809_v18, %v5807_v46  ;;  %v5808_v38 = vld [vmem:[%s13935_s15 + $0x130] sm:$0xff]  ;;  %v7828_v18 = vpack.c.bf16 %v6073_v30, %v6072_v35  ;;  %v5851_v30 = vld [vmem:[%s13935_s15 + $0x288] sm:$0xff] }
0x14ab   : > { %7653 = vmatprep.subr.bf16.mxu1 %v7652_v6  ;;  %v5556_v6 = vld [vmem:[%s13933_s13 + $0x90] sm:$0xff]  ;;  %7715 = vmatpush1.bf16.msra.mxu0 %v7714_v53  ;;  %v5815_v53 = vld [vmem:[%s13935_s15 + $0x168] sm:$0xff] }
0x14ac   : > { %7717 = vmatprep.subr.bf16.mxu0 %v7716_v1  ;;  %v5848_v35 = vld [vmem:[%s13935_s15 + $0x270] sm:$0xff] }
0x14ae   : > { %7655 = vmatpush1.bf16.msra.mxu1 %v7654_v16  ;;  %v5790_v16 = vld [vmem:[%s13935_s15 + $0xa0] sm:$0xff] }
0x14af   : > { %7657 = vmatprep.subr.bf16.mxu1 %v7656_v7  ;;  %v7674_v7 = vpack.c.bf16 %v5560_v34, %v5556_v6  ;;  %v7718_v5 = vpack.c.bf16 %v5792_v19, %v5790_v16  ;;  %v7736_v6 = vpack.c.bf16 %v5813_v31, %v5811_v43  ;;  %v5810_v34 = vld [vmem:[%s13935_s15 + $0x140] sm:$0xff] }
0x14b1   : > { %7719 = vmatpush1.bf16.msra.mxu0 %v7718_v5  ;;  %v5820_v5 = vld [vmem:[%s13935_s15 + $0x190] sm:$0xff] }
0x14b2   : > { %7659 = vmatpush1.bf16.msra.mxu1 %v7658_v15  ;;  %v7678_v15 = vpack.c.bf16 %v5568_v59, %v5564_v17  ;;  %7721 = vmatprep.subr.bf16.mxu0 %v7720_v40  ;;  %v7742_v17 = vpack.c.bf16 %v5816_v51, %v5814_v26  ;;  %v5825_v40 = vld [vmem:[%s13935_s15 + $0x1b8] sm:$0xff]  ;;  %v7746_v54 = vpack.c.bf16 %v5820_v5, %v5818_v12  ;;  %v6082_v51 = vld [vmem:[%s13937_s17 + $0xe0] sm:$0xff]  ;;  %v14828_v12 = vld [vmem:[#allocation9_spill] sm:$0xff] }
0x14b3   : > { %7661 = vmatprep.subr.bf16.mxu1 %v7660_v4  ;;  %v5581_v4 = vld [vmem:[%s13933_s13 + $0x158] sm:$0xff]  ;;  %v7748_v24 = vpack.c.bf16 %v5825_v40, %v5823_v62 }
0x14b4   : > { %v7684_v21 = vpack.c.bf16 %v5585_v41, %v5581_v4  ;;  %v5828_v4 = vld [vmem:[%s13935_s15 + $0x1d0] sm:$0xff]  ;;  %v5831_v41 = vld [vmem:[%s13935_s15 + $0x1e8] sm:$0xff]  ;;  %v6065_v26 = vld [vmem:[%s13937_s17 + $0x58] sm:$0xff] }
0x14b5   : > { %7723 = vmatpush1.bf16.msra.mxu0 %v7722_v44  ;;  %v7754_v44 = vpack.c.bf16 %v5828_v4, %v5826_v3  ;;  %v14829_v62 = vld [vmem:[#allocation10_spill] sm:$0xff] }
0x14b6   : > { %7663 = vmatpush1.bf16.msra.mxu1 %v7662_v13  ;;  %v5584_v13 = vld [vmem:[%s13933_s13 + $0x170] sm:$0xff]  ;;  %7725 = vmatprep.subr.bf16.mxu0 %v7724_v25  ;;  %v5833_v25 = vld [vmem:[%s13935_s15 + $0x1f8] sm:$0xff] }
0x14b7   : > { %7665 = vmatprep.subr.bf16.mxu1 %v7664_v28  ;;  %v5589_v28 = vld [vmem:[%s13933_s13 + $0x198] sm:$0xff]  ;;  %v7686_v11 = vpack.c.bf16 %v5584_v13, %v5580_v48  ;;  %v7756_v20 = vpack.c.bf16 %v5833_v25, %v5831_v41  ;;  %v6070_v13 = vld [vmem:[%s13937_s17 + $0x80] sm:$0xff] }
0x14b8   : > { %v7688_v10 = vpack.c.bf16 %v5593_v23, %v5589_v28  ;;  %v6071_v28 = vld [vmem:[%s13937_s17 + $0x88] sm:$0xff]  ;;  %v5838_v25 = vld [vmem:[%s13935_s15 + $0x220] sm:$0xff] }
0x14b9   : > { %5689 = vmatmul.mubr.f32.vlgmr.msra.gmra.mrb[0].mxu1 %v13372_v37  ;;  %7727 = vmatpush1.bf16.msra.mxu0 %v7726_v45  ;;  %v6054_v45 = vld [vmem:[%s13937_s17] sm:$0xff]  ;;  %v7824_v23 = vpack.c.bf16 %v6071_v28, %v6070_v13  ;;  %v5847_v13 = vld [vmem:[%s13935_s15 + $0x268] sm:$0xff]  ;;  %v5849_v28 = vld [vmem:[%s13935_s15 + $0x278] sm:$0xff] }
0x14ba   : > { %7667 = vmatpush1.bf16.msra.mxu1 %v7666_v52  ;;  %5759 = vmatprep.mubr.f32.mxu1 %v8808_v42  ;;  %v5569_v42 = vld [vmem:[%s13933_s13 + $0xf8] sm:$0xff]  ;;  %v5592_v52 = vld [vmem:[%s13933_s13 + $0x1b0] sm:$0xff] }
0x14bb   : > { %7669 = vmatprep.subr.bf16.mxu1 %v7668_v58  ;;  %v7676_v49 = vpack.c.bf16 %v5569_v42, %v5565_v9  ;;  %v5597_v58 = vld [vmem:[%s13933_s13 + $0x1d8] sm:$0xff]  ;;  %7729 = vmatprep.subr.bf16.mxu0 %v7728_v55  ;;  %v7690_v8 = vpack.c.bf16 %v5592_v52, %v5588_v63  ;;  %v5812_v9 = vld [vmem:[%s13935_s15 + $0x150] sm:$0xff]  ;;  %v6055_v55 = vld [vmem:[%s13937_s17 + $0x8] sm:$0xff] }
0x14bc   : > { %v7692_v36 = vpack.c.bf16 %v5601_v14, %v5597_v58  ;;  %v5817_v42 = vld [vmem:[%s13935_s15 + $0x178] sm:$0xff]  ;;  %v7738_v16 = vpack.c.bf16 %v5812_v9, %v5810_v34  ;;  %v7826_v46 = vpack.c.bf16 %v6055_v55, %v6054_v45  ;;  %v6074_v63 = vld [vmem:[%s13937_s17 + $0xa0] sm:$0xff]  ;;  %v6075_v52 = vld [vmem:[%s13937_s17 + $0xa8] sm:$0xff] }
0x14bd   : > { %7731 = vmatpush1.bf16.msra.mxu0 %v7730_v56  ;;  %v7740_v19 = vpack.c.bf16 %v5817_v42, %v5815_v53  ;;  %v7832_v56 = vpack.c.bf16 %v6075_v52, %v6074_v63  ;;  %v6058_v14 = vld [vmem:[%s13937_s17 + $0x20] sm:$0xff]  ;;  %v6063_v9 = vld [vmem:[%s13937_s17 + $0x48] sm:$0xff]  ;;  %v6080_v53 = vld [vmem:[%s13937_s17 + $0xd0] sm:$0xff] }
0x14be   : > { %7671 = vmatpush1.bf16.msra.mxu1 %v7670_v39  ;;  %v5600_v39 = vld [vmem:[%s13933_s13 + $0x1f0] sm:$0xff]  ;;  %7733 = vmatprep.subr.bf16.mxu0 %v7732_v47  ;;  %v6059_v47 = vld [vmem:[%s13937_s17 + $0x28] sm:$0xff]  ;;  %v6062_v34 = vld [vmem:[%s13937_s17 + $0x40] sm:$0xff] }
0x14bf   : > { %7673 = vmatprep.subr.bf16.mxu1 %v7672_v33  ;;  %v7734_v33 = vpack.c.bf16 %v5808_v38, %v5806_v32  ;;  %v7694_v1 = vpack.c.bf16 %v5600_v39, %v5596_v2  ;;  %v6076_v32 = vld [vmem:[%s13937_s17 + $0xb0] sm:$0xff]  ;;  %v6077_v38 = vld [vmem:[%s13937_s17 + $0xb8] sm:$0xff]  ;;  %v7834_v43 = vpack.c.bf16 %v6059_v47, %v6058_v14  ;;  %v6078_v2 = vld [vmem:[%s13937_s17 + $0xc0] sm:$0xff] }
0x14c0   : > { %v7836_v31 = vpack.c.bf16 %v6077_v38, %v6076_v32  ;;  %v6079_v39 = vld [vmem:[%s13937_s17 + $0xc8] sm:$0xff]  ;;  %v6081_v42 = vld [vmem:[%s13937_s17 + $0xd8] sm:$0xff]  ;;  %v5846_v55 = vld [vmem:[%s13935_s15 + $0x260] sm:$0xff] }
0x14c1   : > { %7735 = vmatpush1.bf16.msra.mxu0 %v7734_v33  ;;  %v5852_v63 = vld [vmem:[%s13935_s15 + $0x290] sm:$0xff]  ;;  %v5855_v52 = vld [vmem:[%s13935_s15 + $0x2a8] sm:$0xff]  ;;  %v5854_v47 = vld [vmem:[%s13935_s15 + $0x2a0] sm:$0xff] }
0x14c2   : > { %7675 = vmatpush1.bf16.msra.mxu1 %v7674_v7  ;;  %7737 = vmatprep.subr.bf16.mxu0 %v7736_v6  ;;  %v5819_v7 = vld [vmem:[%s13935_s15 + $0x188] sm:$0xff]  ;;  %v7840_v6 = vpack.c.bf16 %v6079_v39, %v6078_v2  ;;  %v5856_v32 = vld [vmem:[%s13935_s15 + $0x2b0] sm:$0xff] }
0x14c3   : > { %7677 = vmatprep.subr.bf16.mxu1 %v7676_v49  ;;  %v5821_v49 = vld [vmem:[%s13935_s15 + $0x198] sm:$0xff]  ;;  %v5859_v38 = vld [vmem:[%s13935_s15 + $0x2c8] sm:$0xff]  ;;  %v5860_v2 = vld [vmem:[%s13935_s15 + $0x2d0] sm:$0xff] }
0x14c4   : > { %v7744_v59 = vpack.c.bf16 %v5821_v49, %v5819_v7  ;;  %v6083_v7 = vld [vmem:[%s13937_s17 + $0xe8] sm:$0xff] }
0x14c5   : > { %7739 = vmatpush1.bf16.msra.mxu0 %v7738_v16  ;;  %v7844_v16 = vpack.c.bf16 %v6081_v42, %v6080_v53  ;;  %v5863_v39 = vld [vmem:[%s13935_s15 + $0x2e8] sm:$0xff]  ;;  %v5862_v42 = vld [vmem:[%s13935_s15 + $0x2e0] sm:$0xff] }
0x14c6   : > { %7679 = vmatpush1.bf16.msra.mxu1 %v7678_v15  ;;  %7741 = vmatprep.subr.bf16.mxu0 %v7740_v19  ;;  %v5829_v15 = vld [vmem:[%s13935_s15 + $0x1d8] sm:$0xff]  ;;  %v6064_v19 = vld [vmem:[%s13937_s17 + $0x50] sm:$0xff] }
0x14c7   : > { %7681 = vmatprep.subr.bf16.mxu1 %v7680_v61  ;;  %v7752_v57 = vpack.c.bf16 %v5829_v15, %v5827_v60  ;;  %v7846_v49 = vpack.c.bf16 %v6065_v26, %v6064_v19  ;;  %v5836_v60 = vld [vmem:[%s13935_s15 + $0x210] sm:$0xff]  ;;  %v5869_v19 = vld [vmem:[%s13935_s15 + $0x318] sm:$0xff] }
0x14c9   : > { %7743 = vmatpush1.bf16.msra.mxu0 %v7742_v17  ;;  %v7848_v17 = vpack.c.bf16 %v6083_v7, %v6082_v51 }
0x14ca   : > { %7683 = vmatpush1.bf16.msra.mxu1 %v7682_v0  ;;  %7745 = vmatprep.subr.bf16.mxu0 %v7744_v59  ;;  %v5835_v0 = vld [vmem:[%s13935_s15 + $0x208] sm:$0xff]  ;;  %v13686_v59 = vld [vmem:[%s13934_s14] sm:$0xf] }
0x14cb   : > { %7685 = vmatprep.subr.bf16.mxu1 %v7684_v21  ;;  %v5837_v21 = vld [vmem:[%s13935_s15 + $0x218] sm:$0xff]  ;;  %v5607_v5 = vrot.slane %v13686_v59, %v14828_v12  ;;  %v5611_v40 = vrot.slane %v13686_v59, %v14829_v62 }
0x14cc   : > { %v7760_v48 = vpack.c.bf16 %v5837_v21, %v5835_v0  ;;  %v7768_v0 = vpack.c.bf16 %v5845_v50, %v5843_v22  ;;  %v5842_v21 = vld [vmem:[%s13935_s15 + $0x240] sm:$0xff]  ;;  %v5879_v22 = vld [vmem:[%s13935_s15 + $0x368] sm:$0xff]  ;;  %v5881_v50 = vld [vmem:[%s13935_s15 + $0x378] sm:$0xff] }
0x14cd   : > { %7747 = vmatpush1.bf16.msra.mxu0 %v7746_v54 }
0x14ce   : > { %7687 = vmatpush1.bf16.msra.mxu1 %v7686_v11  ;;  %7749 = vmatprep.subr.bf16.mxu0 %v7748_v24  ;;  %v6056_v11 = vld [vmem:[%s13937_s17 + $0x10] sm:$0xff] }
0x14cf   : > { %7689 = vmatprep.subr.bf16.mxu1 %v7688_v10  ;;  %v6057_v10 = vld [vmem:[%s13937_s17 + $0x18] sm:$0xff] }
0x14d0   : > { %v7830_v58 = vpack.c.bf16 %v6057_v10, %v6056_v11  ;;  %v5850_v10 = vld [vmem:[%s13935_s15 + $0x280] sm:$0xff] }
0x14d2   : > { %7691 = vmatpush1.bf16.msra.mxu1 %v7690_v8  ;;  %v6060_v8 = vld [vmem:[%s13937_s17 + $0x30] sm:$0xff] }
0x14d3   : > { %7693 = vmatprep.subr.bf16.mxu1 %v7692_v36  ;;  %v6061_v36 = vld [vmem:[%s13937_s17 + $0x38] sm:$0xff] }
0x14d4   : > { %v7838_v33 = vpack.c.bf16 %v6061_v36, %v6060_v8  ;;  %v5858_v36 = vld [vmem:[%s13935_s15 + $0x2c0] sm:$0xff] }
0x14d6   : > { %7695 = vmatpush1.bf16.msra.mxu1 %v7694_v1  ;;  %v7842_v1 = vpack.c.bf16 %v6063_v9, %v6062_v34  ;;  %v7786_v9 = vpack.c.bf16 %v5860_v2, %v5858_v36 }
0x14d7   : > { %7825 = vmatprep.subr.bf16.mxu1 %v7824_v23  ;;  %v7772_v23 = vpack.c.bf16 %v5849_v28, %v5847_v13  ;;  %v5883_v13 = vld [vmem:[%s13935_s15 + $0x388] sm:$0xff]  ;;  %v5885_v28 = vld [vmem:[%s13935_s15 + $0x398] sm:$0xff] }
0x14d9   : > { %5760 = vmatmul.mubr.f32.vlgmr.msra.gmra.mrb[2].mxu1 %v13372_v37  ;;  %v5824_v37 = vld [vmem:[%s13935_s15 + $0x1b0] sm:$0xff] }
0x14da   : > { %v7750_v61 = vpack.c.bf16 %v5824_v37, %v5822_v29  ;;  %7827 = vmatpush3.bf16.msra.mxu1 %v7826_v46  ;;  %v5834_v37 = vld [vmem:[%s13935_s15 + $0x200] sm:$0xff]  ;;  %v5853_v46 = vld [vmem:[%s13935_s15 + $0x298] sm:$0xff] }
0x14db   : > { %7829 = vmatprep.subr.bf16.mxu1 %v7828_v18  ;;  %v7762_v4 = vpack.c.bf16 %v5836_v60, %v5834_v37  ;;  %v7774_v18 = vpack.c.bf16 %v5848_v35, %v5846_v55  ;;  %v7776_v11 = vpack.c.bf16 %v5853_v46, %v5851_v30  ;;  %v5882_v55 = vld [vmem:[%s13935_s15 + $0x380] sm:$0xff]  ;;  %v5884_v35 = vld [vmem:[%s13935_s15 + $0x390] sm:$0xff]  ;;  %v5887_v30 = vld [vmem:[%s13935_s15 + $0x3a8] sm:$0xff] }
0x14dc   : > { %7751 = vmatpush1.bf16.msra.mxu0 %v7750_v61  ;;  %v5839_v61 = vld [vmem:[%s13935_s15 + $0x228] sm:$0xff]  ;;  %v5889_v46 = vld [vmem:[%s13935_s15 + $0x3b8] sm:$0xff] }
0x14dd   : > { %7753 = vmatprep.subr.bf16.mxu0 %v7752_v57  ;;  %v5841_v57 = vld [vmem:[%s13935_s15 + $0x238] sm:$0xff] }
0x14de   : > { %7831 = vmatpush3.bf16.msra.mxu1 %v7830_v58  ;;  %v7764_v41 = vpack.c.bf16 %v5841_v57, %v5839_v61  ;;  %v5857_v58 = vld [vmem:[%s13935_s15 + $0x2b8] sm:$0xff]  ;;  %v5870_v61 = vld [vmem:[%s13935_s15 + $0x320] sm:$0xff]  ;;  %v5872_v57 = vld [vmem:[%s13935_s15 + $0x330] sm:$0xff] }
0x14df   : > { %7833 = vmatprep.subr.bf16.mxu1 %v7832_v56  ;;  %v7778_v56 = vpack.c.bf16 %v5852_v63, %v5850_v10  ;;  %v7780_v14 = vpack.c.bf16 %v5857_v58, %v5855_v52  ;;  %v5886_v10 = vld [vmem:[%s13935_s15 + $0x3a0] sm:$0xff]  ;;  %v5888_v63 = vld [vmem:[%s13935_s15 + $0x3b0] sm:$0xff]  ;;  %v5891_v52 = vld [vmem:[%s13935_s15 + $0x3c8] sm:$0xff] }
0x14e0   : > { %7755 = vmatpush1.bf16.msra.mxu0 %v7754_v44  ;;  %v5893_v58 = vld [vmem:[%s13935_s15 + $0x3d8] sm:$0xff] }
0x14e1   : > { %7757 = vmatprep.subr.bf16.mxu0 %v7756_v20  ;;  %v5840_v20 = vld [vmem:[%s13935_s15 + $0x230] sm:$0xff] }
0x14e2   : > { %7835 = vmatpush3.bf16.msra.mxu1 %v7834_v43  ;;  %v5861_v43 = vld [vmem:[%s13935_s15 + $0x2d8] sm:$0xff] }
0x14e3   : > { %7837 = vmatprep.subr.bf16.mxu1 %v7836_v31  ;;  %v7782_v31 = vpack.c.bf16 %v5856_v32, %v5854_v47  ;;  %v7784_v8 = vpack.c.bf16 %v5861_v43, %v5859_v38  ;;  %v5890_v47 = vld [vmem:[%s13935_s15 + $0x3c0] sm:$0xff]  ;;  %v5892_v32 = vld [vmem:[%s13935_s15 + $0x3d0] sm:$0xff]  ;;  %v5895_v38 = vld [vmem:[%s13935_s15 + $0x3e8] sm:$0xff] }
0x14e4   : > { %7759 = vmatpush1.bf16.msra.mxu0 %v7758_v27  ;;  %v7766_v27 = vpack.c.bf16 %v5840_v20, %v5838_v25  ;;  %v5874_v25 = vld [vmem:[%s13935_s15 + $0x340] sm:$0xff]  ;;  %v5876_v20 = vld [vmem:[%s13935_s15 + $0x350] sm:$0xff]  ;;  %v5897_v43 = vld [vmem:[%s13935_s15 + $0x3f8] sm:$0xff] }
0x14e5   : > { %7761 = vmatprep.subr.bf16.mxu0 %v7760_v48  ;;  %v5844_v48 = vld [vmem:[%s13935_s15 + $0x250] sm:$0xff]  ;;  %v7820_v2 = vpack.c.bf16 %v5897_v43, %v5895_v38 }
0x14e6   : > { %7839 = vmatpush3.bf16.msra.mxu1 %v7838_v33  ;;  %v7770_v45 = vpack.c.bf16 %v5844_v48, %v5842_v21  ;;  %v5865_v33 = vld [vmem:[%s13935_s15 + $0x2f8] sm:$0xff]  ;;  %v5878_v21 = vld [vmem:[%s13935_s15 + $0x360] sm:$0xff]  ;;  %v5880_v48 = vld [vmem:[%s13935_s15 + $0x370] sm:$0xff] }
0x14e7   : > { %7841 = vmatprep.subr.bf16.mxu1 %v7840_v6  ;;  %v14830_v6 = vld [vmem:[#allocation8_spill] sm:$0xff]  ;;  %v7788_v53 = vpack.c.bf16 %v5865_v33, %v5863_v39  ;;  %v5896_v33 = vld [vmem:[%s13935_s15 + $0x3f0] sm:$0xff] }
0x14e8   : > { %v5618_v34 = vsub.s32 3, %v14830_v6  ;;  %v5894_v39 = vld [vmem:[%s13935_s15 + $0x3e0] sm:$0xff] }
0x14e9   : > { %v7822_v6 = vpack.c.bf16 %v5896_v33, %v5894_v39 }
0x14ea   : > { %7843 = vmatpush3.bf16.msra.mxu1 %v7842_v1  ;;  %v5864_v1 = vld [vmem:[%s13935_s15 + $0x2f0] sm:$0xff]  ;;  %v5619_v26 = vrot.slane %v13686_v59, %v5618_v34 }
0x14eb   : > { %7845 = vmatprep.subr.bf16.mxu1 %v7844_v16  ;;  %v5867_v16 = vld [vmem:[%s13935_s15 + $0x308] sm:$0xff]  ;;  %v7790_v51 = vpack.c.bf16 %v5864_v1, %v5862_v42  ;;  %v6084_v1 = vld [vmem:[%s13937_s17 + $0xf0] sm:$0xff] }
0x14ee   : > { %7847 = vmatpush3.bf16.msra.mxu1 %v7846_v49  ;;  %v7792_v49 = vpack.c.bf16 %v5869_v19, %v5867_v16  ;;  %v6085_v16 = vld [vmem:[%s13937_s17 + $0xf8] sm:$0xff] }
0x14ef   : > { %7849 = vmatprep.subr.bf16.mxu1 %v7848_v17  ;;  %v5866_v17 = vld [vmem:[%s13935_s15 + $0x300] sm:$0xff]  ;;  %v7852_v19 = vpack.c.bf16 %v6085_v16, %v6084_v1 }
0x158c   : > { %v5690_v54 = vpop.f32.mrb[0].mxu1 }
0x158d   : > { %v5691_v24 = vadd.f32 %v5690_v54, %v5607_v5  ;;  %v5692_v29 = vpop.f32.mrb[1].mxu1  ;;  %v5868_v5 = vld [vmem:[%s13935_s15 + $0x310] sm:$0xff]  ;;  %v5871_v54 = vld [vmem:[%s13935_s15 + $0x328] sm:$0xff] }
0x158e   : > { %v5693_v15 = vadd.f32 %v5692_v29, %v5611_v40  ;;  %v7794_v37 = vpack.c.bf16 %v5868_v5, %v5866_v17 }
0x158f   : > { %v5766_v44 = vmax.f32 %v5691_v24, 0.0  ;;  %v5873_v24 = vld [vmem:[%s13935_s15 + $0x338] sm:$0xff] }
0x1590   : > { %v5767_v3 = vmax.f32 %v5693_v15, 0.0  ;;  %v7796_v15 = vpack.c.bf16 %v5873_v24, %v5871_v54 }
0x1592   : > { %5974 = vmatprep.mubr.f32.mxu0 %v5767_v3  ;;  %v5875_v3 = vld [vmem:[%s13935_s15 + $0x348] sm:$0xff] }
0x1593   : > { %5975 = vmatmul.mubr.f32.vlgmr.msra.gmra.mrb[0].mxu0 %v5766_v44  ;;  %v7798_v44 = vpack.c.bf16 %v5872_v57, %v5870_v61  ;;  %v6418_v61 = vld [vmem:[#allocation7] ss:$0 sm:$0xff] }
0x1594   : > { %7763 = vmatpush1.bf16.msra.mxu0 %v7762_v4  ;;  %v5877_v4 = vld [vmem:[%s13935_s15 + $0x358] sm:$0xff] }
0x1595   : > { %7765 = vmatprep.subr.bf16.mxu0 %v7764_v41  ;;  %v7800_v41 = vpack.c.bf16 %v5877_v4, %v5875_v3 }
0x1598   : > { %7767 = vmatpush1.bf16.msra.mxu0 %v7766_v27  ;;  %v7802_v27 = vpack.c.bf16 %v5876_v20, %v5874_v25 }
0x1599   : > { %7769 = vmatprep.subr.bf16.mxu0 %v7768_v0  ;;  %v7804_v0 = vpack.c.bf16 %v5881_v50, %v5879_v22 }
0x159c   : > { %7771 = vmatpush1.bf16.msra.mxu0 %v7770_v45  ;;  %v7806_v45 = vpack.c.bf16 %v5880_v48, %v5878_v21 }
0x159d   : > { %7773 = vmatprep.subr.bf16.mxu0 %v7772_v23  ;;  %v7808_v23 = vpack.c.bf16 %v5885_v28, %v5883_v13 }
0x15a0   : > { %7775 = vmatpush1.bf16.msra.mxu0 %v7774_v18  ;;  %v7810_v18 = vpack.c.bf16 %v5884_v35, %v5882_v55 }
0x15a1   : > { %7777 = vmatprep.subr.bf16.mxu0 %v7776_v11  ;;  %v7812_v11 = vpack.c.bf16 %v5889_v46, %v5887_v30 }
0x15a4   : > { %7779 = vmatpush1.bf16.msra.mxu0 %v7778_v56  ;;  %v7814_v56 = vpack.c.bf16 %v5888_v63, %v5886_v10 }
0x15a5   : > { %7781 = vmatprep.subr.bf16.mxu0 %v7780_v14  ;;  %v7816_v14 = vpack.c.bf16 %v5893_v58, %v5891_v52 }
0x15a8   : > { %7783 = vmatpush1.bf16.msra.mxu0 %v7782_v31  ;;  %v7818_v31 = vpack.c.bf16 %v5892_v32, %v5890_v47 }
0x15a9   : > { %7785 = vmatprep.subr.bf16.mxu0 %v7784_v8  ;;  %v14831_v8 = vld [vmem:[#allocation11_spill] sm:$0xff] }
0x15aa   : > { %v5615_v36 = vrot.slane %v13686_v59, %v14831_v8  ;;  %v6066_v59 = vld [vmem:[%s13937_s17 + $0x60] sm:$0xff] }
0x15ac   : > { %7787 = vmatpush1.bf16.msra.mxu0 %v7786_v9  ;;  %v13790_v7 = vpop.f32.mrb[2].mxu1 }
0x15ad   : > { %7789 = vmatprep.subr.bf16.mxu0 %v7788_v53  ;;  %v5763_v40 = vpop.f32.mrb[3].mxu1  ;;  %v5762_v34 = vadd.f32 %v13790_v7, %v5615_v36  ;;  %v6067_v53 = vld [vmem:[%s13937_s17 + $0x68] sm:$0xff] }
0x15ae   : > { %v5764_v29 = vadd.f32 %v5763_v40, %v5619_v26  ;;  %v7850_v42 = vpack.c.bf16 %v6067_v53, %v6066_v59  ;;  %v6068_v26 = vld [vmem:[%s13937_s17 + $0x70] sm:$0xff] }
0x15af   : > { %v5768_v9 = vmax.f32 %v5762_v34, 0.0 }
0x15b0   : > { %7791 = vmatpush1.bf16.msra.mxu0 %v7790_v51  ;;  %v5769_v60 = vmax.f32 %v5764_v29, 0.0  ;;  %7851 = vmatpush3.bf16.msra.mxu1 %v7850_v42  ;;  %v6069_v51 = vld [vmem:[%s13937_s17 + $0x78] sm:$0xff] }
0x15b1   : > { %7793 = vmatprep.subr.bf16.mxu0 %v7792_v49  ;;  %v7854_v7 = vpack.c.bf16 %v6069_v51, %v6068_v26  ;;  %7853 = vmatprep.subr.bf16.mxu1 %v7852_v19  ;;  %v5898_v49 = vld [vmem:[%s13936_s16] sm:$0x3] }
0x15b2   : > { %6045 = vmatprep.mubr.f32.mxu0 %v5769_v60  ;;  %v5903_v17 = vrot.slane %v5898_v49, %v14828_v12  ;;  %v5907_v5 = vrot.slane %v5898_v49, %v14829_v62 }
0x15b4   : > { %7795 = vmatpush1.bf16.msra.mxu0 %v7794_v37  ;;  %7855 = vmatpush3.bf16.msra.mxu1 %v7854_v7 }
0x15b5   : > { %7797 = vmatprep.subr.bf16.mxu0 %v7796_v15 }
0x15b8   : > { %7799 = vmatpush1.bf16.msra.mxu0 %v7798_v44 }
0x15b9   : > { %7801 = vmatprep.subr.bf16.mxu0 %v7800_v41 }
0x15bc   : > { %7803 = vmatpush1.bf16.msra.mxu0 %v7802_v27 }
0x15bd   : > { %7805 = vmatprep.subr.bf16.mxu0 %v7804_v0 }
0x15c0   : > { %7807 = vmatpush1.bf16.msra.mxu0 %v7806_v45 }
0x15c1   : > { %7809 = vmatprep.subr.bf16.mxu0 %v7808_v23 }
0x15c4   : > { %7811 = vmatpush1.bf16.msra.mxu0 %v7810_v18 }
0x15c5   : > { %7813 = vmatprep.subr.bf16.mxu0 %v7812_v11 }
0x15c8   : > { %7815 = vmatpush1.bf16.msra.mxu0 %v7814_v56 }
0x15c9   : > { %7817 = vmatprep.subr.bf16.mxu0 %v7816_v14 }
0x15cc   : > { %7819 = vmatpush1.bf16.msra.mxu0 %v7818_v31 }
0x15cd   : > { %7821 = vmatprep.subr.bf16.mxu0 %v7820_v2 }
0x15d0   : > { %7823 = vmatpush1.bf16.msra.mxu0 %v7822_v6 }
0x15d3   : > { %6046 = vmatmul.mubr.f32.vlgmr.msra.gmra.mrb[0].mxu0 %v5768_v9 }
0x16a6   : > { %v6047_v40 = vpop.f32.mrb[0].mxu0 }
0x16a7   : > { %v7952_v54 = vadd.f32 %v6047_v40, %v5903_v17  ;;  %v6049_v24 = vpop.f32.mrb[1].mxu0 }
0x16a8   : > { %v7953_v29 = vadd.f32 %v6049_v24, %v5907_v5 }
0x16a9   : > { %v6052_v60 = vmax.f32 %v7952_v54, 0.0 }
0x16aa   : > { %v6053_v37 = vmax.f32 %v7953_v29, 0.0 }
0x16ac   : > { %6157 = vmatprep.mubr.f32.mxu1 %v6053_v37 }
0x16ad   : > { %6158 = vmatmul.mubr.f32.vlgmr.msra.gmra.mrb[4].mxu1 %v6052_v60 }
0x1780   : > { %v6819_v15 = vpop.f32.mrb[4].mxu1 }
0x1781   : > { %v6820_v57 = vpop.f32.mrb[5].mxu1 }
0x1782   : > { %v6821_v3 = vadd.f32 %v6820_v57, %v6819_v15 }
0x1784   : > { %v6160_v4 = vadd.f32 %v6821_v3, %v6418_v61 }
0x1786   : > { %6164 = vst.msk [vmem:[%s13939_s19] sm:$0xff] %vm6163_vm3, %v6160_v4 }
0x1787 PF: > { %s31_s1 = sadd.s32 1, %s8802_s1   ;;  %s14832_s20 = smov %s8798_s21 }
0x1788   : > { %p28_p7 = scmp.ge.s32.totalorder %s31_s1, 4   ;;  %s14833_s21 = smov %s14835_s18 }
0x178a   :  { %30 = sbr.rel (!%p28_p7) target bundleno = 5 (0x5), region = 141 }

</bundles_post_ra>
